<compile_context>
chip_gen: v6e
topology: v6e:2x2x1
jax: 0.10.0
libtpu: 0.0.40
codegen_flags: <defaults>
</compile_context>

<pallas_src>
import functools
import numpy as np
import jax
import jax.numpy as jnp
from jax.experimental import pallas as pl
from jax.experimental.pallas import tpu as pltpu

GELU_GAMMA = 1.7015043497085571      # _nonlin_gamma['gelu']
_SQRT_2_OVER_PI = 0.7978845608028654
LANE = 128
TAPS = tuple((dy, dx) for dy in (-1, 0, 1) for dx in (-1, 0, 1))


def _round_up(v, m):
    return (v + m - 1) // m * m


def _gelu_gamma(x):
    # tanh-approximate GELU scaled by the NF gamma (kept in f32 on the VPU/EUP).
    return 0.5 * x * (1.0 + jnp.tanh(_SQRT_2_OVER_PI * (x + 0.044715 * (x * x * x)))) * GELU_GAMMA


# ----------------------------- Pallas kernels ---------------------------------
def _conv3x3(ain, wstk, b, cm_m1, cm_p1, W, L):
    """3x3 stride-1 conv on row-flattened (rows*W, C) activations.

    `ain` covers the output rows plus a 1-row halo on each side; out-of-image rows of
    `ain` must already be zero.  Column (width) zero-padding is applied with the
    per-output masks cm_m1 / cm_p1.  Returns the (L, C) conv output (rows [1, rows-1)).
    The 9 taps are static slices concatenated into (L, 9*C) and reduced by a single
    bf16 MXU matmul against the stacked (9*C, C) tap weights.
    """
    f32 = jnp.float32
    c = ain.shape[1]
    zp = jnp.zeros((W, c), f32)
    ap = jnp.concatenate([zp, ain, zp], axis=0)          # W-row zero pad on both ends
    pieces = []
    for (dy, dx) in TAPS:
        off = 2 * W + dy * W + dx                        # static slice start
        p = ap[off:off + L, :]
        if dx == -1:
            p = p * cm_m1
        elif dx == 1:
            p = p * cm_p1
        pieces.append(p)
    patches = jnp.concatenate(pieces, axis=1).astype(jnp.bfloat16)   # (L, 9*C)
    return jnp.dot(patches, wstk, preferred_element_type=f32) + b


def _nf_main_kernel(x_ref, m_ref, w1_ref, b1_ref, w2_ref, b2_ref, w3_ref, b3_ref,
                    w4_ref, b4_ref, wse1_ref, bse1_ref, wse2_ref, bse2_ref,
                    y4_ref, s_ref, psum_ref, *, beta, row_tile, W, inv_hw):
    f32 = jnp.float32
    bf16 = jnp.bfloat16
    t = pl.program_id(1)
    n_tiles = pl.num_programs(1)
    trw = row_tile * W
    n0 = (row_tile + 4) * W            # tile + 2-row halo each side
    l1 = (row_tile + 2) * W            # rows alive after the first 3x3
    l2 = trw                           # rows alive after the second 3x3 (= the tile)

    row0 = pl.multiple_of(t * trw, trw)
    xs = x_ref[pl.ds(row0, n0), :]                       # (n0, Cp) f32, row-padded input
    mk = m_ref[pl.ds(row0, n0), :]                       # (n0, 3): [row-valid, col-1 ok, col+1 ok]

    # pre-activation + 1x1 WSConv (in -> mid), computed on halo rows too
    a0 = _gelu_gamma(xs * beta)
    z1 = jnp.dot(a0.astype(bf16), w1_ref[...], preferred_element_type=f32) + b1_ref[...]
    a1 = _gelu_gamma(z1) * mk[:, 0:1]                    # zero out-of-image halo rows

    # first grouped 3x3 WSConv
    z2 = _conv3x3(a1, w2_ref[...], b2_ref[...], mk[:l1, 1:2], mk[:l1, 2:3], W, l1)
    a2 = _gelu_gamma(z2) * mk[W:W + l1, 0:1]

    # second grouped 3x3 WSConv
    z3 = _conv3x3(a2, w3_ref[...], b3_ref[...], mk[:l2, 1:2], mk[:l2, 2:3], W, l2)
    a3 = _gelu_gamma(z3)

    # final 1x1 WSConv (mid -> out); no activation before the SE block
    z4 = jnp.dot(a3.astype(bf16), w4_ref[...], preferred_element_type=f32) + b4_ref[...]
    y4_ref[...] = z4.astype(y4_ref.dtype)

    # SE global average pool, accumulated across spatial tiles
    @pl.when(t == 0)
    def _():
        psum_ref[...] = jnp.zeros_like(psum_ref)

    psum_ref[...] += jnp.sum(z4, axis=0, keepdims=True)

    @pl.when(t == n_tiles - 1)
    def _():
        pooled = psum_ref[...] * inv_hw                               # (1, outp)
        u = jnp.dot(pooled, wse1_ref[...], preferred_element_type=f32) + bse1_ref[...]
        u = jnp.maximum(u, 0.0)
        v = jnp.dot(u, wse2_ref[...], preferred_element_type=f32) + bse2_ref[...]
        s_ref[...] = 1.0 / (1.0 + jnp.exp(-v))                        # sigmoid (EUP)


def _se_residual_kernel(x_ref, y4_ref, s_ref, o_ref, *, alpha):
    f32 = jnp.float32
    o_ref[...] = (y4_ref[...].astype(f32) * s_ref[...] * alpha
                  + x_ref[...].astype(f32)).astype(o_ref.dtype)


# --------------------------- parameter handling -------------------------------
def ws_standardize(w, eps=1e-4):
    # WSConv2d.get_weight with gamma=1.0, gain=ones, use_layernorm=False
    fan = w.shape[1] * w.shape[2] * w.shape[3]
    mean = jnp.mean(w, axis=(1, 2, 3), keepdims=True)
    std = jnp.std(w, axis=(1, 2, 3), keepdims=True)       # unbiased=False
    return (fan ** -0.5) * (w - mean) / (std + eps)


def init_params(key, in_dim, mid_dim, out_dim, groups):
    hid = max(1, int(out_dim * 0.5))
    ks = jax.random.split(key, 12)

    def kaiming(k, shape):
        fan_in = shape[1] * shape[2] * shape[3]
        return jax.random.normal(k, shape, jnp.float32) * np.sqrt(2.0 / fan_in)

    def small(k, shape):
        return 0.1 * jax.random.normal(k, shape, jnp.float32)

    return dict(
        w1=kaiming(ks[0], (mid_dim, in_dim, 1, 1)),             b1=small(ks[1], (mid_dim,)),
        w2=kaiming(ks[2], (mid_dim, mid_dim // groups, 3, 3)),  b2=small(ks[3], (mid_dim,)),
        w3=kaiming(ks[4], (mid_dim, mid_dim // groups, 3, 3)),  b3=small(ks[5], (mid_dim,)),
        w4=kaiming(ks[6], (out_dim, mid_dim, 1, 1)),            b4=small(ks[7], (out_dim,)),
        wse1=0.3 * jax.random.normal(ks[8], (hid, out_dim, 1, 1), jnp.float32),
        bse1=small(ks[9], (hid,)),
        wse2=0.3 * jax.random.normal(ks[10], (out_dim, hid, 1, 1), jnp.float32),
        bse2=small(ks[11], (out_dim,)),
    )


def prepare_operands(params, groups):
    """Weight standardization, channel padding to 128 lanes, bf16 pre-cast, tap stacking."""
    w1s = ws_standardize(params['w1'])
    w2s = ws_standardize(params['w2'])
    w3s = ws_standardize(params['w3'])
    w4s = ws_standardize(params['w4'])

    mid, in_dim = w1s.shape[0], w1s.shape[1]
    out_dim = w4s.shape[0]
    hid = params['wse1'].shape[0]
    cp = _round_up(in_dim, LANE)
    midp = _round_up(mid, LANE)
    outp = _round_up(out_dim, LANE)
    hidp = _round_up(hid, LANE)

    def pad2(a, r, c):
        return jnp.pad(a, ((0, r - a.shape[0]), (0, c - a.shape[1])))

    def bias(b, c):
        return pad2(jnp.asarray(b, jnp.float32).reshape(1, -1), 1, c)

    def stack_taps(ws):
        # (mid, mid//groups, 3, 3) -> (9*midp, midp) block-diagonal per tap, stacked on
        # the contraction dim so all 9 taps reduce inside a single MXU matmul.
        wnp = np.asarray(ws, np.float32)
        cg = mid // groups
        out = np.zeros((9, midp, midp), np.float32)
        for t, (dy, dx) in enumerate(TAPS):
            ky, kx = dy + 1, dx + 1
            for co in range(mid):
                g = co // cg
                out[t, g * cg:(g + 1) * cg, co] = wnp[co, :, ky, kx]
        return jnp.asarray(out.reshape(9 * midp, midp), jnp.bfloat16)

    return dict(
        dims=(in_dim, mid, out_dim, hid),
        w1=pad2(jnp.transpose(w1s[:, :, 0, 0]), cp, midp).astype(jnp.bfloat16),
        b1=bias(params['b1'], midp),
        w2stk=stack_taps(w2s), b2=bias(params['b2'], midp),
        w3stk=stack_taps(w3s), b3=bias(params['b3'], midp),
        w4=pad2(jnp.transpose(w4s[:, :, 0, 0]), midp, outp).astype(jnp.bfloat16),
        b4=bias(params['b4'], outp),
        wse1=pad2(jnp.transpose(params['wse1'][:, :, 0, 0]), outp, hidp),   # tiny, keep f32
        bse1=bias(params['bse1'], hidp),
        wse2=pad2(jnp.transpose(params['wse2'][:, :, 0, 0]), hidp, outp),
        bse2=bias(params['bse2'], outp),
    )


def _make_conv_masks(H, W):
    # Column 0: row is inside the image (the row-padded layout has 2 zero rows each side).
    # Columns 1/2: the dx=-1 / dx=+1 tap reads a real neighbor (no wrap across image width).
    rows = np.arange((H + 4) * W) // W
    cols = np.arange((H + 4) * W) % W
    m = np.stack([
        ((rows >= 2) & (rows < H + 2)).astype(np.float32),
        (cols >= 1).astype(np.float32),
        (cols <= W - 2).astype(np.float32),
    ], axis=1)
    return jnp.asarray(m)


# ------------------------------- wrapper --------------------------------------
def nfnet_block_forward(x_nchw, ops, *, alpha=0.2, beta=1.0, row_tile=8,
                        out_dtype=jnp.float32):
    N, Cin, H, W = x_nchw.shape
    in_dim, mid, out_dim, _hid = ops['dims']
    assert Cin == in_dim
    assert in_dim == out_dim, "stride=1 residual add requires in_dim == out_dim"
    assert H % row_tile == 0, "ragged last row-tile not implemented"
    assert (row_tile * W) % 8 == 0 and ((row_tile + 4) * W) % 8 == 0

    cp = ops['w1'].shape[0]
    outp = ops['w4'].shape[1]
    HW = H * W
    HpW = (H + 4) * W
    T = H // row_tile
    trw = row_tile * W

    # channel-last, channel-padded; plus a copy with 2 zero rows top/bottom for the halos
    x_cl = jnp.transpose(x_nchw, (0, 2, 3, 1)).astype(jnp.float32)
    x_cl = jnp.pad(x_cl, ((0, 0), (0, 0), (0, 0), (0, cp - Cin)))
    x_pad = jnp.pad(x_cl, ((0, 0), (2, 2), (0, 0), (0, 0))).reshape(N, HpW, cp)
    x_cl = x_cl.reshape(N, HW, cp)
    masks = _make_conv_masks(H, W)

    def _full(a):
        return pl.BlockSpec(a.shape, lambda n, t: (0, 0))

    weight_args = (ops['w1'], ops['b1'], ops['w2stk'], ops['b2'],
                   ops['w3stk'], ops['b3'], ops['w4'], ops['b4'],
                   ops['wse1'], ops['bse1'], ops['wse2'], ops['bse2'])

    main_kernel = functools.partial(
        _nf_main_kernel, beta=beta, row_tile=row_tile, W=W, inv_hw=1.0 / HW)

    vmem_limit = 48 * 1024 * 1024   # fits the scoped ceiling on v5e/v6e/v7x (64 MiB phys on v7x)

    y4, s = pl.pallas_call(
        main_kernel,
        grid=(N, T),
        in_specs=[pl.BlockSpec((pl.Squeezed(), HpW, cp), lambda n, t: (n, 0, 0)),
                  _full(masks)] + [_full(a) for a in weight_args],
        out_specs=[pl.BlockSpec((pl.Squeezed(), trw, outp), lambda n, t: (n, t, 0)),
                   pl.BlockSpec((pl.Squeezed(), 1, outp), lambda n, t: (n, 0, 0))],
        out_shape=[jax.ShapeDtypeStruct((N, HW, outp), jnp.bfloat16),
                   jax.ShapeDtypeStruct((N, 1, outp), jnp.float32)],
        scratch_shapes=[pltpu.VMEM((1, outp), jnp.float32)],
        compiler_params=pltpu.CompilerParams(
            dimension_semantics=("parallel", "arbitrary"),
            vmem_limit_bytes=vmem_limit),
    )(x_pad, masks, *weight_args)

    apply_kernel = functools.partial(_se_residual_kernel, alpha=alpha)
    out = pl.pallas_call(
        apply_kernel,
        grid=(N, T),
        in_specs=[pl.BlockSpec((pl.Squeezed(), trw, cp), lambda n, t: (n, t, 0)),
                  pl.BlockSpec((pl.Squeezed(), trw, outp), lambda n, t: (n, t, 0)),
                  pl.BlockSpec((pl.Squeezed(), 1, outp), lambda n, t: (n, 0, 0))],
        out_specs=pl.BlockSpec((pl.Squeezed(), trw, outp), lambda n, t: (n, t, 0)),
        out_shape=jax.ShapeDtypeStruct((N, HW, outp), out_dtype),
        compiler_params=pltpu.CompilerParams(
            dimension_semantics=("parallel", "parallel"),
            vmem_limit_bytes=vmem_limit),
    )(x_cl, y4, s)

    out = out[:, :, :out_dim].reshape(N, H, W, out_dim)
    return jnp.transpose(out, (0, 3, 1, 2)).astype(x_nchw.dtype)


# --------------------------- pure-JAX reference --------------------------------
def _conv(x, w, b, stride=1, padding=0, groups=1):
    y = jax.lax.conv_general_dilated(
        x, w, (stride, stride), [(padding, padding)] * 2,
        dimension_numbers=("NCHW", "OIHW", "NCHW"),
        feature_group_count=groups)
    return y + b[None, :, None, None]


def reference(x, params, groups, alpha=0.2, beta=1.0):
    act = lambda v: jax.nn.gelu(v, approximate=False) * GELU_GAMMA   # torch exact GELU
    w1s, w2s = ws_standardize(params['w1']), ws_standardize(params['w2'])
    w3s, w4s = ws_standardize(params['w3']), ws_standardize(params['w4'])
    a0 = act(x * beta)
    h = act(_conv(a0, w1s, params['b1']))
    h = act(_conv(h, w2s, params['b2'], padding=1, groups=groups))
    h = act(_conv(h, w3s, params['b3'], padding=1, groups=groups))
    h = _conv(h, w4s, params['b4'])
    p = jnp.mean(h, axis=(2, 3), keepdims=True)
    se = jnp.maximum(_conv(p, params['wse1'], params['bse1']), 0.0)
    se = jax.nn.sigmoid(_conv(se, params['wse2'], params['bse2']))
    return (h * se) * alpha + x          # StochasticDepth is identity at inference


# --------------------------------- main ----------------------------------------
if __name__ == "__main__":
    N, in_dim, mid_dim, out_dim, groups, H, W = 2, 32, 32, 32, 4, 16, 16
    key = jax.random.PRNGKey(0)
    kx, kp = jax.random.split(key)
    x = jax.random.normal(kx, (N, in_dim, H, W), jnp.float32)

    params = init_params(kp, in_dim, mid_dim, out_dim, groups)
    ops = prepare_operands(params, groups)

    y = nfnet_block_forward(x, ops, alpha=0.2, beta=1.0, row_tile=8)
    y = jax.block_until_ready(y)

    ref = reference(x, params, groups, alpha=0.2, beta=1.0)
    err = float(jnp.max(jnp.abs(y - ref)))
    if not np.isfinite(err) or err > 8e-2:   # bf16 matmuls + tanh-GELU approx tolerance
        raise SystemExit(f"mismatch vs reference: max abs err = {err}")
    print("KERNEL_OK")
</pallas_src>

<mosaic_0001>
module attributes {stable_mosaic.version = 11 : i64} {
  func.func @_nf_main_kernel(%arg0: i32, %arg1: i32, %arg2: memref<1x320x128xf32, #tpu.memory_space<vmem>>, %arg3: memref<320x3xf32, #tpu.memory_space<vmem>>, %arg4: memref<128x128xbf16, #tpu.memory_space<vmem>>, %arg5: memref<1x128xf32, #tpu.memory_space<vmem>>, %arg6: memref<1152x128xbf16, #tpu.memory_space<vmem>>, %arg7: memref<1x128xf32, #tpu.memory_space<vmem>>, %arg8: memref<1152x128xbf16, #tpu.memory_space<vmem>>, %arg9: memref<1x128xf32, #tpu.memory_space<vmem>>, %arg10: memref<128x128xbf16, #tpu.memory_space<vmem>>, %arg11: memref<1x128xf32, #tpu.memory_space<vmem>>, %arg12: memref<128x128xf32, #tpu.memory_space<vmem>>, %arg13: memref<1x128xf32, #tpu.memory_space<vmem>>, %arg14: memref<128x128xf32, #tpu.memory_space<vmem>>, %arg15: memref<1x128xf32, #tpu.memory_space<vmem>>, %arg16: memref<1x128x128xbf16, #tpu.memory_space<vmem>>, %arg17: memref<1x1x128xf32, #tpu.memory_space<vmem>>, %arg18: memref<1x128xf32, #tpu.memory_space<vmem>>) attributes {dimension_semantics = [#tpu.dimension_semantics<parallel>, #tpu.dimension_semantics<arbitrary>], iteration_bounds = array<i64: 2, 2>, scalar_prefetch = 0 : i64, scratch_operands = 1 : i64, tpu.core_type = #tpu.core_type<tc>, window_params = [{transform_indices = @transform_0, window_bounds = array<i64: 1, 320, 128>}, {pipeline_mode = #tpu.pipeline_mode<synchronous>, transform_indices = @transform_1, window_bounds = array<i64: 320, 3>}, {pipeline_mode = #tpu.pipeline_mode<synchronous>, transform_indices = @transform_2, window_bounds = array<i64: 128, 128>}, {pipeline_mode = #tpu.pipeline_mode<synchronous>, transform_indices = @transform_3, window_bounds = array<i64: 1, 128>}, {pipeline_mode = #tpu.pipeline_mode<synchronous>, transform_indices = @transform_4, window_bounds = array<i64: 1152, 128>}, {pipeline_mode = #tpu.pipeline_mode<synchronous>, transform_indices = @transform_5, window_bounds = array<i64: 1, 128>}, {pipeline_mode = #tpu.pipeline_mode<synchronous>, transform_indices = @transform_6, window_bounds = array<i64: 1152, 128>}, {pipeline_mode = #tpu.pipeline_mode<synchronous>, transform_indices = @transform_7, window_bounds = array<i64: 1, 128>}, {pipeline_mode = #tpu.pipeline_mode<synchronous>, transform_indices = @transform_8, window_bounds = array<i64: 128, 128>}, {pipeline_mode = #tpu.pipeline_mode<synchronous>, transform_indices = @transform_9, window_bounds = array<i64: 1, 128>}, {pipeline_mode = #tpu.pipeline_mode<synchronous>, transform_indices = @transform_10, window_bounds = array<i64: 128, 128>}, {pipeline_mode = #tpu.pipeline_mode<synchronous>, transform_indices = @transform_11, window_bounds = array<i64: 1, 128>}, {pipeline_mode = #tpu.pipeline_mode<synchronous>, transform_indices = @transform_12, window_bounds = array<i64: 128, 128>}, {pipeline_mode = #tpu.pipeline_mode<synchronous>, transform_indices = @transform_13, window_bounds = array<i64: 1, 128>}, {transform_indices = @transform_14, window_bounds = array<i64: 1, 128, 128>}, {transform_indices = @transform_15, window_bounds = array<i64: 1, 1, 128>}]} {
    %c128_i32 = arith.constant 128 : i32
    %0 = arith.muli %arg1, %c128_i32 : i32
    %1 = tpu.assume_multiple %0, 128 : i32
    %c0 = arith.constant 0 : index
    %2 = arith.index_cast %1 : i32 to index
    %c0_0 = arith.constant 0 : index
    %3 = vector.load %arg2[%c0, %2, %c0_0] : memref<1x320x128xf32, #tpu.memory_space<vmem>>, vector<1x192x128xf32>
    %4 = vector.shape_cast %3 : vector<1x192x128xf32> to vector<192x128xf32>
    %5 = arith.index_cast %1 : i32 to index
    %c0_1 = arith.constant 0 : index
    %6 = vector.load %arg3[%5, %c0_1] : memref<320x3xf32, #tpu.memory_space<vmem>>, vector<192x3xf32>
    %cst = arith.constant 1.000000e+00 : f32
    %7 = vector.broadcast %cst : f32 to vector<192x128xf32>
    %8 = arith.mulf %4, %7 : vector<192x128xf32>
    %cst_2 = arith.constant 5.000000e-01 : f32
    %9 = vector.broadcast %cst_2 : f32 to vector<192x128xf32>
    %10 = arith.mulf %9, %8 : vector<192x128xf32>
    %11 = arith.mulf %8, %8 : vector<192x128xf32>
    %12 = arith.mulf %11, %8 : vector<192x128xf32>
    %cst_3 = arith.constant 4.471500e-02 : f32
    %13 = vector.broadcast %cst_3 : f32 to vector<192x128xf32>
    %14 = arith.mulf %13, %12 : vector<192x128xf32>
    %15 = arith.addf %8, %14 : vector<192x128xf32>
    %cst_4 = arith.constant 0.797884583 : f32
    %16 = vector.broadcast %cst_4 : f32 to vector<192x128xf32>
    %17 = arith.mulf %16, %15 : vector<192x128xf32>
    %18 = math.tanh %17 : vector<192x128xf32>
    %cst_5 = arith.constant 1.000000e+00 : f32
    %19 = vector.broadcast %cst_5 : f32 to vector<192x128xf32>
    %20 = arith.addf %19, %18 : vector<192x128xf32>
    %21 = arith.mulf %10, %20 : vector<192x128xf32>
    %cst_6 = arith.constant 1.70150435 : f32
    %22 = vector.broadcast %cst_6 : f32 to vector<192x128xf32>
    %23 = arith.mulf %21, %22 : vector<192x128xf32>
    %24 = arith.truncf %23 : vector<192x128xf32> to vector<192x128xbf16>
    %c0_7 = arith.constant 0 : index
    %c0_8 = arith.constant 0 : index
    %25 = vector.load %arg4[%c0_7, %c0_8] : memref<128x128xbf16, #tpu.memory_space<vmem>>, vector<128x128xbf16>
    %cst_9 = arith.constant dense<0.000000e+00> : vector<192x128xf32>
    %26 = tpu.matmul %24, %25, %cst_9 {dimension_numbers = #tpu.dot_dimension_numbers<[1], [0], [0], [1], [0, 0, 1, 1], [], []>} : vector<192x128xbf16>, vector<128x128xbf16>, vector<192x128xf32> -> vector<192x128xf32>
    %c0_10 = arith.constant 0 : index
    %c0_11 = arith.constant 0 : index
    %27 = vector.load %arg5[%c0_10, %c0_11] : memref<1x128xf32, #tpu.memory_space<vmem>>, vector<1x128xf32>
    %28 = vector.broadcast %27 : vector<1x128xf32> to vector<192x128xf32>
    %29 = arith.addf %26, %28 : vector<192x128xf32>
    %cst_12 = arith.constant 5.000000e-01 : f32
    %30 = vector.broadcast %cst_12 : f32 to vector<192x128xf32>
    %31 = arith.mulf %30, %29 : vector<192x128xf32>
    %32 = arith.mulf %29, %29 : vector<192x128xf32>
    %33 = arith.mulf %32, %29 : vector<192x128xf32>
    %cst_13 = arith.constant 4.471500e-02 : f32
    %34 = vector.broadcast %cst_13 : f32 to vector<192x128xf32>
    %35 = arith.mulf %34, %33 : vector<192x128xf32>
    %36 = arith.addf %29, %35 : vector<192x128xf32>
    %cst_14 = arith.constant 0.797884583 : f32
    %37 = vector.broadcast %cst_14 : f32 to vector<192x128xf32>
    %38 = arith.mulf %37, %36 : vector<192x128xf32>
    %39 = math.tanh %38 : vector<192x128xf32>
    %cst_15 = arith.constant 1.000000e+00 : f32
    %40 = vector.broadcast %cst_15 : f32 to vector<192x128xf32>
    %41 = arith.addf %40, %39 : vector<192x128xf32>
    %42 = arith.mulf %31, %41 : vector<192x128xf32>
    %cst_16 = arith.constant 1.70150435 : f32
    %43 = vector.broadcast %cst_16 : f32 to vector<192x128xf32>
    %44 = arith.mulf %42, %43 : vector<192x128xf32>
    %45 = vector.extract_strided_slice %6 {offsets = [0, 0], sizes = [192, 1], strides = [1, 1]} : vector<192x3xf32> to vector<192x1xf32>
    %46 = vector.broadcast %45 : vector<192x1xf32> to vector<192x128xf32>
    %47 = arith.mulf %44, %46 : vector<192x128xf32>
    %c0_17 = arith.constant 0 : index
    %c0_18 = arith.constant 0 : index
    %48 = vector.load %arg6[%c0_17, %c0_18] : memref<1152x128xbf16, #tpu.memory_space<vmem>>, vector<1152x128xbf16>
    %c0_19 = arith.constant 0 : index
    %c0_20 = arith.constant 0 : index
    %49 = vector.load %arg7[%c0_19, %c0_20] : memref<1x128xf32, #tpu.memory_space<vmem>>, vector<1x128xf32>
    %50 = vector.extract_strided_slice %6 {offsets = [0, 1], sizes = [160, 1], strides = [1, 1]} : vector<192x3xf32> to vector<160x1xf32>
    %51 = vector.extract_strided_slice %6 {offsets = [0, 2], sizes = [160, 1], strides = [1, 1]} : vector<192x3xf32> to vector<160x1xf32>
    %cst_21 = arith.constant 0.000000e+00 : f32
    %52 = vector.broadcast %cst_21 : f32 to vector<16x128xf32>
    %53 = tpu.concatenate %52, %47, %52 in 0 : vector<16x128xf32>, vector<192x128xf32>, vector<16x128xf32> -> vector<224x128xf32>
    %54 = vector.extract_strided_slice %53 {offsets = [15, 0], sizes = [160, 128], strides = [1, 1]} : vector<224x128xf32> to vector<160x128xf32>
    %55 = vector.broadcast %50 : vector<160x1xf32> to vector<160x128xf32>
    %56 = arith.mulf %54, %55 : vector<160x128xf32>
    %57 = vector.extract_strided_slice %53 {offsets = [16, 0], sizes = [160, 128], strides = [1, 1]} : vector<224x128xf32> to vector<160x128xf32>
    %58 = vector.extract_strided_slice %53 {offsets = [17, 0], sizes = [160, 128], strides = [1, 1]} : vector<224x128xf32> to vector<160x128xf32>
    %59 = vector.broadcast %51 : vector<160x1xf32> to vector<160x128xf32>
    %60 = arith.mulf %58, %59 : vector<160x128xf32>
    %61 = vector.extract_strided_slice %53 {offsets = [31, 0], sizes = [160, 128], strides = [1, 1]} : vector<224x128xf32> to vector<160x128xf32>
    %62 = vector.broadcast %50 : vector<160x1xf32> to vector<160x128xf32>
    %63 = arith.mulf %61, %62 : vector<160x128xf32>
    %64 = vector.extract_strided_slice %53 {offsets = [32, 0], sizes = [160, 128], strides = [1, 1]} : vector<224x128xf32> to vector<160x128xf32>
    %65 = vector.extract_strided_slice %53 {offsets = [33, 0], sizes = [160, 128], strides = [1, 1]} : vector<224x128xf32> to vector<160x128xf32>
    %66 = vector.broadcast %51 : vector<160x1xf32> to vector<160x128xf32>
    %67 = arith.mulf %65, %66 : vector<160x128xf32>
    %68 = vector.extract_strided_slice %53 {offsets = [47, 0], sizes = [160, 128], strides = [1, 1]} : vector<224x128xf32> to vector<160x128xf32>
    %69 = vector.broadcast %50 : vector<160x1xf32> to vector<160x128xf32>
    %70 = arith.mulf %68, %69 : vector<160x128xf32>
    %71 = vector.extract_strided_slice %53 {offsets = [48, 0], sizes = [160, 128], strides = [1, 1]} : vector<224x128xf32> to vector<160x128xf32>
    %72 = vector.extract_strided_slice %53 {offsets = [49, 0], sizes = [160, 128], strides = [1, 1]} : vector<224x128xf32> to vector<160x128xf32>
    %73 = vector.broadcast %51 : vector<160x1xf32> to vector<160x128xf32>
    %74 = arith.mulf %72, %73 : vector<160x128xf32>
    %75 = tpu.concatenate %56, %57, %60, %63, %64, %67, %70, %71, %74 in 1 : vector<160x128xf32>, vector<160x128xf32>, vector<160x128xf32>, vector<160x128xf32>, vector<160x128xf32>, vector<160x128xf32>, vector<160x128xf32>, vector<160x128xf32>, vector<160x128xf32> -> vector<160x1152xf32>
    %76 = arith.truncf %75 : vector<160x1152xf32> to vector<160x1152xbf16>
    %cst_22 = arith.constant dense<0.000000e+00> : vector<160x128xf32>
    %77 = tpu.matmul %76, %48, %cst_22 {dimension_numbers = #tpu.dot_dimension_numbers<[1], [0], [0], [1], [0, 0, 1, 1], [], []>} : vector<160x1152xbf16>, vector<1152x128xbf16>, vector<160x128xf32> -> vector<160x128xf32>
    %78 = vector.broadcast %49 : vector<1x128xf32> to vector<160x128xf32>
    %79 = arith.addf %77, %78 : vector<160x128xf32>
    %cst_23 = arith.constant 5.000000e-01 : f32
    %80 = vector.broadcast %cst_23 : f32 to vector<160x128xf32>
    %81 = arith.mulf %80, %79 : vector<160x128xf32>
    %82 = arith.mulf %79, %79 : vector<160x128xf32>
    %83 = arith.mulf %82, %79 : vector<160x128xf32>
    %cst_24 = arith.constant 4.471500e-02 : f32
    %84 = vector.broadcast %cst_24 : f32 to vector<160x128xf32>
    %85 = arith.mulf %84, %83 : vector<160x128xf32>
    %86 = arith.addf %79, %85 : vector<160x128xf32>
    %cst_25 = arith.constant 0.797884583 : f32
    %87 = vector.broadcast %cst_25 : f32 to vector<160x128xf32>
    %88 = arith.mulf %87, %86 : vector<160x128xf32>
    %89 = math.tanh %88 : vector<160x128xf32>
    %cst_26 = arith.constant 1.000000e+00 : f32
    %90 = vector.broadcast %cst_26 : f32 to vector<160x128xf32>
    %91 = arith.addf %90, %89 : vector<160x128xf32>
    %92 = arith.mulf %81, %91 : vector<160x128xf32>
    %cst_27 = arith.constant 1.70150435 : f32
    %93 = vector.broadcast %cst_27 : f32 to vector<160x128xf32>
    %94 = arith.mulf %92, %93 : vector<160x128xf32>
    %95 = vector.extract_strided_slice %6 {offsets = [16, 0], sizes = [160, 1], strides = [1, 1]} : vector<192x3xf32> to vector<160x1xf32>
    %96 = vector.broadcast %95 : vector<160x1xf32> to vector<160x128xf32>
    %97 = arith.mulf %94, %96 : vector<160x128xf32>
    %c0_28 = arith.constant 0 : index
    %c0_29 = arith.constant 0 : index
    %98 = vector.load %arg8[%c0_28, %c0_29] : memref<1152x128xbf16, #tpu.memory_space<vmem>>, vector<1152x128xbf16>
    %c0_30 = arith.constant 0 : index
    %c0_31 = arith.constant 0 : index
    %99 = vector.load %arg9[%c0_30, %c0_31] : memref<1x128xf32, #tpu.memory_space<vmem>>, vector<1x128xf32>
    %100 = vector.extract_strided_slice %6 {offsets = [0, 1], sizes = [128, 1], strides = [1, 1]} : vector<192x3xf32> to vector<128x1xf32>
    %101 = vector.extract_strided_slice %6 {offsets = [0, 2], sizes = [128, 1], strides = [1, 1]} : vector<192x3xf32> to vector<128x1xf32>
    %cst_32 = arith.constant 0.000000e+00 : f32
    %102 = vector.broadcast %cst_32 : f32 to vector<16x128xf32>
    %103 = tpu.concatenate %102, %97, %102 in 0 : vector<16x128xf32>, vector<160x128xf32>, vector<16x128xf32> -> vector<192x128xf32>
    %104 = vector.extract_strided_slice %103 {offsets = [15, 0], sizes = [128, 128], strides = [1, 1]} : vector<192x128xf32> to vector<128x128xf32>
    %105 = vector.broadcast %100 : vector<128x1xf32> to vector<128x128xf32>
    %106 = arith.mulf %104, %105 : vector<128x128xf32>
    %107 = vector.extract_strided_slice %103 {offsets = [16, 0], sizes = [128, 128], strides = [1, 1]} : vector<192x128xf32> to vector<128x128xf32>
    %108 = vector.extract_strided_slice %103 {offsets = [17, 0], sizes = [128, 128], strides = [1, 1]} : vector<192x128xf32> to vector<128x128xf32>
    %109 = vector.broadcast %101 : vector<128x1xf32> to vector<128x128xf32>
    %110 = arith.mulf %108, %109 : vector<128x128xf32>
    %111 = vector.extract_strided_slice %103 {offsets = [31, 0], sizes = [128, 128], strides = [1, 1]} : vector<192x128xf32> to vector<128x128xf32>
    %112 = vector.broadcast %100 : vector<128x1xf32> to vector<128x128xf32>
    %113 = arith.mulf %111, %112 : vector<128x128xf32>
    %114 = vector.extract_strided_slice %103 {offsets = [32, 0], sizes = [128, 128], strides = [1, 1]} : vector<192x128xf32> to vector<128x128xf32>
    %115 = vector.extract_strided_slice %103 {offsets = [33, 0], sizes = [128, 128], strides = [1, 1]} : vector<192x128xf32> to vector<128x128xf32>
    %116 = vector.broadcast %101 : vector<128x1xf32> to vector<128x128xf32>
    %117 = arith.mulf %115, %116 : vector<128x128xf32>
    %118 = vector.extract_strided_slice %103 {offsets = [47, 0], sizes = [128, 128], strides = [1, 1]} : vector<192x128xf32> to vector<128x128xf32>
    %119 = vector.broadcast %100 : vector<128x1xf32> to vector<128x128xf32>
    %120 = arith.mulf %118, %119 : vector<128x128xf32>
    %121 = vector.extract_strided_slice %103 {offsets = [48, 0], sizes = [128, 128], strides = [1, 1]} : vector<192x128xf32> to vector<128x128xf32>
    %122 = vector.extract_strided_slice %103 {offsets = [49, 0], sizes = [128, 128], strides = [1, 1]} : vector<192x128xf32> to vector<128x128xf32>
    %123 = vector.broadcast %101 : vector<128x1xf32> to vector<128x128xf32>
    %124 = arith.mulf %122, %123 : vector<128x128xf32>
    %125 = tpu.concatenate %106, %107, %110, %113, %114, %117, %120, %121, %124 in 1 : vector<128x128xf32>, vector<128x128xf32>, vector<128x128xf32>, vector<128x128xf32>, vector<128x128xf32>, vector<128x128xf32>, vector<128x128xf32>, vector<128x128xf32>, vector<128x128xf32> -> vector<128x1152xf32>
    %126 = arith.truncf %125 : vector<128x1152xf32> to vector<128x1152xbf16>
    %cst_33 = arith.constant dense<0.000000e+00> : vector<128x128xf32>
    %127 = tpu.matmul %126, %98, %cst_33 {dimension_numbers = #tpu.dot_dimension_numbers<[1], [0], [0], [1], [0, 0, 1, 1], [], []>} : vector<128x1152xbf16>, vector<1152x128xbf16>, vector<128x128xf32> -> vector<128x128xf32>
    %128 = vector.broadcast %99 : vector<1x128xf32> to vector<128x128xf32>
    %129 = arith.addf %127, %128 : vector<128x128xf32>
    %cst_34 = arith.constant 5.000000e-01 : f32
    %130 = vector.broadcast %cst_34 : f32 to vector<128x128xf32>
    %131 = arith.mulf %130, %129 : vector<128x128xf32>
    %132 = arith.mulf %129, %129 : vector<128x128xf32>
    %133 = arith.mulf %132, %129 : vector<128x128xf32>
    %cst_35 = arith.constant 4.471500e-02 : f32
    %134 = vector.broadcast %cst_35 : f32 to vector<128x128xf32>
    %135 = arith.mulf %134, %133 : vector<128x128xf32>
    %136 = arith.addf %129, %135 : vector<128x128xf32>
    %cst_36 = arith.constant 0.797884583 : f32
    %137 = vector.broadcast %cst_36 : f32 to vector<128x128xf32>
    %138 = arith.mulf %137, %136 : vector<128x128xf32>
    %139 = math.tanh %138 : vector<128x128xf32>
    %cst_37 = arith.constant 1.000000e+00 : f32
    %140 = vector.broadcast %cst_37 : f32 to vector<128x128xf32>
    %141 = arith.addf %140, %139 : vector<128x128xf32>
    %142 = arith.mulf %131, %141 : vector<128x128xf32>
    %cst_38 = arith.constant 1.70150435 : f32
    %143 = vector.broadcast %cst_38 : f32 to vector<128x128xf32>
    %144 = arith.mulf %142, %143 : vector<128x128xf32>
    %145 = arith.truncf %144 : vector<128x128xf32> to vector<128x128xbf16>
    %c0_39 = arith.constant 0 : index
    %c0_40 = arith.constant 0 : index
    %146 = vector.load %arg10[%c0_39, %c0_40] : memref<128x128xbf16, #tpu.memory_space<vmem>>, vector<128x128xbf16>
    %cst_41 = arith.constant dense<0.000000e+00> : vector<128x128xf32>
    %147 = tpu.matmul %145, %146, %cst_41 {dimension_numbers = #tpu.dot_dimension_numbers<[1], [0], [0], [1], [0, 0, 1, 1], [], []>} : vector<128x128xbf16>, vector<128x128xbf16>, vector<128x128xf32> -> vector<128x128xf32>
    %c0_42 = arith.constant 0 : index
    %c0_43 = arith.constant 0 : index
    %148 = vector.load %arg11[%c0_42, %c0_43] : memref<1x128xf32, #tpu.memory_space<vmem>>, vector<1x128xf32>
    %149 = vector.broadcast %148 : vector<1x128xf32> to vector<128x128xf32>
    %150 = arith.addf %147, %149 : vector<128x128xf32>
    %151 = arith.truncf %150 : vector<128x128xf32> to vector<128x128xbf16>
    %c0_44 = arith.constant 0 : index
    %c0_45 = arith.constant 0 : index
    %c0_46 = arith.constant 0 : index
    %152 = vector.load %arg16[%c0_44, %c0_45, %c0_46] : memref<1x128x128xbf16, #tpu.memory_space<vmem>>, vector<1x128x128xbf16>
    %153 = vector.shape_cast %152 : vector<1x128x128xbf16> to vector<128x128xbf16>
    %154 = vector.shape_cast %151 : vector<128x128xbf16> to vector<1x128x128xbf16>
    tpu.vector_store %arg16[%c0_44, %c0_45, %c0_46], %154 {strides = array<i32>} : memref<1x128x128xbf16, #tpu.memory_space<vmem>>, vector<1x128x128xbf16>,
    %c0_i32 = arith.constant 0 : i32
    %155 = arith.cmpi eq, %arg1, %c0_i32 : i32
    %156 = arith.extui %155 : i1 to i32
    %c0_i32_47 = arith.constant 0 : i32
    %157 = arith.cmpi ne, %156, %c0_i32_47 : i32
    scf.if %157 {
      %cst_54 = arith.constant 0.000000e+00 : f32
      %166 = vector.broadcast %cst_54 : f32 to vector<1x128xf32>
      %c0_55 = arith.constant 0 : index
      %c0_56 = arith.constant 0 : index
      %167 = vector.load %arg18[%c0_55, %c0_56] : memref<1x128xf32, #tpu.memory_space<vmem>>, vector<1x128xf32>
      tpu.vector_store %arg18[%c0_55, %c0_56], %166 {strides = array<i32>} : memref<1x128xf32, #tpu.memory_space<vmem>>, vector<1x128xf32>,
    } else {
    }
    %c0_48 = arith.constant 0 : index
    %c0_49 = arith.constant 0 : index
    %158 = vector.load %arg18[%c0_48, %c0_49] : memref<1x128xf32, #tpu.memory_space<vmem>>, vector<1x128xf32>
    %cst_50 = arith.constant dense<0.000000e+00> : vector<128xf32>
    %159 = vector.multi_reduction <add>, %150, %cst_50 [0] : vector<128x128xf32> to vector<128xf32>
    %160 = vector.shape_cast %159 : vector<128xf32> to vector<1x128xf32>
    %161 = arith.addf %158, %160 : vector<1x128xf32>
    %c0_51 = arith.constant 0 : index
    %c0_52 = arith.constant 0 : index
    %162 = vector.load %arg18[%c0_51, %c0_52] : memref<1x128xf32, #tpu.memory_space<vmem>>, vector<1x128xf32>
    tpu.vector_store %arg18[%c0_51, %c0_52], %161 {strides = array<i32>} : memref<1x128xf32, #tpu.memory_space<vmem>>, vector<1x128xf32>,
    %c1_i32 = arith.constant 1 : i32
    %163 = arith.cmpi eq, %arg1, %c1_i32 : i32
    %164 = arith.extui %163 : i1 to i32
    %c0_i32_53 = arith.constant 0 : i32
    %165 = arith.cmpi ne, %164, %c0_i32_53 : i32
    scf.if %165 {
      %c0_54 = arith.constant 0 : index
      %c0_55 = arith.constant 0 : index
      %166 = vector.load %arg18[%c0_54, %c0_55] : memref<1x128xf32, #tpu.memory_space<vmem>>, vector<1x128xf32>
      %cst_56 = arith.constant 3.906250e-03 : f32
      %167 = vector.broadcast %cst_56 : f32 to vector<1x128xf32>
      %168 = arith.mulf %166, %167 : vector<1x128xf32>
      %c0_57 = arith.constant 0 : index
      %c0_58 = arith.constant 0 : index
      %169 = vector.load %arg12[%c0_57, %c0_58] : memref<128x128xf32, #tpu.memory_space<vmem>>, vector<128x128xf32>
      %cst_59 = arith.constant dense<0.000000e+00> : vector<1x128xf32>
      %170 = tpu.matmul %168, %169, %cst_59 {dimension_numbers = #tpu.dot_dimension_numbers<[1], [0], [0], [1], [0, 0, 1, 1], [], []>} : vector<1x128xf32>, vector<128x128xf32>, vector<1x128xf32> -> vector<1x128xf32>
      %c0_60 = arith.constant 0 : index
      %c0_61 = arith.constant 0 : index
      %171 = vector.load %arg13[%c0_60, %c0_61] : memref<1x128xf32, #tpu.memory_space<vmem>>, vector<1x128xf32>
      %172 = arith.addf %170, %171 : vector<1x128xf32>
      %cst_62 = arith.constant 0.000000e+00 : f32
      %173 = vector.broadcast %cst_62 : f32 to vector<1x128xf32>
      %174 = arith.maximumf %172, %173 : vector<1x128xf32>
      %c0_63 = arith.constant 0 : index
      %c0_64 = arith.constant 0 : index
      %175 = vector.load %arg14[%c0_63, %c0_64] : memref<128x128xf32, #tpu.memory_space<vmem>>, vector<128x128xf32>
      %cst_65 = arith.constant dense<0.000000e+00> : vector<1x128xf32>
      %176 = tpu.matmul %174, %175, %cst_65 {dimension_numbers = #tpu.dot_dimension_numbers<[1], [0], [0], [1], [0, 0, 1, 1], [], []>} : vector<1x128xf32>, vector<128x128xf32>, vector<1x128xf32> -> vector<1x128xf32>
      %c0_66 = arith.constant 0 : index
      %c0_67 = arith.constant 0 : index
      %177 = vector.load %arg15[%c0_66, %c0_67] : memref<1x128xf32, #tpu.memory_space<vmem>>, vector<1x128xf32>
      %178 = arith.addf %176, %177 : vector<1x128xf32>
      %cst_68 = arith.constant 0.000000e+00 : f32
      %179 = vector.broadcast %cst_68 : f32 to vector<1x128xf32>
      %180 = arith.subf %179, %178 : vector<1x128xf32>
      %181 = math.exp %180 : vector<1x128xf32>
      %cst_69 = arith.constant 1.000000e+00 : f32
      %182 = vector.broadcast %cst_69 : f32 to vector<1x128xf32>
      %183 = arith.addf %182, %181 : vector<1x128xf32>
      %cst_70 = arith.constant 1.000000e+00 : f32
      %184 = vector.broadcast %cst_70 : f32 to vector<1x128xf32>
      %185 = arith.divf %184, %183 : vector<1x128xf32>
      %c0_71 = arith.constant 0 : index
      %c0_72 = arith.constant 0 : index
      %c0_73 = arith.constant 0 : index
      %186 = vector.load %arg17[%c0_71, %c0_72, %c0_73] : memref<1x1x128xf32, #tpu.memory_space<vmem>>, vector<1x1x128xf32>
      %187 = vector.shape_cast %186 : vector<1x1x128xf32> to vector<1x128xf32>
      %188 = vector.shape_cast %185 : vector<1x128xf32> to vector<1x1x128xf32>
      tpu.vector_store %arg17[%c0_71, %c0_72, %c0_73], %188 {strides = array<i32>} : memref<1x1x128xf32, #tpu.memory_space<vmem>>, vector<1x1x128xf32>,
    } else {
    }
    return
  }
  func.func @transform_0(%arg0: i32, %arg1: i32) -> (i32, i32, i32) {
    %c0_i32 = arith.constant 0 : i32
    %c0_i32_0 = arith.constant 0 : i32
    %c0_i32_1 = arith.constant 0 : i32
    return %arg0, %c0_i32, %c0_i32_0 : i32, i32, i32
  }
  func.func @transform_1(%arg0: i32, %arg1: i32) -> (i32, i32) {
    %c0_i32 = arith.constant 0 : i32
    %c0_i32_0 = arith.constant 0 : i32
    %c0_i32_1 = arith.constant 0 : i32
    return %c0_i32, %c0_i32_0 : i32, i32
  }
  func.func @transform_2(%arg0: i32, %arg1: i32) -> (i32, i32) {
    %c0_i32 = arith.constant 0 : i32
    %c0_i32_0 = arith.constant 0 : i32
    %c0_i32_1 = arith.constant 0 : i32
    return %c0_i32, %c0_i32_0 : i32, i32
  }
  func.func @transform_3(%arg0: i32, %arg1: i32) -> (i32, i32) {
    %c0_i32 = arith.constant 0 : i32
    %c0_i32_0 = arith.constant 0 : i32
    %c0_i32_1 = arith.constant 0 : i32
    return %c0_i32, %c0_i32_0 : i32, i32
  }
  func.func @transform_4(%arg0: i32, %arg1: i32) -> (i32, i32) {
    %c0_i32 = arith.constant 0 : i32
    %c0_i32_0 = arith.constant 0 : i32
    %c0_i32_1 = arith.constant 0 : i32
    return %c0_i32, %c0_i32_0 : i32, i32
  }
  func.func @transform_5(%arg0: i32, %arg1: i32) -> (i32, i32) {
    %c0_i32 = arith.constant 0 : i32
    %c0_i32_0 = arith.constant 0 : i32
    %c0_i32_1 = arith.constant 0 : i32
    return %c0_i32, %c0_i32_0 : i32, i32
  }
  func.func @transform_6(%arg0: i32, %arg1: i32) -> (i32, i32) {
    %c0_i32 = arith.constant 0 : i32
    %c0_i32_0 = arith.constant 0 : i32
    %c0_i32_1 = arith.constant 0 : i32
    return %c0_i32, %c0_i32_0 : i32, i32
  }
  func.func @transform_7(%arg0: i32, %arg1: i32) -> (i32, i32) {
    %c0_i32 = arith.constant 0 : i32
    %c0_i32_0 = arith.constant 0 : i32
    %c0_i32_1 = arith.constant 0 : i32
    return %c0_i32, %c0_i32_0 : i32, i32
  }
  func.func @transform_8(%arg0: i32, %arg1: i32) -> (i32, i32) {
    %c0_i32 = arith.constant 0 : i32
    %c0_i32_0 = arith.constant 0 : i32
    %c0_i32_1 = arith.constant 0 : i32
    return %c0_i32, %c0_i32_0 : i32, i32
  }
  func.func @transform_9(%arg0: i32, %arg1: i32) -> (i32, i32) {
    %c0_i32 = arith.constant 0 : i32
    %c0_i32_0 = arith.constant 0 : i32
    %c0_i32_1 = arith.constant 0 : i32
    return %c0_i32, %c0_i32_0 : i32, i32
  }
  func.func @transform_10(%arg0: i32, %arg1: i32) -> (i32, i32) {
    %c0_i32 = arith.constant 0 : i32
    %c0_i32_0 = arith.constant 0 : i32
    %c0_i32_1 = arith.constant 0 : i32
    return %c0_i32, %c0_i32_0 : i32, i32
  }
  func.func @transform_11(%arg0: i32, %arg1: i32) -> (i32, i32) {
    %c0_i32 = arith.constant 0 : i32
    %c0_i32_0 = arith.constant 0 : i32
    %c0_i32_1 = arith.constant 0 : i32
    return %c0_i32, %c0_i32_0 : i32, i32
  }
  func.func @transform_12(%arg0: i32, %arg1: i32) -> (i32, i32) {
    %c0_i32 = arith.constant 0 : i32
    %c0_i32_0 = arith.constant 0 : i32
    %c0_i32_1 = arith.constant 0 : i32
    return %c0_i32, %c0_i32_0 : i32, i32
  }
  func.func @transform_13(%arg0: i32, %arg1: i32) -> (i32, i32) {
    %c0_i32 = arith.constant 0 : i32
    %c0_i32_0 = arith.constant 0 : i32
    %c0_i32_1 = arith.constant 0 : i32
    return %c0_i32, %c0_i32_0 : i32, i32
  }
  func.func @transform_14(%arg0: i32, %arg1: i32) -> (i32, i32, i32) {
    %c0_i32 = arith.constant 0 : i32
    %c0_i32_0 = arith.constant 0 : i32
    return %arg0, %arg1, %c0_i32 : i32, i32, i32
  }
  func.func @transform_15(%arg0: i32, %arg1: i32) -> (i32, i32, i32) {
    %c0_i32 = arith.constant 0 : i32
    %c0_i32_0 = arith.constant 0 : i32
    %c0_i32_1 = arith.constant 0 : i32
    return %arg0, %c0_i32, %c0_i32_0 : i32, i32, i32
  }
}

</mosaic_0001>

<bundles_post_ra>
// kernel: tpu_custom_call.1
= control target key start
LH: loop header
LB: loop body
LE: loop exit
PB: predicated region body
PF: predicated region fallthrough
CT: control target
= control target key end

     0   :  { %s13070_s0 = inlined_call_operand.hbm [shape: f32[2,320,128], index: 0, kind: input, shape index: {}]   ;;  %s13071_s1 = inlined_call_operand.vmem [shape: f32[320,3], index: 1, kind: input, shape index: {}]   ;;  %s13072_s2 = inlined_call_operand.vmem [shape: bf16[128,128], index: 2, kind: input, shape index: {}]   ;;  %s13073_s3 = inlined_call_operand.vmem [shape: f32[1,128], index: 3, kind: input, shape index: {}]   ;;  %s13074_s4 = inlined_call_operand.hbm [shape: bf16[1152,128], index: 4, kind: input, shape index: {}]   ;;  %s13075_s5 = inlined_call_operand.vmem [shape: f32[1,128], index: 5, kind: input, shape index: {}]   ;;  %s13076_s6 = inlined_call_operand.hbm [shape: bf16[1152,128], index: 6, kind: input, shape index: {}]   ;;  %s13077_s7 = inlined_call_operand.vmem [shape: f32[1,128], index: 7, kind: input, shape index: {}]   ;;  %s13078_s8 = inlined_call_operand.hbm [shape: bf16[128,128], index: 8, kind: input, shape index: {}]   ;;  %s13079_s9 = inlined_call_operand.vmem [shape: f32[1,128], index: 9, kind: input, shape index: {}]   ;;  %s13080_s10 = inlined_call_operand.vmem [shape: f32[128,128], index: 10, kind: input, shape index: {}]   ;;  %s13081_s11 = inlined_call_operand.vmem [shape: f32[1,128], index: 11, kind: input, shape index: {}]   ;;  %s13082_s12 = inlined_call_operand.vmem [shape: f32[128,128], index: 12, kind: input, shape index: {}]   ;;  %s13083_s13 = inlined_call_operand.vmem [shape: f32[1,128], index: 13, kind: input, shape index: {}]   ;;  %s13084_s14 = inlined_call_operand.hbm [shape: bf16[2,256,128], index: 14, kind: output, shape index: {0}]   ;;  %s13085_s15 = inlined_call_operand.hbm [shape: f32[2,1,128], index: 15, kind: output, shape index: {1}]  }
   0x1   :  { %13328 = sst [smem:[#allocation131_spill]] %s13070_s0 }
   0x2   :  { %13329 = sst [smem:[#allocation132_spill]] %s13071_s1 }
   0x3   :  { %13330 = sst [smem:[#allocation133_spill]] %s13072_s2 }
   0x4   :  { %13331 = sst [smem:[#allocation134_spill]] %s13073_s3 }
   0x5   :  { %13332 = sst [smem:[#allocation135_spill]] %s13074_s4 }
   0x6   :  { %13333 = sst [smem:[#allocation136_spill]] %s13075_s5 }
   0x7   :  { %13334 = sst [smem:[#allocation137_spill]] %s13076_s6 }
   0x8   :  { %13335 = sst [smem:[#allocation138_spill]] %s13077_s7 }
   0x9   :  { %13336 = sst [smem:[#allocation139_spill]] %s13078_s8 }
   0xa   :  { %13337 = sst [smem:[#allocation140_spill]] %s13079_s9 }
   0xb   :  { %13338 = sst [smem:[#allocation141_spill]] %s13080_s10 }
   0xc   :  { %13339 = sst [smem:[#allocation142_spill]] %s13081_s11 }
   0xd   :  { %13340 = sst [smem:[#allocation143_spill]] %s13082_s12 }
   0xe   :  { %13341 = sst [smem:[#allocation144_spill]] %s13083_s13 }
   0xf   :  { %13342 = sst [smem:[#allocation145_spill]] %s13084_s14 }
  0x10   :  { %13343 = sst [smem:[#allocation146_spill]] %s13085_s15 }
  0x11   :  { %21 = vsyncpa [#allocation4], 0 }
  0x12   :  { %23 = vsyncpa [#allocation4 + $0x1], 0 }
  0x13   :  { %24 = vsyncpa [#allocation7], 0 }
  0x14   :  { %25 = vsyncpa [#allocation10], 0 }
  0x15   :  { %26 = vsyncpa [#allocation5], 0 }
  0x16   :  { %28 = vsyncpa [#allocation5 + $0x1], 0 }
  0x17   :  { %29 = vsyncpa [#allocation13], 0 }
  0x18   :  { %31 = vsyncpa [#allocation13 + $0x1], 0  ;;  %s9494_s18 = smov 0   ;;  %s9496_s19 = smov 0  }
  0x19   :  { %s9498_s20 = smov 0   ;;  %s9500_s21 = smov 0  }
  0x1a   :  { %s9502_s22 = smov 0   ;;  %s9504_s23 = smov 0  }
  0x1b   :  { %s9506_s24 = smov 0   ;;  %s9508_s25 = smov 0  }
  0x1c   :  { %s9510_s26 = smov 0   ;;  %s9512_s27 = smov 0  }
  0x1d   :  { %s9514_s28 = smov 0  }
  0x1e LB: > { %13344 = sst [smem:[#allocation19_spill]] %s9354_s18  ;;  %s7471_s29 = sadd.s32 4294967295, %s9394_s28   ;;  %s9394_s28 = sphi %s9514_s28, %s37_s28   ;;  %s9390_s27 = sphi %s9512_s27, %s13895_s27   ;;  %s9386_s26 = sphi %s9510_s26, %s13887_s26   ;;  %s9382_s25 = sphi %s9508_s25, %s13894_s25   ;;  %s9378_s24 = sphi %s9506_s24, %s13886_s24   ;;  %s9374_s23 = sphi %s9504_s23, %s13893_s23   ;;  %s9370_s22 = sphi %s9502_s22, %s13892_s22   ;;  %s9366_s21 = sphi %s9500_s21, %s13891_s21   ;;  %s9362_s20 = sphi %s9498_s20, %s13890_s20   ;;  %s9358_s19 = sphi %s9496_s19, %s13889_s19   ;;  %s9354_s18 = sphi %s9494_s18, %s13885_s18  }
  0x1f   : > { %13345 = sst [smem:[#allocation20_spill]] %s9358_s19  ;;  %s7472_s30 = sadd.s32 4294967294, %s9394_s28  }
  0x20   : > { %13346 = sst [smem:[#allocation21_spill]] %s9366_s21  ;;  %p69_p0 = scmp.ne.s32.totalorder %s9370_s22, %s9366_s21 }
  0x21   : > { %13347 = sst [smem:[#allocation22_spill]] %s9382_s25  ;;  %p9553_p1 = scmp.eq.s32.totalorder %s7471_s29, 0 }
  0x22   : > { %13348 = sst [smem:[#allocation23_spill]] %s9386_s26  ;;  %p367_p2 = scmp.ne.s32.totalorder %s9362_s20, %s9358_s19 }
  0x23   : > { %p9562_p3 = por %p9553_p1, %p69_p0  ;;  %p9566_p4 = scmp.eq.s32.totalorder %s7471_s29, 3 }
  0x24   : > { %p373_p5 = scmp.ne.s32.totalorder %s9358_s19, %s9354_s18  ;;  %p374_p6 = scmp.eq.s32.totalorder %s7472_s30, 3 }
  0x25   : > { %p9574_p7 = por %p9566_p4, %p367_p2  ;;  %p7473_p8 = scmp.ge.s32.totalorder %s9394_s28, 1 }
  0x26   : > { %p9579_p9 = por %p374_p6, %p373_p5  ;;  %p9583_p10 = por %p374_p6, %p69_p0 }
  0x27   : > { %s13352_s21 = scalar_select %p9574_p7, 1, 0 }
  0x28   : > { %s13354_s17 = scalar_select %p9579_p9, 1, 0 }
  0x29   : > { %13353 = sst [smem:[#allocation24_spill]] %s13352_s21  ;;  %p407_p11 = scmp.lt.s32.totalorder %s9394_s28, 5 }
  0x2a   : > { %13355 = sst [smem:[#allocation25_spill]] %s13354_s17  ;;  %s9396_s30 = smov [#allocation6]  }
  0x2b   : > { %s13356_s25 = scalar_select %p9583_p10, 1, 0 }
  0x2c   : > { %p9588_p12 = pnand %p7473_p8, %p407_p11  ;;  %s428_s18 = sshll.u32 %s9396_s30, 4  ;;  %s429_s18 = int_to_ptr.vmem [resolvable:$true] %s428_s18 }
  0x2d   : > { %13357 = sst [smem:[#allocation26_spill]] %s13356_s25  ;;  %s9397_s17 = smov [#allocation8]  }
  0x2e   : > { %p8632_p13 = pneg %p9588_p12  ;;  %s444_s25 = sshll.u32 %s9397_s17, 4  ;;  %s9600_s25 = int_to_ptr.vmem [resolvable:$true] %s444_s25 }
  0x2f   : > { %s9398_s13 = smov [#allocation9]   ;;  %s9141_s30 = scalar_lea.vmem %s429_s18, 9216 }
  0x30   : > { %p9596_p2 = pnand %p8632_p13, %p9553_p1  ;;  %s460_s11 = sshll.u32 %s9398_s13, 4  ;;  %s9602_s11 = int_to_ptr.vmem [resolvable:$true] %s460_s11 }
  0x31   : > { %p9142_p5 = scmp.ne.s32.totalorder %s429_s18, %s9141_s30  ;;  %p9149_p11 = scmp.lt.s32.totalorder %s429_s18, %s429_s18 }
  0x32   : > { %p9132_p0 = pneg %p9596_p2  ;;  %p9150_p13 = scmp.lt.s32.totalorder %s9141_s30, %s9141_s30 }
  0x34   : > { %p9144_p6 = pnand %p9142_p5, %p9132_p0  ;;  %p9151_p10 = por %p9150_p13, %p9149_p11 }
  0x36   : > { %p9145_p8 = pneg %p9144_p6 }
  0x38   : > { %p9152_p9 = pnand %p9151_p10, %p9145_p8 }
  0x3a   : > { %9155 = shalt.err (!%p9152_p9)
}
  0x3b   : > { %s9399_s17 = smov 64   ;;  %s9400_s13 = smov 4  }
  0x3c   : > { %s13360_s4 = sld [smem:[#allocation135_spill]]  ;;  %s9167_s9 = scalar_lea.vmem %s9600_s25, 9216 }
  0x3d   : > { %p9168_p5 = scmp.ne.s32.totalorder %s9600_s25, %s9167_s9  ;;  %p9175_p9 = scmp.lt.s32.totalorder %s9600_s25, %s9600_s25 }
  0x3e   : > { %p9176_p10 = scmp.lt.s32.totalorder %s9167_s9, %s9167_s9 }
  0x3f   : > { %p9170_p6 = pnand %p9168_p5, %p9132_p0 }
  0x40   : > { %p9177_p8 = por %p9176_p10, %p9175_p9 }
  0x41   : > { %p9171_p11 = pneg %p9170_p6 }
  0x42   : > { %8635 = dma.hbm_to_vmem [thread:$0]  (!%p9596_p2), %s13360_s4, 9216, %s429_s18, [#allocation7], %s9399_s17, %s9399_s17, %s9400_s13  }
  0x43   : > { %p9178_p13 = pnand %p9177_p8, %p9171_p11 }
  0x45   : > { %9181 = shalt.err (!%p9178_p13)
}
  0x46   : > { %s13361_s6 = sld [smem:[#allocation137_spill]]  ;;  %s9193_s10 = scalar_lea.vmem %s9602_s11, 1024 }
  0x47   : > { %p9194_p5 = scmp.ne.s32.totalorder %s9602_s11, %s9193_s10  ;;  %p9201_p11 = scmp.lt.s32.totalorder %s9602_s11, %s9602_s11 }
  0x48   : > { %p9202_p9 = scmp.lt.s32.totalorder %s9193_s10, %s9193_s10 }
  0x49   : > { %p9196_p6 = pnand %p9194_p5, %p9132_p0 }
  0x4a   : > { %p9203_p10 = por %p9202_p9, %p9201_p11 }
  0x4b   : > { %p9197_p7 = pneg %p9196_p6 }
  0x4c   : > { %8638 = dma.hbm_to_vmem [thread:$0]  (!%p9596_p2), %s13361_s6, 9216, %s9600_s25, [#allocation7], %s9399_s17, %s9399_s17, %s9400_s13  }
  0x4d   : > { %p9204_p8 = pnand %p9203_p10, %p9197_p7 }
  0x4f   : > { %9207 = shalt.err (!%p9204_p8)
}
  0x50   : > { %s13362_s8 = sld [smem:[#allocation139_spill]]  ;;  %s46_s18 = sadd.s32 1, %s9386_s26 }
  0x51   : > { %s49_s19 = sadd.s32 1, %s9390_s27  ;;  %p47_p7 = scmp.ge.s32.totalorder %s46_s18, 2 }
  0x52   : > { %s56_s21 = sadd.s32 1, %s9374_s23  ;;  %p63_p0 = scmp.ne.s32.totalorder %s9374_s23, %s9370_s22 }
  0x53   : > { %p64_p13 = scmp.eq.s32.totalorder %s9394_s28, 0  ;;  %s13897_s18 = smov (%p47_p7, %s46_s18), 0 }
  0x54   : > { %13363 = sst [smem:[#allocation27_spill]] %s13897_s18  ;;  %s13899_s19 = smov (!%p47_p7, %s49_s19), %s9390_s27 }
  0x55   : > { %p9649_p5 = por %p64_p13, %p63_p0  ;;  %p9657_p6 = por %p9566_p4, %p63_p0 }
  0x56   : > { %8641 = dma.hbm_to_vmem [thread:$0]  (!%p9596_p2), %s13362_s8, 1024, %s9602_s11, [#allocation10], %s9399_s17, %s9399_s17, %s9400_s13  }
  0x57   : > { %s353_s11 = ssub.s32 %s9386_s26, %s13897_s18  ;;  %p51_p2 = scmp.ge.s32.totalorder %s13899_s19, 2 }
  0x58   : > { %s13365_s17 = scalar_select %p9657_p6, 1, 0 }
  0x59   : > { %p8656_p11 = scmp.lt.s32.totalorder %s9394_s28, 4  ;;  %s489_s13 = sand.u32 1, %s9374_s23  }
  0x5a   : > { %13366 = sst [smem:[#allocation28_spill]] %s13365_s17  ;;  %s13901_s19 = smov (%p51_p2, %s13899_s19), 0 }
  0x5b   : > { %13367 = sst [smem:[#allocation29_spill]] %s13901_s19  ;;  %s8611_s30 = smul.u32 320, %s489_s13 }
  0x5c   : > { %s53_s10 = ssub.s32 %s9390_s27, %s13901_s19  ;;  %s8612_s9 = smul.u32 5120, %s9390_s27 }
  0x5d   : > { %p54_p9 = scmp.eq.s32.totalorder %s53_s10, 0  ;;  %s354_s12 = sor.u32 %s353_s11, %s53_s10 }
  0x5e   : > { %p355_p10 = scmp.eq.s32.totalorder %s354_s12, 0  ;;  %s13368_s14 = sadd.s32 1, %s9362_s20 }
  0x5f   : > { %s9669_s4 = scalar_select %p54_p9, %s9374_s23, %s56_s21  }
  0x60   : > { %s9674_s6 = scalar_select %p355_p10, %s9362_s20, %s13368_s14  }
  0x61   : > { %s13369_s0 = sld [smem:[#allocation131_spill]]  ;;  %s493_s17 = scalar_lea.vmem [#allocation3], %s8611_s30 }
  0x62   : > { %s500_s7 = sshll.u32 %s493_s17, 4  ;;  %p9683_p4 = pnand %p8656_p11, %p9649_p5  ;;  %s501_s7 = int_to_ptr.vmem [resolvable:$true] %s500_s7 }
  0x63   : > { %s490_s11 = scalar_lea.sflag [#allocation4], %s489_s13  ;;  %s9221_s21 = scalar_lea.vmem %s501_s7, 5120 }
  0x64   : > { %p9210_p8 = pneg %p9683_p4  ;;  %p9222_p7 = scmp.ne.s32.totalorder %s501_s7, %s9221_s21 }
  0x65   : > { %s9401_s10 = smov [#allocation3]  }
  0x66   : > { %p9224_p0 = pnand %p9222_p7, %p9210_p8  ;;  %s9226_s8 = sshll.u32 %s9401_s10, 4  ;;  %s9227_s8 = int_to_ptr.vmem [resolvable:$false] %s9226_s8 }
  0x67   : > { %s499_s26 = scalar_lea.hbm %s13369_s0, %s8612_s9  ;;  %s9228_s18 = scalar_lea.vmem %s9227_s8, 10240 }
  0x68   : > { %p9225_p13 = pneg %p9224_p0  ;;  %p9229_p2 = scmp.lt.s32.totalorder %s501_s7, %s9227_s8 }
  0x69   : > { %p9230_p9 = scmp.lt.s32.totalorder %s9228_s18, %s9221_s21 }
  0x6b   : > { %p9231_p10 = por %p9230_p9, %p9229_p2 }
  0x6d   : > { %p9232_p6 = pnand %p9231_p10, %p9225_p13 }
  0x6f   : > { %9235 = shalt.err (!%p9232_p6)
}
  0x70   : > { %s9402_s25 = smov 128   ;;  %s9403_s17 = smov 8  }
  0x71   : > { %8645 = dma.hbm_to_vmem [thread:$0]  (!%p9683_p4), %s499_s26, 5120, %s501_s7, %s490_s11, %s9402_s25, %s9402_s25, %s9403_s17  }
  0x72   : > { %512 = sbr.rel (%p9588_p12) target bundleno = 2136 (0x858), region = 76 }
  0x77   : > { %s9694_s13 = sand.u32 1, %s9370_s22  }
  0x78   : > { %s8613_s30 = smul.u32 320, %s9694_s13  ;;  %s515_s9 = scalar_lea.sflag [#allocation4], %s9694_s13 }
  0x7a   : > { %s518_s12 = scalar_lea.vmem [#allocation3], %s8613_s30 }
  0x7b   : > { %9333 = dma.done.wait (%p9562_p3), %s515_s9, 5120  }
  0x7c   : > { %9335 = vsyncadd (%p9562_p3), %s515_s9, 4294962176 }
  0x7d   : > { %9337 = dma.done.wait (%p9553_p1), [#allocation7], 18432  }
  0x7e   : > { %9339 = vsyncadd (%p9553_p1), [#allocation7], 4294948864 }
  0x7f   : > { %9341 = dma.done.wait (%p9553_p1), [#allocation10], 1024  }
  0x80   : > { %9343 = vsyncadd (%p9553_p1), [#allocation10], 4294966272  ;;  %v9404_v0 = vmov 0   ;;  %s13371_s2 = sld [smem:[#allocation133_spill]]  ;;  %s7484_s26 = sshll.u32 %s9378_s24, 7  ;;  %v9405_v21 = vmov 1  }
  0x81   : > { %8765 = vset.pattern.permute.xlu1 %v9404_v0  ;;  %8764 = vset.pattern.permute.xlu0 %v9404_v0  ;;  %s13372_s1 = sld [smem:[#allocation132_spill]]  ;;  %s9728_s8 = scalar_lea.vmem %s518_s12, %s7484_s26 [#allocation3]  ;;  %vm1675_vm0 = vcmask 1046528   ;;  %vm1817_vm1 = vcmask 1040384   ;;  %vm2422_vm2 = vsmask.f32 4352  ;;  %vm2084_vm3 = vcmask 1045504  }
  0x82   : > { %v585_v7 = vld [vmem:[%s9728_s8] sm:$0xff]  ;;  %v586_v8 = vld [vmem:[%s9728_s8 + $0x8] sm:$0xff]  ;;  %v587_v11 = vld [vmem:[%s9728_s8 + $0x10] sm:$0xff]  ;;  %s13403_s3 = sld [smem:[#allocation134_spill]]  ;;  %s13327_s15 = scalar_lea.vmem [#allocation12], %s9694_s13 }
  0x83   : > { %v658_v9 = vmul.f32 %v585_v7, %v585_v7  ;;  %v659_v10 = vmul.f32 %v586_v8, %v586_v8  ;;  %v588_v12 = vld [vmem:[%s9728_s8 + $0x18] sm:$0xff]  ;;  %v9742_v13 = vld [vmem:[%s9728_s8 + $0x20] sm:$0xff]  ;;  %v660_v15 = vmul.f32 %v587_v11, %v587_v11  ;;  %v9748_v17 = vld [vmem:[%s9728_s8 + $0x28] sm:$0xff]  ;;  %v9765_v28 = vmul.f32 0.5, %v585_v7  ;;  %s13713_s5 = sld [smem:[#allocation136_spill]]  ;;  %p7665_p1 = scmp.ne.s32.totalorder %s9378_s24, 0 }
  0x84   : > { %v661_v16 = vmul.f32 %v588_v12, %v588_v12  ;;  %v662_v24 = vmul.f32 %v9742_v13, %v9742_v13  ;;  %v663_v25 = vmul.f32 %v9748_v17, %v9748_v17  ;;  %v9759_v26 = vld [vmem:[%s9728_s8 + $0x30] sm:$0xff]  ;;  %v9762_v27 = vld [vmem:[%s9728_s8 + $0x38] sm:$0xff]  ;;  %v9767_v29 = vmul.f32 0.5, %v586_v8  ;;  %v593_v56 = vld [vmem:[%s9728_s8 + $0x40] sm:$0xff]  ;;  %s13863_s18 = sld [smem:[#allocation20_spill]] }
  0x85   : > { %v682_v19 = vmul.f32 %v658_v9, %v585_v7  ;;  %v683_v20 = vmul.f32 %v659_v10, %v586_v8  ;;  %v684_v22 = vmul.f32 %v660_v15, %v587_v11  ;;  %v664_v39 = vmul.f32 %v9759_v26, %v9759_v26  ;;  %v594_v60 = vld [vmem:[%s9728_s8 + $0x48] sm:$0xff]  ;;  %s13864_s9 = sld [smem:[#allocation140_spill]] }
  0x86   : > { %v8793_v1 = vld [vmem:[%s13371_s2 + $0x38] sm:$0xff]   ;;  %v8794_v2 = vld [vmem:[%s13371_s2 + $0x30] sm:$0xff]   ;;  %v8795_v3 = vld [vmem:[%s13371_s2 + $0x28] sm:$0xff]   ;;  %v685_v23 = vmul.f32 %v661_v16, %v588_v12  ;;  %v686_v34 = vmul.f32 %v662_v24, %v9742_v13  ;;  %v687_v35 = vmul.f32 %v663_v25, %v9748_v17  ;;  %v665_v40 = vmul.f32 %v9762_v27, %v9762_v27 }
  0x87   : > { %s9722_s16 = scalar_lea.vmem %s13372_s1, %s7484_s26  ;;  %8401 = vmatprep.subr.bf16.mxu0 %v8793_v1  ;;  %v8796_v6 = vld [vmem:[%s13371_s2 + $0x20] sm:$0xff]   ;;  %v8797_v18 = vld [vmem:[%s13371_s2 + $0x18] sm:$0xff]   ;;  %v706_v30 = vmul.f32 0.044715, %v682_v19  ;;  %v707_v31 = vmul.f32 0.044715, %v683_v20  ;;  %v688_v49 = vmul.f32 %v664_v39, %v9759_v26  ;;  %v667_v9 = vmul.f32 %v594_v60, %v594_v60 }
  0x88   : > { %8402 = vmatpush3.bf16.msra.mxu0 %v8793_v1  ;;  %v612_v4 = vld [vmem:[%s9722_s16 + $0x10] sm:$0xff]  ;;  %v9731_v5 = vld [vmem:[%s9722_s16 + $0x18] sm:$0xff]  ;;  %v9745_v14 = vld [vmem:[%s9722_s16 + $0x8] sm:$0xff]  ;;  %v708_v32 = vmul.f32 0.044715, %v684_v22  ;;  %v689_v50 = vmul.f32 %v665_v40, %v9762_v27  ;;  %v9793_v57 = vmul.f32 0.5, %v587_v11 }
  0x89   : > { %8403 = vmatprep.subr.bf16.mxu0 %v8794_v2  ;;  %1338 = vperm.xlu1 %8765, %v612_v4   ;;  %v709_v33 = vmul.f32 0.044715, %v685_v23  ;;  %v8798_v36 = vld [vmem:[%s13371_s2 + $0x10] sm:$0xff]   ;;  %v730_v37 = vadd.f32 %v706_v30, %v585_v7  ;;  %v731_v38 = vadd.f32 %v707_v31, %v586_v8  ;;  %v710_v43 = vmul.f32 0.044715, %v686_v34  ;;  %v9779_v45 = vld [vmem:[%s9722_s16] sm:$0xff] }
  0x8a   : > { %v732_v41 = vadd.f32 %v708_v32, %v587_v11  ;;  %v711_v44 = vmul.f32 0.044715, %v687_v35  ;;  %v8799_v46 = vld [vmem:[%s13371_s2 + $0x8] sm:$0xff]   ;;  %1328 = vperm.xlu0 %8764, %v9779_v45   ;;  %v9788_v51 = vld [vmem:[%s9722_s16 + $0x20] sm:$0xff]  ;;  %v712_v58 = vmul.f32 0.044715, %v688_v49  ;;  %v691_v16 = vmul.f32 %v667_v9, %v594_v60 }
  0x8b   : > { %v733_v42 = vadd.f32 %v709_v33, %v588_v12  ;;  %v754_v47 = vmul.f32 0.7978846, %v730_v37  ;;  %v755_v48 = vmul.f32 0.7978846, %v731_v38  ;;  %v734_v54 = vadd.f32 %v710_v43, %v9742_v13  ;;  %v8800_v10 = vld [vmem:[%s13371_s2] sm:$0xff]   ;;  %v9826_v19 = vld [vmem:[%s9728_s8 + $0x68] sm:$0xff] }
  0x8c   : > { %8404 = vmatpush3.bf16.msra.mxu0 %v8794_v2  ;;  %v756_v52 = vmul.f32 0.7978846, %v732_v41  ;;  %v735_v55 = vadd.f32 %v711_v44, %v9748_v17  ;;  %v713_v59 = vmul.f32 0.044715, %v689_v50  ;;  %v9796_v61 = vmul.f32 0.5, %v588_v12  ;;  %v9835_v24 = vld [vmem:[%s9728_s8 + $0x70] sm:$0xff] }
  0x8d   : > { %8405 = vmatprep.subr.bf16.mxu0 %v8795_v3  ;;  %1343 = vperm.xlu1 %8765, %v9731_v5   ;;  %v757_v53 = vmul.f32 0.7978846, %v733_v42  ;;  %8953 = vtanh.f32 %v754_v47  ;;  %v758_v62 = vmul.f32 0.7978846, %v734_v54  ;;  %v736_v1 = vadd.f32 %v712_v58, %v9759_v26  ;;  %v9849_v34 = vld [vmem:[%s9728_s8 + $0x78] sm:$0xff]  ;;  %v9852_v35 = vld [vmem:[%s9722_s16 + $0x28] sm:$0xff] }
  0x8e   : > { %8955 = vtanh.f32 %v755_v48  ;;  %v759_v63 = vmul.f32 0.7978846, %v735_v55  ;;  %v737_v2 = vadd.f32 %v713_v59, %v9762_v27  ;;  %1333 = vperm.xlu0 %8764, %v9745_v14   ;;  %v9810_v7 = vmul.f32 0.5, %v9742_v13  ;;  %s572_s25 = sand.u32 1, %s13863_s18  }
  0x8f   : > { %8957 = vtanh.f32 %v756_v52  ;;  %v9813_v8 = vmul.f32 0.5, %v9748_v17  ;;  %v760_v11 = vmul.f32 0.7978846, %v736_v1  ;;  %v9829_v20 = vmul.f32 0.5, %v9759_v26  ;;  %v9873_v1 = vld [vmem:[%s9722_s16 + $0x30] sm:$0xff]  ;;  %s7483_s12 = sshll.u32 %s572_s25, 6 }
  0x90   : > { %8406 = vmatpush3.bf16.msra.mxu0 %v8795_v3  ;;  %v666_v3 = vmul.f32 %v593_v56, %v593_v56  ;;  %8959 = vtanh.f32 %v757_v53  ;;  %v761_v12 = vmul.f32 0.7978846, %v737_v2  ;;  %v9832_v22 = vmul.f32 0.5, %v9762_v27  ;;  %s12825_s7 = scalar_lea.vmem [#allocation11], %s7483_s12 }
  0x91   : > { %8407 = vmatprep.subr.bf16.mxu0 %v8796_v6  ;;  %8767 = vset.pattern.permute.xlu1 %v9405_v21  ;;  %8961 = vtanh.f32 %v758_v62  ;;  %v715_v25 = vmul.f32 0.044715, %v691_v16  ;;  %v9842_v27 = vmul.f32 0.5, %v593_v56  ;;  %v671_v33 = vmul.f32 %v9826_v19, %v9826_v19 }
  0x92   : > { %1619 = vperm.xlu1 %8767, %v9745_v14   ;;  %v690_v15 = vmul.f32 %v666_v3, %v593_v56  ;;  %8963 = vtanh.f32 %v759_v63  ;;  %8766 = vset.pattern.permute.xlu0 %v9405_v21  ;;  %v672_v43 = vmul.f32 %v9835_v24, %v9835_v24  ;;  %v673_v48 = vmul.f32 %v9849_v34, %v9849_v34 }
  0x93   : > { %8965 = vtanh.f32 %v760_v11  ;;  %v739_v37 = vadd.f32 %v715_v25, %v594_v60  ;;  %1616 = vperm.xlu0 %8766, %v9779_v45   ;;  %v695_v42 = vmul.f32 %v671_v33, %v9826_v19  ;;  %v617_v45 = vld [vmem:[%s9722_s16 + $0x38] sm:$0xff] }
  0x94   : > { %8408 = vmatpush3.bf16.msra.mxu0 %v8796_v6  ;;  %v9805_v6 = vld [vmem:[%s9728_s8 + $0x58] sm:$0xff]  ;;  %v714_v23 = vmul.f32 0.044715, %v690_v15  ;;  %8967 = vtanh.f32 %v761_v12  ;;  %v696_v52 = vmul.f32 %v672_v43, %v9835_v24 }
  0x95   : > { %8409 = vmatprep.subr.bf16.mxu0 %v8797_v18  ;;  %v669_v17 = vmul.f32 %v9805_v6, %v9805_v6  ;;  %v763_v44 = vmul.f32 0.7978846, %v739_v37  ;;  %v719_v50 = vmul.f32 0.044715, %v695_v42  ;;  %v9888_v42 = vld [vmem:[%s9728_s8 + $0x80] sm:$0xff] }
  0x96   : > { %1622 = vperm.xlu1 %8767, %v612_v4   ;;  %v9802_v4 = vld [vmem:[%s9728_s8 + $0x50] sm:$0xff]  ;;  %v738_v31 = vadd.f32 %v714_v23, %v593_v56  ;;  %v697_v56 = vmul.f32 %v673_v48, %v9849_v34  ;;  %v720_v63 = vmul.f32 0.044715, %v696_v52  ;;  %v9898_v48 = vld [vmem:[%s9722_s16 + $0x40] sm:$0xff] }
  0x97   : > { %v668_v13 = vmul.f32 %v9802_v4, %v9802_v4  ;;  %v693_v26 = vmul.f32 %v669_v17, %v9805_v6  ;;  %1625 = vperm.xlu0 %8766, %v9731_v5   ;;  %v743_v62 = vadd.f32 %v719_v50, %v9826_v19  ;;  %v9876_v9 = vmul.f32 0.5, %v9802_v4  ;;  %v9901_v52 = vld [vmem:[%s9728_s8 + $0x90] sm:$0xff] }
  0x98   : > { %8410 = vmatpush3.bf16.msra.mxu0 %v8797_v18  ;;  %v9823_v18 = vld [vmem:[%s9728_s8 + $0x60] sm:$0xff]  ;;  %v762_v40 = vmul.f32 0.7978846, %v738_v31  ;;  %v744_v25 = vadd.f32 %v720_v63, %v9835_v24 }
  0x99   : > { %8411 = vmatprep.subr.bf16.mxu0 %v8798_v36  ;;  %v692_v30 = vmul.f32 %v668_v13, %v9802_v4  ;;  %v670_v32 = vmul.f32 %v9823_v18, %v9823_v18  ;;  %v717_v39 = vmul.f32 0.044715, %v693_v26  ;;  %v767_v23 = vmul.f32 0.7978846, %v743_v62 }
  0x9a   : > { %8768 = vset.pattern.permute.xlu1 %v9404_v0  ;;  %8969 = vtanh.f32 %v762_v40  ;;  %v8954_v53 = vpop.eup %8953  ;;  %v646_v62 = vmul.f32 0.5, %v9823_v18 }
  0x9b   : > { %1348 = vperm.xlu1 %8768, %v9788_v51   ;;  %v716_v38 = vmul.f32 0.044715, %v692_v30  ;;  %v694_v41 = vmul.f32 %v670_v32, %v9823_v18  ;;  %v741_v47 = vadd.f32 %v717_v39, %v9805_v6  ;;  %8971 = vtanh.f32 %v763_v44  ;;  %v8956_v58 = vpop.eup %8955  ;;  %1634 = vperm.xlu0 %8766, %v9873_v1  }
  0x9c   : > { %8412 = vmatpush3.bf16.msra.mxu0 %v8798_v36  ;;  %v9854_v36 = vmul.f32 0.5, %v594_v60  ;;  %v802_v59 = vadd.f32 1.0, %v8954_v53  ;;  %v8958_v2 = vpop.eup %8957  ;;  %v803_v3 = vadd.f32 1.0, %v8956_v58 }
  0x9d   : > { %8413 = vmatprep.subr.bf16.mxu0 %v8799_v46  ;;  %v718_v49 = vmul.f32 0.044715, %v694_v41  ;;  %v765_v55 = vmul.f32 0.7978846, %v741_v47  ;;  %v8960_v11 = vpop.eup %8959  ;;  %v804_v5 = vadd.f32 1.0, %v8958_v2 }
  0x9e   : > { %v826_v12 = vmul.f32 %v802_v59, %v9765_v28  ;;  %v8962_v16 = vpop.eup %8961  ;;  %v827_v13 = vmul.f32 %v803_v3, %v9767_v29  ;;  %v805_v17 = vadd.f32 1.0, %v8960_v11  ;;  %v676_v11 = vmul.f32 %v9901_v52, %v9901_v52 }
  0x9f   : > { %8769 = vset.pattern.permute.xlu1 %v9405_v21  ;;  %v742_v60 = vadd.f32 %v718_v49, %v9823_v18  ;;  %v828_v28 = vmul.f32 %v804_v5, %v9793_v57  ;;  %v806_v26 = vadd.f32 1.0, %v8962_v16  ;;  %8771 = vset.pattern.permute.xlu0 %v9404_v0  ;;  %v768_v49 = vmul.f32 0.7978846, %v744_v25 }
  0xa0   : > { %8414 = vmatpush3.bf16.msra.mxu0 %v8799_v46  ;;  %1628 = vperm.xlu1 %8769, %v9788_v51   ;;  %v740_v46 = vadd.f32 %v716_v38, %v9802_v4  ;;  %v8964_v4 = vpop.eup %8963  ;;  %v850_v30 = vmul.f32 1.7015043, %v826_v12  ;;  %v851_v32 = vmul.f32 1.7015043, %v827_v13  ;;  %v829_v33 = vmul.f32 %v805_v17, %v9796_v61  ;;  %v9893_v61 = vld [vmem:[%s9728_s8 + $0x88] sm:$0xff] }
  0xa1   : > { %8415 = vmatprep.subr.bf16.mxu0 %v8800_v10  ;;  %v766_v15 = vmul.f32 0.7978846, %v742_v60  ;;  %v8966_v31 = vpop.eup %8965  ;;  %v807_v29 = vadd.f32 1.0, %v8964_v4  ;;  %v852_v38 = vmul.f32 1.7015043, %v828_v28  ;;  %v830_v39 = vmul.f32 %v806_v26, %v9810_v7  ;;  %1353 = vperm.xlu0 %8771, %v9852_v35  }
  0xa2   : > { %v764_v54 = vmul.f32 0.7978846, %v740_v46  ;;  %v8968_v37 = vpop.eup %8967  ;;  %v808_v40 = vadd.f32 1.0, %v8966_v31  ;;  %v874_v57 = vpack.c.bf16 %v851_v32, %v850_v30  ;;  %v853_v43 = vmul.f32 1.7015043, %v829_v33  ;;  %v9932_v30 = vld [vmem:[%s9722_s16 + $0x48] sm:$0xff] }
  0xa3   : > { %v831_v44 = vmul.f32 %v807_v29, %v9813_v8  ;;  %v809_v46 = vadd.f32 1.0, %v8968_v37  ;;  %v854_v47 = vmul.f32 1.7015043, %v830_v39  ;;  %v9921_v18 = vmul.f32 0.5, %v9835_v24 }
  0xa4   : > { %8416 = vmatpush3.bf16.msra.mxu0 %v8800_v10  ;;  %1631 = vperm.xlu1 %8769, %v9852_v35   ;;  %8973 = vtanh.f32 %v764_v54  ;;  %v721_v10 = vmul.f32 0.044715, %v697_v56  ;;  %v832_v7 = vmul.f32 %v808_v40, %v9829_v20  ;;  %v875_v8 = vpack.c.bf16 %v853_v43, %v852_v38  ;;  %v9907_v56 = vld [vmem:[%s9728_s8 + $0x98] sm:$0xff] }
  0xa5   : > { %8975 = vtanh.f32 %v765_v55  ;;  %8417 = vmatprep.mubr.bf16.mxu0 %v874_v57  ;;  %v855_v53 = vmul.f32 1.7015043, %v831_v44  ;;  %v833_v54 = vmul.f32 %v809_v46, %v9832_v22  ;;  %v645_v55 = vmul.f32 0.5, %v9805_v6  ;;  %1358 = vperm.xlu0 %8771, %v9873_v1   ;;  %v9944_v44 = vld [vmem:[%s9728_s8 + $0xa0] sm:$0xff] }
  0xa6   : > { %8977 = vtanh.f32 %v766_v15  ;;  %v745_v41 = vadd.f32 %v721_v10, %v9849_v34  ;;  %v856_v58 = vmul.f32 1.7015043, %v832_v7  ;;  %v674_v20 = vmul.f32 %v9888_v42, %v9888_v42 }
  0xa7   : > { %8979 = vtanh.f32 %v767_v23  ;;  %v8970_v59 = vpop.eup %8969  ;;  %8418 = vmatmul.mubr.bf16.vlgmr.msra.gmra.mxu0 %v875_v8  ;;  %v876_v35 = vpack.c.bf16 %v855_v53, %v854_v47  ;;  %v857_v60 = vmul.f32 1.7015043, %v833_v54  ;;  %v647_v6 = vmul.f32 0.5, %v9826_v19 }
  0xa8   : > { %8770 = vset.pattern.permute.xlu1 %v9404_v0  ;;  %v769_v50 = vmul.f32 0.7978846, %v745_v41  ;;  %8981 = vtanh.f32 %v768_v49  ;;  %v8972_v22 = vpop.eup %8971  ;;  %v810_v63 = vadd.f32 1.0, %v8970_v59  ;;  %v698_v2 = vmul.f32 %v674_v20, %v9888_v42  ;;  %v9948_v49 = vld [vmem:[%s9728_s8 + $0xa8] sm:$0xff]  ;;  %v9954_v20 = vld [vmem:[%s9728_s8 + $0xb0] sm:$0xff] }
  0xa9   : > { %1363 = vperm.xlu1 %8770, %v617_v45   ;;  %8421 = vmatprep.mubr.bf16.mxu0 %v876_v35  ;;  %v811_v10 = vadd.f32 1.0, %v8972_v22  ;;  %v677_v19 = vmul.f32 %v9907_v56, %v9907_v56  ;;  %v877_v5 = vpack.c.bf16 %v857_v60, %v856_v58  ;;  %v700_v24 = vmul.f32 %v676_v11, %v9901_v52 }
  0xaa   : > { %8983 = vtanh.f32 %v769_v50  ;;  %v834_v15 = vmul.f32 %v810_v63, %v9842_v27  ;;  %v722_v16 = vmul.f32 0.044715, %v698_v2  ;;  %1373 = vperm.xlu0 %8771, %v9932_v30   ;;  %v9938_v27 = vld [vmem:[%s9722_s16 + $0x50] sm:$0xff]  ;;  %v678_v35 = vmul.f32 %v9944_v44, %v9944_v44  ;;  %v9960_v63 = vld [vmem:[%s9722_s16 + $0x58] sm:$0xff] }
  0xab   : > { %v835_v23 = vmul.f32 %v811_v10, %v9854_v36  ;;  %v701_v4 = vmul.f32 %v677_v19, %v9907_v56  ;;  %v724_v37 = vmul.f32 0.044715, %v700_v24  ;;  %v650_v10 = vmul.f32 0.5, %v9888_v42 }
  0xac   : > { %v858_v28 = vmul.f32 1.7015043, %v834_v15  ;;  %v746_v31 = vadd.f32 %v722_v16, %v9888_v42  ;;  %v702_v11 = vmul.f32 %v678_v35, %v9944_v44  ;;  %v680_v15 = vmul.f32 %v9954_v20, %v9954_v20 }
  0xad   : > { %8772 = vset.pattern.permute.xlu1 %v9405_v21  ;;  %v859_v36 = vmul.f32 1.7015043, %v835_v23  ;;  %v725_v38 = vmul.f32 0.044715, %v701_v4  ;;  %v9980_v23 = vld [vmem:[%s9722_s16 + $0x70] sm:$0xff] }
  0xae   : > { %1637 = vperm.xlu1 %8772, %v617_v45   ;;  %v675_v45 = vmul.f32 %v9893_v61, %v9893_v61  ;;  %v770_v57 = vmul.f32 0.7978846, %v746_v31  ;;  %1378 = vperm.xlu0 %8771, %v9938_v27   ;;  %v726_v42 = vmul.f32 0.044715, %v702_v11  ;;  %v704_v4 = vmul.f32 %v680_v15, %v9954_v20  ;;  %v10017_v15 = vld [vmem:[%s9722_s16 + $0x78] sm:$0xff] }
  0xaf   : > { %8422 = vmatmul.mubr.bf16.gmra.mxu0 %v877_v5  ;;  %v878_v46 = vpack.c.bf16 %v859_v36, %v858_v28  ;;  %v749_v53 = vadd.f32 %v725_v38, %v9907_v56 }
  0xb0   : > { %v699_v3 = vmul.f32 %v675_v45, %v9893_v61  ;;  %8985 = vtanh.f32 %v770_v57 }
  0xb1   : > { %v8974_v12 = vpop.eup %8973  ;;  %8425 = vmatprep.mubr.bf16.mxu0 %v878_v46  ;;  %v773_v59 = vmul.f32 0.7978846, %v749_v53 }
  0xb2   : > { %8773 = vset.pattern.permute.xlu1 %v9404_v0  ;;  %v723_v13 = vmul.f32 0.044715, %v699_v3  ;;  %v8976_v17 = vpop.eup %8975  ;;  %v812_v25 = vadd.f32 1.0, %v8974_v12  ;;  %8776 = vset.pattern.permute.xlu0 %v9405_v21 }
  0xb3   : > { %1368 = vperm.xlu1 %8773, %v9898_v48   ;;  %v813_v26 = vadd.f32 1.0, %v8976_v17  ;;  %v8978_v33 = vpop.eup %8977  ;;  %1646 = vperm.xlu0 %8776, %v9938_v27  }
  0xb4   : > { %v747_v32 = vadd.f32 %v723_v13, %v9893_v61  ;;  %v836_v29 = vmul.f32 %v812_v25, %v9876_v9  ;;  %v8980_v39 = vpop.eup %8979  ;;  %v814_v41 = vadd.f32 1.0, %v8978_v33  ;;  %v748_v9 = vadd.f32 %v724_v37, %v9901_v52 }
  0xb5   : > { %v837_v40 = vmul.f32 %v813_v26, %v645_v55  ;;  %v815_v7 = vadd.f32 1.0, %v8980_v39  ;;  %v649_v55 = vmul.f32 0.5, %v9849_v34  ;;  %v8982_v60 = vpop.eup %8981  ;;  %v679_v34 = vmul.f32 %v9948_v49, %v9948_v49  ;;  %v9991_v39 = vld [vmem:[%s9722_s16 + $0x68] sm:$0xff] }
  0xb6   : > { %v771_v43 = vmul.f32 0.7978846, %v747_v32  ;;  %v860_v47 = vmul.f32 1.7015043, %v836_v29  ;;  %v838_v8 = vmul.f32 %v814_v41, %v646_v62  ;;  %v772_v58 = vmul.f32 0.7978846, %v748_v9 }
  0xb7   : > { %8774 = vset.pattern.permute.xlu1 %v9405_v21  ;;  %v861_v50 = vmul.f32 1.7015043, %v837_v40  ;;  %v839_v54 = vmul.f32 %v815_v7, %v647_v6  ;;  %v9965_v6 = vld [vmem:[%s9728_s8 + $0xb8] sm:$0xff]  ;;  %v8984_v2 = vpop.eup %8983  ;;  %v816_v3 = vadd.f32 1.0, %v8982_v60  ;;  %v703_v5 = vmul.f32 %v679_v34, %v9948_v49  ;;  %1658 = vperm.xlu0 %8776, %v9980_v23   ;;  %v9996_v41 = vld [vmem:[%s9722_s16 + $0x60] sm:$0xff]  ;;  %s13822_s8 = sld [smem:[#allocation138_spill]] }
  0xb8   : > { %1640 = vperm.xlu1 %8774, %v9898_v48   ;;  %8987 = vtanh.f32 %v771_v43  ;;  %v862_v45 = vmul.f32 1.7015043, %v838_v8  ;;  %v817_v12 = vadd.f32 1.0, %v8984_v2  ;;  %v651_v13 = vmul.f32 0.5, %v9893_v61 }
  0xb9   : > { %v879_v62 = vpack.c.bf16 %v861_v50, %v860_v47  ;;  %v863_v22 = vmul.f32 1.7015043, %v839_v54  ;;  %8989 = vtanh.f32 %v772_v58  ;;  %v840_v16 = vmul.f32 %v816_v3, %v9921_v18 }
  0xba   : > { %8991 = vtanh.f32 %v773_v59  ;;  %v681_v17 = vmul.f32 %v9965_v6, %v9965_v6  ;;  %v841_v25 = vmul.f32 %v817_v12, %v649_v55  ;;  %v727_v24 = vmul.f32 0.044715, %v703_v5 }
  0xbb   : > { %v880_v19 = vpack.c.bf16 %v863_v22, %v862_v45  ;;  %8426 = vmatmul.mubr.bf16.gmra.mxu0 %v879_v62  ;;  %v864_v18 = vmul.f32 1.7015043, %v840_v16  ;;  %v750_v61 = vadd.f32 %v726_v42, %v9944_v44  ;;  %v728_v32 = vmul.f32 0.044715, %v704_v4  ;;  %8781 = vset.pattern.permute.xlu0 %v9404_v0  ;;  %v10008_v22 = vld [vmem:[%s9722_s16 + $0x88] sm:$0xff] }
  0xbc   : > { %1643 = vperm.xlu1 %8774, %v9932_v30   ;;  %v705_v28 = vmul.f32 %v681_v17, %v9965_v6  ;;  %v865_v26 = vmul.f32 1.7015043, %v841_v25  ;;  %v751_v31 = vadd.f32 %v727_v24, %v9948_v49  ;;  %v652_v7 = vmul.f32 0.5, %v9901_v52  ;;  %1393 = vperm.xlu0 %8781, %v9991_v39  }
  0xbd   : > { %8429 = vmatprep.mubr.bf16.mxu0 %v880_v19  ;;  %v774_v33 = vmul.f32 0.7978846, %v750_v61  ;;  %v752_v38 = vadd.f32 %v728_v32, %v9954_v20  ;;  %v8986_v57 = vpop.eup %8985  ;;  %v653_v8 = vmul.f32 0.5, %v9907_v56  ;;  %v654_v59 = vmul.f32 0.5, %v9944_v44 }
  0xbe   : > { %v729_v36 = vmul.f32 0.044715, %v705_v28  ;;  %v881_v29 = vpack.c.bf16 %v865_v26, %v864_v18  ;;  %v775_v37 = vmul.f32 0.7978846, %v751_v31  ;;  %v818_v47 = vadd.f32 1.0, %v8986_v57 }
  0xbf   : > { %8993 = vtanh.f32 %v774_v33  ;;  %v776_v43 = vmul.f32 0.7978846, %v752_v38  ;;  %v655_v60 = vmul.f32 0.5, %v9948_v49  ;;  %v656_v5 = vmul.f32 0.5, %v9954_v20  ;;  %v9124_v38 = vld [vmem:[%s9722_s16 + $0x28] sm:$0xff] }
  0xc0   : > { %8775 = vset.pattern.permute.xlu1 %v9404_v0  ;;  %v753_v40 = vadd.f32 %v729_v36, %v9965_v6  ;;  %8995 = vtanh.f32 %v775_v37  ;;  %v842_v54 = vmul.f32 %v818_v47, %v650_v10  ;;  %1398 = vperm.xlu0 %8781, %v9980_v23   ;;  %v628_v10 = vld [vmem:[%s9722_s16 + $0x90] sm:$0xff]  ;;  %v626_v36 = vld [vmem:[%s9722_s16 + $0x80] sm:$0xff]  ;;  %v10034_v37 = vld [vmem:[%s9722_s16 + $0x98] sm:$0xff] }
  0xc1   : > { %1383 = vperm.xlu1 %8775, %v9960_v63   ;;  %8997 = vtanh.f32 %v776_v43  ;;  %v8802_v43 = vld [vmem:[#allocation6 + $0x38] sm:$0xff]  }
  0xc2   : > { %v777_v9 = vmul.f32 0.7978846, %v753_v40  ;;  %v866_v52 = vmul.f32 1.7015043, %v842_v54  ;;  %v9125_v40 = vld [vmem:[%s9722_s16 + $0x38] sm:$0xff] }
  0xc3   : > { %8430 = vmatmul.mubr.bf16.gmra.mxu0 %v881_v29  ;;  %v9406_v29 = vmov 2  }
  0xc4   : > { %8999 = vtanh.f32 %v777_v9  ;;  %1413 = vperm.xlu0 %8781, %v10008_v22   ;;  %v8806_v9 = vld [vmem:[#allocation6 + $0xb8] sm:$0xff]  }
  0xc5   : > { %8777 = vset.pattern.permute.xlu1 %v9405_v21  ;;  %v8988_v46 = vpop.eup %8987 }
  0xc6   : > { %1649 = vperm.xlu1 %8777, %v9960_v63   ;;  %v819_v50 = vadd.f32 1.0, %v8988_v46  ;;  %v8990_v53 = vpop.eup %8989  ;;  %v8804_v46 = vld [vmem:[#allocation6 + $0xf8] sm:$0xff]  }
  0xc7   : > { %v8992_v55 = vpop.eup %8991  ;;  %v820_v45 = vadd.f32 1.0, %v8990_v53  ;;  %7833 = vmatprep.subr.bf16.mxu0 %v8804_v46  ;;  %v8805_v53 = vld [vmem:[#allocation6 + $0x30] sm:$0xff]  }
  0xc8   : > { %v843_v58 = vmul.f32 %v819_v50, %v651_v13  ;;  %v821_v35 = vadd.f32 1.0, %v8992_v55  ;;  %v657_v13 = vmul.f32 0.5, %v9965_v6  ;;  %1418 = vperm.xlu0 %8781, %v628_v10   ;;  %7834 = vmatpush3.bf16.msra.mxu0 %v8806_v9 }
  0xc9   : > { %v844_v62 = vmul.f32 %v820_v45, %v652_v7  ;;  %v8803_v7 = vld [vmem:[#allocation6 + $0x70] sm:$0xff]  }
  0xca   : > { %8778 = vset.pattern.permute.xlu1 %v9404_v0  ;;  %v867_v56 = vmul.f32 1.7015043, %v843_v58  ;;  %v845_v34 = vmul.f32 %v821_v35, %v653_v8  ;;  %v8807_v58 = vld [vmem:[#allocation6 + $0x68] sm:$0xff]   ;;  %v8810_v45 = vld [vmem:[#allocation6 + $0xb0] sm:$0xff]  }
  0xcb   : > { %1388 = vperm.xlu1 %8778, %v9996_v41   ;;  %v868_v3 = vmul.f32 1.7015043, %v844_v62  ;;  %v8809_v35 = vld [vmem:[#allocation6 + $0x28] sm:$0xff]  }
  0xcc   : > { %v882_v2 = vpack.c.bf16 %v867_v56, %v866_v52  ;;  %v869_v44 = vmul.f32 1.7015043, %v845_v34  ;;  %v8994_v11 = vpop.eup %8993  ;;  %8786 = vset.pattern.permute.xlu0 %v9405_v21 }
  0xcd   : > { %v8996_v19 = vpop.eup %8995  ;;  %v822_v12 = vadd.f32 1.0, %v8994_v11  ;;  %1670 = vperm.xlu0 %8786, %v628_v10   ;;  %v8811_v11 = vld [vmem:[#allocation6 + $0x60] sm:$0xff]  }
  0xce   : > { %8433 = vmatprep.mubr.bf16.mxu0 %v882_v2  ;;  %v883_v49 = vpack.c.bf16 %v869_v44, %v868_v3  ;;  %v823_v16 = vadd.f32 1.0, %v8996_v19  ;;  %v8998_v42 = vpop.eup %8997  ;;  %v631_v3 = vld [vmem:[%s9722_s16 + $0xa8] sm:$0xff] }
  0xcf   : > { %8779 = vset.pattern.permute.xlu1 %v9405_v21  ;;  %v846_v17 = vmul.f32 %v822_v12, %v654_v59  ;;  %v824_v4 = vadd.f32 1.0, %v8998_v42  ;;  %v8812_v44 = vld [vmem:[#allocation6 + $0xe8] sm:$0xff]   ;;  %v8813_v12 = vld [vmem:[#allocation6 + $0x20] sm:$0xff]  }
  0xd0   : > { %1652 = vperm.xlu1 %8779, %v9996_v41   ;;  %8434 = vmatmul.mubr.bf16.gmra.mxu0 %v883_v49  ;;  %v847_v24 = vmul.f32 %v823_v16, %v655_v60  ;;  %v8814_v19 = vld [vmem:[#allocation6 + $0xa8] sm:$0xff]  }
  0xd1   : > { %v9000_v25 = vpop.eup %8999  ;;  %v870_v18 = vmul.f32 1.7015043, %v846_v17  ;;  %v848_v20 = vmul.f32 %v824_v4, %v656_v5  ;;  %8789 = vset.pattern.permute.xlu0 %v9406_v29  ;;  %v8815_v4 = vld [vmem:[#allocation6 + $0x58] sm:$0xff]  }
  0xd2   : > { %v825_v61 = vadd.f32 1.0, %v9000_v25  ;;  %v871_v28 = vmul.f32 1.7015043, %v847_v24  ;;  %1761 = vperm.xlu0 %8789, %v9745_v14   ;;  %v9121_v14 = vld [vmem:[%s9722_s16] sm:$0xff] }
  0xd3   : > { %v872_v31 = vmul.f32 1.7015043, %v848_v20  ;;  %v8816_v25 = vld [vmem:[#allocation6 + $0xe0] sm:$0xff]   ;;  %v8820_v20 = vld [vmem:[#allocation6 + $0xd8] sm:$0xff]  }
  0xd4   : > { %1655 = vperm.xlu1 %8779, %v9991_v39   ;;  %v849_v26 = vmul.f32 %v825_v61, %v657_v13  ;;  %v884_v6 = vpack.c.bf16 %v871_v28, %v870_v18  ;;  %v8817_v61 = vld [vmem:[#allocation6 + $0x18] sm:$0xff]  }
  0xd6   : > { %v873_v32 = vmul.f32 1.7015043, %v849_v26  ;;  %8437 = vmatprep.mubr.bf16.mxu0 %v884_v6  ;;  %1770 = vperm.xlu0 %8789, %v9788_v51   ;;  %v9122_v51 = vld [vmem:[%s9722_s16 + $0x10] sm:$0xff] }
  0xd7   : > { %v8819_v6 = vld [vmem:[#allocation6 + $0x50] sm:$0xff]  }
  0xd8   : > { %8780 = vset.pattern.permute.xlu1 %v9404_v0  ;;  %v885_v33 = vpack.c.bf16 %v873_v32, %v872_v31 }
  0xd9   : > { %1403 = vperm.xlu1 %8780, %v10017_v15  }
  0xda   : > { %8438 = vmatmul.mubr.bf16.gmra.mxu0 %v885_v33  ;;  %1776 = vperm.xlu0 %8789, %v9873_v1   ;;  %v630_v1 = vld [vmem:[%s9722_s16 + $0xa0] sm:$0xff] }
  0xdd   : > { %8782 = vset.pattern.permute.xlu1 %v9405_v21 }
  0xde   : > { %1661 = vperm.xlu1 %8782, %v10017_v15   ;;  %1782 = vperm.xlu0 %8789, %v9898_v48   ;;  %v9123_v48 = vld [vmem:[%s9722_s16 + $0x18] sm:$0xff] }
  0xe2   : > { %8783 = vset.pattern.permute.xlu1 %v9404_v0  ;;  %1788 = vperm.xlu0 %8789, %v9938_v27   ;;  %v633_v27 = vld [vmem:[%s9722_s16 + $0xb8] sm:$0xff] }
  0xe3   : > { %1408 = vperm.xlu1 %8783, %v626_v36  }
  0xe6   : > { %1794 = vperm.xlu0 %8789, %v9996_v41   ;;  %v8801_v41 = vld [vmem:[#allocation6 + $0x78] sm:$0xff]  }
  0xe7   : > { %8784 = vset.pattern.permute.xlu1 %v9405_v21  ;;  %7757 = vmatprep.subr.bf16.mxu1 %v8801_v41 }
  0xe8   : > { %1664 = vperm.xlu1 %8784, %v626_v36   ;;  %7758 = vmatpush3.bf16.msra.mxu1 %v8802_v43  ;;  %v8825_v43 = vld [vmem:[#allocation6 + $0x8] sm:$0xff]  }
  0xe9   : > { %7759 = vmatprep.subr.bf16.mxu1 %v8803_v7 }
  0xea   : > { %1800 = vperm.xlu0 %8789, %v9980_v23  }
  0xec   : > { %1667 = vperm.xlu1 %8784, %v10008_v22   ;;  %7760 = vmatpush3.bf16.msra.mxu1 %v8805_v53  ;;  %v8828_v53 = vld [vmem:[#allocation6 + $0xc8] sm:$0xff]  }
  0xed   : > { %7761 = vmatprep.subr.bf16.mxu1 %v8807_v58 }
  0xee   : > { %1806 = vperm.xlu0 %8789, %v626_v36   ;;  %v8822_v36 = vld [vmem:[#allocation6 + $0x98] sm:$0xff]  }
  0xf0   : > { %8785 = vset.pattern.permute.xlu1 %v9404_v0  ;;  %7762 = vmatpush3.bf16.msra.mxu1 %v8809_v35  ;;  %v8830_v35 = vld [vmem:[#allocation6 + $0x88] sm:$0xff]  }
  0xf1   : > { %1423 = vperm.xlu1 %8785, %v10034_v37   ;;  %7763 = vmatprep.subr.bf16.mxu1 %v8811_v11 }
  0xf2   : > { %1812 = vperm.xlu0 %8789, %v628_v10  }
  0xf4   : > { %7764 = vmatpush3.bf16.msra.mxu1 %v8813_v12 }
  0xf5   : > { %8787 = vset.pattern.permute.xlu1 %v9405_v21  ;;  %7765 = vmatprep.subr.bf16.mxu1 %v8815_v4 }
  0xf6   : > { %1673 = vperm.xlu1 %8787, %v10034_v37   ;;  %8790 = vset.pattern.permute.xlu0 %v9404_v0 }
  0xf7   : > { %1428 = vperm.xlu0 %8790, %v630_v1  }
  0xf8   : > { %7766 = vmatpush3.bf16.msra.mxu1 %v8817_v61  ;;  %v8831_v61 = vld [vmem:[#allocation6 + $0xc0] sm:$0xff]  }
  0xf9   : > { %7767 = vmatprep.subr.bf16.mxu1 %v8819_v6  ;;  %v8833_v6 = vld [vmem:[#allocation6 + $0x80] sm:$0xff]  }
  0xfa   : > { %8788 = vset.pattern.permute.xlu1 %v9406_v29 }
  0xfb   : > { %1758 = vperm.xlu1 %8788, %v9121_v14   ;;  %1443 = vperm.xlu0 %8790, %v633_v27  }
  0xff   : > { %1764 = vperm.xlu1 %8788, %v9122_v51   ;;  %8792 = vset.pattern.permute.xlu0 %v9406_v29 }
 0x103   : > { %1767 = vperm.xlu1 %8788, %v9123_v48   ;;  %v8824_v48 = vld [vmem:[#allocation6 + $0xd0] sm:$0xff]  }
 0x104   : > { %v10049_v21 = vpop.permute.xlu1 %1338 }
 0x105   : > { %13373 = vst [vmem:[#allocation30_spill] sm:$0xff] %v10049_v21  ;;  %v10061_v8 = vpop.permute.xlu0 %1328 }
 0x107   : > { %1773 = vperm.xlu1 %8788, %v9124_v38   ;;  %v8823_v38 = vld [vmem:[#allocation6 + $0x48] sm:$0xff]  }
 0x108   : > { %v10052_v23 = vpop.permute.xlu1 %1343 }
 0x109   : > { %13374 = vst [vmem:[#allocation31_spill] sm:$0xff] %v10052_v23  ;;  %v10074_v52 = vpop.permute.xlu0 %1333 }
 0x10b   : > { %1779 = vperm.xlu1 %8788, %v9125_v40   ;;  %v8826_v40 = vld [vmem:[#allocation6 + $0x90] sm:$0xff]  }
 0x10d   : > { %v10055_v57 = vpop.permute.xlu1 %1619 }
 0x10e   : > { %v13111_v47 = vrot.slane %v10055_v57, 1  ;;  %v10080_v60 = vpop.permute.xlu0 %1616 }
 0x10f   : > { %1785 = vperm.xlu1 %8788, %v9932_v30   ;;  %v8808_v30 = vld [vmem:[#allocation6 + $0xf0] sm:$0xff]  }
 0x110   : > { %7835 = vmatprep.subr.bf16.mxu0 %v8808_v30 }
 0x111   : > { %v10059_v50 = vpop.permute.xlu1 %1622  ;;  %7836 = vmatpush3.bf16.msra.mxu0 %v8810_v45  ;;  %v8827_v45 = vld [vmem:[#allocation6 + $0x40] sm:$0xff]  }
 0x112   : > { %v13110_v54 = vrot.slane %v10059_v50, 1  ;;  %v10084_v2 = vpop.permute.xlu0 %1625  ;;  %7837 = vmatprep.subr.bf16.mxu0 %v8812_v44 }
 0x113   : > { %1791 = vperm.xlu1 %8788, %v9960_v63  }
 0x114   : > { %v10070_v55 = vsel %vm1675_vm0, %v13111_v47, %v13110_v54 }
 0x115   : > { %13375 = vst [vmem:[#allocation32_spill] sm:$0xff] %v10070_v55  ;;  %7838 = vmatpush3.bf16.msra.mxu0 %v8814_v19 }
 0x116   : > { %v10072_v59 = vpop.permute.xlu1 %1348  ;;  %v1635_v49 = vpop.permute.xlu0 %1634  ;;  %7839 = vmatprep.subr.bf16.mxu0 %v8816_v25 }
 0x117   : > { %13376 = vst [vmem:[#allocation33_spill] sm:$0xff] %v10072_v59  ;;  %1797 = vperm.xlu1 %8788, %v9991_v39  }
 0x11b   : > { %1803 = vperm.xlu1 %8788, %v10017_v15   ;;  %v10078_v63 = vpop.permute.xlu1 %1628  ;;  %v632_v15 = vld [vmem:[%s9722_s16 + $0xb0] sm:$0xff] }
 0x11c   : > { %v13109_v56 = vrot.slane %v10078_v63, 1  ;;  %v10100_v13 = vpop.permute.xlu0 %1353 }
 0x11d   : > { %13380 = vst [vmem:[#allocation37_spill] sm:$0xff] %v10100_v13 }
 0x11f   : > { %1809 = vperm.xlu1 %8788, %v10008_v22   ;;  %v1632_v62 = vpop.permute.xlu1 %1631  ;;  %v1687_v22 = vrot.slane %v1635_v49, 1 }
 0x120   : > { %v1685_v34 = vrot.slane %v1632_v62, 1  ;;  %v10105_v24 = vpop.permute.xlu0 %1358  ;;  %v8829_v62 = vld [vmem:[#allocation6] sm:$0xff]  }
 0x121   : > { %13382 = vst [vmem:[#allocation39_spill] sm:$0xff] %v10105_v24 }
 0x122   : > { %v10089_v39 = vsel %vm1675_vm0, %v13109_v56, %v1685_v34  ;;  %v10097_v5 = vsel %vm1675_vm0, %v1685_v34, %v1687_v22 }
 0x123   : > { %13377 = vst [vmem:[#allocation34_spill] sm:$0xff] %v10089_v39  ;;  %1815 = vperm.xlu1 %8788, %v10034_v37   ;;  %13379 = vst [vmem:[#allocation36_spill] sm:$0xff] %v10097_v5  ;;  %v8821_v37 = vld [vmem:[#allocation6 + $0x10] sm:$0xff]  }
 0x124   : > { %v10093_v10 = vpop.permute.xlu1 %1363  ;;  %7768 = vmatpush3.bf16.msra.mxu1 %v8821_v37 }
 0x125   : > { %13378 = vst [vmem:[#allocation35_spill] sm:$0xff] %v10093_v10  ;;  %v10109_v28 = vpop.permute.xlu0 %1373  ;;  %7769 = vmatprep.subr.bf16.mxu1 %v8823_v38 }
 0x126   : > { %13384 = vst [vmem:[#allocation41_spill] sm:$0xff] %v10109_v28 }
 0x127   : > { %8791 = vset.pattern.permute.xlu1 %v9404_v0  ;;  %v8818_v0 = vld [vmem:[#allocation6 + $0xa0] sm:$0xff]  }
 0x128   : > { %1433 = vperm.xlu1 %8791, %v631_v3   ;;  %7840 = vmatpush3.bf16.msra.mxu0 %v8818_v0 }
 0x129   : > { %v1638_v16 = vpop.permute.xlu1 %1637  ;;  %7841 = vmatprep.subr.bf16.mxu0 %v8820_v20  ;;  %v10111_v32 = vpop.permute.xlu0 %1378  ;;  %7770 = vmatpush3.bf16.msra.mxu1 %v8825_v43  ;;  %v8832_v20 = vld [vmem:[#allocation6 + $0x178] sm:$0xff]  }
 0x12a   : > { %v1689_v42 = vrot.slane %v1638_v16, 1  ;;  %13385 = vst [vmem:[#allocation42_spill] sm:$0xff] %v10111_v32  ;;  %7771 = vmatprep.subr.bf16.mxu1 %v8827_v45 }
 0x12c   : > { %1438 = vperm.xlu1 %8791, %v632_v15   ;;  %v10103_v17 = vsel %vm1675_vm0, %v1687_v22, %v1689_v42  ;;  %7842 = vmatpush3.bf16.msra.mxu0 %v8822_v36 }
 0x12d   : > { %13381 = vst [vmem:[#allocation38_spill] sm:$0xff] %v10103_v17  ;;  %7843 = vmatprep.subr.bf16.mxu0 %v8824_v48  ;;  %7772 = vmatpush3.bf16.msra.mxu1 %v8829_v62 }
 0x12e   : > { %v10107_v18 = vpop.permute.xlu1 %1368  ;;  %v1647_v1 = vpop.permute.xlu0 %1646  ;;  %7909 = vmatprep.subr.bf16.mxu1 %v8832_v20 }
 0x12f   : > { %13383 = vst [vmem:[#allocation40_spill] sm:$0xff] %v10107_v18  ;;  %v1695_v27 = vrot.slane %v1647_v1, 1 }
 0x130   : > { %7844 = vmatpush3.bf16.msra.mxu0 %v8826_v40 }
 0x131   : > { %7845 = vmatprep.subr.bf16.mxu0 %v8828_v53 }
 0x132   : > { %v10127_v58 = vpop.permute.xlu0 %1658 }
 0x133   : > { %v1641_v26 = vpop.permute.xlu1 %1640  ;;  %v13108_v19 = vrot.slane %v10127_v58, 1 }
 0x134   : > { %v1691_v31 = vrot.slane %v1641_v26, 1  ;;  %7846 = vmatpush3.bf16.msra.mxu0 %v8830_v35 }
 0x135   : > { %7847 = vmatprep.subr.bf16.mxu0 %v8831_v61 }
 0x136   : > { %v10114_v33 = vsel %vm1675_vm0, %v1689_v42, %v1691_v31 }
 0x137   : > { %13386 = vst [vmem:[#allocation43_spill] sm:$0xff] %v10114_v33  ;;  %v1644_v29 = vpop.permute.xlu1 %1643  ;;  %v10131_v3 = vpop.permute.xlu0 %1393 }
 0x138   : > { %v1693_v14 = vrot.slane %v1644_v29, 1  ;;  %13392 = vst [vmem:[#allocation49_spill] sm:$0xff] %v10131_v3  ;;  %7848 = vmatpush3.bf16.msra.mxu0 %v8833_v6 }
 0x13a   : > { %v10117_v51 = vsel %vm1675_vm0, %v1691_v31, %v1693_v14  ;;  %v10122_v46 = vsel %vm1675_vm0, %v1693_v14, %v1695_v27 }
 0x13b   : > { %13387 = vst [vmem:[#allocation44_spill] sm:$0xff] %v10117_v51  ;;  %13389 = vst [vmem:[#allocation46_spill] sm:$0xff] %v10122_v46  ;;  %v10137_v15 = vpop.permute.xlu0 %1398 }
 0x13c   : > { %v10119_v41 = vpop.permute.xlu1 %1383  ;;  %13394 = vst [vmem:[#allocation51_spill] sm:$0xff] %v10137_v15 }
 0x13d   : > { %13388 = vst [vmem:[#allocation45_spill] sm:$0xff] %v10119_v41 }
 0x13f   : > { %v10149_v4 = vpop.permute.xlu0 %1413 }
 0x140   : > { %13398 = vst [vmem:[#allocation55_spill] sm:$0xff] %v10149_v4 }
 0x141   : > { %v1650_v7 = vpop.permute.xlu1 %1649 }
 0x142   : > { %v1697_v9 = vrot.slane %v1650_v7, 1  ;;  %v10180_v7 = vld [vmem:[%s13403_s3] ss:$0 sm:$0xff] }
 0x143   : > { %v10153_v26 = vpop.permute.xlu0 %1418 }
 0x144   : > { %v10125_v30 = vsel %vm1675_vm0, %v1695_v27, %v1697_v9  ;;  %13399 = vst [vmem:[#allocation56_spill] sm:$0xff] %v10153_v26 }
 0x145   : > { %13390 = vst [vmem:[#allocation47_spill] sm:$0xff] %v10125_v30 }
 0x146   : > { %v10129_v34 = vpop.permute.xlu1 %1388 }
 0x147   : > { %13391 = vst [vmem:[#allocation48_spill] sm:$0xff] %v10129_v34 }
 0x148   : > { %v10157_v36 = vpop.permute.xlu0 %1670 }
 0x149   : > { %v13106_v48 = vrot.slane %v10157_v36, 1 }
 0x14b   : > { %v1653_v44 = vpop.permute.xlu1 %1652 }
 0x14c   : > { %v1699_v49 = vrot.slane %v1653_v44, 1 }
 0x14d   : > { %v10163_v27 = vpop.permute.xlu0 %1761 }
 0x14e   : > { %v10134_v11 = vsel %vm1675_vm0, %v1697_v9, %v1699_v49 }
 0x14f   : > { %13393 = vst [vmem:[#allocation50_spill] sm:$0xff] %v10134_v11  ;;  %v1656_v22 = vpop.permute.xlu1 %1655 }
 0x150   : > { %v1701_v12 = vrot.slane %v1656_v22, 1 }
 0x151   : > { %v10175_v43 = vpop.permute.xlu0 %1770 }
 0x152   : > { %v10140_v16 = vsel %vm1675_vm0, %v1699_v49, %v1701_v12  ;;  %v10145_v42 = vsel %vm1675_vm0, %v1701_v12, %v13108_v19 }
 0x153   : > { %13395 = vst [vmem:[#allocation52_spill] sm:$0xff] %v10140_v16  ;;  %13396 = vst [vmem:[#allocation53_spill] sm:$0xff] %v10145_v42 }
 0x154   : > { %v10147_v25 = vpop.permute.xlu1 %1403 }
 0x155   : > { %13397 = vst [vmem:[#allocation54_spill] sm:$0xff] %v10147_v25  ;;  %v10190_v44 = vpop.permute.xlu0 %1776 }
 0x159   : > { %v10151_v0 = vpop.permute.xlu1 %1661 }
 0x15e   : > { %v10155_v31 = vpop.permute.xlu1 %1408 }
 0x15f   : > { %13400 = vst [vmem:[#allocation57_spill] sm:$0xff] %v10155_v31 }
 0x163   : > { %v10159_v29 = vpop.permute.xlu1 %1664 }
 0x164   : > { %v13107_v14 = vrot.slane %v10159_v29, 1 }
 0x167   : > { %v1668_v37 = vpop.permute.xlu1 %1667  ;;  %v8419_v9 = vpop.f32.mrf.mxu0 }
 0x168   : > { %v1709_v1 = vrot.slane %v1668_v37, 1  ;;  %v10183_v53 = vadd.f32 %v8419_v9, %v10180_v7 }
 0x169   : > { %v991_v45 = vpop.f32.mrf.mxu0 }
 0x16a   : > { %v10168_v38 = vsel %vm1675_vm0, %v13107_v14, %v1709_v1  ;;  %v10173_v40 = vsel %vm1675_vm0, %v1709_v1, %v13106_v48  ;;  %v1112_v35 = vmul.f32 %v10183_v53, %v10183_v53  ;;  %v10188_v62 = vadd.f32 %v10180_v7, %v991_v45  ;;  %v10207_v48 = vpop.permute.xlu0 %1782 }
 0x16b   : > { %13401 = vst [vmem:[#allocation58_spill] sm:$0xff] %v10168_v38  ;;  %13402 = vst [vmem:[#allocation59_spill] sm:$0xff] %v10173_v40  ;;  %v8420_v49 = vpop.f32.mrf.mxu0 }
 0x16c   : > { %v1110_v22 = vmul.f32 %v10188_v62, %v10188_v62  ;;  %v10195_v12 = vadd.f32 %v8420_v49, %v10180_v7  ;;  %v1136_v61 = vmul.f32 %v1112_v35, %v10183_v53 }
 0x16d   : > { %v994_v20 = vpop.f32.mrf.mxu0 }
 0x16e   : > { %v1134_v6 = vmul.f32 %v1110_v22, %v10188_v62  ;;  %v1113_v37 = vmul.f32 %v10195_v12, %v10195_v12  ;;  %v10202_v1 = vadd.f32 %v10180_v7, %v994_v20  ;;  %v1160_v14 = vmul.f32 0.044715, %v1136_v61  ;;  %v10230_v16 = vpop.permute.xlu0 %1788 }
 0x16f   : > { %v8423_v9 = vpop.f32.mrf.mxu0  ;;  %13405 = vst [vmem:[#allocation61_spill] sm:$0xff] %v10230_v16 }
 0x170   : > { %v10205_v45 = vadd.f32 %v8423_v9, %v10180_v7  ;;  %v1111_v49 = vmul.f32 %v10202_v1, %v10202_v1  ;;  %v1158_v19 = vmul.f32 0.044715, %v1134_v6  ;;  %v1137_v22 = vmul.f32 %v1113_v37, %v10195_v12 }
 0x171   : > { %v1007_v35 = vpop.f32.mrf.mxu0  ;;  %v1184_v61 = vadd.f32 %v1160_v14, %v10183_v53  ;;  %v10225_v37 = vrot.slane %v10080_v60, 1 }
 0x172   : > { %v1135_v56 = vmul.f32 %v1111_v49, %v10202_v1  ;;  %v1116_v20 = vmul.f32 %v10205_v45, %v10205_v45  ;;  %v10216_v54 = vadd.f32 %v10180_v7, %v1007_v35  ;;  %v1161_v11 = vmul.f32 0.044715, %v1137_v22 }
 0x173   : > { %v8424_v9 = vpop.f32.mrf.mxu0  ;;  %13404 = vst [vmem:[#allocation60_spill] sm:$0xff] %v10225_v37  ;;  %v10301_v3 = vmul.f32 0.0, %v10225_v37 }
 0x174   : > { %v10219_v47 = vadd.f32 %v8424_v9, %v10180_v7  ;;  %v1159_v38 = vmul.f32 0.044715, %v1135_v56  ;;  %v1114_v6 = vmul.f32 %v10216_v54, %v10216_v54  ;;  %v1140_v49 = vmul.f32 %v1116_v20, %v10205_v45 }
 0x175   : > { %v1010_v42 = vpop.f32.mrf.mxu0  ;;  %v1182_v9 = vadd.f32 %v1158_v19, %v10188_v62  ;;  %v1208_v20 = vmul.f32 0.7978846, %v1184_v61  ;;  %v1185_v61 = vadd.f32 %v1161_v11, %v10195_v12  ;;  %13416 = vst [vmem:[#allocation69_spill] sm:$0xff] %v10301_v3 }
 0x176   : > { %v1117_v35 = vmul.f32 %v10219_v47, %v10219_v47  ;;  %v1138_v14 = vmul.f32 %v1114_v6, %v10216_v54  ;;  %v10235_v56 = vadd.f32 %v10180_v7, %v1010_v42  ;;  %v1183_v30 = vadd.f32 %v1159_v38, %v10202_v1  ;;  %v10246_v42 = vpop.permute.xlu1 %1423 }
 0x177   : > { %v1164_v17 = vmul.f32 0.044715, %v1140_v49  ;;  %13406 = vst [vmem:[#allocation62_spill] sm:$0xff] %v10246_v42  ;;  %v13407_v6 = vrot.slane %v10055_v57, 1  ;;  %v10263_v57 = vpop.permute.xlu0 %1794  ;;  %9001 = vtanh.f32 %v1208_v20 }
 0x178   : > { %v1162_v46 = vmul.f32 0.044715, %v1138_v14  ;;  %v1141_v51 = vmul.f32 %v1117_v35, %v10219_v47  ;;  %v1115_v19 = vmul.f32 %v10235_v56, %v10235_v56  ;;  %v1681_v14 = vrot.slane %v10084_v2, 1  ;;  %13409 = vst [vmem:[#allocation64_spill] sm:$0xff] %v10263_v57 }
 0x179   : > { %v10252_v38 = vsel %vm1675_vm0, %v10225_v37, %v13407_v6  ;;  %v1207_v5 = vmul.f32 0.7978846, %v1183_v30  ;;  %v1188_v42 = vadd.f32 %v1164_v17, %v10205_v45  ;;  %v1090_v57 = vmul.f32 0.5, %v10216_v54 }
 0x17a   : > { %13408 = vst [vmem:[#allocation63_spill] sm:$0xff] %v10252_v38  ;;  %v1139_v4 = vmul.f32 %v1115_v19, %v10235_v56  ;;  %v1186_v6 = vadd.f32 %v1162_v46, %v10216_v54  ;;  %v1209_v19 = vmul.f32 0.7978846, %v1185_v61  ;;  %v10277_v46 = vrot.slane %v10151_v0, 1 }
 0x17b   : > { %v8427_v40 = vpop.f32.mrf.mxu0  ;;  %v1091_v16 = vmul.f32 0.5, %v10235_v56 }
 0x17c   : > { %v10239_v60 = vadd.f32 %v8427_v40, %v10180_v7  ;;  %v1206_v40 = vmul.f32 0.7978846, %v1182_v9  ;;  %v1165_v9 = vmul.f32 0.044715, %v1141_v51  ;;  %v1163_v55 = vmul.f32 0.044715, %v1139_v4 }
 0x17d   : > { %v1023_v33 = vpop.f32.mrf.mxu0  ;;  %13410 = vst [vmem:[#allocation65_spill] sm:$0xff] %v10277_v46  ;;  %v1210_v38 = vmul.f32 0.7978846, %v1186_v6 }
 0x17e   : > { %v1120_v22 = vmul.f32 %v10239_v60, %v10239_v60  ;;  %v10256_v35 = vadd.f32 %v10180_v7, %v1023_v33  ;;  %9003 = vtanh.f32 %v1206_v40  ;;  %v1187_v17 = vadd.f32 %v1163_v55, %v10235_v56 }
 0x17f   : > { %v8428_v49 = vpop.f32.mrf.mxu0  ;;  %9005 = vtanh.f32 %v1207_v5  ;;  %v1189_v31 = vadd.f32 %v1165_v9, %v10219_v47  ;;  %v13413_v5 = vrot.slane %v10078_v63, 1  ;;  %v10297_v9 = vpop.permute.xlu0 %1800 }
 0x180   : > { %v10261_v39 = vadd.f32 %v8428_v49, %v10180_v7  ;;  %v1118_v11 = vmul.f32 %v10256_v35, %v10256_v35  ;;  %v1144_v2 = vmul.f32 %v1120_v22, %v10239_v60  ;;  %v1674_v22 = vpop.permute.xlu1 %1673  ;;  %13415 = vst [vmem:[#allocation68_spill] sm:$0xff] %v10297_v9  ;;  %9007 = vtanh.f32 %v1209_v19 }
 0x181   : > { %v1026_v33 = vpop.f32.mrf.mxu0  ;;  %v10295_v55 = vsel %vm1675_vm0, %v1681_v14, %v13413_v5  ;;  %9009 = vtanh.f32 %v1210_v38  ;;  %v13419_v5 = vrot.slane %v10159_v29, 1 }
 0x182   : > { %v1121_v30 = vmul.f32 %v10261_v39, %v10261_v39  ;;  %v1142_v49 = vmul.f32 %v1118_v11, %v10256_v35  ;;  %v10274_v20 = vadd.f32 %v10180_v7, %v1026_v33  ;;  %v13411_v11 = vrot.slane %v10059_v50, 1  ;;  %13414 = vst [vmem:[#allocation67_spill] sm:$0xff] %v10295_v55 }
 0x183   : > { %v8431_v51 = vpop.f32.mrf.mxu0  ;;  %v1212_v33 = vmul.f32 0.7978846, %v1188_v42  ;;  %v1168_v6 = vmul.f32 0.044715, %v1144_v2  ;;  %v1211_v50 = vmul.f32 0.7978846, %v1187_v17 }
 0x184   : > { %v1145_v4 = vmul.f32 %v1121_v30, %v10261_v39  ;;  %v1119_v40 = vmul.f32 %v10274_v20, %v10274_v20  ;;  %v10285_v61 = vadd.f32 %v8431_v51, %v10180_v7  ;;  %v10290_v0 = vsel %vm1675_vm0, %v13411_v11, %v1681_v14 }
 0x185   : > { %13412 = vst [vmem:[#allocation66_spill] sm:$0xff] %v10290_v0  ;;  %v1039_v30 = vpop.f32.mrf.mxu0  ;;  %v1166_v26 = vmul.f32 0.044715, %v1142_v49  ;;  %v13417_v42 = vrot.slane %v10127_v58, 1  ;;  %v1213_v2 = vmul.f32 0.7978846, %v1189_v31  ;;  %9011 = vtanh.f32 %v1212_v33 }
 0x186   : > { %v1169_v11 = vmul.f32 0.044715, %v1145_v4  ;;  %v1143_v0 = vmul.f32 %v1119_v40, %v10274_v20  ;;  %v1124_v63 = vmul.f32 %v10285_v61, %v10285_v61  ;;  %v10313_v19 = vadd.f32 %v10180_v7, %v1039_v30  ;;  %v1759_v4 = vpop.permute.xlu1 %1758  ;;  %v10330_v40 = vpop.permute.xlu0 %1806 }
 0x187   : > { %v10310_v14 = vsel %vm1675_vm0, %v13417_v42, %v10277_v46  ;;  %v1192_v49 = vadd.f32 %v1168_v6, %v10239_v60  ;;  %v10322_v58 = vsel %vm1675_vm0, %v10277_v46, %v13419_v5  ;;  %v1190_v38 = vadd.f32 %v1166_v26, %v10256_v35  ;;  %v8432_v30 = vpop.f32.mrf.mxu0  ;;  %13422 = vst [vmem:[#allocation73_spill] sm:$0xff] %v10330_v40  ;;  %v9002_v5 = vpop.eup %9001 }
 0x188   : > { %13418 = vst [vmem:[#allocation70_spill] sm:$0xff] %v10310_v14  ;;  %v1148_v17 = vmul.f32 %v1124_v63, %v10285_v61  ;;  %13420 = vst [vmem:[#allocation71_spill] sm:$0xff] %v10322_v58  ;;  %v10325_v31 = vrot.slane %v1674_v22, 1  ;;  %9013 = vtanh.f32 %v1211_v50  ;;  %v1193_v6 = vadd.f32 %v1169_v11, %v10261_v39 }
 0x189   : > { %v1167_v63 = vmul.f32 0.044715, %v1143_v0  ;;  %9015 = vtanh.f32 %v1213_v2  ;;  %v1122_v29 = vmul.f32 %v10313_v19, %v10313_v19  ;;  %v1216_v51 = vmul.f32 0.7978846, %v1192_v49  ;;  %v1042_v22 = vpop.f32.mrf.mxu0 }
 0x18a   : > { %13421 = vst [vmem:[#allocation72_spill] sm:$0xff] %v10325_v31  ;;  %v1172_v33 = vmul.f32 0.044715, %v1148_v17  ;;  %v10337_v50 = vadd.f32 %v8432_v30, %v10180_v7  ;;  %v1088_v11 = vmul.f32 0.5, %v10183_v53  ;;  %v1214_v42 = vmul.f32 0.7978846, %v1190_v38  ;;  %v10352_v53 = vpop.permute.xlu1 %1764 }
 0x18b   : > { %v1146_v2 = vmul.f32 %v1122_v29, %v10313_v19  ;;  %v13423_v46 = vrot.slane %v10157_v36, 1  ;;  %v9004_v58 = vpop.eup %9003  ;;  %v1086_v49 = vmul.f32 0.5, %v10188_v62  ;;  %v1217_v17 = vmul.f32 0.7978846, %v1193_v6 }
 0x18c   : > { %v1191_v30 = vadd.f32 %v1167_v63, %v10274_v20  ;;  %v1125_v0 = vmul.f32 %v10337_v50, %v10337_v50  ;;  %v9006_v38 = vpop.eup %9005  ;;  %v1089_v29 = vmul.f32 0.5, %v10195_v12  ;;  %v10355_v36 = vrot.slane %v1759_v4, 7  ;;  %v10363_v63 = vpop.permute.xlu0 %1812 }
 0x18d   : > { %v10346_v26 = vsel %vm1675_vm0, %v13423_v46, %v10325_v31  ;;  %v1170_v14 = vmul.f32 0.044715, %v1146_v2  ;;  %9017 = vtanh.f32 %v1216_v51  ;;  %v1196_v31 = vadd.f32 %v1172_v33, %v10285_v61  ;;  %13426 = vst [vmem:[#allocation76_spill] sm:$0xff] %v10363_v63  ;;  %v9008_v2 = vpop.eup %9007 }
 0x18e   : > { %13424 = vst [vmem:[#allocation74_spill] sm:$0xff] %v10346_v26  ;;  %13425 = vst [vmem:[#allocation75_spill] sm:$0xff] %v10355_v36  ;;  %v1149_v62 = vmul.f32 %v1125_v0, %v10337_v50  ;;  %v10361_v6 = vadd.f32 %v10180_v7, %v1042_v22  ;;  %v1256_v26 = vadd.f32 1.0, %v9002_v5  ;;  %v1254_v9 = vadd.f32 1.0, %v9004_v58  ;;  %v10379_v12 = vpop.permute.xlu1 %1767 }
 0x18f   : > { %9019 = vtanh.f32 %v1214_v42  ;;  %v1255_v4 = vadd.f32 1.0, %v9006_v38  ;;  %v1215_v55 = vmul.f32 0.7978846, %v1191_v30  ;;  %v1087_v33 = vmul.f32 0.5, %v10202_v1  ;;  %v9010_v42 = vpop.eup %9009 }
 0x190   : > { %9021 = vtanh.f32 %v1217_v17  ;;  %v1123_v51 = vmul.f32 %v10361_v6, %v10361_v6  ;;  %v1194_v0 = vadd.f32 %v1170_v14, %v10313_v19  ;;  %v13427_v22 = vrot.slane %v10163_v27, 7 }
 0x191   : > { %v1092_v38 = vmul.f32 0.5, %v10205_v45  ;;  %v1220_v17 = vmul.f32 0.7978846, %v1196_v31  ;;  %v1173_v30 = vmul.f32 0.044715, %v1149_v62  ;;  %v1280_v40 = vmul.f32 %v1256_v26, %v1088_v11  ;;  %v8435_v26 = vpop.f32.mrf.mxu0 }
 0x192   : > { %v10374_v5 = vsel %vm1817_vm1, %v10355_v36, %v13427_v22  ;;  %v1147_v46 = vmul.f32 %v1123_v51, %v10361_v6  ;;  %v9012_v1 = vpop.eup %9011  ;;  %v1257_v14 = vadd.f32 1.0, %v9008_v2  ;;  %v13429_v37 = vrot.slane %v10352_v53, 7 }
 0x193   : > { %13428 = vst [vmem:[#allocation77_spill] sm:$0xff] %v10374_v5  ;;  %v1278_v63 = vmul.f32 %v1254_v9, %v1086_v49  ;;  %v1279_v45 = vmul.f32 %v1255_v4, %v1087_v33  ;;  %v1093_v31 = vmul.f32 0.5, %v10219_v47  ;;  %9023 = vtanh.f32 %v1215_v55  ;;  %v1055_v56 = vpop.f32.mrf.mxu0 }
 0x194   : > { %v10387_v58 = vsel %vm1817_vm1, %v13427_v22, %v13429_v37  ;;  %v1258_v51 = vadd.f32 1.0, %v9010_v42  ;;  %v1218_v36 = vmul.f32 0.7978846, %v1194_v0  ;;  %v1171_v3 = vmul.f32 0.044715, %v1147_v46 }
 0x195   : > { %13430 = vst [vmem:[#allocation78_spill] sm:$0xff] %v10387_v58  ;;  %v9014_v62 = vpop.eup %9013  ;;  %v1823_v11 = vrot.slane %v10379_v12, 7  ;;  %v1260_v2 = vadd.f32 1.0, %v9012_v1  ;;  %9025 = vtanh.f32 %v1220_v17  ;;  %v1197_v27 = vadd.f32 %v1173_v30, %v10337_v50 }
 0x196   : > { %v9016_v54 = vpop.eup %9015  ;;  %v1304_v37 = vmul.f32 1.7015043, %v1280_v40  ;;  %v1281_v9 = vmul.f32 %v1257_v14, %v1089_v29  ;;  %v1096_v49 = vmul.f32 0.5, %v10239_v60  ;;  %v1094_v47 = vmul.f32 0.5, %v10256_v35 }
 0x197   : > { %v1302_v55 = vmul.f32 1.7015043, %v1278_v63  ;;  %v1303_v4 = vmul.f32 1.7015043, %v1279_v45  ;;  %v1259_v33 = vadd.f32 1.0, %v9014_v62  ;;  %v1097_v46 = vmul.f32 0.5, %v10261_v39 }
 0x198   : > { %v1282_v0 = vmul.f32 %v1258_v51, %v1090_v57  ;;  %v1261_v42 = vadd.f32 1.0, %v9016_v54  ;;  %9027 = vtanh.f32 %v1218_v36  ;;  %v1195_v1 = vadd.f32 %v1171_v3, %v10361_v6 }
 0x199   : > { %v1284_v17 = vmul.f32 %v1260_v2, %v1092_v38  ;;  %v10398_v30 = vmul.f32 0.5, %v10274_v20  ;;  %v10401_v40 = vmul.f32 0.5, %v10285_v61  ;;  %v1221_v60 = vmul.f32 0.7978846, %v1197_v27 }
 0x19a   : > { %v9018_v35 = vpop.eup %9017  ;;  %v10404_v29 = vmul.f32 %v10049_v21, %v1304_v37  ;;  %v1305_v63 = vmul.f32 1.7015043, %v1281_v9  ;;  %v10407_v39 = vmul.f32 0.5, %v10313_v19  ;;  %v10410_v57 = vadd.f32 %v8435_v26, %v10180_v7 }
 0x19b   : > { %v10413_v36 = vmul.f32 %v10061_v8, %v1302_v55  ;;  %v10416_v20 = vmul.f32 %v10074_v52, %v1303_v4  ;;  %v1283_v61 = vmul.f32 %v1259_v33, %v1091_v16  ;;  %v10419_v38 = vadd.f32 %v10180_v7, %v1055_v56 }
 0x19c   : > { %v9020_v3 = vpop.eup %9019  ;;  %v1306_v22 = vmul.f32 1.7015043, %v1282_v0  ;;  %v1285_v45 = vmul.f32 %v1261_v42, %v1093_v31  ;;  %v1219_v62 = vmul.f32 0.7978846, %v1195_v1  ;;  %v1128_v19 = vmul.f32 %v10410_v57, %v10410_v57  ;;  %v8436_v31 = vpop.f32.mrf.mxu0 }
 0x19d   : > { %v9022_v14 = vpop.eup %9021  ;;  %v1308_v51 = vmul.f32 1.7015043, %v1284_v17  ;;  %v1264_v26 = vadd.f32 1.0, %v9018_v35  ;;  %9029 = vtanh.f32 %v1221_v60  ;;  %v1126_v8 = vmul.f32 %v10419_v38, %v10419_v38 }
 0x19e   : > { %v10426_v52 = vmul.f32 %v10052_v23, %v1305_v63  ;;  %v1262_v16 = vadd.f32 1.0, %v9020_v3  ;;  %v10429_v54 = vmul.f32 0.5, %v10337_v50  ;;  %v1152_v2 = vmul.f32 %v1128_v19, %v10410_v57 }
 0x19f   : > { %v1307_v27 = vmul.f32 1.7015043, %v1283_v61  ;;  %v1265_v37 = vadd.f32 1.0, %v9022_v14  ;;  %v10433_v9 = vmul.f32 0.5, %v10361_v6  ;;  %v1150_v55 = vmul.f32 %v1126_v8, %v10419_v38  ;;  %v1058_v61 = vpop.f32.mrf.mxu0 }
 0x1a0   : > { %v9024_v4 = vpop.eup %9023  ;;  %v10437_v33 = vmul.f32 %v10072_v59, %v1306_v22  ;;  %v1309_v0 = vmul.f32 1.7015043, %v1285_v45  ;;  %9031 = vtanh.f32 %v1219_v62  ;;  %v1176_v42 = vmul.f32 0.044715, %v1152_v2 }
 0x1a1   : > { %v10440_v50 = vmul.f32 %v10105_v24, %v1308_v51  ;;  %v1288_v1 = vmul.f32 %v1264_v26, %v1096_v49  ;;  %v10444_v56 = vmul.f32 %v10374_v5, %v10416_v20  ;;  %v1174_v17 = vmul.f32 0.044715, %v1150_v55  ;;  %v8439_v55 = vpop.f32.mrf.mxu0 }
 0x1a2   : > { %13431 = vst [vmem:[#allocation79_spill] sm:$0xff] %v10437_v33  ;;  %v9026_v6 = vpop.eup %9025  ;;  %v1286_v60 = vmul.f32 %v1262_v16, %v1094_v47  ;;  %v10448_v35 = vmul.f32 %v10387_v58, %v10404_v29  ;;  %v1200_v63 = vadd.f32 %v1176_v42, %v10410_v57  ;;  %v10452_v3 = vadd.f32 %v8436_v31, %v10180_v7 }
 0x1a3   : > { %13432 = vst [vmem:[#allocation80_spill] sm:$0xff] %v10440_v50  ;;  %v10455_v14 = vmul.f32 %v10100_v13, %v1307_v27  ;;  %v1289_v49 = vmul.f32 %v1265_v37, %v1097_v46  ;;  %v1263_v22 = vadd.f32 1.0, %v9024_v4  ;;  %v1198_v45 = vadd.f32 %v1174_v17, %v10419_v38  ;;  %v13461_v13 = vld [vmem:[#allocation49_spill] sm:$0xff] }
 0x1a4   : > { %v10459_v62 = vmul.f32 %v10093_v10, %v1309_v0  ;;  %v10463_v47 = vmul.f32 %v10374_v5, %v10426_v52  ;;  %v10467_v19 = vmul.f32 %v10387_v58, %v10437_v33  ;;  %v1224_v51 = vmul.f32 0.7978846, %v1200_v63 }
 0x1a5   : > { %13433 = vst [vmem:[#allocation81_spill] sm:$0xff] %v10455_v14  ;;  %v9028_v26 = vpop.eup %9027  ;;  %v1312_v8 = vmul.f32 1.7015043, %v1288_v1  ;;  %v1268_v16 = vadd.f32 1.0, %v9026_v6  ;;  %v1222_v2 = vmul.f32 0.7978846, %v1198_v45  ;;  %v1129_v46 = vmul.f32 %v10452_v3, %v10452_v3 }
 0x1a6   : > { %13434 = vst [vmem:[#allocation82_spill] sm:$0xff] %v10459_v62  ;;  %13435 = vst [vmem:[#allocation83_spill] sm:$0xff] %v10463_v47  ;;  %v1310_v31 = vmul.f32 1.7015043, %v1286_v60  ;;  %v10473_v27 = vmul.f32 %v10387_v58, %v10440_v50  ;;  %9033 = vtanh.f32 %v1224_v51  ;;  %v10476_v37 = vadd.f32 %v10180_v7, %v1058_v61 }
 0x1a7   : > { %13436 = vst [vmem:[#allocation84_spill] sm:$0xff] %v10467_v19  ;;  %v1313_v4 = vmul.f32 1.7015043, %v1289_v49  ;;  %v1287_v0 = vmul.f32 %v1263_v22, %v10398_v30  ;;  %v10481_v42 = vmul.f32 %v10374_v5, %v10455_v14  ;;  %9035 = vtanh.f32 %v1222_v2 }
 0x1a8   : > { %13437 = vst [vmem:[#allocation85_spill] sm:$0xff] %v10473_v27  ;;  %v1266_v1 = vadd.f32 1.0, %v9028_v26  ;;  %v13439_v6 = vrot.slane %v10352_v53, 7  ;;  %v1153_v63 = vmul.f32 %v1129_v46, %v10452_v3  ;;  %v10493_v61 = vmul.f32 %v10111_v32, %v1312_v8  ;;  %v1071_v46 = vpop.f32.mrf.mxu0  ;;  %v13478_v27 = vld [vmem:[#allocation69_spill] sm:$0xff] }
 0x1a9   : > { %13438 = vst [vmem:[#allocation86_spill] sm:$0xff] %v10481_v42  ;;  %v1292_v30 = vmul.f32 %v1268_v16, %v10401_v40  ;;  %v10499_v51 = vmul.f32 %v10107_v18, %v1310_v31  ;;  %v1127_v2 = vmul.f32 %v10476_v37, %v10476_v37  ;;  %v10506_v8 = vmul.f32 %v10119_v41, %v1313_v4  ;;  %v8845_v41 = vld [vmem:[#allocation6 + $0x1f8] sm:$0xff]  }
 0x1aa   : > { %v10489_v60 = vsel %vm1817_vm1, %v13439_v6, %v1823_v11  ;;  %v9030_v45 = vpop.eup %9029  ;;  %v1311_v40 = vmul.f32 1.7015043, %v1287_v0  ;;  %v1290_v31 = vmul.f32 %v1266_v1, %v10407_v39  ;;  %v10515_v22 = vmul.f32 0.5, %v10410_v57  ;;  %v1774_v0 = vpop.permute.xlu1 %1773  ;;  %7985 = vmatprep.subr.bf16.mxu0 %v8845_v41  ;;  %v13476_v42 = vld [vmem:[#allocation32_spill] sm:$0xff] }
 0x1ab   : > { %13440 = vst [vmem:[#allocation87_spill] sm:$0xff] %v10489_v60  ;;  %13441 = vst [vmem:[#allocation88_spill] sm:$0xff] %v10499_v51  ;;  %v10511_v6 = vmul.f32 %v10489_v60, %v10426_v52  ;;  %v13442_v26 = vrot.slane %v10175_v43, 7  ;;  %v1177_v4 = vmul.f32 0.044715, %v1153_v63  ;;  %v1269_v49 = vadd.f32 1.0, %v9030_v45  ;;  %v8440_v63 = vpop.f32.mrf.mxu0 }
 0x1ac   : > { %v1316_v16 = vmul.f32 1.7015043, %v1292_v30  ;;  %v10526_v58 = vmul.f32 %v10489_v60, %v10455_v14  ;;  %v10530_v39 = vmul.f32 %v10489_v60, %v10459_v62  ;;  %v1102_v57 = vmul.f32 0.5, %v10419_v38 }
 0x1ad   : > { %v10522_v53 = vsel %vm1817_vm1, %v1823_v11, %v13442_v26  ;;  %v9032_v17 = vpop.eup %9031  ;;  %v1151_v11 = vmul.f32 %v1127_v2, %v10476_v37  ;;  %v10539_v1 = vadd.f32 %v10180_v7, %v1071_v46  ;;  %v10542_v30 = vmul.f32 %v10109_v28, %v1311_v40  ;;  %v1074_v24 = vpop.f32.mrf.mxu0 }
 0x1ae   : > { %13443 = vst [vmem:[#allocation89_spill] sm:$0xff] %v10522_v53  ;;  %13444 = vst [vmem:[#allocation90_spill] sm:$0xff] %v10526_v58  ;;  %v10535_v12 = vmul.f32 %v10522_v53, %v10437_v33  ;;  %v10547_v26 = vmul.f32 %v10522_v53, %v10440_v50  ;;  %v10550_v38 = vadd.f32 %v8439_v55, %v10180_v7  ;;  %v1314_v60 = vmul.f32 1.7015043, %v1290_v31  ;;  %v1780_v28 = vpop.permute.xlu1 %1779 }
 0x1af   : > { %13445 = vst [vmem:[#allocation91_spill] sm:$0xff] %v10530_v39  ;;  %13446 = vst [vmem:[#allocation92_spill] sm:$0xff] %v10539_v1  ;;  %v1267_v5 = vadd.f32 1.0, %v9032_v17  ;;  %v1201_v2 = vadd.f32 %v1177_v4, %v10452_v3  ;;  %v1130_v46 = vmul.f32 %v10539_v1, %v10539_v1  ;;  %v10556_v40 = vmul.f32 %v10137_v15, %v1316_v16 }
 0x1b0   : > { %13447 = vst [vmem:[#allocation93_spill] sm:$0xff] %v10547_v26  ;;  %13448 = vst [vmem:[#allocation94_spill] sm:$0xff] %v10550_v38  ;;  %v1293_v45 = vmul.f32 %v1269_v49, %v10429_v54  ;;  %v10563_v55 = vmul.f32 %v10522_v53, %v10499_v51  ;;  %v1175_v31 = vmul.f32 0.044715, %v1151_v11  ;;  %v1827_v4 = vrot.slane %v1774_v0, 7 }
 0x1b1   : > { %v10568_v54 = vmul.f32 0.5, %v10452_v3  ;;  %v1132_v49 = vmul.f32 %v10550_v38, %v10550_v38  ;;  %v1154_v10 = vmul.f32 %v1130_v46, %v10539_v1  ;;  %v10574_v53 = vmul.f32 %v10129_v34, %v1314_v60 }
 0x1b2   : > { %13449 = vst [vmem:[#allocation95_spill] sm:$0xff] %v10563_v55  ;;  %v1291_v0 = vmul.f32 %v1267_v5, %v10433_v9  ;;  %v1225_v11 = vmul.f32 0.7978846, %v1201_v2  ;;  %v10578_v41 = vadd.f32 %v8440_v63, %v10180_v7  ;;  %v1317_v17 = vmul.f32 1.7015043, %v1293_v45  ;;  %v1786_v34 = vpop.permute.xlu1 %1785 }
 0x1b3   : > { %v9034_v18 = vpop.eup %9033  ;;  %v13451_v16 = vrot.slane %v10175_v43, 7  ;;  %v1831_v15 = vrot.slane %v1780_v28, 7  ;;  %v10586_v23 = vadd.f32 %v10180_v7, %v1074_v24  ;;  %v10589_v46 = vmul.f32 0.5, %v10476_v37 }
 0x1b4   : > { %v9036_v32 = vpop.eup %9035  ;;  %13450 = vst [vmem:[#allocation96_spill] sm:$0xff] %v10578_v41  ;;  %v1199_v60 = vadd.f32 %v1175_v31, %v10476_v37  ;;  %v13453_v9 = vrot.slane %v10190_v44, 7  ;;  %v1272_v63 = vadd.f32 1.0, %v9034_v18  ;;  %v1156_v28 = vmul.f32 %v1132_v49, %v10550_v38 }
 0x1b5   : > { %v10583_v3 = vsel %vm1817_vm1, %v13451_v16, %v1827_v4  ;;  %v1270_v45 = vadd.f32 1.0, %v9036_v32  ;;  %v1178_v24 = vmul.f32 0.044715, %v1154_v10  ;;  %v1315_v7 = vmul.f32 1.7015043, %v1291_v0 }
 0x1b6   : > { %13452 = vst [vmem:[#allocation97_spill] sm:$0xff] %v10583_v3  ;;  %v10594_v5 = vmul.f32 %v10583_v3, %v10455_v14  ;;  %v10599_v43 = vsel %vm1817_vm1, %v1827_v4, %v13453_v9  ;;  %9037 = vtanh.f32 %v1225_v11  ;;  %v10604_v2 = vmul.f32 %v10583_v3, %v10459_v62 }
 0x1b7   : > { %13454 = vst [vmem:[#allocation98_spill] sm:$0xff] %v10599_v43  ;;  %v1133_v37 = vmul.f32 %v10578_v41, %v10578_v41  ;;  %v10609_v31 = vmul.f32 %v10147_v25, %v1317_v17  ;;  %v10613_v4 = vmul.f32 %v10599_v43, %v10440_v50  ;;  %v13456_v18 = vmov %v13453_v9 }
 0x1b8   : > { %13455 = vst [vmem:[#allocation99_spill] sm:$0xff] %v10604_v2  ;;  %v10618_v10 = vsel %vm1817_vm1, %v13456_v18, %v1831_v15  ;;  %v1131_v32 = vmul.f32 %v10586_v23, %v10586_v23  ;;  %v1223_v16 = vmul.f32 0.7978846, %v1199_v60  ;;  %v10625_v0 = vmul.f32 %v10599_v43, %v10499_v51 }
 0x1b9   : > { %13457 = vst [vmem:[#allocation100_spill] sm:$0xff] %v10618_v10  ;;  %v13459_v17 = vrot.slane %v10207_v48, 7  ;;  %v1296_v44 = vmul.f32 %v1272_v63, %v10515_v22  ;;  %v1294_v9 = vmul.f32 %v1270_v45, %v1102_v57  ;;  %v1180_v18 = vmul.f32 0.044715, %v1156_v28 }
 0x1ba   : > { %13458 = vst [vmem:[#allocation101_spill] sm:$0xff] %v10625_v0  ;;  %v1202_v25 = vadd.f32 %v1178_v24, %v10539_v1  ;;  %v10635_v60 = vmul.f32 %v13461_v13, %v1315_v7  ;;  %v10640_v21 = vmul.f32 %v10618_v10, %v10459_v62  ;;  %v1157_v59 = vmul.f32 %v1133_v37, %v10578_v41  ;;  %v13471_v13 = vld [vmem:[#allocation56_spill] sm:$0xff] }
 0x1bb   : > { %v10630_v11 = vsel %vm1817_vm1, %v1831_v15, %v13459_v17  ;;  %v10645_v15 = vmul.f32 %v10618_v10, %v10542_v30  ;;  %v1155_v63 = vmul.f32 %v1131_v32, %v10586_v23  ;;  %9039 = vtanh.f32 %v1223_v16 }
 0x1bc   : > { %13460 = vst [vmem:[#allocation102_spill] sm:$0xff] %v10630_v11  ;;  %v10649_v22 = vmul.f32 %v10630_v11, %v10499_v51  ;;  %v10653_v57 = vmul.f32 %v10630_v11, %v10493_v61  ;;  %v1835_v24 = vrot.slane %v1786_v34, 7  ;;  %v1320_v7 = vmul.f32 1.7015043, %v1296_v44  ;;  %v13472_v34 = vld [vmem:[#allocation57_spill] sm:$0xff] }
 0x1bd   : > { %13462 = vst [vmem:[#allocation103_spill] sm:$0xff] %v10645_v15  ;;  %v1318_v37 = vmul.f32 1.7015043, %v1294_v9  ;;  %v10659_v17 = vadd.f32 %v1180_v18, %v10550_v38  ;;  %v1226_v49 = vmul.f32 0.7978846, %v1202_v25  ;;  %v13465_v39 = vrot.slane %v10207_v48, 7 }
 0x1be   : > { %13463 = vst [vmem:[#allocation104_spill] sm:$0xff] %v10649_v22  ;;  %13464 = vst [vmem:[#allocation105_spill] sm:$0xff] %v10653_v57  ;;  %v1181_v55 = vmul.f32 0.044715, %v1157_v59  ;;  %v2004_v32 = vrot.slane %v10416_v20, 1  ;;  %v13468_v18 = vld [vmem:[#allocation61_spill] sm:$0xff]  ;;  %v10683_v16 = vmul.f32 %v13471_v13, %v1320_v7 }
 0x1bf   : > { %v10665_v11 = vsel %vm1817_vm1, %v13465_v39, %v1835_v24  ;;  %v1179_v9 = vmul.f32 0.044715, %v1155_v63  ;;  %v13469_v59 = vrot.slane %v13468_v18, 7  ;;  %v2003_v39 = vrot.slane %v10413_v36, 1 }
 0x1c0   : > { %13466 = vst [vmem:[#allocation106_spill] sm:$0xff] %v10665_v11  ;;  %v10673_v25 = vmul.f32 %v10665_v11, %v10542_v30  ;;  %v2006_v28 = vrot.slane %v10404_v29, 1  ;;  %v10686_v45 = vmul.f32 %v13472_v34, %v1318_v37  ;;  %9041 = vtanh.f32 %v1226_v49  ;;  %v1792_v37 = vpop.permute.xlu1 %1791  ;;  %v13475_v34 = vld [vmem:[#allocation63_spill] sm:$0xff] }
 0x1c1   : > { %v10678_v48 = vsel %vm1817_vm1, %v1835_v24, %v13469_v59  ;;  %v10690_v63 = vmul.f32 %v10665_v11, %v10506_v8  ;;  %v10693_v44 = vadd.f32 %v1181_v55, %v10578_v41  ;;  %v2005_v24 = vsel %vm1675_vm0, %v2003_v39, %v2004_v32 }
 0x1c2   : > { %13467 = vst [vmem:[#allocation107_spill] sm:$0xff] %v10673_v25  ;;  %13470 = vst [vmem:[#allocation61_spill] sm:$0xff] %v10678_v48  ;;  %v2007_v59 = vsel %vm1675_vm0, %v2004_v32, %v2006_v28  ;;  %v13213_v10 = vrot.slane %v10426_v52, 1  ;;  %v10699_v13 = vadd.f32 %v1179_v9, %v10586_v23  ;;  %v2334_v49 = vpack.c.bf16 %v2005_v24, %v2003_v39  ;;  %v13477_v9 = vld [vmem:[#allocation66_spill] sm:$0xff] }
 0x1c3   : > { %13473 = vst [vmem:[#allocation108_spill] sm:$0xff] %v10690_v63  ;;  %13474 = vst [vmem:[#allocation109_spill] sm:$0xff] %v10693_v44  ;;  %v9038_v7 = vpop.eup %9037  ;;  %v1737_v11 = vmul.f32 %v13475_v34, %v10413_v36  ;;  %v1738_v55 = vmul.f32 %v13476_v42, %v10416_v20  ;;  %v10708_v32 = vmul.f32 %v10678_v48, %v10493_v61  ;;  %v1839_v2 = vrot.slane %v1792_v37, 7 }
 0x1c4   : > { %v2009_v43 = vsel %vm1675_vm0, %v2006_v28, %v13213_v10  ;;  %v1739_v3 = vmul.f32 %v13477_v9, %v10404_v29  ;;  %v2441_v57 = vshrl.u32 %v2334_v49, 16  ;;  %v2444_v15 = vshll.u32 %v2334_v49, 16 }
 0x1c5   : > { %v10715_v39 = vpack.c.bf16 %v2009_v43, %v2006_v28  ;;  %v2343_v24 = vpack.c.bf16 %v2009_v43, %v2007_v59  ;;  %v1273_v0 = vadd.f32 1.0, %v9038_v7  ;;  %v2333_v26 = vpack.c.bf16 %v1737_v11, %v13478_v27  ;;  %v8836_v27 = vld [vmem:[#allocation6 + $0x130] sm:$0xff]  }
 0x1c6   : > { %v2342_v58 = vpack.c.bf16 %v1739_v3, %v1738_v55  ;;  %v2443_v47 = vrot.slane %v2441_v57, 3  ;;  %v2446_v19 = vrot.slane %v2444_v15, 4  ;;  %v10720_v43 = vmul.f32 %v10678_v48, %v10574_v53 }
 0x1c7   : > { %v2449_v25 = vshrl.u32 %v2343_v24, 16  ;;  %v2452_v22 = vshll.u32 %v2343_v24, 16  ;;  %v2424_v41 = vshrl.u32 %v2333_v26, 16  ;;  %v2427_v10 = vshll.u32 %v2333_v26, 16 }
 0x1c8   : > { %v2432_v38 = vshrl.u32 %v2342_v58, 16  ;;  %v2435_v1 = vshll.u32 %v2342_v58, 16  ;;  %v9040_v44 = vpop.eup %9039  ;;  %13479 = vst [vmem:[#allocation110_spill] sm:$0xff] %v10720_v43  ;;  %v2447_v28 = vor.u32 %v2446_v19, %v2443_v47  ;;  %v1297_v15 = vmul.f32 %v1273_v0, %v10568_v54  ;;  %v13483_v0 = vld [vmem:[#allocation64_spill] sm:$0xff] }
 0x1c9   : > { %v2451_v59 = vrot.slane %v2449_v25, 3  ;;  %v2454_v7 = vrot.slane %v2452_v22, 4  ;;  %v2426_v37 = vrot.slane %v2424_v41, 3  ;;  %v2429_v49 = vrot.slane %v2427_v10, 4  ;;  %v8834_v41 = vld [vmem:[#allocation6 + $0x138] sm:$0xff]  }
 0x1ca   : > { %v2434_v11 = vrot.slane %v2432_v38, 3  ;;  %v2437_v3 = vrot.slane %v2435_v1, 4  ;;  %v13480_v26 = vrot.slane %v13468_v18, 7  ;;  %v13482_v38 = vld [vmem:[#allocation60_spill] sm:$0xff]  ;;  %v1271_v10 = vadd.f32 1.0, %v9040_v44 }
 0x1cb   : > { %v10729_v55 = vor.u32 %v2454_v7, %v2451_v59  ;;  %v2430_v47 = vor.u32 %v2429_v49, %v2426_v37  ;;  %v1899_v1 = vmul.f32 %v13482_v38, %v10416_v20  ;;  %v13484_v22 = vrot.slane %v13483_v0, 7  ;;  %v8835_v59 = vld [vmem:[#allocation6 + $0x170] sm:$0xff]  }
 0x1cc   : > { %v10727_v58 = vsel %vm1817_vm1, %v13480_v26, %v1839_v2  ;;  %v10732_v19 = vor.u32 %v2437_v3, %v2434_v11  ;;  %v1321_v49 = vmul.f32 1.7015043, %v1297_v15  ;;  %v1902_v11 = vmul.f32 %v13477_v9, %v10437_v33  ;;  %v13487_v3 = vld [vmem:[#allocation75_spill] sm:$0xff] }
 0x1cd   : > { %13481 = vst [vmem:[#allocation111_spill] sm:$0xff] %v10727_v58  ;;  %v10740_v25 = vsel %vm1817_vm1, %v1839_v2, %v13484_v22  ;;  %v2456_v18 = vsel %vm2422_vm2, %v2447_v28, %v10729_v55  ;;  %v10744_v7 = vpop.eup %9041  ;;  %v10748_v37 = vmul.f32 %v10727_v58, %v10506_v8  ;;  %v10752_v20 = vmul.f32 %v10727_v58, %v10635_v60 }
 0x1ce   : > { %13485 = vst [vmem:[#allocation64_spill] sm:$0xff] %v10740_v25  ;;  %3703 = vmatprep.mubr.bf16.mxu1 %v2456_v18  ;;  %v2439_v44 = vsel %vm2422_vm2, %v2430_v47, %v10732_v19  ;;  %v1900_v2 = vmul.f32 %v13475_v34, %v10404_v29  ;;  %v1901_v28 = vmul.f32 %v13476_v42, %v10426_v52  ;;  %v13488_v18 = vrot.slane %v10448_v35, 2  ;;  %v13495_v34 = vld [vmem:[#allocation62_spill] sm:$0xff] }
 0x1cf   : > { %13486 = vst [vmem:[#allocation112_spill] sm:$0xff] %v10752_v20  ;;  %3704 = vmatmul.mubr.bf16.vlgmr.msra.gmra.mxu1 %v2439_v44  ;;  %v1878_v26 = vmul.f32 %v13487_v3, %v10413_v36  ;;  %v10766_v22 = vmul.f32 %v10740_v25, %v10574_v53  ;;  %v13489_v15 = vrot.slane %v10444_v56, 2  ;;  %v13490_v54 = vrot.slane %v10511_v6, 2 }
 0x1d0   : > { %7910 = vmatpush3.bf16.msra.mxu1 %v8834_v41  ;;  %v2336_v47 = vpack.c.bf16 %v1900_v2, %v1899_v1  ;;  %v13491_v57 = vmov %v13488_v18  ;;  %v10780_v36 = vmul.f32 %v10740_v25, %v10556_v40  ;;  %v2345_v58 = vpack.c.bf16 %v1902_v11, %v1901_v28  ;;  %v8837_v2 = vld [vmem:[#allocation6 + $0x168] sm:$0xff]  }
 0x1d1   : > { %v2089_v44 = vsel %vm2084_vm3, %v13489_v15, %v13488_v18  ;;  %v2091_v24 = vsel %vm2084_vm3, %v13491_v57, %v13490_v54  ;;  %v2085_v41 = vrot.slane %v1878_v26, 2  ;;  %7911 = vmatprep.subr.bf16.mxu1 %v8835_v59  ;;  %v1295_v48 = vmul.f32 %v1271_v10, %v10589_v46  ;;  %v13494_v10 = vld [vmem:[#allocation67_spill] sm:$0xff] }
 0x1d2   : > { %13492 = vst [vmem:[#allocation113_spill] sm:$0xff] %v10780_v36  ;;  %v2344_v1 = vpack.c.bf16 %v2091_v24, %v2089_v44  ;;  %v2475_v15 = vshrl.u32 %v2336_v47, 16  ;;  %v2478_v43 = vshll.u32 %v2336_v47, 16  ;;  %v2483_v63 = vshrl.u32 %v2345_v58, 16  ;;  %v8838_v24 = vld [vmem:[#allocation6 + $0x128] sm:$0xff]   ;;  %v8839_v47 = vld [vmem:[#allocation6 + $0x160] sm:$0xff]  }
 0x1d3   : > { %v2486_v35 = vshll.u32 %v2345_v58, 16  ;;  %v13493_v57 = vrot.slane %v10444_v56, 2  ;;  %v1903_v44 = vmul.f32 %v13494_v10, %v10455_v14  ;;  %v8840_v58 = vld [vmem:[#allocation6 + $0x120] sm:$0xff]   ;;  %v13500_v36 = vld [vmem:[#allocation68_spill] sm:$0xff] }
 0x1d4   : > { %v2466_v9 = vshrl.u32 %v2344_v1, 16  ;;  %v2477_v25 = vrot.slane %v2475_v15, 3  ;;  %v2480_v42 = vrot.slane %v2478_v43, 4  ;;  %v2469_v11 = vshll.u32 %v2344_v1, 16  ;;  %7912 = vmatpush3.bf16.msra.mxu1 %v8836_v27  ;;  %v1798_v43 = vpop.permute.xlu1 %1797 }
 0x1d5   : > { %v2087_v54 = vsel %vm2084_vm3, %v2085_v41, %v13493_v57  ;;  %v2485_v59 = vrot.slane %v2483_v63, 3  ;;  %v2488_v26 = vrot.slane %v2486_v35, 4  ;;  %7913 = vmatprep.subr.bf16.mxu1 %v8837_v2  ;;  %v10791_v15 = vmul.f32 %v13495_v34, %v1321_v49  ;;  %v13496_v63 = vld [vmem:[#allocation34_spill] sm:$0xff] }
 0x1d6   : > { %v2335_v28 = vpack.c.bf16 %v2087_v54, %v2085_v41  ;;  %v2468_v46 = vrot.slane %v2466_v9, 3  ;;  %v2471_v57 = vrot.slane %v2469_v11, 4  ;;  %v2481_v41 = vor.u32 %v2480_v42, %v2477_v25  ;;  %v8841_v25 = vld [vmem:[#allocation6 + $0x158] sm:$0xff]  }
 0x1d7   : > { %v2489_v27 = vor.u32 %v2488_v26, %v2485_v59  ;;  %v1904_v1 = vmul.f32 %v13496_v63, %v10440_v50  ;;  %v10798_v2 = vrot.slane %v10437_v33, 1  ;;  %v1319_v59 = vmul.f32 1.7015043, %v1295_v48 }
 0x1d8   : > { %v2458_v56 = vshrl.u32 %v2335_v28, 16  ;;  %v2461_v18 = vshll.u32 %v2335_v28, 16  ;;  %v10795_v54 = vor.u32 %v2471_v57, %v2468_v46  ;;  %7914 = vmatpush3.bf16.msra.mxu1 %v8838_v24  ;;  %v1843_v26 = vrot.slane %v1798_v43, 7  ;;  %v8847_v28 = vld [vmem:[#allocation6 + $0x1f0] sm:$0xff]  }
 0x1d9   : > { %v2490_v11 = vsel %vm2422_vm2, %v2481_v41, %v2489_v27  ;;  %v2353_v42 = vpack.c.bf16 %v1904_v1, %v1903_v44  ;;  %7915 = vmatprep.subr.bf16.mxu1 %v8839_v47  ;;  %v2012_v46 = vrot.slane %v10455_v14, 1  ;;  %v1740_v24 = vmul.f32 %v13494_v10, %v10426_v52  ;;  %v13503_v10 = vld [vmem:[#allocation55_spill] sm:$0xff] }
 0x1da   : > { %v2460_v9 = vrot.slane %v2458_v56, 3  ;;  %v2463_v35 = vrot.slane %v2461_v18, 4  ;;  %3816 = vmatprep.mubr.bf16.mxu0 %v2490_v11  ;;  %v8846_v56 = vld [vmem:[#allocation6 + $0x1b8] sm:$0xff]   ;;  %v1741_v49 = vmul.f32 %v13496_v63, %v10437_v33  ;;  %v13497_v44 = vrot.slane %v13483_v0, 7  ;;  %v8850_v63 = vld [vmem:[#allocation6 + $0x1e8] sm:$0xff]  }
 0x1db   : > { %v2596_v57 = vshrl.u32 %v2353_v42, 16  ;;  %v2599_v34 = vshll.u32 %v2353_v42, 16  ;;  %v13499_v43 = vrot.slane %v10426_v52, 1  ;;  %v10821_v1 = vsel %vm1675_vm0, %v10798_v2, %v2012_v46 }
 0x1dc   : > { %v2464_v18 = vor.u32 %v2463_v35, %v2460_v9  ;;  %v10811_v47 = vsel %vm1817_vm1, %v13497_v44, %v1843_v26  ;;  %7916 = vmatpush3.bf16.msra.mxu1 %v8840_v58  ;;  %v8842_v9 = vld [vmem:[#allocation6 + $0x118] sm:$0xff]   ;;  %v2351_v42 = vpack.c.bf16 %v1741_v49, %v1740_v24  ;;  %v8843_v44 = vld [vmem:[#allocation6 + $0x150] sm:$0xff]   ;;  %v2014_v58 = vrot.slane %v10440_v50, 1 }
 0x1dd   : > { %13498 = vst [vmem:[#allocation114_spill] sm:$0xff] %v10811_v47  ;;  %v2011_v41 = vsel %vm1675_vm0, %v13499_v43, %v10798_v2  ;;  %v2598_v35 = vrot.slane %v2596_v57, 3  ;;  %v2601_v0 = vrot.slane %v2599_v34, 4  ;;  %7917 = vmatprep.subr.bf16.mxu1 %v8841_v25  ;;  %v13501_v43 = vrot.slane %v13500_v36, 7  ;;  %v8848_v34 = vld [vmem:[#allocation6 + $0x1b0] sm:$0xff]   ;;  %v1804_v57 = vpop.permute.xlu1 %1803 }
 0x1de   : > { %v2473_v48 = vsel %vm2422_vm2, %v2464_v18, %v10795_v54  ;;  %v2346_v11 = vpack.c.bf16 %v10821_v1, %v2011_v41  ;;  %v10826_v18 = vmul.f32 %v10811_v47, %v10635_v60  ;;  %v2577_v24 = vshrl.u32 %v2351_v42, 16 }
 0x1df   : > { %3817 = vmatmul.mubr.bf16.vlgmr.msra.gmra.mxu0 %v2473_v48  ;;  %v10831_v20 = vsel %vm1817_vm1, %v1843_v26, %v13501_v43  ;;  %v10835_v41 = vor.u32 %v2601_v0, %v2598_v35  ;;  %v10838_v33 = vmul.f32 %v13503_v10, %v1319_v59  ;;  %v10842_v26 = vmul.f32 %v10811_v47, %v10609_v31 }
 0x1e0   : > { %13502 = vst [vmem:[#allocation68_spill] sm:$0xff] %v10831_v20  ;;  %7986 = vmatpush3.bf16.msra.mxu0 %v8846_v56  ;;  %v2500_v49 = vshrl.u32 %v2346_v11, 16  ;;  %v2503_v25 = vshll.u32 %v2346_v11, 16  ;;  %v2580_v43 = vshll.u32 %v2351_v42, 16  ;;  %v2015_v48 = vsel %vm1675_vm0, %v2012_v46, %v2014_v58  ;;  %7918 = vmatpush3.bf16.msra.mxu1 %v8842_v9  ;;  %v8844_v56 = vld [vmem:[#allocation6 + $0x110] sm:$0xff]   ;;  %v8852_v9 = vld [vmem:[#allocation6 + $0x1a8] sm:$0xff]  }
 0x1e1   : > { %7987 = vmatprep.subr.bf16.mxu0 %v8847_v28  ;;  %13504 = vst [vmem:[#allocation115_spill] sm:$0xff] %v10842_v26  ;;  %v2603_v35 = vsel %vm2422_vm2, %v2489_v27, %v10835_v41  ;;  %v2579_v38 = vrot.slane %v2577_v24, 3  ;;  %7919 = vmatprep.subr.bf16.mxu1 %v8843_v44  ;;  %v8849_v28 = vld [vmem:[#allocation6 + $0x148] sm:$0xff]   ;;  %v10850_v10 = vmul.f32 %v10831_v20, %v10556_v40  ;;  %v10852_v47 = vrot.slane %v1804_v57, 7  ;;  %v13517_v26 = vld [vmem:[#allocation73_spill] sm:$0xff] }
 0x1e2   : > { %v2502_v0 = vrot.slane %v2500_v49, 3  ;;  %v2505_v11 = vrot.slane %v2503_v25, 4  ;;  %3824 = vmatprep.mubr.bf16.mxu0 %v2603_v35  ;;  %v2582_v46 = vrot.slane %v2580_v43, 4  ;;  %v13507_v27 = vrot.slane %v10459_v62, 1 }
 0x1e3   : > { %13505 = vst [vmem:[#allocation116_spill] sm:$0xff] %v10852_v47  ;;  %v13508_v44 = vrot.slane %v10535_v12, 2  ;;  %v13509_v25 = vrot.slane %v10511_v6, 2  ;;  %v13510_v59 = vrot.slane %v10594_v5, 2  ;;  %v10871_v35 = vmul.f32 %v10831_v20, %v10686_v45  ;;  %v8851_v6 = vld [vmem:[#allocation6 + $0x108] sm:$0xff]   ;;  %v13513_v12 = vld [vmem:[#allocation36_spill] sm:$0xff] }
 0x1e4   : > { %7988 = vmatpush3.bf16.msra.mxu0 %v8848_v34  ;;  %v10854_v42 = vor.u32 %v2505_v11, %v2502_v0  ;;  %v2017_v49 = vsel %vm1675_vm0, %v2014_v58, %v13507_v27  ;;  %v8853_v34 = vld [vmem:[#allocation6 + $0x1e0] sm:$0xff]   ;;  %v10873_v0 = vor.u32 %v2582_v46, %v2579_v38  ;;  %7920 = vmatpush3.bf16.msra.mxu1 %v8844_v56  ;;  %v8855_v20 = vld [vmem:[#allocation6 + $0x1d8] sm:$0xff]  }
 0x1e5   : > { %v2093_v24 = vsel %vm2084_vm3, %v13509_v25, %v13508_v44  ;;  %v13511_v57 = vmov %v13508_v44  ;;  %7989 = vmatprep.subr.bf16.mxu0 %v8850_v63  ;;  %13512 = vst [vmem:[#allocation118_spill] sm:$0xff] %v10871_v35  ;;  %v2349_v58 = vpack.c.bf16 %v2017_v49, %v2015_v48  ;;  %v1905_v44 = vmul.f32 %v13513_v12, %v10459_v62  ;;  %v13514_v63 = vld [vmem:[#allocation38_spill] sm:$0xff] }
 0x1e6   : > { %13506 = vst [vmem:[#allocation117_spill] sm:$0xff] %v10854_v42  ;;  %v2095_v43 = vsel %vm2084_vm3, %v13511_v57, %v13510_v59  ;;  %v2585_v27 = vsel %vm2422_vm2, %v10729_v55, %v10854_v42  ;;  %v1906_v59 = vmul.f32 %v13514_v63, %v10499_v51  ;;  %v1742_v25 = vmul.f32 %v13513_v12, %v10455_v14  ;;  %v8857_v38 = vld [vmem:[#allocation6 + $0x140] sm:$0xff]  }
 0x1e7   : > { %v2352_v11 = vpack.c.bf16 %v2095_v43, %v2093_v24  ;;  %7921 = vmatprep.subr.bf16.mxu1 %v8849_v28  ;;  %3711 = vmatprep.mubr.bf16.mxu1 %v2585_v27  ;;  %v2584_v48 = vsel %vm2422_vm2, %v10732_v19, %v10873_v0  ;;  %v2551_v56 = vshrl.u32 %v2349_v58, 16  ;;  %v2554_v46 = vshll.u32 %v2349_v58, 16  ;;  %v8854_v55 = vld [vmem:[#allocation6 + $0x1a0] sm:$0xff]  }
 0x1e8   : > { %7990 = vmatpush3.bf16.msra.mxu0 %v8852_v9  ;;  %v13515_v24 = vrot.slane %v13500_v36, 7  ;;  %3712 = vmatmul.mubr.bf16.gmra.mxu1 %v2584_v48  ;;  %v2360_v28 = vpack.c.bf16 %v1906_v59, %v1905_v44  ;;  %v1743_v27 = vmul.f32 %v13514_v63, %v10440_v50  ;;  %v2018_v9 = vrot.slane %v10499_v51, 1  ;;  %v8858_v12 = vld [vmem:[#allocation6 + $0x100] sm:$0xff]   ;;  %v1810_v63 = vpop.permute.xlu1 %1809 }
 0x1e9   : > { %v2587_v49 = vshrl.u32 %v2352_v11, 16  ;;  %v2590_v43 = vshll.u32 %v2352_v11, 16  ;;  %7991 = vmatprep.subr.bf16.mxu0 %v8853_v34  ;;  %v2553_v19 = vrot.slane %v2551_v56, 3  ;;  %v2556_v35 = vrot.slane %v2554_v46, 4  ;;  %7922 = vmatpush3.bf16.msra.mxu1 %v8851_v6 }
 0x1ea   : > { %v10891_v57 = vsel %vm1817_vm1, %v13515_v24, %v10852_v47  ;;  %v13518_v36 = vrot.slane %v13517_v26, 7  ;;  %v2660_v44 = vshrl.u32 %v2360_v28, 16  ;;  %v2663_v59 = vshll.u32 %v2360_v28, 16  ;;  %7923 = vmatprep.subr.bf16.mxu1 %v8857_v38  ;;  %v8856_v38 = vld [vmem:[#allocation6 + $0x198] sm:$0xff]  }
 0x1eb   : > { %13516 = vst [vmem:[#allocation119_spill] sm:$0xff] %v10891_v57  ;;  %v2589_v58 = vrot.slane %v2587_v49, 3  ;;  %v2592_v11 = vrot.slane %v2590_v43, 4  ;;  %v10902_v48 = vor.u32 %v2556_v35, %v2553_v19  ;;  %v2358_v34 = vpack.c.bf16 %v1743_v27, %v1742_v25  ;;  %v10908_v49 = vld [vmem:[#allocation6 + $0x238] sm:$0xff]  }
 0x1ec   : > { %v10900_v24 = vsel %vm1817_vm1, %v10852_v47, %v13518_v36  ;;  %v13521_v56 = vrot.slane %v10459_v62, 1  ;;  %v13245_v6 = vrot.slane %v10542_v30, 1  ;;  %7992 = vmatpush3.bf16.msra.mxu0 %v8854_v55  ;;  %13522 = vst [vmem:[#allocation121_spill] sm:$0xff] %v10908_v49  ;;  %v2662_v36 = vrot.slane %v2660_v44, 3 }
 0x1ed   : > { %13519 = vst [vmem:[#allocation73_spill] sm:$0xff] %v10900_v24  ;;  %13520 = vst [vmem:[#allocation120_spill] sm:$0xff] %v10902_v48  ;;  %v10910_v50 = vor.u32 %v2592_v11, %v2589_v58  ;;  %v2665_v43 = vrot.slane %v2663_v59, 4  ;;  %v13523_v28 = vrot.slane %v10613_v4, 2  ;;  %v13524_v35 = vrot.slane %v10594_v5, 2  ;;  %7993 = vmatprep.subr.bf16.mxu0 %v8855_v20  ;;  %7924 = vmatpush3.bf16.msra.mxu1 %v8858_v12  ;;  %v8859_v11 = vld [vmem:[#allocation6 + $0x1d0] sm:$0xff]  }
 0x1ee   : > { %v2019_v46 = vsel %vm1675_vm0, %v13521_v56, %v2018_v9  ;;  %v10920_v27 = vsel %vm2422_vm2, %v10854_v42, %v10902_v48  ;;  %v2642_v55 = vshrl.u32 %v2358_v34, 16  ;;  %v2645_v19 = vshll.u32 %v2358_v34, 16  ;;  %8441 = vmatprep.subr.bf16.mxu1 %v10908_v49 }
 0x1ef   : > { %v2097_v25 = vsel %vm2084_vm3, %v13524_v35, %v13523_v28  ;;  %13525 = vst [vmem:[#allocation122_spill] sm:$0xff] %v10920_v27  ;;  %v2021_v58 = vsel %vm1675_vm0, %v2018_v9, %v13245_v6  ;;  %3719 = vmatprep.mubr.bf16.mxu1 %v10920_v27  ;;  %v2594_v5 = vsel %vm2422_vm2, %v10795_v54, %v10910_v50  ;;  %v13526_v59 = vrot.slane %v10640_v21, 2 }
 0x1f0   : > { %v10929_v20 = vor.u32 %v2665_v43, %v2662_v36  ;;  %v2356_v44 = vpack.c.bf16 %v2021_v58, %v2019_v46  ;;  %v13527_v56 = vmov %v13523_v28  ;;  %v10938_v9 = vmul.f32 %v10900_v24, %v10686_v45  ;;  %3825 = vmatmul.mubr.bf16.gmra.mxu0 %v2594_v5  ;;  %v8860_v43 = vld [vmem:[#allocation6 + $0x190] sm:$0xff]  }
 0x1f1   : > { %v2099_v34 = vsel %vm2084_vm3, %v13527_v56, %v13526_v59  ;;  %v2644_v12 = vrot.slane %v2642_v55, 3  ;;  %v2647_v28 = vrot.slane %v2645_v19, 4  ;;  %v1227_v4 = vmul.f32 0.7978846, %v10699_v13  ;;  %7994 = vmatpush3.bf16.msra.mxu0 %v8856_v38  ;;  %v1816_v56 = vpop.permute.xlu1 %1815 }
 0x1f2   : > { %v2359_v35 = vpack.c.bf16 %v2099_v34, %v2097_v25  ;;  %v2667_v54 = vsel %vm2422_vm2, %v10835_v41, %v10929_v20  ;;  %v2624_v46 = vshrl.u32 %v2356_v44, 16  ;;  %v2627_v36 = vshll.u32 %v2356_v44, 16  ;;  %7995 = vmatprep.subr.bf16.mxu0 %v8859_v11  ;;  %v8861_v25 = vld [vmem:[#allocation6 + $0x1c8] sm:$0xff]  }
 0x1f3   : > { %v1851_v58 = vrot.slane %v1810_v63, 7  ;;  %3832 = vmatprep.mubr.bf16.mxu0 %v2667_v54  ;;  %v10945_v59 = vor.u32 %v2647_v28, %v2644_v12  ;;  %v10949_v19 = vmul.f32 %v10900_v24, %v10683_v16  ;;  %9043 = vtanh.f32 %v1227_v4  ;;  %v13529_v44 = vld [vmem:[#allocation43_spill] sm:$0xff]  ;;  %v13540_v24 = vld [vmem:[#allocation104_spill] sm:$0xff] }
 0x1f4   : > { %v2651_v5 = vshrl.u32 %v2359_v35, 16  ;;  %v2654_v55 = vshll.u32 %v2359_v35, 16  ;;  %v2626_v41 = vrot.slane %v2624_v46, 3  ;;  %v2629_v34 = vrot.slane %v2627_v36, 4  ;;  %v13531_v46 = vld [vmem:[#allocation44_spill] sm:$0xff] }
 0x1f5   : > { %13528 = vst [vmem:[#allocation123_spill] sm:$0xff] %v10949_v19  ;;  %v2649_v13 = vsel %vm2422_vm2, %v10873_v0, %v10945_v59  ;;  %v1907_v12 = vmul.f32 %v13529_v44, %v10542_v30  ;;  %v13530_v28 = vrot.slane %v13517_v26, 7  ;;  %v1908_v36 = vmul.f32 %v13531_v46, %v10493_v61  ;;  %7996 = vmatpush3.bf16.msra.mxu0 %v8860_v43  ;;  %v13532_v0 = vld [vmem:[#allocation76_spill] sm:$0xff]  ;;  %v13543_v19 = vld [vmem:[#allocation107_spill] sm:$0xff] }
 0x1f6   : > { %v2653_v63 = vrot.slane %v2651_v5, 3  ;;  %v2656_v38 = vrot.slane %v2654_v55, 4  ;;  %3720 = vmatmul.mubr.bf16.gmra.mxu1 %v2649_v13  ;;  %v10962_v54 = vor.u32 %v2629_v34, %v2626_v41  ;;  %v13533_v4 = vrot.slane %v13532_v0, 7  ;;  %7997 = vmatprep.subr.bf16.mxu0 %v8861_v25  ;;  %v13536_v13 = vld [vmem:[#allocation109_spill] sm:$0xff] }
 0x1f7   : > { %v10960_v35 = vsel %vm1817_vm1, %v13530_v28, %v1851_v58  ;;  %v10971_v55 = vrot.slane %v1816_v56, 7  ;;  %v1228_v26 = vmul.f32 0.7978846, %v10659_v17  ;;  %v8862_v28 = vld [vmem:[#allocation6 + $0x188] sm:$0xff]   ;;  %v1107_v43 = vmul.f32 0.5, %v10586_v23  ;;  %v13537_v17 = vld [vmem:[#allocation92_spill] sm:$0xff] }
 0x1f8   : > { %v10969_v5 = vsel %vm1817_vm1, %v1851_v58, %v13533_v4  ;;  %v10973_v11 = vor.u32 %v2656_v38, %v2653_v63  ;;  %v10979_v41 = vsel %vm2422_vm2, %v10902_v48, %v10962_v54  ;;  %v2367_v34 = vpack.c.bf16 %v1908_v36, %v1907_v12  ;;  %v8863_v58 = vld [vmem:[#allocation6 + $0x1c0] sm:$0xff]   ;;  %v13539_v12 = vld [vmem:[#allocation96_spill] sm:$0xff] }
 0x1f9   : > { %13534 = vst [vmem:[#allocation76_spill] sm:$0xff] %v10969_v5  ;;  %13535 = vst [vmem:[#allocation124_spill] sm:$0xff] %v10979_v41  ;;  %v1229_v6 = vmul.f32 0.7978846, %v13536_v13  ;;  %3727 = vmatprep.mubr.bf16.mxu1 %v10979_v41  ;;  %v10988_v25 = vmul.f32 0.5, %v13537_v17  ;;  %v13538_v63 = vld [vmem:[#allocation94_spill] sm:$0xff]  ;;  %9045 = vtanh.f32 %v1228_v26  ;;  %v1744_v13 = vmul.f32 %v13529_v44, %v10459_v62  ;;  %7998 = vmatpush3.bf16.msra.mxu0 %v8862_v28 }
 0x1fa   : > { %v2658_v56 = vsel %vm2422_vm2, %v10910_v50, %v10973_v11  ;;  %v10991_v38 = vmul.f32 0.5, %v13538_v63  ;;  %v2723_v4 = vshrl.u32 %v2367_v34, 16  ;;  %v2726_v23 = vshll.u32 %v2367_v34, 16  ;;  %v8865_v63 = vld [vmem:[#allocation6 + $0x180] sm:$0xff]   ;;  %7999 = vmatprep.subr.bf16.mxu0 %v8863_v58 }
 0x1fb   : > { %3833 = vmatmul.mubr.bf16.gmra.mxu0 %v2658_v56  ;;  %v10994_v36 = vmul.f32 0.5, %v13539_v12  ;;  %9047 = vtanh.f32 %v1229_v6  ;;  %v1745_v50 = vmul.f32 %v13531_v46, %v10499_v51  ;;  %v2022_v17 = vrot.slane %v10493_v61, 1 }
 0x1fc   : > { %v2725_v26 = vrot.slane %v2723_v4, 3  ;;  %v2728_v56 = vrot.slane %v2726_v23, 4  ;;  %v13541_v34 = vrot.slane %v13540_v24, 2  ;;  %v13542_v12 = vrot.slane %v10640_v21, 2  ;;  %v13549_v24 = vld [vmem:[#allocation47_spill] sm:$0xff] }
 0x1fd   : > { %v13544_v41 = vrot.slane %v13543_v19, 2  ;;  %v2365_v27 = vpack.c.bf16 %v1745_v50, %v1744_v13  ;;  %v13546_v47 = vrot.slane %v10542_v30, 1  ;;  %v13547_v4 = vrot.slane %v10506_v8, 1  ;;  %8000 = vmatpush3.bf16.msra.mxu0 %v8865_v63 }
 0x1fe   : > { %v2101_v6 = vsel %vm2084_vm3, %v13542_v12, %v13541_v34  ;;  %v13545_v44 = vmov %v13541_v34  ;;  %v2729_v21 = vor.u32 %v2728_v56, %v2725_v26  ;;  %v13548_v34 = vld [vmem:[#allocation46_spill] sm:$0xff]  ;;  %v1910_v49 = vmul.f32 %v13549_v24, %v10574_v53 }
 0x1ff   : > { %v2103_v46 = vsel %vm2084_vm3, %v13545_v44, %v13544_v41  ;;  %v2023_v28 = vsel %vm1675_vm0, %v13546_v47, %v2022_v17  ;;  %v2025_v23 = vsel %vm1675_vm0, %v2022_v17, %v13547_v4  ;;  %v1909_v12 = vmul.f32 %v13548_v34, %v10506_v8 }
 0x200   : > { %v2366_v51 = vpack.c.bf16 %v2103_v46, %v2101_v6  ;;  %v2363_v62 = vpack.c.bf16 %v2025_v23, %v2023_v28  ;;  %v2705_v44 = vshrl.u32 %v2365_v27, 16  ;;  %v2708_v41 = vshll.u32 %v2365_v27, 16  ;;  %v9044_v46 = vpop.eup %9043 }
 0x201   : > { %v2730_v47 = vsel %vm2422_vm2, %v10929_v20, %v2729_v21  ;;  %v2374_v17 = vpack.c.bf16 %v1910_v49, %v1909_v12  ;;  %v1275_v4 = vadd.f32 1.0, %v9044_v46  ;;  %v1746_v20 = vmul.f32 %v13548_v34, %v10542_v30 }
 0x202   : > { %v2714_v58 = vshrl.u32 %v2366_v51, 16  ;;  %v2717_v13 = vshll.u32 %v2366_v51, 16  ;;  %v2687_v50 = vshrl.u32 %v2363_v62, 16  ;;  %v2690_v48 = vshll.u32 %v2363_v62, 16  ;;  %3840 = vmatprep.mubr.bf16.mxu0 %v2730_v47  ;;  %v11030_v62 = vpop.permute.xlu1 %1433 }
 0x203   : > { %v2707_v26 = vrot.slane %v2705_v44, 3  ;;  %v2710_v56 = vrot.slane %v2708_v41, 4  ;;  %v2786_v14 = vshrl.u32 %v2374_v17, 16  ;;  %v2789_v63 = vshll.u32 %v2374_v17, 16  ;;  %13550 = vst [vmem:[#allocation109_spill] sm:$0xff] %v11030_v62 }
 0x204   : > { %v2716_v6 = vrot.slane %v2714_v58, 3  ;;  %v2719_v28 = vrot.slane %v2717_v13, 4  ;;  %v2689_v23 = vrot.slane %v2687_v50, 3  ;;  %v2692_v42 = vrot.slane %v2690_v48, 4  ;;  %v11036_v58 = vpop.permute.xlu0 %1428 }
 0x205   : > { %v11024_v27 = vor.u32 %v2710_v56, %v2707_v26  ;;  %v1299_v49 = vmul.f32 %v1275_v4, %v1107_v43  ;;  %v2788_v44 = vrot.slane %v2786_v14, 3  ;;  %v1747_v41 = vmul.f32 %v13549_v24, %v10493_v61  ;;  %13551 = vst [vmem:[#allocation92_spill] sm:$0xff] %v11036_v58 }
 0x206   : > { %v11026_v51 = vor.u32 %v2719_v28, %v2716_v6  ;;  %v11032_v12 = vor.u32 %v2692_v42, %v2689_v23  ;;  %v2791_v47 = vrot.slane %v2789_v63, 4  ;;  %v2026_v50 = vrot.slane %v10574_v53, 1  ;;  %v9046_v43 = vpop.eup %9045 }
 0x207   : > { %v2712_v48 = vsel %vm2422_vm2, %v10945_v59, %v11024_v27  ;;  %v1323_v42 = vmul.f32 1.7015043, %v1299_v49  ;;  %v2372_v17 = vpack.c.bf16 %v1747_v41, %v1746_v20  ;;  %v13261_v46 = vrot.slane %v10635_v60, 1 }
 0x208   : > { %v2721_v13 = vsel %vm2422_vm2, %v10973_v11, %v11026_v51  ;;  %3728 = vmatmul.mubr.bf16.gmra.mxu1 %v2712_v48  ;;  %v11048_v14 = vsel %vm2422_vm2, %v10962_v54, %v11032_v12  ;;  %v9048_v59 = vpop.eup %9047  ;;  %v1274_v26 = vadd.f32 1.0, %v10744_v7  ;;  %v1276_v56 = vadd.f32 1.0, %v9046_v43  ;;  %v1439_v48 = vpop.permute.xlu1 %1438 }
 0x209   : > { %13552 = vst [vmem:[#allocation94_spill] sm:$0xff] %v11048_v14  ;;  %3841 = vmatmul.mubr.bf16.gmra.mxu0 %v2721_v13  ;;  %v13553_v11 = vrot.slane %v13532_v0, 7  ;;  %3735 = vmatprep.mubr.bf16.mxu1 %v11048_v14  ;;  %v11057_v28 = vor.u32 %v2791_v47, %v2788_v44  ;;  %v11060_v54 = vmul.f32 %v11030_v62, %v1323_v42  ;;  %v1277_v4 = vadd.f32 1.0, %v9048_v59  ;;  %v13556_v13 = vld [vmem:[#allocation59_spill] sm:$0xff]  ;;  %v1444_v59 = vpop.permute.xlu0 %1443 }
 0x20a   : > { %v2768_v23 = vshrl.u32 %v2372_v17, 16  ;;  %v2771_v63 = vshll.u32 %v2372_v17, 16  ;;  %v1300_v20 = vmul.f32 %v1276_v56, %v10991_v38  ;;  %v13554_v49 = vrot.slane %v10506_v8, 1 }
 0x20b   : > { %v1856_v6 = vsel %vm1817_vm1, %v13553_v11, %v10971_v55  ;;  %v2793_v7 = vsel %vm2422_vm2, %v2729_v21, %v11057_v28  ;;  %v2029_v44 = vsel %vm1675_vm0, %v2026_v50, %v13261_v46  ;;  %v11073_v41 = vmul.f32 %v10960_v35, %v11060_v54 }
 0x20c   : > { %v2027_v0 = vsel %vm1675_vm0, %v13554_v49, %v2026_v50  ;;  %v1959_v47 = vmul.f32 %v13556_v13, %v11060_v54  ;;  %v1301_v38 = vmul.f32 %v1277_v4, %v10994_v36  ;;  %3848 = vmatprep.mubr.bf16.mxu0 %v2793_v7  ;;  %v13557_v21 = vrot.slane %v10708_v32, 2 }
 0x20d   : > { %13555 = vst [vmem:[#allocation96_spill] sm:$0xff] %v11073_v41  ;;  %v13558_v43 = vrot.slane %v13543_v19, 2  ;;  %v1324_v17 = vmul.f32 1.7015043, %v1300_v20  ;;  %v11084_v50 = vmul.f32 %v1856_v6, %v11060_v54  ;;  %v2770_v56 = vrot.slane %v2768_v23, 3 }
 0x20e   : > { %v2773_v11 = vrot.slane %v2771_v63, 4  ;;  %v1298_v49 = vmul.f32 %v1274_v26, %v10988_v25  ;;  %v1325_v46 = vmul.f32 1.7015043, %v1301_v38  ;;  %v2370_v62 = vpack.c.bf16 %v2029_v44, %v2027_v0  ;;  %v13564_v63 = vld [vmem:[#allocation74_spill] sm:$0xff] }
 0x20f   : > { %v2105_v42 = vsel %vm2084_vm3, %v13558_v43, %v13557_v21  ;;  %13559 = vst [vmem:[#allocation104_spill] sm:$0xff] %v11084_v50  ;;  %v13560_v36 = vrot.slane %v10748_v37, 2  ;;  %v13561_v4 = vmov %v13557_v21  ;;  %v11093_v19 = vrot.slane %v11060_v54, 1 }
 0x210   : > { %v11095_v20 = vmul.f32 %v1439_v48, %v1324_v17  ;;  %v11097_v21 = vor.u32 %v2773_v11, %v2770_v56  ;;  %v11101_v23 = vmul.f32 %v10960_v35, %v10838_v33  ;;  %v11105_v25 = vmul.f32 %v10969_v5, %v10683_v16 }
 0x211   : > { %v2107_v7 = vsel %vm2084_vm3, %v13561_v4, %v13560_v36  ;;  %13562 = vst [vmem:[#allocation107_spill] sm:$0xff] %v11093_v19  ;;  %v1469_v26 = vmul.f32 %v1444_v59, %v1325_v46  ;;  %v2750_v32 = vshrl.u32 %v2370_v62, 16  ;;  %v2753_v38 = vshll.u32 %v2370_v62, 16 }
 0x212   : > { %13563 = vst [vmem:[#allocation59_spill] sm:$0xff] %v11095_v20  ;;  %v2373_v43 = vpack.c.bf16 %v2107_v7, %v2105_v42  ;;  %v1960_v0 = vmul.f32 %v13564_v63, %v11095_v20  ;;  %v11111_v44 = vmul.f32 %v10969_v5, %v11095_v20  ;;  %v2242_v48 = vrot.slane %v11095_v20, 1 }
 0x213   : > { %v1322_v42 = vmul.f32 1.7015043, %v1298_v49  ;;  %v11114_v17 = vmul.f32 %v1856_v6, %v1469_v26  ;;  %v11116_v56 = vrot.slane %v1469_v26, 1  ;;  %v2775_v46 = vsel %vm2422_vm2, %v11024_v27, %v11097_v21 }
 0x214   : > { %13565 = vst [vmem:[#allocation74_spill] sm:$0xff] %v11111_v44  ;;  %v11122_v11 = vpack.c.bf16 %v1960_v0, %v1959_v47  ;;  %v2243_v36 = vsel %vm1675_vm0, %v11093_v19, %v2242_v48  ;;  %3736 = vmatmul.mubr.bf16.gmra.mxu1 %v2775_v46  ;;  %v2777_v4 = vshrl.u32 %v2373_v43, 16  ;;  %v11128_v49 = vmul.f32 %v1856_v6, %v10791_v15  ;;  %v13570_v0 = vld [vmem:[#allocation50_spill] sm:$0xff]  ;;  %v13574_v19 = vld [vmem:[#allocation72_spill] sm:$0xff] }
 0x215   : > { %13566 = vst [vmem:[#allocation125_spill] sm:$0xff] %v11114_v17  ;;  %13567 = vst [vmem:[#allocation126_spill] sm:$0xff] %v11116_v56  ;;  %v2245_v7 = vsel %vm1675_vm0, %v2242_v48, %v11116_v56  ;;  %v13269_v41 = vrot.slane %v11114_v17, 2  ;;  %v2752_v59 = vrot.slane %v2750_v32, 3  ;;  %v2755_v47 = vrot.slane %v2753_v38, 4 }
 0x216   : > { %13568 = vst [vmem:[#allocation127_spill] sm:$0xff] %v11122_v11  ;;  %v11133_v27 = vpack.c.bf16 %v2245_v7, %v2243_v36  ;;  %v1911_v11 = vmul.f32 %v13570_v0, %v10635_v60  ;;  %v11140_v62 = vmul.f32 %v11036_v58, %v1322_v42  ;;  %v13571_v6 = vrot.slane %v11111_v44, 2  ;;  %v13573_v7 = vld [vmem:[#allocation52_spill] sm:$0xff] }
 0x217   : > { %v2756_v36 = vor.u32 %v2755_v47, %v2752_v59  ;;  %v2779_v32 = vrot.slane %v2777_v4, 3  ;;  %v2780_v38 = vshll.u32 %v2373_v43, 16  ;;  %v11152_v46 = vmul.f32 %v13574_v19, %v1469_v26 }
 0x218   : > { %13569 = vst [vmem:[#allocation128_spill] sm:$0xff] %v11133_v27  ;;  %v11147_v48 = vsel %vm2084_vm3, %v13571_v6, %v13269_v41  ;;  %v1912_v27 = vmul.f32 %v13573_v7, %v10556_v40  ;;  %v1748_v42 = vmul.f32 %v13570_v0, %v10506_v8  ;;  %v1749_v58 = vmul.f32 %v13573_v7, %v10574_v53 }
 0x219   : > { %13572 = vst [vmem:[#allocation129_spill] sm:$0xff] %v11147_v48  ;;  %v11161_v6 = vsel %vm2422_vm2, %v11032_v12, %v2756_v36  ;;  %v2782_v59 = vrot.slane %v2780_v38, 4  ;;  %v2030_v4 = vrot.slane %v10556_v40, 1  ;;  %v2032_v47 = vrot.slane %v10609_v31, 1 }
 0x21a   : > { %13575 = vst [vmem:[#allocation72_spill] sm:$0xff] %v11161_v6  ;;  %v2381_v43 = vpack.c.bf16 %v1912_v27, %v1911_v11  ;;  %3743 = vmatprep.mubr.bf16.mxu1 %v11161_v6  ;;  %v2379_v26 = vpack.c.bf16 %v1749_v58, %v1748_v42  ;;  %v13576_v41 = vrot.slane %v10766_v22, 2  ;;  %v13577_v5 = vrot.slane %v10748_v37, 2 }
 0x21b   : > { %v13578_v44 = vrot.slane %v10826_v18, 2  ;;  %v2783_v11 = vor.u32 %v2782_v59, %v2779_v32  ;;  %v13580_v6 = vrot.slane %v10635_v60, 1  ;;  %v2033_v0 = vsel %vm1675_vm0, %v2030_v4, %v2032_v47 }
 0x21c   : > { %v2109_v48 = vsel %vm2084_vm3, %v13577_v5, %v13576_v41  ;;  %v13579_v12 = vmov %v13576_v41  ;;  %v2849_v27 = vshrl.u32 %v2381_v43, 16  ;;  %v2852_v17 = vshll.u32 %v2381_v43, 16 }
 0x21d   : > { %v2111_v38 = vsel %vm2084_vm3, %v13579_v12, %v13578_v44  ;;  %v2031_v58 = vsel %vm1675_vm0, %v13580_v6, %v2030_v4  ;;  %v2831_v42 = vshrl.u32 %v2379_v26, 16  ;;  %v2834_v56 = vshll.u32 %v2379_v26, 16  ;;  %v13581_v6 = vld [vmem:[#allocation53_spill] sm:$0xff] }
 0x21e   : > { %v2380_v37 = vpack.c.bf16 %v2111_v38, %v2109_v48  ;;  %v2784_v5 = vsel %vm2422_vm2, %v11026_v51, %v2783_v11  ;;  %v2851_v41 = vrot.slane %v2849_v27, 3  ;;  %v2854_v7 = vrot.slane %v2852_v17, 4  ;;  %v13582_v38 = vld [vmem:[#allocation70_spill] sm:$0xff] }
 0x21f   : > { %v2377_v22 = vpack.c.bf16 %v2033_v0, %v2031_v58  ;;  %3849 = vmatmul.mubr.bf16.gmra.mxu0 %v2784_v5  ;;  %v2833_v44 = vrot.slane %v2831_v42, 3  ;;  %v2836_v32 = vrot.slane %v2834_v56, 4  ;;  %v1913_v26 = vmul.f32 %v13581_v6, %v10609_v31 }
 0x220   : > { %v2840_v59 = vshrl.u32 %v2380_v37, 16  ;;  %v2843_v43 = vshll.u32 %v2380_v37, 16  ;;  %v2855_v12 = vor.u32 %v2854_v7, %v2851_v41  ;;  %v1914_v51 = vmul.f32 %v13582_v38, %v10686_v45 }
 0x221   : > { %v2813_v14 = vshrl.u32 %v2377_v22, 16  ;;  %v2816_v20 = vshll.u32 %v2377_v22, 16  ;;  %v2837_v50 = vor.u32 %v2836_v32, %v2833_v44  ;;  %v1750_v56 = vmul.f32 %v13581_v6, %v10635_v60 }
 0x222   : > { %v2842_v4 = vrot.slane %v2840_v59, 3  ;;  %v2845_v48 = vrot.slane %v2843_v43, 4  ;;  %v2856_v17 = vsel %vm2422_vm2, %v11057_v28, %v2855_v12  ;;  %v2388_v42 = vpack.c.bf16 %v1914_v51, %v1913_v26 }
 0x223   : > { %v2815_v0 = vrot.slane %v2813_v14, 3  ;;  %v2818_v27 = vrot.slane %v2816_v20, 4  ;;  %3856 = vmatprep.mubr.bf16.mxu0 %v2856_v17  ;;  %v2838_v7 = vsel %vm2422_vm2, %v11097_v21, %v2837_v50  ;;  %v1751_v37 = vmul.f32 %v13582_v38, %v10556_v40 }
 0x224   : > { %v11192_v58 = vor.u32 %v2845_v48, %v2842_v4  ;;  %3744 = vmatmul.mubr.bf16.gmra.mxu1 %v2838_v7  ;;  %v2034_v41 = vrot.slane %v10686_v45, 1  ;;  %v2036_v14 = vrot.slane %v10838_v33, 1  ;;  %v1893_v28 = vmul.f32 %v10891_v57, %v10609_v31  ;;  %v13587_v7 = vld [vmem:[#allocation58_spill] sm:$0xff] }
 0x225   : > { %v2819_v5 = vor.u32 %v2818_v27, %v2815_v0  ;;  %v2912_v22 = vshrl.u32 %v2388_v42, 16  ;;  %v2915_v21 = vshll.u32 %v2388_v42, 16  ;;  %v2386_v44 = vpack.c.bf16 %v1751_v37, %v1750_v56  ;;  %v13586_v56 = vld [vmem:[#allocation71_spill] sm:$0xff] }
 0x226   : > { %v2847_v20 = vsel %vm2422_vm2, %v2783_v11, %v11192_v58  ;;  %v2035_v59 = vsel %vm1675_vm0, %v2032_v47, %v2034_v41  ;;  %v2037_v43 = vsel %vm1675_vm0, %v2034_v41, %v2036_v14  ;;  %v13584_v26 = vrot.slane %v10850_v10, 2 }
 0x227   : > { %v11203_v32 = vsel %vm2422_vm2, %v2756_v36, %v2819_v5  ;;  %v13585_v4 = vrot.slane %v10826_v18, 2  ;;  %3857 = vmatmul.mubr.bf16.gmra.mxu0 %v2847_v20  ;;  %v2914_v11 = vrot.slane %v2912_v22, 3  ;;  %v2917_v51 = vrot.slane %v2915_v21, 4 }
 0x228   : > { %13583 = vst [vmem:[#allocation130_spill] sm:$0xff] %v11203_v32  ;;  %3751 = vmatprep.mubr.bf16.mxu1 %v11203_v32  ;;  %v2894_v17 = vshrl.u32 %v2386_v44, 16  ;;  %v2897_v0 = vshll.u32 %v2386_v44, 16  ;;  %v2384_v27 = vpack.c.bf16 %v2037_v43, %v2035_v59  ;;  %v2114_v36 = vrot.slane %v1893_v28, 2 }
 0x229   : > { %v2113_v48 = vsel %vm2084_vm3, %v13585_v4, %v13584_v26  ;;  %v1915_v47 = vmul.f32 %v13586_v56, %v10838_v33  ;;  %v1916_v42 = vmul.f32 %v13587_v7, %v10683_v16  ;;  %v2918_v37 = vor.u32 %v2917_v51, %v2914_v11 }
 0x22a   : > { %v2896_v41 = vrot.slane %v2894_v17, 3  ;;  %v2899_v18 = vrot.slane %v2897_v0, 4  ;;  %v1752_v26 = vmul.f32 %v13586_v56, %v10609_v31  ;;  %v2876_v4 = vshrl.u32 %v2384_v27, 16 }
 0x22b   : > { %v2879_v20 = vshll.u32 %v2384_v27, 16  ;;  %v13588_v22 = vrot.slane %v10850_v10, 2  ;;  %v2395_v44 = vpack.c.bf16 %v1916_v42, %v1915_v47  ;;  %v2919_v28 = vsel %vm2422_vm2, %v2855_v12, %v2918_v37 }
 0x22c   : > { %v2900_v59 = vor.u32 %v2899_v18, %v2896_v41  ;;  %v1753_v32 = vmul.f32 %v13587_v7, %v10686_v45  ;;  %3864 = vmatprep.mubr.bf16.mxu0 %v2919_v28  ;;  %v2878_v11 = vrot.slane %v2876_v4, 3  ;;  %v2038_v12 = vrot.slane %v10683_v16, 1 }
 0x22d   : > { %v2115_v21 = vsel %vm2084_vm3, %v13588_v22, %v2114_v36  ;;  %v2881_v51 = vrot.slane %v2879_v20, 4  ;;  %v2975_v17 = vshrl.u32 %v2395_v44, 16  ;;  %v2978_v0 = vshll.u32 %v2395_v44, 16 }
 0x22e   : > { %v2387_v43 = vpack.c.bf16 %v2115_v21, %v2113_v48  ;;  %v2901_v56 = vsel %vm2422_vm2, %v2837_v50, %v2900_v59  ;;  %v2393_v10 = vpack.c.bf16 %v1753_v32, %v1752_v26  ;;  %v2039_v44 = vsel %vm1675_vm0, %v2036_v14, %v2038_v12 }
 0x22f   : > { %3752 = vmatmul.mubr.bf16.gmra.mxu1 %v2901_v56  ;;  %v2882_v22 = vor.u32 %v2881_v51, %v2878_v11  ;;  %v2977_v47 = vrot.slane %v2975_v17, 3  ;;  %v2980_v42 = vrot.slane %v2978_v0, 4  ;;  %v11232_v50 = vrot.slane %v10791_v15, 1 }
 0x230   : > { %v2903_v27 = vshrl.u32 %v2387_v43, 16  ;;  %v2906_v38 = vshll.u32 %v2387_v43, 16  ;;  %v2957_v18 = vshrl.u32 %v2393_v10, 16  ;;  %v2960_v21 = vshll.u32 %v2393_v10, 16 }
 0x231   : > { %v11228_v4 = vsel %vm2422_vm2, %v2819_v5, %v2882_v22  ;;  %v2981_v20 = vor.u32 %v2980_v42, %v2977_v47  ;;  %v13590_v28 = vrot.slane %v10938_v9, 2  ;;  %v2041_v5 = vsel %vm1675_vm0, %v2038_v12, %v11232_v50 }
 0x232   : > { %v2905_v48 = vrot.slane %v2903_v27, 3  ;;  %v2908_v41 = vrot.slane %v2906_v38, 4  ;;  %13589 = vst [vmem:[#allocation58_spill] sm:$0xff] %v11228_v4  ;;  %3759 = vmatprep.mubr.bf16.mxu1 %v11228_v4  ;;  %v2959_v56 = vrot.slane %v2957_v18, 3  ;;  %v2962_v26 = vrot.slane %v2960_v21, 4 }
 0x233   : > { %v2117_v38 = vsel %vm2084_vm3, %v2114_v36, %v13590_v28  ;;  %v2982_v43 = vsel %vm2422_vm2, %v2918_v37, %v2981_v20  ;;  %v13591_v11 = vrot.slane %v11101_v23, 2  ;;  %v13592_v14 = vmov %v13590_v28 }
 0x234   : > { %v2909_v32 = vor.u32 %v2908_v41, %v2905_v48  ;;  %v1917_v17 = vmul.f32 %v13556_v13, %v10791_v15  ;;  %v2963_v27 = vor.u32 %v2962_v26, %v2959_v56  ;;  %v2391_v10 = vpack.c.bf16 %v2041_v5, %v2039_v44 }
 0x235   : > { %v2119_v51 = vsel %vm2084_vm3, %v13592_v14, %v13591_v11  ;;  %v1918_v37 = vmul.f32 %v13564_v63, %v11140_v62  ;;  %v1754_v47 = vmul.f32 %v13556_v13, %v10838_v33  ;;  %v1755_v9 = vmul.f32 %v13564_v63, %v10683_v16 }
 0x236   : > { %v2910_v0 = vsel %vm2422_vm2, %v11192_v58, %v2909_v32  ;;  %v2394_v36 = vpack.c.bf16 %v2119_v51, %v2117_v38  ;;  %v2408_v42 = vpack.c.bf16 %v11232_v50, %v11232_v50  ;;  %v2964_v12 = vsel %vm2422_vm2, %v2900_v59, %v2963_v27 }
 0x237   : > { %3865 = vmatmul.mubr.bf16.gmra.mxu0 %v2910_v0  ;;  %v2939_v58 = vshrl.u32 %v2391_v10, 16  ;;  %v2942_v48 = vshll.u32 %v2391_v10, 16  ;;  %3760 = vmatmul.mubr.bf16.gmra.mxu1 %v2964_v12  ;;  %v2402_v21 = vpack.c.bf16 %v1918_v37, %v1917_v17  ;;  %v2400_v44 = vpack.c.bf16 %v1755_v9, %v1754_v47 }
 0x238   : > { %3872 = vmatprep.mubr.bf16.mxu0 %v2982_v43  ;;  %v2966_v41 = vshrl.u32 %v2394_v36, 16  ;;  %v2969_v18 = vshll.u32 %v2394_v36, 16  ;;  %v3092_v56 = vshrl.u32 %v2408_v42, 16  ;;  %v3095_v38 = vshll.u32 %v2408_v42, 16 }
 0x239   : > { %v2941_v26 = vrot.slane %v2939_v58, 3  ;;  %v2944_v28 = vrot.slane %v2942_v48, 4  ;;  %v3038_v63 = vshrl.u32 %v2402_v21, 16  ;;  %v3041_v11 = vshll.u32 %v2402_v21, 16 }
 0x23a   : > { %v2968_v13 = vrot.slane %v2966_v41, 3  ;;  %v2971_v5 = vrot.slane %v2969_v18, 4  ;;  %v3020_v14 = vshrl.u32 %v2400_v44, 16  ;;  %v3023_v43 = vshll.u32 %v2400_v44, 16 }
 0x23b   : > { %v11259_v51 = vor.u32 %v2944_v28, %v2941_v26  ;;  %v3094_v59 = vrot.slane %v3092_v56, 3  ;;  %v3097_v0 = vrot.slane %v3095_v38, 4  ;;  %v3040_v4 = vrot.slane %v3038_v63, 3 }
 0x23c   : > { %v2972_v10 = vor.u32 %v2971_v5, %v2968_v13  ;;  %v3043_v12 = vrot.slane %v3041_v11, 4  ;;  %v3022_v36 = vrot.slane %v3020_v14, 3  ;;  %v3025_v37 = vrot.slane %v3023_v43, 4  ;;  %v13597_v13 = vld [vmem:[#allocation84_spill] sm:$0xff]  ;;  %v13599_v5 = vld [vmem:[#allocation83_spill] sm:$0xff] }
 0x23d   : > { %v11263_v17 = vsel %vm2422_vm2, %v2882_v22, %v11259_v51  ;;  %v3098_v47 = vor.u32 %v3097_v0, %v3094_v59  ;;  %v13593_v9 = vrot.slane %v11105_v25, 2  ;;  %v13594_v42 = vrot.slane %v11101_v23, 2 }
 0x23e   : > { %3767 = vmatprep.mubr.bf16.mxu1 %v11263_v17  ;;  %v2973_v48 = vsel %vm2422_vm2, %v2909_v32, %v2972_v10  ;;  %v3044_v41 = vor.u32 %v3043_v12, %v3040_v4  ;;  %v13595_v18 = vrot.slane %v11128_v49, 2  ;;  %v1919_v44 = vmul.f32 %v13574_v19, %v11060_v54  ;;  %v13601_v12 = vld [vmem:[#allocation90_spill] sm:$0xff] }
 0x23f   : > { %v2121_v58 = vsel %vm2084_vm3, %v13594_v42, %v13593_v9  ;;  %v13596_v21 = vmov %v13593_v9  ;;  %3873 = vmatmul.mubr.bf16.gmra.mxu0 %v2973_v48  ;;  %v3026_v56 = vor.u32 %v3025_v37, %v3022_v36  ;;  %v3099_v23 = vsel %vm2422_vm2, %v11259_v51, %v3098_v47 }
 0x240   : > { %v2123_v22 = vsel %vm2084_vm3, %v13596_v21, %v13595_v18  ;;  %v1756_v28 = vmul.f32 %v13574_v19, %v10791_v15  ;;  %v3045_v4 = vsel %vm2422_vm2, %v2981_v20, %v3044_v41  ;;  %v2410_v32 = vpack.c.bf16 %v1919_v44, %v1919_v44 }
 0x241   : > { %v2401_v26 = vpack.c.bf16 %v2123_v22, %v2121_v58  ;;  %v1920_v25 = vmul.f32 %v13487_v3, %v10404_v29  ;;  %v13598_v38 = vrot.slane %v13597_v13, 2  ;;  %v13600_v63 = vrot.slane %v13599_v5, 2  ;;  %3880 = vmatprep.mubr.bf16.mxu0 %v3045_v4 }
 0x242   : > { %v3027_v11 = vsel %vm2422_vm2, %v2963_v27, %v3026_v56  ;;  %v2407_v59 = vpack.c.bf16 %v1756_v28, %v1756_v28  ;;  %v3110_v19 = vshrl.u32 %v2410_v32, 16  ;;  %v3113_v0 = vshll.u32 %v2410_v32, 16 }
 0x243   : > { %v2182_v54 = vsel %vm2084_vm3, %v13600_v63, %v13598_v38  ;;  %v3029_v14 = vshrl.u32 %v2401_v26, 16  ;;  %v3032_v43 = vshll.u32 %v2401_v26, 16  ;;  %3768 = vmatmul.mubr.bf16.gmra.mxu1 %v3027_v11  ;;  %v2178_v20 = vrot.slane %v1920_v25, 2 }
 0x244   : > { %v13602_v36 = vrot.slane %v13601_v12, 2  ;;  %v13603_v29 = vmov %v13598_v38  ;;  %3775 = vmatprep.mubr.bf16.mxu1 %v3099_v23  ;;  %v3083_v42 = vshrl.u32 %v2407_v59, 16  ;;  %v3086_v58 = vshll.u32 %v2407_v59, 16 }
 0x245   : > { %v3031_v47 = vrot.slane %v3029_v14, 3  ;;  %v3034_v9 = vrot.slane %v3032_v43, 4  ;;  %v3112_v48 = vrot.slane %v3110_v19, 3  ;;  %v3115_v27 = vrot.slane %v3113_v0, 4 }
 0x246   : > { %v2184_v37 = vsel %vm2084_vm3, %v13603_v29, %v13602_v36  ;;  %v13604_v18 = vmov %v13600_v63  ;;  %v3085_v26 = vrot.slane %v3083_v42, 3  ;;  %v3088_v28 = vrot.slane %v3086_v58, 4 }
 0x247   : > { %v2180_v21 = vsel %vm2084_vm3, %v2178_v20, %v13604_v18  ;;  %v2347_v22 = vpack.c.bf16 %v2184_v37, %v2182_v54  ;;  %v11300_v44 = vor.u32 %v3034_v9, %v3031_v47  ;;  %v3116_v32 = vor.u32 %v3115_v27, %v3112_v48  ;;  %v13606_v18 = vld [vmem:[#allocation93_spill] sm:$0xff] }
 0x248   : > { %v2338_v4 = vpack.c.bf16 %v2180_v21, %v2178_v20  ;;  %v1898_v23 = vmul.f32 %v10971_v55, %v11140_v62  ;;  %v3089_v63 = vor.u32 %v3088_v28, %v3085_v26  ;;  %v2340_v36 = vpack.c.bf16 %v10821_v1, %v10798_v2 }
 0x249   : > { %v2517_v25 = vshrl.u32 %v2347_v22, 16  ;;  %v2520_v13 = vshll.u32 %v2347_v22, 16  ;;  %v3036_v38 = vsel %vm2422_vm2, %v2972_v10, %v11300_v44  ;;  %v3117_v54 = vsel %vm2422_vm2, %v3044_v41, %v3116_v32  ;;  %v13609_v22 = vld [vmem:[#allocation99_spill] sm:$0xff] }
 0x24a   : > { %v2509_v11 = vshrl.u32 %v2338_v4, 16  ;;  %v2512_v5 = vshll.u32 %v2338_v4, 16  ;;  %3881 = vmatmul.mubr.bf16.gmra.mxu0 %v3036_v38  ;;  %v2124_v59 = vrot.slane %v1898_v23, 2  ;;  %v3090_v19 = vsel %vm2422_vm2, %v3026_v56, %v3089_v63  ;;  %v13612_v63 = vld [vmem:[#allocation60_spill] sm:$0xff] }
 0x24b   : > { %v2519_v14 = vrot.slane %v2517_v25, 3  ;;  %v2522_v43 = vrot.slane %v2520_v13, 4  ;;  %3888 = vmatprep.mubr.bf16.mxu0 %v3117_v54  ;;  %3776 = vmatmul.mubr.bf16.gmra.mxu1 %v3090_v19  ;;  %v13605_v10 = vrot.slane %v11128_v49, 2  ;;  %v2492_v47 = vshrl.u32 %v10715_v39, 16  ;;  %v13613_v54 = vld [vmem:[#allocation79_spill] sm:$0xff]  ;;  %v13616_v19 = vld [vmem:[#allocation32_spill] sm:$0xff] }
 0x24c   : > { %v2511_v0 = vrot.slane %v2509_v11, 3  ;;  %v2514_v20 = vrot.slane %v2512_v5, 4  ;;  %v2495_v41 = vshll.u32 %v10715_v39, 16  ;;  %v2543_v58 = vshrl.u32 %v2340_v36, 16 }
 0x24d   : > { %v2523_v29 = vor.u32 %v2522_v43, %v2519_v14  ;;  %v2125_v37 = vsel %vm2084_vm3, %v13605_v10, %v2124_v59  ;;  %v2546_v48 = vshll.u32 %v2340_v36, 16  ;;  %v2494_v56 = vrot.slane %v2492_v47, 3  ;;  %v13614_v14 = vld [vmem:[#allocation63_spill] sm:$0xff]  ;;  %v13615_v59 = vld [vmem:[#allocation81_spill] sm:$0xff] }
 0x24e   : > { %v2515_v9 = vor.u32 %v2514_v20, %v2511_v0  ;;  %v2409_v42 = vpack.c.bf16 %v2125_v37, %v2125_v37  ;;  %v2497_v27 = vrot.slane %v2495_v41, 4  ;;  %v13607_v21 = vrot.slane %v13606_v18, 2  ;;  %v13617_v36 = vld [vmem:[#allocation117_spill] sm:$0xff]  ;;  %v8866_v41 = vld [vmem:[#allocation6 + $0x230] sm:$0xff]  }
 0x24f   : > { %v13608_v2 = vrot.slane %v13601_v12, 2  ;;  %v13610_v49 = vrot.slane %v13609_v22, 2  ;;  %v2545_v25 = vrot.slane %v2543_v58, 3  ;;  %v2548_v13 = vrot.slane %v2546_v48, 4  ;;  %v13619_v58 = vld [vmem:[#allocation66_spill] sm:$0xff] }
 0x250   : > { %v13611_v26 = vmov %v13607_v21  ;;  %v2524_v39 = vsel %vm2422_vm2, %v2515_v9, %v2523_v29  ;;  %v3101_v4 = vshrl.u32 %v2409_v42, 16  ;;  %v3104_v32 = vshll.u32 %v2409_v42, 16  ;;  %v13618_v42 = vld [vmem:[#allocation80_spill] sm:$0xff] }
 0x251   : > { %v2186_v1 = vsel %vm2084_vm3, %v13608_v2, %v13607_v21  ;;  %v2188_v28 = vsel %vm2084_vm3, %v13611_v26, %v13610_v49  ;;  %3929 = vmatprep.mubr.bf16.mxu1 %v2524_v39  ;;  %v2498_v23 = vor.u32 %v2497_v27, %v2494_v56  ;;  %v1941_v12 = vmul.f32 %v13612_v63, %v10426_v52  ;;  %v13620_v56 = vld [vmem:[#allocation101_spill] sm:$0xff]  ;;  %v13623_v2 = vld [vmem:[#allocation120_spill] sm:$0xff] }
 0x252   : > { %v2354_v38 = vpack.c.bf16 %v2188_v28, %v2186_v1  ;;  %v3103_v11 = vrot.slane %v3101_v4, 3  ;;  %v3106_v5 = vrot.slane %v3104_v32, 4  ;;  %v1942_v43 = vmul.f32 %v13614_v14, %v13613_v54  ;;  %v13624_v28 = vld [vmem:[#allocation103_spill] sm:$0xff] }
 0x253   : > { %v1943_v0 = vmul.f32 %v13616_v19, %v13615_v59  ;;  %v2549_v20 = vor.u32 %v2548_v13, %v2545_v25  ;;  %v2507_v10 = vsel %vm2422_vm2, %v2498_v23, %v13617_v36  ;;  %v1944_v48 = vmul.f32 %v13619_v58, %v13618_v42  ;;  %v13627_v13 = vld [vmem:[#allocation121_spill] sm:$0xff]  ;;  %v13629_v59 = vld [vmem:[#allocation82_spill] sm:$0xff] }
 0x254   : > { %v2606_v37 = vshrl.u32 %v2354_v38, 16  ;;  %v2609_v47 = vshll.u32 %v2354_v38, 16  ;;  %v3107_v9 = vor.u32 %v3106_v5, %v3103_v11  ;;  %v2339_v52 = vpack.c.bf16 %v1942_v43, %v1941_v12  ;;  %3930 = vmatmul.mubr.bf16.vlgmr.msra.gmra.mxu1 %v2507_v10  ;;  %v13628_v12 = vld [vmem:[#allocation115_spill] sm:$0xff] }
 0x255   : > { %v13621_v27 = vrot.slane %v13620_v56, 2  ;;  %v13622_v18 = vmov %v13610_v49  ;;  %v2558_v1 = vsel %vm2422_vm2, %v2549_v20, %v13623_v2  ;;  %v13625_v39 = vrot.slane %v13624_v28, 2  ;;  %8442 = vmatpush3.bf16.msra.mxu1 %v13627_v13  ;;  %v13630_v20 = vld [vmem:[#allocation67_spill] sm:$0xff]  ;;  %v13632_v56 = vld [vmem:[#allocation34_spill] sm:$0xff] }
 0x256   : > { %v2608_v49 = vrot.slane %v2606_v37, 3  ;;  %v2611_v26 = vrot.slane %v2609_v47, 4  ;;  %v3108_v25 = vsel %vm2422_vm2, %v11300_v44, %v3107_v9  ;;  %v2348_v22 = vpack.c.bf16 %v1944_v48, %v1943_v0  ;;  %8443 = vmatprep.subr.bf16.mxu1 %v8866_v41  ;;  %v8867_v10 = vld [vmem:[#allocation6 + $0x228] sm:$0xff]  }
 0x257   : > { %v2190_v21 = vsel %vm2084_vm3, %v13622_v18, %v13621_v27  ;;  %v13626_v4 = vmov %v13621_v27  ;;  %v2526_v23 = vshrl.u32 %v2339_v52, 16  ;;  %v2529_v38 = vshll.u32 %v2339_v52, 16  ;;  %3889 = vmatmul.mubr.bf16.gmra.mxu0 %v3108_v25  ;;  %v13631_v52 = vld [vmem:[#allocation88_spill] sm:$0xff]  ;;  %v13640_v28 = vld [vmem:[#allocation38_spill] sm:$0xff] }
 0x258   : > { %v2192_v32 = vsel %vm2084_vm3, %v13626_v4, %v13625_v39  ;;  %v2612_v5 = vor.u32 %v2611_v26, %v2608_v49  ;;  %v1945_v36 = vmul.f32 %v13630_v20, %v13629_v59  ;;  %4042 = vmatprep.mubr.bf16.mxu0 %v2558_v1  ;;  %v2534_v42 = vshrl.u32 %v2348_v22, 16  ;;  %v13633_v49 = vld [vmem:[#allocation105_spill] sm:$0xff] }
 0x259   : > { %v2361_v43 = vpack.c.bf16 %v2192_v32, %v2190_v21  ;;  %v2528_v37 = vrot.slane %v2526_v23, 3  ;;  %v2531_v47 = vrot.slane %v2529_v38, 4  ;;  %v2537_v44 = vshll.u32 %v2348_v22, 16  ;;  %8444 = vmatpush3.bf16.msra.mxu1 %v8866_v41  ;;  %v8868_v38 = vld [vmem:[#allocation6 + $0x220] sm:$0xff]   ;;  %v13639_v41 = vld [vmem:[#allocation36_spill] sm:$0xff] }
 0x25a   : > { %v2613_v9 = vsel %vm2422_vm2, %v2523_v29, %v2612_v5  ;;  %v1946_v27 = vmul.f32 %v13632_v56, %v13631_v52  ;;  %v2536_v21 = vrot.slane %v2534_v42, 3  ;;  %v13634_v26 = vrot.slane %v13633_v49, 2  ;;  %v13636_v29 = vld [vmem:[#allocation108_spill] sm:$0xff]  ;;  %8445 = vmatprep.subr.bf16.mxu1 %v8867_v10  ;;  %v13641_v42 = vld [vmem:[#allocation122_spill] sm:$0xff] }
 0x25b   : > { %v2669_v0 = vshrl.u32 %v2361_v43, 16  ;;  %v2672_v48 = vshll.u32 %v2361_v43, 16  ;;  %3937 = vmatprep.mubr.bf16.mxu1 %v2613_v9  ;;  %v2532_v18 = vor.u32 %v2531_v47, %v2528_v37  ;;  %v2539_v2 = vrot.slane %v2537_v44, 4 }
 0x25c   : > { %v13635_v1 = vmov %v13625_v39  ;;  %v2355_v25 = vpack.c.bf16 %v1946_v27, %v1945_v36  ;;  %v13637_v13 = vrot.slane %v13636_v29, 2  ;;  %v13638_v22 = vmov %v13634_v26  ;;  %3938 = vmatmul.mubr.bf16.gmra.mxu1 %v13641_v42  ;;  %v8869_v29 = vld [vmem:[#allocation6 + $0x218] sm:$0xff]  }
 0x25d   : > { %v2194_v39 = vsel %vm2084_vm3, %v13635_v1, %v13634_v26  ;;  %v2671_v4 = vrot.slane %v2669_v0, 3  ;;  %v2674_v32 = vrot.slane %v2672_v48, 4  ;;  %v2540_v43 = vor.u32 %v2539_v2, %v2536_v21  ;;  %v13642_v0 = vld [vmem:[#allocation110_spill] sm:$0xff]  ;;  %8446 = vmatpush3.bf16.msra.mxu1 %v8867_v10 }
 0x25e   : > { %v2196_v23 = vsel %vm2084_vm3, %v13638_v22, %v13637_v13  ;;  %v1947_v37 = vmul.f32 %v13639_v41, %v10542_v30  ;;  %v1948_v47 = vmul.f32 %v13640_v28, %v10493_v61  ;;  %v2615_v36 = vshrl.u32 %v2355_v25, 16  ;;  %8447 = vmatprep.subr.bf16.mxu1 %v8868_v38 }
 0x25f   : > { %v2368_v59 = vpack.c.bf16 %v2196_v23, %v2194_v39  ;;  %v2675_v44 = vor.u32 %v2674_v32, %v2671_v4  ;;  %v2618_v9 = vshll.u32 %v2355_v25, 16  ;;  %v13643_v48 = vrot.slane %v13642_v0, 2  ;;  %v13645_v4 = vld [vmem:[#allocation112_spill] sm:$0xff] }
 0x260   : > { %v13644_v52 = vmov %v13637_v13  ;;  %v2541_v21 = vsel %vm2422_vm2, %v2532_v18, %v2540_v43  ;;  %v2362_v26 = vpack.c.bf16 %v1948_v47, %v1947_v37  ;;  %v2617_v39 = vrot.slane %v2615_v36, 3  ;;  %v13648_v23 = vld [vmem:[#allocation124_spill] sm:$0xff]  ;;  %v13649_v47 = vld [vmem:[#allocation118_spill] sm:$0xff]  ;;  %v13650_v36 = vld [vmem:[#allocation43_spill] sm:$0xff] }
 0x261   : > { %v2198_v27 = vsel %vm2084_vm3, %v13644_v52, %v13643_v48  ;;  %v2732_v2 = vshrl.u32 %v2368_v59, 16  ;;  %v2735_v49 = vshll.u32 %v2368_v59, 16  ;;  %4043 = vmatmul.mubr.bf16.vlgmr.msra.gmra.mxu0 %v2541_v21  ;;  %v2676_v1 = vsel %vm2422_vm2, %v2612_v5, %v2675_v44  ;;  %v13652_v52 = vld [vmem:[#allocation123_spill] sm:$0xff]  ;;  %8448 = vmatpush3.bf16.msra.mxu1 %v8868_v38 }
 0x262   : > { %v2620_v13 = vrot.slane %v2618_v9, 4  ;;  %v13646_v32 = vrot.slane %v13645_v4, 2  ;;  %v13647_v25 = vmov %v13643_v48  ;;  %4050 = vmatprep.mubr.bf16.mxu0 %v13648_v23  ;;  %3945 = vmatprep.mubr.bf16.mxu1 %v2676_v1  ;;  %v2678_v37 = vshrl.u32 %v2362_v26, 16  ;;  %v13651_v48 = vld [vmem:[#allocation44_spill] sm:$0xff] }
 0x263   : > { %v2734_v18 = vrot.slane %v2732_v2, 3  ;;  %v2737_v59 = vrot.slane %v2735_v49, 4  ;;  %v2681_v10 = vshll.u32 %v2362_v26, 16  ;;  %v2205_v42 = vrot.slane %v13649_v47, 2  ;;  %v13653_v47 = vld [vmem:[#allocation113_spill] sm:$0xff]  ;;  %8449 = vmatprep.subr.bf16.mxu1 %v8869_v29 }
 0x264   : > { %v2200_v22 = vsel %vm2084_vm3, %v13647_v25, %v13646_v32  ;;  %v1949_v9 = vmul.f32 %v13650_v36, %v10506_v8  ;;  %v1950_v0 = vmul.f32 %v13651_v48, %v10574_v53  ;;  %v11393_v32 = vmul.f32 %v10960_v35, %v10791_v15  ;;  %v8870_v48 = vld [vmem:[#allocation6 + $0x210] sm:$0xff]   ;;  %3946 = vmatmul.mubr.bf16.gmra.mxu1 %v13648_v23 }
 0x265   : > { %v2375_v5 = vpack.c.bf16 %v2200_v22, %v2198_v27  ;;  %v2621_v1 = vor.u32 %v2620_v13, %v2617_v39  ;;  %v2738_v2 = vor.u32 %v2737_v59, %v2734_v18  ;;  %v13654_v27 = vrot.slane %v13653_v47, 2  ;;  %8450 = vmatpush3.bf16.msra.mxu1 %v8869_v29  ;;  %v8871_v47 = vld [vmem:[#allocation6 + $0x208] sm:$0xff]  }
 0x266   : > { %v2369_v25 = vpack.c.bf16 %v1950_v0, %v1949_v9  ;;  %v13655_v22 = vrot.slane %v13645_v4, 2  ;;  %v11402_v21 = vpack.c.bf16 %v11152_v46, %v11152_v46  ;;  %v2680_v35 = vrot.slane %v2678_v37, 3  ;;  %8451 = vmatprep.subr.bf16.mxu1 %v8870_v48 }
 0x267   : > { %v2795_v49 = vshrl.u32 %v2375_v5, 16  ;;  %v2798_v26 = vshll.u32 %v2375_v5, 16  ;;  %v2683_v36 = vrot.slane %v2681_v10, 4  ;;  %v1951_v38 = vmul.f32 %v13548_v34, %v10635_v60 }
 0x268   : > { %v2202_v11 = vsel %vm2084_vm3, %v13655_v22, %v13654_v27  ;;  %v2739_v39 = vsel %vm2422_vm2, %v2675_v44, %v2738_v2  ;;  %v13656_v4 = vrot.slane %v13628_v12, 2  ;;  %v13657_v59 = vmov %v13654_v27  ;;  %v13658_v44 = vld [vmem:[#allocation104_spill] sm:$0xff]  ;;  %v13659_v27 = vld [vmem:[#allocation59_spill] sm:$0xff]  ;;  %v13660_v22 = vld [vmem:[#allocation94_spill] sm:$0xff] }
 0x269   : > { %v2797_v13 = vrot.slane %v2795_v49, 3  ;;  %v2800_v18 = vrot.slane %v2798_v26, 4  ;;  %v2622_v46 = vsel %vm2422_vm2, %v2540_v43, %v2621_v1  ;;  %3953 = vmatprep.mubr.bf16.mxu1 %v2739_v39  ;;  %v2741_v37 = vshrl.u32 %v2369_v25, 16  ;;  %8452 = vmatpush3.bf16.msra.mxu1 %v8870_v48 }
 0x26a   : > { %v2204_v5 = vsel %vm2084_vm3, %v13657_v59, %v13656_v4  ;;  %v1952_v9 = vmul.f32 %v13549_v24, %v10556_v40  ;;  %4051 = vmatmul.mubr.bf16.gmra.mxu0 %v2622_v46  ;;  %v2744_v49 = vshll.u32 %v2369_v25, 16  ;;  %v1935_v26 = vmul.f32 %v10891_v57, %v10838_v33  ;;  %8453 = vmatprep.subr.bf16.mxu1 %v8871_v47 }
 0x26b   : > { %v2382_v10 = vpack.c.bf16 %v2204_v5, %v2202_v11  ;;  %v11422_v43 = vmul.f32 %v10971_v55, %v13659_v27  ;;  %v3137_v11 = vshrl.u32 %v11402_v21, 16  ;;  %4058 = vmatprep.mubr.bf16.mxu0 %v13660_v22  ;;  %v2801_v29 = vor.u32 %v2800_v18, %v2797_v13  ;;  %v13662_v13 = vld [vmem:[#allocation52_spill] sm:$0xff] }
 0x26c   : > { %v2376_v39 = vpack.c.bf16 %v1952_v9, %v1951_v38  ;;  %v3140_v4 = vshll.u32 %v11402_v21, 16  ;;  %v2207_v25 = vrot.slane %v1935_v26, 2  ;;  %v2684_v46 = vor.u32 %v2683_v36, %v2680_v35  ;;  %v8872_v21 = vld [vmem:[#allocation6 + $0x200] sm:$0xff]   ;;  %3954 = vmatmul.mubr.bf16.gmra.mxu1 %v13660_v22 }
 0x26d   : > { %v2858_v59 = vshrl.u32 %v2382_v10, 16  ;;  %v2861_v5 = vshll.u32 %v2382_v10, 16  ;;  %v2743_v0 = vrot.slane %v2741_v37, 3  ;;  %v2746_v34 = vrot.slane %v2744_v49, 4  ;;  %v13663_v36 = vld [vmem:[#allocation50_spill] sm:$0xff]  ;;  %8454 = vmatpush3.bf16.msra.mxu1 %v8871_v47 }
 0x26e   : > { %v2804_v23 = vshrl.u32 %v2376_v39, 16  ;;  %v2807_v24 = vshll.u32 %v2376_v39, 16  ;;  %v13661_v27 = vrot.slane %v13628_v12, 2  ;;  %v2208_v41 = vsel %vm2084_vm3, %v2205_v42, %v2207_v25  ;;  %8455 = vmatprep.subr.bf16.mxu1 %v8872_v21 }
 0x26f   : > { %v1954_v38 = vmul.f32 %v13662_v13, %v10686_v45  ;;  %v2802_v18 = vsel %vm2422_vm2, %v2738_v2, %v2801_v29  ;;  %v1953_v35 = vmul.f32 %v13663_v36, %v10609_v31  ;;  %v13664_v48 = vrot.slane %v13652_v52, 2  ;;  %v13668_v52 = vld [vmem:[#allocation72_spill] sm:$0xff] }
 0x270   : > { %v2206_v28 = vsel %vm2084_vm3, %v13661_v27, %v2205_v42  ;;  %v2860_v12 = vrot.slane %v2858_v59, 3  ;;  %v2863_v9 = vrot.slane %v2861_v5, 4  ;;  %v2806_v42 = vrot.slane %v2804_v23, 3  ;;  %3961 = vmatprep.mubr.bf16.mxu1 %v2802_v18 }
 0x271   : > { %v2389_v10 = vpack.c.bf16 %v2208_v41, %v2206_v28  ;;  %v2210_v37 = vsel %vm2084_vm3, %v2207_v25, %v13664_v48  ;;  %v2809_v49 = vrot.slane %v2807_v24, 4  ;;  %v2685_v26 = vsel %vm2422_vm2, %v2621_v1, %v2684_v46  ;;  %v13667_v24 = vld [vmem:[#allocation126_spill] sm:$0xff]  ;;  %8456 = vmatpush3.bf16.msra.mxu1 %v8872_v21 }
 0x272   : > { %v2383_v39 = vpack.c.bf16 %v1954_v38, %v1953_v35  ;;  %v13665_v2 = vrot.slane %v11393_v32, 2  ;;  %v13666_v41 = vmov %v13664_v48  ;;  %v2149_v27 = vrot.slane %v11140_v62, 1  ;;  %4059 = vmatmul.mubr.bf16.gmra.mxu0 %v2685_v26 }
 0x273   : > { %v2217_v25 = vrot.slane %v11422_v43, 2  ;;  %v2921_v22 = vshrl.u32 %v2389_v10, 16  ;;  %v2924_v59 = vshll.u32 %v2389_v10, 16  ;;  %v11450_v1 = vpack.c.bf16 %v13667_v24, %v13667_v24  ;;  %4066 = vmatprep.mubr.bf16.mxu0 %v13668_v52  ;;  %v13669_v10 = vld [vmem:[#allocation70_spill] sm:$0xff]  ;;  %v13672_v24 = vld [vmem:[#allocation128_spill] sm:$0xff] }
 0x274   : > { %v2212_v28 = vsel %vm2084_vm3, %v13666_v41, %v13665_v2  ;;  %v11452_v5 = vrot.slane %v3137_v11, 3  ;;  %v11454_v38 = vrot.slane %v3140_v4, 4  ;;  %v2747_v18 = vor.u32 %v2746_v34, %v2743_v0  ;;  %v13670_v2 = vld [vmem:[#allocation107_spill] sm:$0xff]  ;;  %3962 = vmatmul.mubr.bf16.gmra.mxu1 %v13668_v52  ;;  %v13673_v52 = vld [vmem:[#allocation130_spill] sm:$0xff] }
 0x275   : > { %v2396_v23 = vpack.c.bf16 %v2212_v28, %v2210_v37  ;;  %v2864_v35 = vor.u32 %v2863_v9, %v2860_v12  ;;  %v11457_v47 = vor.u32 %v2809_v49, %v2806_v42  ;;  %v1955_v43 = vmul.f32 %v13581_v6, %v10838_v33  ;;  %v13671_v49 = vld [vmem:[#allocation76_spill] sm:$0xff] }
 0x276   : > { %v1956_v48 = vmul.f32 %v13669_v10, %v10683_v16  ;;  %v2867_v37 = vshrl.u32 %v2383_v39, 16  ;;  %v2870_v26 = vshll.u32 %v2383_v39, 16  ;;  %v2150_v11 = vsel %vm1675_vm0, %v11232_v50, %v2149_v27 }
 0x277   : > { %v2152_v4 = vsel %vm1675_vm0, %v2149_v27, %v13670_v2  ;;  %v2923_v41 = vrot.slane %v2921_v22, 3  ;;  %v2926_v34 = vrot.slane %v2924_v59, 4  ;;  %v2984_v0 = vshrl.u32 %v2396_v23, 16 }
 0x278   : > { %v2398_v12 = vpack.c.bf16 %v2152_v4, %v2150_v11  ;;  %v2748_v9 = vsel %vm2422_vm2, %v2684_v46, %v2747_v18  ;;  %v2987_v42 = vshll.u32 %v2396_v23, 16  ;;  %v1938_v28 = vmul.f32 %v13671_v49, %v11140_v62 }
 0x279   : > { %v3065_v10 = vshrl.u32 %v13672_v24, 16  ;;  %v2865_v50 = vsel %vm2422_vm2, %v2801_v29, %v2864_v35  ;;  %v11473_v39 = vpack.c.bf16 %v1956_v48, %v1955_v43  ;;  %v2811_v22 = vsel %vm2422_vm2, %v2747_v18, %v11457_v47 }
 0x27a   : > { %v3002_v27 = vshrl.u32 %v2398_v12, 16  ;;  %v3005_v21 = vshll.u32 %v2398_v12, 16  ;;  %3969 = vmatprep.mubr.bf16.mxu1 %v2865_v50  ;;  %v2869_v59 = vrot.slane %v2867_v37, 3  ;;  %v2872_v46 = vrot.slane %v2870_v26, 4  ;;  %4067 = vmatmul.mubr.bf16.gmra.mxu0 %v2748_v9  ;;  %v13677_v50 = vld [vmem:[#allocation127_spill] sm:$0xff] }
 0x27b   : > { %v2213_v23 = vrot.slane %v1938_v28, 2  ;;  %v11477_v11 = vor.u32 %v2926_v34, %v2923_v41  ;;  %v2986_v4 = vrot.slane %v2984_v0, 3  ;;  %4074 = vmatprep.mubr.bf16.mxu0 %v13673_v52  ;;  %v2989_v29 = vrot.slane %v2987_v42, 4 }
 0x27c   : > { %v3004_v49 = vrot.slane %v3002_v27, 3  ;;  %v3007_v6 = vrot.slane %v3005_v21, 4  ;;  %v13674_v43 = vrot.slane %v11393_v32, 2  ;;  %v13675_v12 = vrot.slane %v13658_v44, 2  ;;  %3970 = vmatmul.mubr.bf16.gmra.mxu1 %v13673_v52 }
 0x27d   : > { %v3067_v37 = vrot.slane %v3065_v10, 3  ;;  %v3068_v41 = vshll.u32 %v13672_v24, 16  ;;  %v2930_v42 = vshrl.u32 %v11473_v39, 16  ;;  %v2933_v32 = vshll.u32 %v11473_v39, 16 }
 0x27e   : > { %v2214_v48 = vsel %vm2084_vm3, %v13674_v43, %v2213_v23  ;;  %v2216_v18 = vsel %vm2084_vm3, %v2213_v23, %v13675_v12  ;;  %v11486_v26 = vor.u32 %v3007_v6, %v3004_v49  ;;  %v13676_v34 = vmov %v13675_v12 }
 0x27f   : > { %v2403_v9 = vpack.c.bf16 %v2216_v18, %v2214_v48  ;;  %v2218_v0 = vsel %vm2084_vm3, %v13676_v34, %v2217_v25  ;;  %v3056_v27 = vshrl.u32 %v13677_v50, 16  ;;  %v3070_v23 = vrot.slane %v3068_v41, 4 }
 0x280   : > { %v2412_v28 = vpack.c.bf16 %v2218_v0, %v2218_v0  ;;  %v11498_v10 = vsel %vm2422_vm2, %v11259_v51, %v11486_v26  ;;  %v2928_v44 = vsel %vm2422_vm2, %v2864_v35, %v11477_v11  ;;  %v2990_v24 = vor.u32 %v2989_v29, %v2986_v4  ;;  %v13678_v29 = vld [vmem:[#allocation58_spill] sm:$0xff] }
 0x281   : > { %v3047_v6 = vshrl.u32 %v2403_v9, 16  ;;  %v3050_v21 = vshll.u32 %v2403_v9, 16  ;;  %v1958_v48 = vmul.f32 %v13587_v7, %v11140_v62  ;;  %v3071_v12 = vor.u32 %v3070_v23, %v3067_v37  ;;  %3977 = vmatprep.mubr.bf16.mxu1 %v2928_v44  ;;  %v13679_v7 = vld [vmem:[#allocation71_spill] sm:$0xff] }
 0x282   : > { %v3128_v25 = vshrl.u32 %v2412_v28, 16  ;;  %v3131_v49 = vshll.u32 %v2412_v28, 16  ;;  %v3058_v34 = vrot.slane %v3056_v27, 3  ;;  %v3059_v9 = vshll.u32 %v13677_v50, 16  ;;  %4075 = vmatmul.mubr.bf16.gmra.mxu0 %v2811_v22 }
 0x283   : > { %v3049_v39 = vrot.slane %v3047_v6, 3  ;;  %v3052_v43 = vrot.slane %v3050_v21, 4  ;;  %v11508_v35 = vsel %vm2422_vm2, %v11486_v26, %v3071_v12  ;;  %v3146_v4 = vshrl.u32 %v11450_v1, 16  ;;  %4082 = vmatprep.mubr.bf16.mxu0 %v13678_v29 }
 0x284   : > { %v3130_v51 = vrot.slane %v3128_v25, 3  ;;  %v3133_v18 = vrot.slane %v3131_v49, 4  ;;  %v3149_v52 = vshll.u32 %v11450_v1, 16  ;;  %v1957_v37 = vmul.f32 %v13679_v7, %v10791_v15  ;;  %v13680_v49 = vld [vmem:[#allocation97_spill] sm:$0xff]  ;;  %3978 = vmatmul.mubr.bf16.gmra.mxu1 %v13678_v29 }
 0x285   : > { %v3053_v41 = vor.u32 %v3052_v43, %v3049_v39  ;;  %v3061_v28 = vrot.slane %v3059_v9, 4  ;;  %v2411_v50 = vpack.c.bf16 %v13670_v2, %v13670_v2  ;;  %v2873_v22 = vor.u32 %v2872_v46, %v2869_v59  ;;  %v13681_v59 = vld [vmem:[#allocation98_spill] sm:$0xff] }
 0x286   : > { %v3134_v0 = vor.u32 %v3133_v18, %v3130_v51  ;;  %v3148_v6 = vrot.slane %v3146_v4, 3  ;;  %v3151_v21 = vrot.slane %v3149_v52, 4  ;;  %v2397_v23 = vpack.c.bf16 %v1958_v48, %v1957_v37  ;;  %v13682_v37 = vld [vmem:[#allocation85_spill] sm:$0xff] }
 0x287   : > { %v3054_v27 = vsel %vm2422_vm2, %v2990_v24, %v3053_v41  ;;  %v3119_v1 = vshrl.u32 %v2411_v50, 16  ;;  %v3122_v25 = vshll.u32 %v2411_v50, 16  ;;  %v11523_v39 = vmul.f32 %v13680_v49, %v10542_v30 }
 0x288   : > { %v11519_v44 = vsel %vm2422_vm2, %v3053_v41, %v3134_v0  ;;  %v11525_v43 = vor.u32 %v3061_v28, %v3058_v34  ;;  %v3152_v51 = vor.u32 %v3151_v21, %v3148_v6  ;;  %v1962_v2 = vmul.f32 %v13487_v3, %v13613_v54  ;;  %v13688_v28 = vld [vmem:[#allocation106_spill] sm:$0xff]  ;;  %v13689_v21 = vld [vmem:[#allocation61_spill] sm:$0xff] }
 0x289   : > { %v11531_v46 = vmul.f32 %v13681_v59, %v10493_v61  ;;  %v1982_v48 = vmul.f32 0.0, %v10971_v55  ;;  %v3121_v18 = vrot.slane %v3119_v1, 3  ;;  %v3124_v9 = vrot.slane %v3122_v25, 4 }
 0x28a   : > { %v2991_v30 = vsel %vm2422_vm2, %v11477_v11, %v2990_v24  ;;  %v2932_v41 = vrot.slane %v2930_v42, 3  ;;  %v11538_v34 = vsel %vm2422_vm2, %v3071_v12, %v3152_v51  ;;  %v3143_v54 = vor.u32 %v11454_v38, %v11452_v5  ;;  %v13684_v11 = vld [vmem:[#allocation86_spill] sm:$0xff]  ;;  %v13686_v5 = vld [vmem:[#allocation100_spill] sm:$0xff]  ;;  %v13691_v51 = vld [vmem:[#allocation91_spill] sm:$0xff] }
 0x28b   : > { %v2874_v61 = vsel %vm2422_vm2, %v11457_v47, %v2873_v22  ;;  %3985 = vmatprep.mubr.bf16.mxu1 %v2991_v30  ;;  %v2935_v4 = vrot.slane %v2933_v32, 4  ;;  %v2993_v55 = vshrl.u32 %v2397_v23, 16  ;;  %v3125_v52 = vor.u32 %v3124_v9, %v3121_v18  ;;  %v13687_v47 = vld [vmem:[#allocation102_spill] sm:$0xff]  ;;  %v13694_v18 = vld [vmem:[#allocation95_spill] sm:$0xff] }
 0x28c   : > { %4083 = vmatmul.mubr.bf16.gmra.mxu0 %v2874_v61  ;;  %v2996_v7 = vshll.u32 %v2397_v23, 16  ;;  %v2271_v29 = vrot.slane %v1962_v2, 2  ;;  %v13683_v0 = vrot.slane %v13682_v37, 2  ;;  %v13685_v42 = vrot.slane %v13684_v11, 2  ;;  %3986 = vmatmul.mubr.bf16.gmra.mxu1 %v11263_v17 }
 0x28d   : > { %v11551_v12 = vsel %vm2422_vm2, %v11525_v43, %v3143_v54  ;;  %v1969_v38 = vmul.f32 %v13686_v5, %v10506_v8  ;;  %v1970_v32 = vmul.f32 %v13687_v47, %v10574_v53  ;;  %v1971_v50 = vmul.f32 %v13688_v28, %v10635_v60  ;;  %4090 = vmatprep.mubr.bf16.mxu0 %v11263_v17 }
 0x28e   : > { %v2275_v24 = vsel %vm2084_vm3, %v13685_v42, %v13683_v0  ;;  %v11562_v6 = vsel %vm2422_vm2, %v11486_v26, %v3125_v52  ;;  %v11566_v23 = vmul.f32 %v13689_v21, %v10556_v40  ;;  %v2310_v1 = vrot.slane %v1982_v48, 2  ;;  %v13695_v40 = vld [vmem:[#allocation111_spill] sm:$0xff]  ;;  %3993 = vmatprep.mubr.bf16.mxu1 %v3054_v27  ;;  %v13701_v27 = vld [vmem:[#allocation68_spill] sm:$0xff] }
 0x28f   : > { %v13690_v25 = vmov %v13685_v42  ;;  %v13692_v53 = vrot.slane %v13691_v51, 2  ;;  %v13693_v2 = vmov %v13683_v0  ;;  %v2278_v9 = vrot.slane %v13694_v18, 2 }
 0x290   : > { %v2273_v8 = vsel %vm2084_vm3, %v2271_v29, %v13690_v25  ;;  %v2936_v30 = vor.u32 %v2935_v4, %v2932_v41  ;;  %v2280_v54 = vrot.slane %v11523_v39, 2  ;;  %v11580_v61 = vmul.f32 %v13695_v40, %v10609_v31  ;;  %v13697_v4 = vld [vmem:[#allocation125_spill] sm:$0xff]  ;;  %v13699_v31 = vld [vmem:[#allocation64_spill] sm:$0xff] }
 0x291   : > { %v2277_v60 = vsel %vm2084_vm3, %v13693_v2, %v13692_v53  ;;  %v2995_v48 = vrot.slane %v2993_v55, 3  ;;  %v2998_v52 = vrot.slane %v2996_v7, 4  ;;  %v2282_v0 = vrot.slane %v11531_v46, 2  ;;  %v13696_v2 = vld [vmem:[#allocation114_spill] sm:$0xff] }
 0x292   : > { %v2350_v26 = vpack.c.bf16 %v2277_v60, %v2275_v24  ;;  %v2284_v11 = vrot.slane %v1969_v38, 2  ;;  %v2286_v42 = vrot.slane %v1970_v32, 2  ;;  %v2341_v25 = vpack.c.bf16 %v2273_v8, %v2271_v29  ;;  %v13700_v32 = vld [vmem:[#allocation96_spill] sm:$0xff] }
 0x293   : > { %v2288_v37 = vrot.slane %v1971_v50, 2  ;;  %v13290_v53 = vrot.slane %v11566_v23, 2  ;;  %v11586_v41 = vmul.f32 %v13696_v2, %v10838_v33  ;;  %v13698_v39 = vrot.slane %v13697_v4, 2  ;;  %v8893_v2 = vld [vmem:[#allocation8 + $0xd8] sm:$0xff]  }
 0x294   : > { %v11594_v55 = vmul.f32 %v13699_v31, %v10686_v45  ;;  %v2937_v46 = vsel %vm2422_vm2, %v2873_v22, %v2936_v30  ;;  %v2568_v7 = vshrl.u32 %v2350_v26, 16  ;;  %v2571_v29 = vshll.u32 %v2350_v26, 16  ;;  %3994 = vmatmul.mubr.bf16.gmra.mxu1 %v11498_v10 }
 0x295   : > { %v2311_v24 = vsel %vm2084_vm3, %v13698_v39, %v2310_v1  ;;  %v2304_v33 = vrot.slane %v13700_v32, 2  ;;  %4091 = vmatmul.mubr.bf16.gmra.mxu0 %v2937_v46  ;;  %v11599_v50 = vor.u32 %v2998_v52, %v2995_v48  ;;  %v2281_v1 = vsel %vm2084_vm3, %v2278_v9, %v2280_v54  ;;  %v13703_v32 = vld [vmem:[#allocation73_spill] sm:$0xff]  ;;  %4001 = vmatprep.mubr.bf16.mxu1 %v11519_v44 }
 0x296   : > { %v2415_v8 = vpack.c.bf16 %v2311_v24, %v2311_v24  ;;  %4098 = vmatprep.mubr.bf16.mxu0 %v11498_v10  ;;  %v2560_v17 = vshrl.u32 %v2341_v25, 16  ;;  %v2563_v45 = vshll.u32 %v2341_v25, 16  ;;  %v2283_v60 = vsel %vm2084_vm3, %v2280_v54, %v2282_v0 }
 0x297   : > { %v11607_v18 = vmul.f32 %v13701_v27, %v10683_v16  ;;  %v13702_v26 = vrot.slane %v13691_v51, 2  ;;  %v2285_v52 = vsel %vm2084_vm3, %v2282_v0, %v2284_v11  ;;  %v2570_v4 = vrot.slane %v2568_v7, 3  ;;  %v8892_v27 = vld [vmem:[#allocation8 + $0x10] sm:$0xff]  }
 0x298   : > { %v2573_v39 = vrot.slane %v2571_v29, 4  ;;  %v11615_v25 = vmul.f32 %v10891_v57, %v10791_v15  ;;  %v3000_v54 = vsel %vm2422_vm2, %v2936_v30, %v11599_v50  ;;  %v2364_v46 = vpack.c.bf16 %v2285_v52, %v2283_v60 }
 0x299   : > { %v2279_v48 = vsel %vm2084_vm3, %v13702_v26, %v2278_v9  ;;  %v2287_v16 = vsel %vm2084_vm3, %v2284_v11, %v2286_v42  ;;  %v1978_v51 = vmul.f32 %v13703_v32, %v11140_v62  ;;  %v2562_v22 = vrot.slane %v2560_v17, 3  ;;  %v13704_v26 = vld [vmem:[#allocation74_spill] sm:$0xff] }
 0x29a   : > { %v2357_v24 = vpack.c.bf16 %v2281_v1, %v2279_v48  ;;  %v2565_v9 = vrot.slane %v2563_v45, 4  ;;  %v13705_v0 = vrot.slane %v13704_v26, 2  ;;  %v3155_v29 = vshrl.u32 %v2415_v8, 16  ;;  %v13706_v45 = vld [vmem:[#allocation129_spill] sm:$0xff] }
 0x29b   : > { %v2289_v15 = vsel %vm2084_vm3, %v2286_v42, %v2288_v37  ;;  %v2291_v30 = vsel %vm2084_vm3, %v2288_v37, %v13290_v53  ;;  %v13291_v11 = vrot.slane %v11615_v25, 2  ;;  %v2302_v1 = vrot.slane %v1978_v51, 2  ;;  %v7773_v53 = vpop.f32.mrf.mxu1 }
 0x29c   : > { %v2307_v7 = vsel %vm2084_vm3, %v2304_v33, %v13705_v0  ;;  %v2574_v62 = vor.u32 %v2573_v39, %v2570_v4  ;;  %v2633_v17 = vshrl.u32 %v2357_v24, 16  ;;  %v3158_v48 = vshll.u32 %v2415_v8, 16  ;;  %4002 = vmatmul.mubr.bf16.gmra.mxu1 %v11562_v6 }
 0x29d   : > { %v2406_v60 = vpack.c.bf16 %v13706_v45, %v2307_v7  ;;  %4099 = vmatmul.mubr.bf16.gmra.mxu0 %v3000_v54  ;;  %v2636_v52 = vshll.u32 %v2357_v24, 16  ;;  %v2303_v10 = vsel %vm2084_vm3, %v13291_v11, %v2302_v1  ;;  %v2305_v42 = vsel %vm2084_vm3, %v2302_v1, %v2304_v33 }
 0x29e   : > { %v3157_v32 = vrot.slane %v3155_v29, 3  ;;  %4106 = vmatprep.mubr.bf16.mxu0 %v11508_v35  ;;  %v2399_v37 = vpack.c.bf16 %v2305_v42, %v2303_v10  ;;  %v3160_v44 = vrot.slane %v3158_v48, 4  ;;  %v2566_v4 = vor.u32 %v2565_v9, %v2562_v22 }
 0x29f   : > { %v3074_v51 = vshrl.u32 %v2406_v60, 16  ;;  %v3077_v26 = vshll.u32 %v2406_v60, 16  ;;  %v2696_v39 = vshrl.u32 %v2364_v46, 16  ;;  %v2699_v0 = vshll.u32 %v2364_v46, 16  ;;  %v7774_v46 = vpop.f32.mrf.mxu1 }
 0x2a0   : > { %v2371_v7 = vpack.c.bf16 %v2289_v15, %v2287_v16  ;;  %v3011_v8 = vshrl.u32 %v2399_v37, 16  ;;  %v3014_v54 = vshll.u32 %v2399_v37, 16  ;;  %v2635_v38 = vrot.slane %v2633_v17, 3 }
 0x2a1   : > { %v3076_v24 = vrot.slane %v3074_v51, 3  ;;  %v3079_v45 = vrot.slane %v3077_v26, 4  ;;  %v2638_v11 = vrot.slane %v2636_v52, 4  ;;  %v13707_v33 = vrot.slane %v11580_v61, 2 }
 0x2a2   : > { %v13708_v29 = vrot.slane %v11566_v23, 2  ;;  %v3161_v1 = vor.u32 %v3160_v44, %v3157_v32  ;;  %v3013_v48 = vrot.slane %v3011_v8, 3  ;;  %v3016_v22 = vrot.slane %v3014_v54, 4 }
 0x2a3   : > { %v3080_v9 = vor.u32 %v3079_v45, %v3076_v24  ;;  %v2575_v16 = vsel %vm2422_vm2, %v2566_v4, %v2574_v62  ;;  %v2698_v15 = vrot.slane %v2696_v39, 3  ;;  %v2701_v10 = vrot.slane %v2699_v0, 4 }
 0x2a4   : > { %v2293_v35 = vsel %vm2084_vm3, %v13708_v29, %v13707_v33  ;;  %v7775_v17 = vadd.f32 %v7774_v46, %v7773_v53  ;;  %v3063_v52 = vsel %vm2422_vm2, %v11599_v50, %v11525_v43  ;;  %8457 = vmatprep.mubr.bf16.mxu1 %v2575_v16  ;;  %v11648_v23 = vor.u32 %v3016_v22, %v3013_v48 }
 0x2a5   : > { %v2378_v60 = vpack.c.bf16 %v2293_v35, %v2291_v30  ;;  %v11651_v30 = vsel %vm2422_vm2, %v3080_v9, %v3161_v1  ;;  %v2294_v42 = vrot.slane %v11594_v55, 2  ;;  %4107 = vmatmul.mubr.bf16.gmra.mxu0 %v3063_v52  ;;  %v2639_v32 = vor.u32 %v2638_v11, %v2635_v38  ;;  %v7776_v11 = vpop.f32.mrf.mxu1 }
 0x2a6   : > { %v2759_v6 = vshrl.u32 %v2371_v7, 16  ;;  %v2762_v37 = vshll.u32 %v2371_v7, 16  ;;  %v2298_v51 = vrot.slane %v11607_v18, 2  ;;  %4114 = vmatprep.mubr.bf16.mxu0 %v11538_v34  ;;  %v11658_v43 = vsel %vm2422_vm2, %v11648_v23, %v3080_v9 }
 0x2a7   : > { %v2822_v53 = vshrl.u32 %v2378_v60, 16  ;;  %v2825_v26 = vshll.u32 %v2378_v60, 16  ;;  %v2702_v50 = vor.u32 %v2701_v10, %v2698_v15  ;;  %v13709_v44 = vrot.slane %v11586_v41, 2  ;;  %v7777_v61 = vpop.f32.mrf.mxu1 }
 0x2a8   : > { %v2640_v18 = vsel %vm2422_vm2, %v2574_v62, %v2639_v32  ;;  %v2761_v39 = vrot.slane %v2759_v6, 3  ;;  %v2764_v34 = vrot.slane %v2762_v37, 4  ;;  %v13711_v0 = vmov %v13707_v33  ;;  %v11677_v62 = vld [vmem:[%s13713_s5] ss:$0 sm:$0xff] }
 0x2a9   : > { %v2297_v4 = vsel %vm2084_vm3, %v2294_v42, %v13709_v44  ;;  %v13710_v55 = vmov %v13709_v44  ;;  %v2295_v7 = vsel %vm2084_vm3, %v13711_v0, %v2294_v42  ;;  %v2824_v8 = vrot.slane %v2822_v53, 3  ;;  %8458 = vmatmul.mubr.bf16.vlgmr.msra.gmra.mxu1 %v2640_v18 }
 0x2aa   : > { %v2299_v38 = vsel %vm2084_vm3, %v13710_v55, %v2298_v51  ;;  %v2827_v54 = vrot.slane %v2825_v26, 4  ;;  %v2385_v24 = vpack.c.bf16 %v2297_v4, %v2295_v7  ;;  %v13712_v45 = vrot.slane %v11615_v25, 2  ;;  %v7849_v25 = vpop.f32.mrf.mxu0 }
 0x2ab   : > { %v2703_v41 = vsel %vm2422_vm2, %v2639_v32, %v2702_v50  ;;  %v2765_v35 = vor.u32 %v2764_v34, %v2761_v39  ;;  %v3706_v46 = vadd.f32 %v7775_v17, %v11677_v62  ;;  %v7778_v16 = vadd.f32 %v7777_v61, %v7776_v11 }
 0x2ac   : > { %v2301_v33 = vsel %vm2084_vm3, %v2298_v51, %v13712_v45  ;;  %8461 = vmatprep.mubr.bf16.mxu1 %v2703_v41  ;;  %v2828_v1 = vor.u32 %v2827_v54, %v2824_v8  ;;  %v2885_v60 = vshrl.u32 %v2385_v24, 16  ;;  %v2888_v48 = vshll.u32 %v2385_v24, 16  ;;  %v7850_v15 = vpop.f32.mrf.mxu0 }
 0x2ad   : > { %v2392_v29 = vpack.c.bf16 %v2301_v33, %v2299_v38  ;;  %4115 = vmatmul.mubr.bf16.gmra.mxu0 %v11551_v12  ;;  %v7851_v10 = vadd.f32 %v7850_v15, %v7849_v25  ;;  %v2766_v52 = vsel %vm2422_vm2, %v2702_v50, %v2765_v35  ;;  %v3709_v26 = vadd.f32 %v7778_v16, %v11677_v62  ;;  %v7779_v50 = vpop.f32.mrf.mxu1 }
 0x2ae   : > { %v2829_v42 = vsel %vm2422_vm2, %v2765_v35, %v2828_v1  ;;  %v2887_v32 = vrot.slane %v2885_v60, 3  ;;  %v2890_v6 = vrot.slane %v2888_v48, 4  ;;  %v7852_v37 = vpop.f32.mrf.mxu0 }
 0x2af   : > { %v2948_v22 = vshrl.u32 %v2392_v29, 16  ;;  %v2951_v9 = vshll.u32 %v2392_v29, 16  ;;  %v11683_v53 = vadd.f32 %v7851_v10, %v3706_v46  ;;  %v7780_v18 = vpop.f32.mrf.mxu1 }
 0x2b0   : > { %v7853_v44 = vpop.f32.mrf.mxu0  ;;  %v2891_v4 = vor.u32 %v2890_v6, %v2887_v32  ;;  %v7781_v34 = vadd.f32 %v7780_v18, %v7779_v50 }
 0x2b1   : > { %8462 = vmatmul.mubr.bf16.gmra.mxu1 %v2766_v52  ;;  %v2950_v12 = vrot.slane %v2948_v22, 3  ;;  %v2953_v51 = vrot.slane %v2951_v9, 4  ;;  %v7854_v17 = vadd.f32 %v7853_v44, %v7852_v37  ;;  %v7782_v0 = vpop.f32.mrf.mxu1 }
 0x2b2   : > { %8465 = vmatprep.mubr.bf16.mxu1 %v2829_v42  ;;  %v2892_v11 = vsel %vm2422_vm2, %v2828_v1, %v2891_v4  ;;  %v7855_v8 = vpop.f32.mrf.mxu0  ;;  %v3714_v54 = vadd.f32 %v7781_v34, %v11677_v62 }
 0x2b3   : > { %v2954_v55 = vor.u32 %v2953_v51, %v2950_v12  ;;  %v11686_v38 = vadd.f32 %v7854_v17, %v3709_v26  ;;  %v7783_v7 = vpop.f32.mrf.mxu1 }
 0x2b4   : > { %v7784_v24 = vadd.f32 %v7783_v7, %v7782_v0  ;;  %v7856_v45 = vpop.f32.mrf.mxu0 }
 0x2b5   : > { %v2955_v39 = vsel %vm2422_vm2, %v2891_v4, %v2954_v55  ;;  %v3018_v33 = vsel %vm2422_vm2, %v2954_v55, %v11648_v23  ;;  %v7857_v41 = vadd.f32 %v7856_v45, %v7855_v8 }
 0x2b6   : > { %v7858_v29 = vpop.f32.mrf.mxu0  ;;  %v3717_v35 = vadd.f32 %v7784_v24, %v11677_v62  ;;  %v7785_v1 = vpop.f32.mrf.mxu1 }
 0x2b7   : > { %v11694_v61 = vadd.f32 %v7857_v41, %v3714_v54 }
 0x2b8   : > { %v7859_v60 = vpop.f32.mrf.mxu0  ;;  %v7786_v25 = vpop.f32.mrf.mxu1 }
 0x2b9   : > { %8466 = vmatmul.mubr.bf16.gmra.mxu1 %v2892_v11  ;;  %v7860_v48 = vadd.f32 %v7859_v60, %v7858_v29  ;;  %v7787_v22 = vadd.f32 %v7786_v25, %v7785_v1 }
 0x2ba   : > { %8469 = vmatprep.mubr.bf16.mxu1 %v2955_v39  ;;  %v7788_v16 = vpop.f32.mrf.mxu1 }
 0x2bb   : > { %v11697_v9 = vadd.f32 %v7860_v48, %v3717_v35  ;;  %v7861_v46 = vpop.f32.mrf.mxu0  ;;  %v3722_v23 = vadd.f32 %v7787_v22, %v11677_v62 }
 0x2bc   : > { %v7789_v10 = vpop.f32.mrf.mxu1 }
 0x2bd   : > { %v7862_v15 = vpop.f32.mrf.mxu0  ;;  %v7790_v52 = vadd.f32 %v7789_v10, %v7788_v16 }
 0x2bf   : > { %v7864_v42 = vpop.f32.mrf.mxu0  ;;  %v3725_v6 = vadd.f32 %v7790_v52, %v11677_v62 }
 0x2c1   : > { %8470 = vmatmul.mubr.bf16.gmra.mxu1 %v3018_v33  ;;  %v7865_v37 = vpop.f32.mrf.mxu0 }
 0x2c2   : > { %8473 = vmatprep.mubr.bf16.mxu1 %v11658_v43  ;;  %v7863_v43 = vadd.f32 %v7862_v15, %v7861_v46  ;;  %v7866_v12 = vadd.f32 %v7865_v37, %v7864_v42 }
 0x2c4   : > { %v11701_v32 = vadd.f32 %v7863_v43, %v3722_v23  ;;  %v11704_v51 = vadd.f32 %v7866_v12, %v3725_v6 }
 0x2c8   : > { %v7791_v26 = vpop.f32.mrf.mxu1 }
 0x2c9   : > { %8474 = vmatmul.mubr.bf16.gmra.mxu1 %v11651_v30  ;;  %v7867_v44 = vpop.f32.mrf.mxu0 }
 0x2ca   : > { %v7792_v17 = vpop.f32.mrf.mxu1 }
 0x2cb   : > { %v7868_v4 = vpop.f32.mrf.mxu0  ;;  %v7793_v55 = vadd.f32 %v7792_v17, %v7791_v26 }
 0x2cc   : > { %v7869_v50 = vadd.f32 %v7868_v4, %v7867_v44  ;;  %v7794_v11 = vpop.f32.mrf.mxu1 }
 0x2cd   : > { %v7870_v18 = vpop.f32.mrf.mxu0  ;;  %v3730_v30 = vadd.f32 %v7793_v55, %v11677_v62 }
 0x2ce   : > { %v7795_v39 = vpop.f32.mrf.mxu1 }
 0x2cf   : > { %v7871_v34 = vpop.f32.mrf.mxu0  ;;  %v11707_v0 = vadd.f32 %v7869_v50, %v3730_v30  ;;  %v7796_v7 = vadd.f32 %v7795_v39, %v7794_v11 }
 0x2d0   : > { %v7872_v8 = vadd.f32 %v7871_v34, %v7870_v18 }
 0x2d1   : > { %v3733_v54 = vadd.f32 %v7796_v7, %v11677_v62 }
 0x2d3   : > { %v11710_v45 = vadd.f32 %v7872_v8, %v3733_v54 }
 0x2d4   : > { %v7797_v24 = vpop.f32.mrf.mxu1 }
 0x2d6   : > { %v7798_v33 = vpop.f32.mrf.mxu1 }
 0x2d7   : > { %v7799_v41 = vadd.f32 %v7798_v33, %v7797_v24 }
 0x2d8   : > { %v7800_v29 = vpop.f32.mrf.mxu1 }
 0x2d9   : > { %v3738_v60 = vadd.f32 %v7799_v41, %v11677_v62 }
 0x2da   : > { %v7801_v35 = vpop.f32.mrf.mxu1 }
 0x2db   : > { %v7802_v48 = vadd.f32 %v7801_v35, %v7800_v29 }
 0x2dd   : > { %v3741_v23 = vadd.f32 %v7802_v48, %v11677_v62 }
 0x2df   : > { %v7873_v1 = vpop.f32.mrf.mxu0 }
 0x2e1   : > { %v7874_v25 = vpop.f32.mrf.mxu0 }
 0x2e2   : > { %v7875_v22 = vadd.f32 %v7874_v25, %v7873_v1 }
 0x2e3   : > { %v7876_v46 = vpop.f32.mrf.mxu0 }
 0x2e4   : > { %v11713_v16 = vadd.f32 %v7875_v22, %v3738_v60  ;;  %v7803_v15 = vpop.f32.mrf.mxu1 }
 0x2e5   : > { %v7877_v10 = vpop.f32.mrf.mxu0 }
 0x2e6   : > { %v7878_v43 = vadd.f32 %v7877_v10, %v7876_v46  ;;  %v7804_v52 = vpop.f32.mrf.mxu1 }
 0x2e7   : > { %v7805_v42 = vadd.f32 %v7804_v52, %v7803_v15  ;;  %v7879_v6 = vpop.f32.mrf.mxu0 }
 0x2e8   : > { %v11716_v37 = vadd.f32 %v7878_v43, %v3741_v23  ;;  %v7806_v12 = vpop.f32.mrf.mxu1 }
 0x2e9   : > { %v3746_v26 = vadd.f32 %v7805_v42, %v11677_v62  ;;  %v7880_v44 = vpop.f32.mrf.mxu0 }
 0x2ea   : > { %v7881_v17 = vadd.f32 %v7880_v44, %v7879_v6  ;;  %v7807_v4 = vpop.f32.mrf.mxu1 }
 0x2eb   : > { %v7808_v55 = vadd.f32 %v7807_v4, %v7806_v12  ;;  %v7882_v50 = vpop.f32.mrf.mxu0 }
 0x2ec   : > { %v11719_v11 = vadd.f32 %v7881_v17, %v3746_v26 }
 0x2ed   : > { %v3749_v18 = vadd.f32 %v7808_v55, %v11677_v62  ;;  %v7883_v30 = vpop.f32.mrf.mxu0 }
 0x2ee   : > { %v7884_v34 = vadd.f32 %v7883_v30, %v7882_v50 }
 0x2ef   : > { %v7809_v39 = vpop.f32.mrf.mxu1 }
 0x2f0   : > { %v11722_v7 = vadd.f32 %v7884_v34, %v3749_v18 }
 0x2f1   : > { %v7810_v8 = vpop.f32.mrf.mxu1 }
 0x2f2   : > { %v7811_v54 = vadd.f32 %v7810_v8, %v7809_v39 }
 0x2f3   : > { %v7812_v24 = vpop.f32.mrf.mxu1 }
 0x2f4   : > { %v3754_v29 = vadd.f32 %v7811_v54, %v11677_v62  ;;  %v8873_v54 = vld [vmem:[#allocation8 + $0xf8] sm:$0xff]  }
 0x2f5   : > { %v7813_v41 = vpop.f32.mrf.mxu1  ;;  %8143 = vmatprep.subr.bf16.mxu0 %v8873_v54 }
 0x2f6   : > { %v7814_v35 = vadd.f32 %v7813_v41, %v7812_v24  ;;  %v8874_v24 = vld [vmem:[#allocation8 + $0xb8] sm:$0xff]  }
 0x2f7   : > { %v7885_v33 = vpop.f32.mrf.mxu0  ;;  %v7815_v60 = vpop.f32.mrf.mxu1  ;;  %8144 = vmatpush3.bf16.msra.mxu0 %v8874_v24 }
 0x2f8   : > { %v3757_v23 = vadd.f32 %v7814_v35, %v11677_v62 }
 0x2f9   : > { %v7886_v1 = vpop.f32.mrf.mxu0  ;;  %v7816_v22 = vpop.f32.mrf.mxu1 }
 0x2fa   : > { %v7887_v48 = vadd.f32 %v7886_v1, %v7885_v33  ;;  %v7817_v15 = vadd.f32 %v7816_v22, %v7815_v60 }
 0x2fb   : > { %v7888_v25 = vpop.f32.mrf.mxu0  ;;  %v7818_v43 = vpop.f32.mrf.mxu1 }
 0x2fc   : > { %v11725_v46 = vadd.f32 %v7887_v48, %v3754_v29  ;;  %v3762_v26 = vadd.f32 %v7817_v15, %v11677_v62 }
 0x2fd   : > { %v7889_v10 = vpop.f32.mrf.mxu0  ;;  %v7819_v42 = vpop.f32.mrf.mxu1 }
 0x2fe   : > { %v7890_v52 = vadd.f32 %v7889_v10, %v7888_v25  ;;  %v7820_v44 = vadd.f32 %v7819_v42, %v7818_v43 }
 0x2ff   : > { %v7891_v12 = vpop.f32.mrf.mxu0 }
 0x300   : > { %v11728_v6 = vadd.f32 %v7890_v52, %v3757_v23  ;;  %v3765_v30 = vadd.f32 %v7820_v44, %v11677_v62 }
 0x301   : > { %v7892_v17 = vpop.f32.mrf.mxu0 }
 0x302   : > { %v7893_v4 = vadd.f32 %v7892_v17, %v7891_v12 }
 0x303   : > { %v7821_v55 = vpop.f32.mrf.mxu1  ;;  %v7894_v50 = vpop.f32.mrf.mxu0 }
 0x304   : > { %v11731_v18 = vadd.f32 %v7893_v4, %v3762_v26 }
 0x305   : > { %v7822_v39 = vpop.f32.mrf.mxu1  ;;  %v7895_v34 = vpop.f32.mrf.mxu0 }
 0x306   : > { %v7823_v8 = vadd.f32 %v7822_v39, %v7821_v55  ;;  %v7896_v33 = vadd.f32 %v7895_v34, %v7894_v50  ;;  %v8875_v55 = vld [vmem:[#allocation8 + $0xf0] sm:$0xff]   ;;  %v8876_v50 = vld [vmem:[#allocation8 + $0x78] sm:$0xff]  }
 0x307   : > { %v7824_v41 = vpop.f32.mrf.mxu1  ;;  %v8878_v34 = vld [vmem:[#allocation8 + $0x38] sm:$0xff]   ;;  %8145 = vmatprep.subr.bf16.mxu0 %v8875_v55  ;;  %8079 = vmatprep.subr.bf16.mxu1 %v8876_v50  ;;  %v8883_v55 = vld [vmem:[#allocation8 + $0xa8] sm:$0xff]  }
 0x308   : > { %v11734_v29 = vadd.f32 %v7896_v33, %v3765_v30  ;;  %v3770_v60 = vadd.f32 %v7823_v8, %v11677_v62  ;;  %v8877_v30 = vld [vmem:[#allocation8 + $0xb0] sm:$0xff]   ;;  %8080 = vmatpush3.bf16.msra.mxu1 %v8878_v34 }
 0x309   : > { %v7825_v1 = vpop.f32.mrf.mxu1  ;;  %8146 = vmatpush3.bf16.msra.mxu0 %v8877_v30 }
 0x30a   : > { %v7897_v35 = vpop.f32.mrf.mxu0  ;;  %v7826_v48 = vadd.f32 %v7825_v1, %v7824_v41  ;;  %v8880_v1 = vld [vmem:[#allocation8 + $0x30] sm:$0xff]  }
 0x30b   : > { %v7827_v22 = vpop.f32.mrf.mxu1 }
 0x30c   : > { %v7898_v25 = vpop.f32.mrf.mxu0  ;;  %v3773_v52 = vadd.f32 %v7826_v48, %v11677_v62 }
 0x30d   : > { %v7899_v23 = vadd.f32 %v7898_v25, %v7897_v35  ;;  %v7828_v10 = vpop.f32.mrf.mxu1  ;;  %v8879_v35 = vld [vmem:[#allocation8 + $0x70] sm:$0xff]  }
 0x30e   : > { %v7900_v15 = vpop.f32.mrf.mxu0  ;;  %v7829_v42 = vadd.f32 %v7828_v10, %v7827_v22  ;;  %8081 = vmatprep.subr.bf16.mxu1 %v8879_v35 }
 0x30f   : > { %v11737_v43 = vadd.f32 %v7899_v23, %v3770_v60  ;;  %v7830_v26 = vpop.f32.mrf.mxu1  ;;  %8082 = vmatpush3.bf16.msra.mxu1 %v8880_v1 }
 0x310   : > { %v7901_v12 = vpop.f32.mrf.mxu0  ;;  %v3778_v24 = vadd.f32 %v7829_v42, %v11677_v62 }
 0x311   : > { %v7902_v44 = vadd.f32 %v7901_v12, %v7900_v15  ;;  %v7831_v17 = vpop.f32.mrf.mxu1 }
 0x312   : > { %v7832_v33 = vadd.f32 %v7831_v17, %v7830_v26  ;;  %v8882_v17 = vld [vmem:[#allocation8 + $0x68] sm:$0xff]  }
 0x313   : > { %v11740_v4 = vadd.f32 %v7902_v44, %v3773_v52  ;;  %v8881_v44 = vld [vmem:[#allocation8 + $0xe8] sm:$0xff]   ;;  %8083 = vmatprep.subr.bf16.mxu1 %v8882_v17 }
 0x314   : > { %v7925_v39 = vpop.f32.mrf.mxu1  ;;  %v3781_v52 = vadd.f32 %v7832_v33, %v11677_v62  ;;  %8147 = vmatprep.subr.bf16.mxu0 %v8881_v44  ;;  %v8884_v62 = vld [vmem:[#allocation8 + $0x28] sm:$0xff]  }
 0x315   : > { %8148 = vmatpush3.bf16.msra.mxu0 %v8883_v55  ;;  %8084 = vmatpush3.bf16.msra.mxu1 %v8884_v62 }
 0x316   : > { %v7926_v54 = vpop.f32.mrf.mxu1 }
 0x317   : > { %v7903_v8 = vpop.f32.mrf.mxu0  ;;  %v7927_v41 = vadd.f32 %v7926_v54, %v7925_v39 }
 0x318   : > { %v7928_v48 = vpop.f32.mrf.mxu1 }
 0x319   : > { %v7904_v60 = vpop.f32.mrf.mxu0  ;;  %v11744_v22 = vadd.f32 %v7927_v41, %v11683_v53 }
 0x31a   : > { %v7905_v25 = vadd.f32 %v7904_v60, %v7903_v8  ;;  %v7929_v15 = vpop.f32.mrf.mxu1 }
 0x31b   : > { %v7906_v23 = vpop.f32.mrf.mxu0  ;;  %v7930_v12 = vadd.f32 %v7929_v15, %v7928_v48 }
 0x31c   : > { %v11746_v10 = vadd.f32 %v7905_v25, %v3778_v24  ;;  %v7931_v26 = vpop.f32.mrf.mxu1 }
 0x31d   : > { %v7907_v42 = vpop.f32.mrf.mxu0  ;;  %v11750_v30 = vadd.f32 %v7930_v12, %v11686_v38 }
 0x31e   : > { %v7908_v50 = vadd.f32 %v7907_v42, %v7906_v23  ;;  %v7932_v39 = vpop.f32.mrf.mxu1  ;;  %v8886_v42 = vld [vmem:[#allocation8 + $0x20] sm:$0xff]  }
 0x31f   : > { %v7933_v8 = vadd.f32 %v7932_v39, %v7931_v26 }
 0x320   : > { %v11754_v34 = vadd.f32 %v7908_v50, %v3781_v52  ;;  %v7934_v24 = vpop.f32.mrf.mxu1 }
 0x321   : > { %v11752_v53 = vpop.f32.mrf.mxu0  ;;  %v11759_v33 = vadd.f32 %v7933_v8, %v11694_v61  ;;  %v8885_v61 = vld [vmem:[#allocation8 + $0x60] sm:$0xff]  }
 0x322   : > { %v7935_v38 = vpop.f32.mrf.mxu1  ;;  %8085 = vmatprep.subr.bf16.mxu1 %v8885_v61 }
 0x323   : > { %v11756_v54 = vpop.f32.mrf.mxu0  ;;  %v7936_v35 = vadd.f32 %v7935_v38, %v7934_v24  ;;  %8086 = vmatpush3.bf16.msra.mxu1 %v8886_v42  ;;  %v8887_v38 = vld [vmem:[#allocation8 + $0xe0] sm:$0xff]   ;;  %v8890_v42 = vld [vmem:[#allocation8 + $0x18] sm:$0xff]  }
 0x324   : > { %v7937_v60 = vpop.f32.mrf.mxu1  ;;  %8149 = vmatprep.subr.bf16.mxu0 %v8887_v38 }
 0x325   : > { %v11761_v41 = vpop.f32.mrf.mxu0  ;;  %v11766_v48 = vadd.f32 %v7936_v35, %v11697_v9  ;;  %v8888_v35 = vld [vmem:[#allocation8 + $0x58] sm:$0xff]  }
 0x326   : > { %v7938_v23 = vpop.f32.mrf.mxu1  ;;  %8087 = vmatprep.subr.bf16.mxu1 %v8888_v35 }
 0x327   : > { %v11763_v1 = vpop.f32.mrf.mxu0  ;;  %v7939_v15 = vadd.f32 %v7938_v23, %v7937_v60  ;;  %8088 = vmatpush3.bf16.msra.mxu1 %v8890_v42 }
 0x328   : > { %v7940_v12 = vpop.f32.mrf.mxu1 }
 0x329   : > { %v11773_v26 = vadd.f32 %v7939_v15, %v11701_v32  ;;  %v8889_v32 = vld [vmem:[#allocation8 + $0xa0] sm:$0xff]  }
 0x32a   : > { %v11768_v25 = vpop.f32.mrf.mxu0  ;;  %v7941_v17 = vpop.f32.mrf.mxu1  ;;  %8150 = vmatpush3.bf16.msra.mxu0 %v8889_v32 }
 0x32b   : > { %v7942_v55 = vadd.f32 %v7941_v17, %v7940_v12  ;;  %8151 = vmatprep.subr.bf16.mxu0 %v8893_v2 }
 0x32c   : > { %v11770_v52 = vpop.f32.mrf.mxu0  ;;  %v7943_v50 = vpop.f32.mrf.mxu1 }
 0x32d   : > { %v11780_v39 = vadd.f32 %v7942_v55, %v11704_v51 }
 0x32e   : > { %v11775_v44 = vpop.f32.mrf.mxu0  ;;  %v7944_v62 = vpop.f32.mrf.mxu1 }
 0x32f   : > { %v7945_v24 = vadd.f32 %v7944_v62, %v7943_v50 }
 0x330   : > { %v11777_v9 = vpop.f32.mrf.mxu0  ;;  %v7946_v23 = vpop.f32.mrf.mxu1 }
 0x331   : > { %v11787_v15 = vadd.f32 %v7945_v24, %v11707_v0 }
 0x332   : > { %v11782_v8 = vpop.f32.mrf.mxu0  ;;  %v7947_v61 = vpop.f32.mrf.mxu1 }
 0x333   : > { %v7948_v51 = vadd.f32 %v7947_v61, %v7946_v23  ;;  %v8891_v61 = vld [vmem:[#allocation8 + $0x50] sm:$0xff]  }
 0x334   : > { %v11784_v60 = vpop.f32.mrf.mxu0  ;;  %v7949_v55 = vpop.f32.mrf.mxu1  ;;  %8089 = vmatprep.subr.bf16.mxu1 %v8891_v61 }
 0x335   : > { %v11794_v50 = vadd.f32 %v7948_v51, %v11710_v45  ;;  %v8894_v45 = vld [vmem:[#allocation8 + $0x98] sm:$0xff]   ;;  %v8895_v51 = vld [vmem:[#allocation8 + $0x48] sm:$0xff]   ;;  %8090 = vmatpush3.bf16.msra.mxu1 %v8892_v27 }
 0x336   : > { %v11789_v12 = vpop.f32.mrf.mxu0  ;;  %v7950_v57 = vpop.f32.mrf.mxu1  ;;  %8152 = vmatpush3.bf16.msra.mxu0 %v8894_v45  ;;  %8091 = vmatprep.subr.bf16.mxu1 %v8895_v51  ;;  %v8902_v27 = vld [vmem:[#allocation8 + $0x88] sm:$0xff]   ;;  %v8903_v51 = vld [vmem:[#allocation8 + $0xc0] sm:$0xff]  }
 0x337   : > { %v7951_v0 = vadd.f32 %v7950_v57, %v7949_v55  ;;  %v8897_v57 = vld [vmem:[#allocation8 + $0xd0] sm:$0xff]  }
 0x338   : > { %v11791_v17 = vpop.f32.mrf.mxu0  ;;  %v7952_v38 = vpop.f32.mrf.mxu1  ;;  %8153 = vmatprep.subr.bf16.mxu0 %v8897_v57  ;;  %v8904_v57 = vld [vmem:[#allocation8 + $0x178] sm:$0xff]  }
 0x339   : > { %v11801_v35 = vadd.f32 %v7951_v0, %v11713_v16  ;;  %v8896_v16 = vld [vmem:[#allocation8 + $0x8] sm:$0xff]   ;;  %v8898_v0 = vld [vmem:[#allocation8 + $0x90] sm:$0xff]  }
 0x33a   : > { %v11796_v62 = vpop.f32.mrf.mxu0  ;;  %v7953_v23 = vpop.f32.mrf.mxu1  ;;  %8092 = vmatpush3.bf16.msra.mxu1 %v8896_v16  ;;  %8154 = vmatpush3.bf16.msra.mxu0 %v8898_v0 }
 0x33b   : > { %v7954_v31 = vadd.f32 %v7953_v23, %v7952_v38  ;;  %v8899_v38 = vld [vmem:[#allocation8 + $0x40] sm:$0xff]   ;;  %v8901_v23 = vld [vmem:[#allocation8 + $0xc8] sm:$0xff]  }
 0x33c   : > { %v11798_v24 = vpop.f32.mrf.mxu0  ;;  %v7955_v13 = vpop.f32.mrf.mxu1  ;;  %8093 = vmatprep.subr.bf16.mxu1 %v8899_v38  ;;  %8155 = vmatprep.subr.bf16.mxu0 %v8901_v23 }
 0x33d   : > { %v11808_v55 = vadd.f32 %v7954_v31, %v11716_v37  ;;  %v8900_v31 = vld [vmem:[#allocation8] sm:$0xff]  }
 0x33e   : > { %v11803_v32 = vpop.f32.mrf.mxu0  ;;  %v7956_v40 = vpop.f32.mrf.mxu1  ;;  %8094 = vmatpush3.bf16.msra.mxu1 %v8900_v31  ;;  %8156 = vmatpush3.bf16.msra.mxu0 %v8902_v27 }
 0x33f   : > { %v7957_v21 = vadd.f32 %v7956_v40, %v7955_v13  ;;  %8157 = vmatprep.subr.bf16.mxu0 %v8903_v51  ;;  %8207 = vmatprep.subr.bf16.mxu1 %v8904_v57 }
 0x340   : > { %v11805_v42 = vpop.f32.mrf.mxu0  ;;  %v7958_v61 = vpop.f32.mrf.mxu1 }
 0x341   : > { %v11815_v2 = vadd.f32 %v7957_v21, %v11719_v11  ;;  %v8905_v21 = vld [vmem:[#allocation8 + $0x80] sm:$0xff]  }
 0x342   : > { %v11810_v36 = vpop.f32.mrf.mxu0  ;;  %v7959_v45 = vpop.f32.mrf.mxu1  ;;  %8158 = vmatpush3.bf16.msra.mxu0 %v8905_v21 }
 0x343   : > { %v7960_v47 = vadd.f32 %v7959_v45, %v7958_v61 }
 0x344   : > { %v11812_v28 = vpop.f32.mrf.mxu0  ;;  %v7961_v13 = vpop.f32.mrf.mxu1 }
 0x345   : > { %v11822_v40 = vadd.f32 %v7960_v47, %v11722_v7 }
 0x346   : > { %v11817_v37 = vpop.f32.mrf.mxu0  ;;  %v7962_v16 = vpop.f32.mrf.mxu1 }
 0x347   : > { %v7963_v0 = vadd.f32 %v7962_v16, %v7961_v13 }
 0x348   : > { %v11819_v5 = vpop.f32.mrf.mxu0  ;;  %v7964_v23 = vpop.f32.mrf.mxu1 }
 0x349   : > { %v11827_v59 = vadd.f32 %v7963_v0, %v11725_v46 }
 0x34a   : > { %v7965_v45 = vpop.f32.mrf.mxu1 }
 0x34b   : > { %v7966_v49 = vadd.f32 %v7965_v45, %v7964_v23 }
 0x34c   : > { %v11824_v11 = vpop.f32.mrf.mxu0  ;;  %v7967_v7 = vpop.f32.mrf.mxu1 }
 0x34d   : > { %v11830_v31 = vadd.f32 %v7966_v49, %v11728_v6 }
 0x34e   : > { %v8032_v38 = vpop.f32.mrf.mxu0  ;;  %v7968_v56 = vpop.f32.mrf.mxu1 }
 0x34f   : > { %v7969_v20 = vadd.f32 %v7968_v56, %v7967_v7 }
 0x350   : > { %v8034_v61 = vpop.f32.mrf.mxu0  ;;  %v7970_v57 = vpop.f32.mrf.mxu1 }
 0x351   : > { %v11833_v13 = vadd.f32 %v7969_v20, %v11731_v18 }
 0x352   : > { %v8035_v47 = vpop.f32.mrf.mxu0  ;;  %v7971_v46 = vpop.f32.mrf.mxu1 }
 0x353   : > { %v7972_v0 = vadd.f32 %v7971_v46, %v7970_v57  ;;  %v8006_v46 = vadd.f32 %v11763_v1, %v11761_v41  ;;  %v8021_v41 = vadd.f32 %v11798_v24, %v11796_v62  ;;  %v8033_v24 = vadd.f32 %v8032_v38, %v11824_v11 }
 0x354   : > { %v7973_v3 = vpop.f32.mrf.mxu1 }
 0x355   : > { %v8037_v27 = vpop.f32.mrf.mxu0  ;;  %v11836_v23 = vadd.f32 %v7972_v0, %v11734_v29  ;;  %v8003_v29 = vadd.f32 %v11756_v54, %v11752_v53  ;;  %v8012_v0 = vadd.f32 %v11777_v9, %v11775_v44  ;;  %v13714_v54 = vld [vmem:[#allocation116_spill] sm:$0xff] }
 0x356   : > { %v7974_v63 = vpop.f32.mrf.mxu1 }
 0x357   : > { %v8038_v51 = vpop.f32.mrf.mxu0  ;;  %v7975_v49 = vadd.f32 %v7974_v63, %v7973_v3  ;;  %v8009_v3 = vadd.f32 %v11770_v52, %v11768_v25  ;;  %v8024_v25 = vadd.f32 %v11805_v42, %v11803_v32  ;;  %v4045_v9 = vadd.f32 %v8003_v29, %v11744_v22 }
 0x358   : > { %v7976_v58 = vpop.f32.mrf.mxu1  ;;  %v8036_v32 = vadd.f32 %v8035_v47, %v8034_v61 }
 0x359   : > { %v8040_v16 = vpop.f32.mrf.mxu0  ;;  %v11839_v56 = vadd.f32 %v7975_v49, %v11737_v43 }
 0x35a   : > { %v7977_v19 = vpop.f32.mrf.mxu1 }
 0x35b   : > { %v8041_v21 = vpop.f32.mrf.mxu0  ;;  %v7978_v20 = vadd.f32 %v7977_v19, %v7976_v58  ;;  %v8015_v19 = vadd.f32 %v11784_v60, %v11782_v8  ;;  %v4048_v8 = vadd.f32 %v8006_v46, %v11750_v30  ;;  %v8027_v60 = vadd.f32 %v11812_v28, %v11810_v36 }
 0x35c   : > { %v7979_v14 = vpop.f32.mrf.mxu1  ;;  %v8039_v30 = vadd.f32 %v8038_v51, %v8037_v27  ;;  %v4069_v28 = vadd.f32 %v8021_v41, %v11787_v15  ;;  %v11884_v51 = vadd.f32 %v8033_v24, %v11815_v2  ;;  %v11887_v15 = vadd.f32 %v8036_v32, %v11822_v40 }
 0x35d   : > { %v8043_v45 = vpop.f32.mrf.mxu0  ;;  %v11842_v57 = vadd.f32 %v7978_v20, %v11740_v4  ;;  %v8018_v4 = vadd.f32 %v11791_v17, %v11789_v12  ;;  %v11857_v20 = vmul.f32 0.0, %v13714_v54  ;;  %v4056_v17 = vadd.f32 %v8012_v0, %v11766_v48 }
 0x35e   : > { %v7980_v43 = vpop.f32.mrf.mxu1  ;;  %v4061_v62 = vadd.f32 %v8015_v19, %v11773_v26  ;;  %v8042_v48 = vadd.f32 %v8041_v21, %v8040_v16 }
 0x35f   : > { %v8044_v6 = vpop.f32.mrf.mxu0  ;;  %v7981_v58 = vadd.f32 %v7980_v43, %v7979_v14  ;;  %13715 = vst [vmem:[#allocation84_spill] sm:$0xff] %v11857_v20  ;;  %v4053_v14 = vadd.f32 %v8009_v3, %v11759_v33  ;;  %v11875_v22 = vadd.f32 %v8018_v4, %v11780_v39  ;;  %v11881_v39 = vadd.f32 %v8027_v60, %v11801_v35 }
 0x360   : > { %v7982_v53 = vpop.f32.mrf.mxu1  ;;  %v8045_v46 = vadd.f32 %v8044_v6, %v8043_v45  ;;  %v11893_v6 = vadd.f32 %v8039_v30, %v11827_v59  ;;  %v11902_v40 = vadd.f32 %v8042_v48, %v11830_v31 }
 0x361   : > { %v8046_v7 = vpop.f32.mrf.mxu0  ;;  %v4004_v1 = vadd.f32 %v7981_v58, %v11746_v10  ;;  %v8030_v10 = vadd.f32 %v11819_v5, %v11817_v37  ;;  %v4072_v5 = vadd.f32 %v8024_v25, %v11794_v50  ;;  %v8913_v37 = vld [vmem:[#allocation8 + $0x1f8] sm:$0xff]  }
 0x362   : > { %v7983_v44 = vpop.f32.mrf.mxu1  ;;  %8271 = vmatprep.subr.bf16.mxu0 %v8913_v37 }
 0x363   : > { %v8047_v18 = vpop.f32.mrf.mxu0  ;;  %v7984_v12 = vadd.f32 %v7983_v44, %v7982_v53  ;;  %v11890_v16 = vadd.f32 %v8030_v10, %v11808_v55 }
 0x364   : > { %v8048_v26 = vadd.f32 %v8047_v18, %v8046_v7 }
 0x365   : > { %v8049_v63 = vpop.f32.mrf.mxu0  ;;  %v4007_v29 = vadd.f32 %v7984_v12, %v11754_v34 }
 0x366   : > { %v11899_v2 = vadd.f32 %v8048_v26, %v11836_v23 }
 0x367   : > { %v8050_v49 = vpop.f32.mrf.mxu0 }
 0x368   : > { %v8051_v11 = vadd.f32 %v8050_v49, %v8049_v63  ;;  %v11896_v63 = vadd.f32 %v8045_v46, %v11833_v13 }
 0x369   : > { %v8052_v52 = vpop.f32.mrf.mxu0  ;;  %v8459_v33 = vpop.f32.mrf.mxu1 }
 0x36a   : > { %v4166_v36 = vadd.f32 %v8459_v33, %v4053_v14  ;;  %v11905_v58 = vadd.f32 %v8051_v11, %v11839_v56 }
 0x36b   : > { %v8053_v42 = vpop.f32.mrf.mxu0  ;;  %v4157_v43 = vpop.f32.mrf.mxu1 }
 0x36c   : > { %v4258_v38 = vmul.f32 %v4166_v36, %v4166_v36  ;;  %v4158_v61 = vadd.f32 %v4157_v43, %v4045_v9  ;;  %v8054_v47 = vadd.f32 %v8053_v42, %v8052_v52  ;;  %v11907_v59 = vmul.f32 0.5, %v4166_v36 }
 0x36d   : > { %v8055_v3 = vpop.f32.mrf.mxu0  ;;  %v8460_v34 = vpop.f32.mrf.mxu1 }
 0x36e   : > { %v4278_v21 = vmul.f32 %v4258_v38, %v4166_v36  ;;  %v4256_v45 = vmul.f32 %v4158_v61, %v4158_v61  ;;  %v4169_v7 = vadd.f32 %v8460_v34, %v4056_v17  ;;  %v11909_v49 = vmul.f32 0.5, %v4158_v61 }
 0x36f   : > { %v8056_v27 = vpop.f32.mrf.mxu0  ;;  %v4160_v18 = vpop.f32.mrf.mxu1  ;;  %v11912_v41 = vadd.f32 %v8054_v47, %v11842_v57 }
 0x370   : > { %v8057_v50 = vadd.f32 %v8056_v27, %v8055_v3  ;;  %v4298_v55 = vmul.f32 0.044715, %v4278_v21  ;;  %v4276_v0 = vmul.f32 %v4256_v45, %v4158_v61  ;;  %v4161_v19 = vadd.f32 %v4160_v18, %v4048_v8 }
 0x371   : > { %v8058_v35 = vpop.f32.mrf.mxu0  ;;  %v4259_v53 = vmul.f32 %v4169_v7, %v4169_v7  ;;  %v8463_v13 = vpop.f32.mrf.mxu1  ;;  %v11916_v44 = vmul.f32 0.5, %v4169_v7 }
 0x372   : > { %v4318_v23 = vadd.f32 %v4298_v55, %v4166_v36  ;;  %v4296_v31 = vmul.f32 0.044715, %v4276_v0  ;;  %v11914_v52 = vadd.f32 %v8057_v50, %v4004_v1  ;;  %v4257_v56 = vmul.f32 %v4161_v19, %v4161_v19 }
 0x373   : > { %v8059_v4 = vpop.f32.mrf.mxu0  ;;  %v4279_v14 = vmul.f32 %v4259_v53, %v4169_v7  ;;  %v4182_v9 = vadd.f32 %v8463_v13, %v4069_v28  ;;  %v4173_v8 = vpop.f32.mrf.mxu1  ;;  %v11918_v17 = vmul.f32 0.5, %v4161_v19 }
 0x374   : > { %v8060_v25 = vadd.f32 %v8059_v4, %v8058_v35  ;;  %v4338_v60 = vmul.f32 0.7978846, %v4318_v23  ;;  %v4316_v12 = vadd.f32 %v4296_v31, %v4158_v61  ;;  %v4174_v10 = vadd.f32 %v4173_v8, %v4061_v62 }
 0x375   : > { %v4299_v24 = vmul.f32 0.044715, %v4279_v14  ;;  %v4277_v32 = vmul.f32 %v4257_v56, %v4161_v19  ;;  %v4262_v57 = vmul.f32 %v4182_v9, %v4182_v9  ;;  %v8464_v42 = vpop.f32.mrf.mxu1  ;;  %v11922_v30 = vmul.f32 0.5, %v4182_v9 }
 0x376   : > { %v11920_v33 = vadd.f32 %v8060_v25, %v4007_v29  ;;  %9049 = vtanh.f32 %v4338_v60  ;;  %v4336_v1 = vmul.f32 0.7978846, %v4316_v12  ;;  %v4260_v36 = vmul.f32 %v4174_v10, %v4174_v10 }
 0x377   : > { %v4319_v48 = vadd.f32 %v4299_v24, %v4169_v7  ;;  %v4297_v46 = vmul.f32 0.044715, %v4277_v32  ;;  %v4282_v28 = vmul.f32 %v4262_v57, %v4182_v9  ;;  %v4185_v26 = vadd.f32 %v8464_v42, %v4072_v5  ;;  %v4176_v3 = vpop.f32.mrf.mxu1 }
 0x378   : > { %9051 = vtanh.f32 %v4336_v1  ;;  %v11924_v43 = vmul.f32 0.5, %v4174_v10  ;;  %v4280_v62 = vmul.f32 %v4260_v36, %v4174_v10  ;;  %v4177_v37 = vadd.f32 %v4176_v3, %v11875_v22 }
 0x379   : > { %v4339_v11 = vmul.f32 0.7978846, %v4319_v48  ;;  %v4317_v38 = vadd.f32 %v4297_v46, %v4161_v19  ;;  %v4302_v29 = vmul.f32 0.044715, %v4282_v28  ;;  %v11927_v61 = vmul.f32 0.5, %v4185_v26  ;;  %v8467_v47 = vpop.f32.mrf.mxu1 }
 0x37a   : > { %v4300_v27 = vmul.f32 0.044715, %v4280_v62  ;;  %v4263_v34 = vmul.f32 %v4185_v26, %v4185_v26  ;;  %v11929_v50 = vmul.f32 0.5, %v4177_v37  ;;  %v4261_v21 = vmul.f32 %v4177_v37, %v4177_v37 }
 0x37b   : > { %9053 = vtanh.f32 %v4339_v11  ;;  %v4337_v5 = vmul.f32 0.7978846, %v4317_v38  ;;  %v4322_v45 = vadd.f32 %v4302_v29, %v4182_v9  ;;  %v4198_v35 = vadd.f32 %v8467_v47, %v11884_v51  ;;  %v4189_v7 = vpop.f32.mrf.mxu1 }
 0x37c   : > { %v4320_v18 = vadd.f32 %v4300_v27, %v4174_v10  ;;  %v4283_v55 = vmul.f32 %v4263_v34, %v4185_v26  ;;  %v4281_v22 = vmul.f32 %v4261_v21, %v4177_v37  ;;  %v4190_v0 = vadd.f32 %v4189_v7, %v11881_v39 }
 0x37d   : > { %9055 = vtanh.f32 %v4337_v5  ;;  %v4342_v19 = vmul.f32 0.7978846, %v4322_v45  ;;  %v11933_v4 = vmul.f32 0.5, %v4198_v35  ;;  %v4266_v53 = vmul.f32 %v4198_v35, %v4198_v35  ;;  %v8468_v13 = vpop.f32.mrf.mxu1 }
 0x37e   : > { %v4340_v23 = vmul.f32 0.7978846, %v4320_v18  ;;  %v4303_v25 = vmul.f32 0.044715, %v4283_v55  ;;  %v4301_v31 = vmul.f32 0.044715, %v4281_v22  ;;  %v4264_v14 = vmul.f32 %v4190_v0, %v4190_v0 }
 0x37f   : > { %9057 = vtanh.f32 %v4342_v19  ;;  %v4286_v56 = vmul.f32 %v4266_v53, %v4198_v35  ;;  %v11935_v9 = vmul.f32 0.5, %v4190_v0  ;;  %v4201_v51 = vadd.f32 %v8468_v13, %v11887_v15  ;;  %v4192_v8 = vpop.f32.mrf.mxu1 }
 0x380   : > { %9059 = vtanh.f32 %v4340_v23  ;;  %v4323_v60 = vadd.f32 %v4303_v25, %v4185_v26  ;;  %v4321_v39 = vadd.f32 %v4301_v31, %v4177_v37  ;;  %v4284_v12 = vmul.f32 %v4264_v14, %v4190_v0  ;;  %v13716_v14 = vld [vmem:[#allocation33_spill] sm:$0xff] }
 0x381   : > { %v4306_v10 = vmul.f32 0.044715, %v4286_v56  ;;  %v11938_v24 = vmul.f32 0.5, %v4201_v51  ;;  %v4267_v32 = vmul.f32 %v4201_v51, %v4201_v51  ;;  %v4193_v57 = vadd.f32 %v4192_v8, %v11890_v16  ;;  %v8471_v42 = vpop.f32.mrf.mxu1 }
 0x382   : > { %v4343_v1 = vmul.f32 0.7978846, %v4323_v60  ;;  %v4341_v36 = vmul.f32 0.7978846, %v4321_v39  ;;  %v4304_v48 = vmul.f32 0.044715, %v4284_v12  ;;  %v4214_v46 = vadd.f32 %v8471_v42, %v11896_v63 }
 0x383   : > { %v9050_v28 = vpop.eup %9049  ;;  %v4326_v3 = vadd.f32 %v4306_v10, %v4198_v35  ;;  %v4287_v15 = vmul.f32 %v4267_v32, %v4201_v51  ;;  %v11942_v62 = vmul.f32 0.5, %v4193_v57  ;;  %v4265_v26 = vmul.f32 %v4193_v57, %v4193_v57  ;;  %v4205_v37 = vpop.f32.mrf.mxu1  ;;  %v13717_v32 = vld [vmem:[#allocation30_spill] sm:$0xff] }
 0x384   : > { %v4378_v11 = vadd.f32 1.0, %v9050_v28  ;;  %9061 = vtanh.f32 %v4343_v1  ;;  %v4324_v38 = vadd.f32 %v4304_v48, %v4190_v0  ;;  %v11944_v29 = vmul.f32 0.5, %v4214_v46 }
 0x385   : > { %v9052_v47 = vpop.eup %9051  ;;  %9063 = vtanh.f32 %v4341_v36  ;;  %v4346_v16 = vmul.f32 0.7978846, %v4326_v3  ;;  %v4307_v27 = vmul.f32 0.044715, %v4287_v15  ;;  %v4285_v34 = vmul.f32 %v4265_v26, %v4193_v57  ;;  %v8472_v35 = vpop.f32.mrf.mxu1 }
 0x386   : > { %v4398_v21 = vmul.f32 %v4378_v11, %v11907_v59  ;;  %v4376_v63 = vadd.f32 1.0, %v9052_v47  ;;  %v4344_v5 = vmul.f32 0.7978846, %v4324_v38  ;;  %v4270_v45 = vmul.f32 %v4214_v46, %v4214_v46  ;;  %v13718_v47 = vld [vmem:[#allocation37_spill] sm:$0xff] }
 0x387   : > { %9065 = vtanh.f32 %v4346_v16  ;;  %v4327_v7 = vadd.f32 %v4307_v27, %v4201_v51  ;;  %v4305_v18 = vmul.f32 0.044715, %v4285_v34  ;;  %v4206_v55 = vadd.f32 %v4205_v37, %v11893_v6  ;;  %v4208_v39 = vpop.f32.mrf.mxu1 }
 0x388   : > { %v9054_v22 = vpop.eup %9053  ;;  %v4418_v0 = vmul.f32 1.7015043, %v4398_v21  ;;  %v4396_v19 = vmul.f32 %v4376_v63, %v11909_v49  ;;  %9067 = vtanh.f32 %v4344_v5  ;;  %v4290_v53 = vmul.f32 %v4270_v45, %v4214_v46  ;;  %v13719_v5 = vld [vmem:[#allocation31_spill] sm:$0xff] }
 0x389   : > { %v4379_v13 = vadd.f32 1.0, %v9054_v22  ;;  %v4347_v23 = vmul.f32 0.7978846, %v4327_v7  ;;  %v4325_v25 = vadd.f32 %v4305_v18, %v4193_v57  ;;  %v11949_v31 = vmul.f32 0.5, %v4206_v55  ;;  %v8475_v38 = vpop.f32.mrf.mxu1 }
 0x38a   : > { %v9056_v59 = vpop.eup %9055  ;;  %v11952_v56 = vmul.f32 %v4418_v0, %v13716_v14  ;;  %v4416_v8 = vmul.f32 1.7015043, %v4396_v19  ;;  %v4310_v51 = vmul.f32 0.044715, %v4290_v53  ;;  %v4268_v60 = vmul.f32 %v4206_v55, %v4206_v55  ;;  %v13721_v14 = vld [vmem:[#allocation39_spill] sm:$0xff] }
 0x38b   : > { %v4399_v6 = vmul.f32 %v4379_v13, %v11916_v44  ;;  %v4377_v12 = vadd.f32 1.0, %v9056_v59  ;;  %9069 = vtanh.f32 %v4347_v23  ;;  %v4345_v49 = vmul.f32 0.7978846, %v4325_v25  ;;  %v13720_v13 = vld [vmem:[#allocation40_spill] sm:$0xff]  ;;  %v4221_v25 = vpop.f32.mrf.mxu1 }
 0x38c   : > { %v9058_v10 = vpop.eup %9057  ;;  %v11956_v42 = vmul.f32 %v4416_v8, %v13717_v32  ;;  %v4330_v57 = vadd.f32 %v4310_v51, %v4214_v46  ;;  %v4288_v1 = vmul.f32 %v4268_v60, %v4206_v55  ;;  %v4217_v36 = vadd.f32 %v8472_v35, %v11899_v2 }
 0x38d   : > { %v9060_v48 = vpop.eup %9059  ;;  %v4419_v28 = vmul.f32 1.7015043, %v4399_v6  ;;  %v4397_v3 = vmul.f32 %v4377_v12, %v11918_v17  ;;  %v4382_v15 = vadd.f32 1.0, %v9058_v10  ;;  %9071 = vtanh.f32 %v4345_v49 }
 0x38e   : > { %v4380_v26 = vadd.f32 1.0, %v9060_v48  ;;  %v4350_v37 = vmul.f32 0.7978846, %v4330_v57  ;;  %v4308_v44 = vmul.f32 0.044715, %v4288_v1  ;;  %v11960_v11 = vmul.f32 0.5, %v4217_v36 }
 0x38f   : > { %v11963_v16 = vmul.f32 %v4419_v28, %v13718_v47  ;;  %v4417_v27 = vmul.f32 1.7015043, %v4397_v3  ;;  %v4402_v46 = vmul.f32 %v4382_v15, %v11922_v30  ;;  %v4271_v34 = vmul.f32 %v4217_v36, %v4217_v36  ;;  %v13723_v47 = vld [vmem:[#allocation35_spill] sm:$0xff] }
 0x390   : > { %v4400_v2 = vmul.f32 %v4380_v26, %v11924_v43  ;;  %9073 = vtanh.f32 %v4350_v37  ;;  %v4328_v21 = vadd.f32 %v4308_v44, %v4206_v55  ;;  %v4209_v17 = vadd.f32 %v4208_v39, %v11902_v40  ;;  %v13722_v26 = vld [vmem:[#allocation41_spill] sm:$0xff] }
 0x391   : > { %v9062_v63 = vpop.eup %9061  ;;  %v11969_v45 = vmul.f32 %v4417_v27, %v13719_v5  ;;  %v4422_v35 = vmul.f32 1.7015043, %v4402_v46  ;;  %v4291_v7 = vmul.f32 %v4271_v34, %v4217_v36  ;;  %v4230_v18 = vadd.f32 %v8475_v38, %v11914_v52  ;;  %v13724_v5 = vld [vmem:[#allocation48_spill] sm:$0xff] }
 0x392   : > { %v9064_v22 = vpop.eup %9063  ;;  %v4420_v0 = vmul.f32 1.7015043, %v4400_v2  ;;  %v4383_v19 = vadd.f32 1.0, %v9062_v63  ;;  %v4348_v53 = vmul.f32 0.7978846, %v4328_v21  ;;  %v11972_v30 = vmul.f32 0.5, %v4209_v17 }
 0x393   : > { %v11975_v43 = vmul.f32 %v4422_v35, %v13720_v13  ;;  %v4381_v55 = vadd.f32 1.0, %v9064_v22  ;;  %v4311_v23 = vmul.f32 0.044715, %v4291_v7  ;;  %v4269_v40 = vmul.f32 %v4209_v17, %v4209_v17 }
 0x394   : > { %v9066_v59 = vpop.eup %9065  ;;  %v11978_v8 = vmul.f32 %v4420_v0, %v13721_v14  ;;  %v4403_v51 = vmul.f32 %v4383_v19, %v11927_v61  ;;  %9075 = vtanh.f32 %v4348_v53  ;;  %v11981_v52 = vmul.f32 0.5, %v4230_v18  ;;  %v13725_v0 = vld [vmem:[#allocation42_spill] sm:$0xff] }
 0x395   : > { %v9068_v60 = vpop.eup %9067  ;;  %v4401_v39 = vmul.f32 %v4381_v55, %v11929_v50  ;;  %v4386_v6 = vadd.f32 1.0, %v9066_v59  ;;  %v4331_v12 = vadd.f32 %v4311_v23, %v4217_v36  ;;  %v4289_v49 = vmul.f32 %v4269_v40, %v4209_v17  ;;  %v8476_v36 = vpop.f32.mrf.mxu1 }
 0x396   : > { %v4423_v10 = vmul.f32 1.7015043, %v4403_v51  ;;  %v4384_v32 = vadd.f32 1.0, %v9068_v60  ;;  %v4274_v57 = vmul.f32 %v4230_v18, %v4230_v18  ;;  %v4222_v1 = vadd.f32 %v4221_v25, %v11905_v58 }
 0x397   : > { %v4421_v48 = vmul.f32 1.7015043, %v4401_v39  ;;  %v4406_v28 = vmul.f32 %v4386_v6, %v11933_v4  ;;  %v4351_v3 = vmul.f32 0.7978846, %v4331_v12  ;;  %v4309_v15 = vmul.f32 0.044715, %v4289_v49  ;;  %v4224_v23 = vpop.f32.mrf.mxu1 }
 0x398   : > { %v9070_v61 = vpop.eup %9069  ;;  %v11987_v37 = vmul.f32 %v4423_v10, %v13722_v26  ;;  %v4404_v44 = vmul.f32 %v4384_v32, %v11935_v9  ;;  %v4294_v50 = vmul.f32 %v4274_v57, %v4230_v18  ;;  %v11990_v38 = vmul.f32 0.5, %v4222_v1  ;;  %v13727_v39 = vld [vmem:[#allocation49_spill] sm:$0xff] }
 0x399   : > { %v11993_v27 = vmul.f32 %v4421_v48, %v13723_v47  ;;  %v4426_v46 = vmul.f32 1.7015043, %v4406_v28  ;;  %v4387_v58 = vadd.f32 1.0, %v9070_v61  ;;  %9077 = vtanh.f32 %v4351_v3  ;;  %v13728_v57 = vld [vmem:[#allocation45_spill] sm:$0xff] }
 0x39a   : > { %v9072_v34 = vpop.eup %9071  ;;  %v4424_v4 = vmul.f32 1.7015043, %v4404_v44  ;;  %v4329_v2 = vadd.f32 %v4309_v15, %v4209_v17  ;;  %v4314_v21 = vmul.f32 0.044715, %v4294_v50  ;;  %v4272_v63 = vmul.f32 %v4222_v1, %v4222_v1  ;;  %v13729_v47 = vld [vmem:[#allocation57_spill] sm:$0xff] }
 0x39b   : > { %v11996_v35 = vmul.f32 %v4426_v46, %v13724_v5  ;;  %v4407_v9 = vmul.f32 %v4387_v58, %v11938_v24  ;;  %v4385_v7 = vadd.f32 1.0, %v9072_v34  ;;  %v4233_v22 = vadd.f32 %v8476_v36, %v11920_v33 }
 0x39c   : > { %v12001_v19 = vmul.f32 %v4424_v4, %v13725_v0  ;;  %v4349_v53 = vmul.f32 0.7978846, %v4329_v2  ;;  %v4334_v13 = vadd.f32 %v4314_v21, %v4230_v18  ;;  %v4292_v55 = vmul.f32 %v4272_v63, %v4222_v1 }
 0x39d   : > { %v9074_v40 = vpop.eup %9073  ;;  %v4427_v25 = vmul.f32 1.7015043, %v4407_v9  ;;  %v4405_v17 = vmul.f32 %v4385_v7, %v11942_v62  ;;  %v12004_v59 = vmul.f32 0.5, %v4233_v22  ;;  %v4275_v14 = vmul.f32 %v4233_v22, %v4233_v22 }
 0x39e   : > { %13726 = vst [vmem:[#allocation83_spill] sm:$0xff] %v12001_v19  ;;  %v4390_v51 = vadd.f32 1.0, %v9074_v40  ;;  %9079 = vtanh.f32 %v4349_v53  ;;  %v4354_v24 = vmul.f32 0.7978846, %v4334_v13  ;;  %v4312_v60 = vmul.f32 0.044715, %v4292_v55 }
 0x39f   : > { %v12007_v33 = vmul.f32 %v4427_v25, %v13727_v39  ;;  %v4425_v6 = vmul.f32 1.7015043, %v4405_v17  ;;  %v4295_v12 = vmul.f32 %v4275_v14, %v4233_v22  ;;  %v4225_v18 = vadd.f32 %v4224_v23, %v11912_v41  ;;  %v13731_v13 = vld [vmem:[#allocation63_spill] sm:$0xff] }
 0x3a0   : > { %v4410_v49 = vmul.f32 %v4390_v51, %v11944_v29  ;;  %9081 = vtanh.f32 %v4354_v24  ;;  %v4332_v10 = vadd.f32 %v4312_v60, %v4222_v1  ;;  %v4720_v62 = vrot.slane %v11956_v42, 1  ;;  %v13732_v23 = vld [vmem:[#allocation51_spill] sm:$0xff] }
 0x3a1   : > { %v9076_v32 = vpop.eup %9075  ;;  %v12013_v48 = vmul.f32 %v4425_v6, %v13728_v57  ;;  %v4315_v28 = vmul.f32 0.044715, %v4295_v12  ;;  %v12015_v3 = vmul.f32 0.5, %v4225_v18  ;;  %v4273_v15 = vmul.f32 %v4225_v18, %v4225_v18  ;;  %v13733_v57 = vld [vmem:[#allocation32_spill] sm:$0xff] }
 0x3a2   : > { %v4430_v61 = vmul.f32 1.7015043, %v4410_v49  ;;  %v4388_v26 = vadd.f32 1.0, %v9076_v32  ;;  %v4352_v44 = vmul.f32 0.7978846, %v4332_v10  ;;  %v4721_v50 = vrot.slane %v11969_v45, 1 }
 0x3a3   : > { %v4335_v41 = vadd.f32 %v4315_v28, %v4233_v22  ;;  %v4293_v36 = vmul.f32 %v4273_v15, %v4225_v18  ;;  %v4723_v29 = vrot.slane %v11952_v56, 1  ;;  %v4725_v1 = vrot.slane %v11963_v16, 1  ;;  %v8918_v39 = vld [vmem:[#allocation8 + $0x1b0] sm:$0xff]  }
 0x3a4   : > { %v12021_v46 = vmul.f32 %v4430_v61, %v13729_v47  ;;  %v4408_v58 = vmul.f32 %v4388_v26, %v11949_v31  ;;  %9083 = vtanh.f32 %v4352_v44  ;;  %v4722_v34 = vsel %vm1675_vm0, %v4720_v62, %v4721_v50  ;;  %v13734_v26 = vld [vmem:[#allocation66_spill] sm:$0xff]  ;;  %v13735_v44 = vld [vmem:[#allocation69_spill] sm:$0xff] }
 0x3a5   : > { %v4355_v4 = vmul.f32 0.7978846, %v4335_v41  ;;  %v4313_v2 = vmul.f32 0.044715, %v4293_v36  ;;  %v4724_v21 = vsel %vm1675_vm0, %v4721_v50, %v4723_v29  ;;  %v4726_v63 = vsel %vm1675_vm0, %v4723_v29, %v4725_v1  ;;  %v13736_v36 = vld [vmem:[#allocation55_spill] sm:$0xff] }
 0x3a6   : > { %13730 = vst [vmem:[#allocation90_spill] sm:$0xff] %v12021_v46  ;;  %v9078_v5 = vpop.eup %9077  ;;  %v4428_v9 = vmul.f32 1.7015043, %v4408_v58  ;;  %v4990_v7 = vpack.c.bf16 %v4722_v34, %v4720_v62  ;;  %v12029_v22 = vpack.c.bf16 %v4726_v63, %v4723_v29  ;;  %v4999_v0 = vpack.c.bf16 %v4726_v63, %v4724_v21  ;;  %v13737_v58 = vld [vmem:[#allocation60_spill] sm:$0xff] }
 0x3a7   : > { %v4391_v53 = vadd.f32 1.0, %v9078_v5  ;;  %9085 = vtanh.f32 %v4355_v4  ;;  %v4333_v31 = vadd.f32 %v4313_v2, %v4225_v18  ;;  %v4602_v55 = vmul.f32 %v11956_v42, %v13731_v13 }
 0x3a8   : > { %v12034_v40 = vmul.f32 %v4428_v9, %v13732_v23  ;;  %v5082_v25 = vshrl.u32 %v4990_v7, 16  ;;  %v5085_v17 = vshll.u32 %v4990_v7, 16  ;;  %v5090_v14 = vshrl.u32 %v4999_v0, 16 }
 0x3a9   : > { %v4411_v51 = vmul.f32 %v4391_v53, %v11960_v11  ;;  %v4353_v24 = vmul.f32 0.7978846, %v4333_v31  ;;  %v5093_v60 = vshll.u32 %v4999_v0, 16  ;;  %v4603_v28 = vmul.f32 %v11969_v45, %v13733_v57 }
 0x3aa   : > { %v5084_v6 = vrot.slane %v5082_v25, 3  ;;  %v5087_v12 = vrot.slane %v5085_v17, 4  ;;  %v5092_v49 = vrot.slane %v5090_v14, 3  ;;  %v4604_v11 = vmul.f32 %v11952_v56, %v13734_v26 }
 0x3ab   : > { %v9080_v10 = vpop.eup %9079  ;;  %v4431_v62 = vmul.f32 1.7015043, %v4411_v51  ;;  %9087 = vtanh.f32 %v4353_v24  ;;  %v5095_v32 = vrot.slane %v5093_v60, 4  ;;  %v4989_v50 = vpack.c.bf16 %v4602_v55, %v13735_v44  ;;  %v13738_v60 = vld [vmem:[#allocation54_spill] sm:$0xff] }
 0x3ac   : > { %v4389_v15 = vadd.f32 1.0, %v9080_v10  ;;  %v5088_v61 = vor.u32 %v5087_v12, %v5084_v6  ;;  %v4636_v34 = vmul.f32 %v11969_v45, %v13737_v58  ;;  %v4637_v4 = vmul.f32 %v11952_v56, %v13731_v13 }
 0x3ad   : > { %v9082_v41 = vpop.eup %9081  ;;  %v12045_v29 = vmul.f32 %v4431_v62, %v13736_v36  ;;  %v12047_v47 = vor.u32 %v5095_v32, %v5092_v49  ;;  %v4998_v63 = vpack.c.bf16 %v4604_v11, %v4603_v28  ;;  %v5065_v5 = vshrl.u32 %v4989_v50, 16 }
 0x3ae   : > { %v4409_v2 = vmul.f32 %v4389_v15, %v11972_v30  ;;  %v4394_v21 = vadd.f32 1.0, %v9082_v41  ;;  %v5068_v7 = vshll.u32 %v4989_v50, 16  ;;  %v4638_v0 = vmul.f32 %v11963_v16, %v13733_v57 }
 0x3af   : > { %v5097_v9 = vsel %vm2422_vm2, %v5088_v61, %v12047_v47  ;;  %v4639_v53 = vmul.f32 %v11978_v8, %v13734_v26  ;;  %v5067_v23 = vrot.slane %v5065_v5, 3  ;;  %v5073_v25 = vshrl.u32 %v4998_v63, 16 }
 0x3b0   : > { %v4429_v31 = vmul.f32 1.7015043, %v4409_v2  ;;  %v4414_v55 = vmul.f32 %v4394_v21, %v11981_v52  ;;  %6204 = vmatprep.mubr.bf16.mxu1 %v5097_v9  ;;  %v5070_v17 = vrot.slane %v5068_v7, 4  ;;  %v5076_v14 = vshll.u32 %v4998_v63, 16  ;;  %v13739_v52 = vld [vmem:[#allocation92_spill] sm:$0xff]  ;;  %v13741_v7 = vld [vmem:[#allocation75_spill] sm:$0xff] }
 0x3b1   : > { %v9084_v30 = vpop.eup %9083  ;;  %v4992_v51 = vpack.c.bf16 %v4637_v4, %v4636_v34  ;;  %v5001_v24 = vpack.c.bf16 %v4639_v53, %v4638_v0  ;;  %v5075_v10 = vrot.slane %v5073_v25, 3  ;;  %v8906_v4 = vld [vmem:[#allocation8 + $0x138] sm:$0xff]   ;;  %v4619_v0 = vmul.f32 %v11956_v42, %v13741_v7  ;;  %v8907_v53 = vld [vmem:[#allocation8 + $0x170] sm:$0xff]  }
 0x3b2   : > { %v12062_v6 = vmul.f32 %v4429_v31, %v13738_v60  ;;  %v4434_v12 = vmul.f32 1.7015043, %v4414_v55  ;;  %v4392_v49 = vadd.f32 1.0, %v9084_v30  ;;  %v5071_v62 = vor.u32 %v5070_v17, %v5067_v23  ;;  %v13742_v23 = vld [vmem:[#allocation77_spill] sm:$0xff]  ;;  %v13743_v17 = vld [vmem:[#allocation56_spill] sm:$0xff]  ;;  %v13746_v60 = vld [vmem:[#allocation87_spill] sm:$0xff] }
 0x3b3   : > { %v5078_v32 = vrot.slane %v5076_v14, 4  ;;  %v5116_v28 = vshrl.u32 %v4992_v51, 16  ;;  %v5119_v15 = vshll.u32 %v4992_v51, 16  ;;  %v5124_v50 = vshrl.u32 %v5001_v24, 16 }
 0x3b4   : > { %v9086_v61 = vpop.eup %9085  ;;  %v12065_v11 = vmul.f32 %v4434_v12, %v13739_v52  ;;  %v4412_v44 = vmul.f32 %v4392_v49, %v11990_v38  ;;  %v5127_v41 = vshll.u32 %v5001_v24, 16  ;;  %v4620_v25 = vmul.f32 %v11969_v45, %v13742_v23  ;;  %v13745_v24 = vld [vmem:[#allocation78_spill] sm:$0xff]  ;;  %v8908_v45 = vld [vmem:[#allocation8 + $0x130] sm:$0xff]  }
 0x3b5   : > { %v4395_v36 = vadd.f32 1.0, %v9086_v61  ;;  %v12068_v34 = vor.u32 %v5078_v32, %v5075_v10  ;;  %v5118_v2 = vrot.slane %v5116_v28, 3  ;;  %v5121_v21 = vrot.slane %v5119_v15, 4  ;;  %v13747_v61 = vld [vmem:[#allocation67_spill] sm:$0xff] }
 0x3b6   : > { %13740 = vst [vmem:[#allocation93_spill] sm:$0xff] %v12065_v11  ;;  %v4432_v63 = vmul.f32 1.7015043, %v4412_v44  ;;  %v5126_v5 = vrot.slane %v5124_v50, 3  ;;  %v5129_v9 = vrot.slane %v5127_v41, 4  ;;  %v4621_v42 = vmul.f32 %v11952_v56, %v13745_v24  ;;  %v8909_v44 = vld [vmem:[#allocation8 + $0x168] sm:$0xff]  }
 0x3b7   : > { %v4415_v31 = vmul.f32 %v4395_v36, %v12004_v59  ;;  %v5080_v38 = vsel %vm2422_vm2, %v5071_v62, %v12068_v34  ;;  %v5122_v55 = vor.u32 %v5121_v21, %v5118_v2  ;;  %v12086_v59 = vmul.f32 %v11963_v16, %v13746_v60  ;;  %v13748_v50 = vld [vmem:[#allocation109_spill] sm:$0xff]  ;;  %v13750_v2 = vld [vmem:[#allocation34_spill] sm:$0xff] }
 0x3b8   : > { %v9088_v30 = vpop.eup %9087  ;;  %v12078_v14 = vmul.f32 %v4432_v63, %v13743_v17  ;;  %6205 = vmatmul.mubr.bf16.vlgmr.msra.gmra.mxu1 %v5080_v38  ;;  %v12080_v51 = vor.u32 %v5129_v9, %v5126_v5  ;;  %v4785_v10 = vrot.slane %v4619_v0, 2  ;;  %v4786_v62 = vrot.slane %v4620_v25, 2 }
 0x3b9   : > { %v4435_v12 = vmul.f32 1.7015043, %v4415_v31  ;;  %v4393_v49 = vadd.f32 1.0, %v9088_v30  ;;  %8208 = vmatpush3.bf16.msra.mxu1 %v8906_v4  ;;  %v4788_v28 = vrot.slane %v4621_v42, 2  ;;  %v13296_v15 = vrot.slane %v12086_v59, 2 }
 0x3ba   : > { %13744 = vst [vmem:[#allocation99_spill] sm:$0xff] %v12078_v14  ;;  %v5131_v32 = vsel %vm2422_vm2, %v5122_v55, %v12080_v51  ;;  %v4640_v52 = vmul.f32 %v11993_v27, %v13747_v61  ;;  %8209 = vmatprep.subr.bf16.mxu1 %v8907_v53  ;;  %v4787_v4 = vsel %vm2084_vm3, %v4785_v10, %v4786_v62  ;;  %v12105_v0 = vrot.slane %v11978_v8, 1  ;;  %v8910_v55 = vld [vmem:[#allocation8 + $0x128] sm:$0xff]  }
 0x3bb   : > { %v12094_v41 = vmul.f32 %v4435_v12, %v13748_v50  ;;  %v4413_v36 = vmul.f32 %v4393_v49, %v12015_v3  ;;  %6301 = vmatprep.mubr.bf16.mxu0 %v5131_v32  ;;  %v4641_v21 = vmul.f32 %v11975_v43, %v13750_v2  ;;  %v4789_v63 = vsel %vm2084_vm3, %v4786_v62, %v4788_v28  ;;  %v8911_v12 = vld [vmem:[#allocation8 + $0x160] sm:$0xff]  }
 0x3bc   : > { %v4791_v5 = vsel %vm2084_vm3, %v4788_v28, %v13296_v15  ;;  %v4991_v9 = vpack.c.bf16 %v4787_v4, %v4785_v10  ;;  %v4729_v3 = vrot.slane %v11993_v27, 1  ;;  %v4728_v17 = vsel %vm1675_vm0, %v4725_v1, %v12105_v0  ;;  %v13751_v49 = vld [vmem:[#allocation62_spill] sm:$0xff] }
 0x3bd   : > { %13749 = vst [vmem:[#allocation79_spill] sm:$0xff] %v12094_v41  ;;  %v4433_v53 = vmul.f32 1.7015043, %v4413_v36  ;;  %v5000_v31 = vpack.c.bf16 %v4791_v5, %v4789_v63  ;;  %v5009_v38 = vpack.c.bf16 %v4641_v21, %v4640_v52  ;;  %8210 = vmatpush3.bf16.msra.mxu1 %v8908_v45  ;;  %v4605_v42 = vmul.f32 %v11963_v16, %v13747_v61 }
 0x3be   : > { %v5099_v25 = vshrl.u32 %v4991_v9, 16  ;;  %v5102_v30 = vshll.u32 %v4991_v9, 16  ;;  %8211 = vmatprep.subr.bf16.mxu1 %v8909_v44  ;;  %v12119_v36 = vsel %vm1675_vm0, %v12105_v0, %v4729_v3  ;;  %v8912_v44 = vld [vmem:[#allocation8 + $0x120] sm:$0xff]   ;;  %v13757_v20 = vrot.slane %v11987_v37, 1 }
 0x3bf   : > { %v12115_v10 = vmul.f32 %v4433_v53, %v13751_v49  ;;  %v5107_v62 = vshrl.u32 %v5000_v31, 16  ;;  %v5110_v32 = vshll.u32 %v5000_v31, 16  ;;  %v5237_v28 = vshrl.u32 %v5009_v38, 16 }
 0x3c0   : > { %v5101_v45 = vrot.slane %v5099_v25, 3  ;;  %v5104_v52 = vrot.slane %v5102_v30, 4  ;;  %v5240_v50 = vshll.u32 %v5009_v38, 16  ;;  %v5002_v63 = vpack.c.bf16 %v12119_v36, %v4728_v17  ;;  %v8915_v38 = vld [vmem:[#allocation8 + $0x158] sm:$0xff]  }
 0x3c1   : > { %v5109_v4 = vrot.slane %v5107_v62, 3  ;;  %v5112_v1 = vrot.slane %v5110_v32, 4  ;;  %v5239_v21 = vrot.slane %v5237_v28, 3  ;;  %8212 = vmatpush3.bf16.msra.mxu1 %v8910_v55  ;;  %v4606_v53 = vmul.f32 %v11978_v8, %v13750_v2  ;;  %v8914_v32 = vld [vmem:[#allocation8 + $0x1b8] sm:$0xff]  }
 0x3c2   : > { %v5105_v5 = vor.u32 %v5104_v52, %v5101_v45  ;;  %v5242_v9 = vrot.slane %v5240_v50, 4  ;;  %v4731_v31 = vrot.slane %v11975_v43, 1  ;;  %8213 = vmatprep.subr.bf16.mxu1 %v8911_v12  ;;  %v5141_v30 = vshrl.u32 %v5002_v63, 16  ;;  %v13752_v45 = vld [vmem:[#allocation89_spill] sm:$0xff]  ;;  %v8917_v50 = vld [vmem:[#allocation8 + $0x1f0] sm:$0xff]  }
 0x3c3   : > { %v12125_v25 = vor.u32 %v5112_v1, %v5109_v4  ;;  %v5144_v49 = vshll.u32 %v5002_v63, 16  ;;  %v13295_v62 = vrot.slane %v11987_v37, 1  ;;  %v5007_v55 = vpack.c.bf16 %v4606_v53, %v4605_v42  ;;  %v8916_v63 = vld [vmem:[#allocation8 + $0x118] sm:$0xff]   ;;  %v8919_v53 = vld [vmem:[#allocation8 + $0x150] sm:$0xff]  }
 0x3c4   : > { %v12128_v28 = vor.u32 %v5242_v9, %v5239_v21  ;;  %v4732_v17 = vsel %vm1675_vm0, %v4729_v3, %v4731_v31  ;;  %v4623_v52 = vmul.f32 %v11978_v8, %v13752_v45  ;;  %v5143_v18 = vrot.slane %v5141_v30, 3  ;;  %v13753_v30 = vld [vmem:[#allocation97_spill] sm:$0xff] }
 0x3c5   : > { %v5114_v12 = vsel %vm2422_vm2, %v5105_v5, %v12125_v25  ;;  %v5146_v4 = vrot.slane %v5144_v49, 4  ;;  %v4734_v1 = vsel %vm1675_vm0, %v4731_v31, %v13295_v62  ;;  %8214 = vmatpush3.bf16.msra.mxu1 %v8912_v44  ;;  %v5218_v42 = vshrl.u32 %v5007_v55, 16  ;;  %v13754_v44 = vld [vmem:[#allocation36_spill] sm:$0xff] }
 0x3c6   : > { %6302 = vmatmul.mubr.bf16.vlgmr.msra.gmra.mxu0 %v5114_v12  ;;  %v5244_v3 = vsel %vm2422_vm2, %v12080_v51, %v12128_v28  ;;  %v5221_v21 = vshll.u32 %v5007_v55, 16  ;;  %v5005_v9 = vpack.c.bf16 %v4734_v1, %v4732_v17  ;;  %8215 = vmatprep.subr.bf16.mxu1 %v8915_v38  ;;  %v12145_v49 = vmul.f32 %v11993_v27, %v13753_v30  ;;  %v8921_v38 = vld [vmem:[#allocation8 + $0x1e8] sm:$0xff]  }
 0x3c7   : > { %6309 = vmatprep.mubr.bf16.mxu0 %v5244_v3  ;;  %v12141_v5 = vor.u32 %v5146_v4, %v5143_v18  ;;  %v4792_v31 = vrot.slane %v4623_v52, 2  ;;  %v4642_v12 = vmul.f32 %v11987_v37, %v13754_v44  ;;  %8272 = vmatpush3.bf16.msra.mxu0 %v8914_v32  ;;  %v5220_v62 = vrot.slane %v5218_v42, 3  ;;  %v13756_v1 = vld [vmem:[#allocation38_spill] sm:$0xff] }
 0x3c8   : > { %v5223_v51 = vrot.slane %v5221_v21, 4  ;;  %v5192_v15 = vshrl.u32 %v5005_v9, 16  ;;  %v5195_v55 = vshll.u32 %v5005_v9, 16  ;;  %8273 = vmatprep.subr.bf16.mxu0 %v8917_v50  ;;  %v13755_v17 = vrot.slane %v12086_v59, 2 }
 0x3c9   : > { %v5226_v18 = vsel %vm2422_vm2, %v12047_v47, %v12141_v5  ;;  %v13297_v52 = vrot.slane %v12145_v49, 2  ;;  %v4643_v32 = vmul.f32 %v12001_v19, %v13756_v1  ;;  %8216 = vmatpush3.bf16.msra.mxu1 %v8916_v63  ;;  %v4607_v21 = vmul.f32 %v11993_v27, %v13754_v44  ;;  %v8920_v47 = vld [vmem:[#allocation8 + $0x110] sm:$0xff]   ;;  %v13759_v44 = vld [vmem:[#allocation98_spill] sm:$0xff] }
 0x3ca   : > { %v4793_v4 = vsel %vm2084_vm3, %v13755_v17, %v4792_v31  ;;  %6212 = vmatprep.mubr.bf16.mxu1 %v5226_v18  ;;  %v12158_v3 = vor.u32 %v5223_v51, %v5220_v62  ;;  %v5194_v42 = vrot.slane %v5192_v15, 3  ;;  %v5197_v50 = vrot.slane %v5195_v55, 4  ;;  %8217 = vmatprep.subr.bf16.mxu1 %v8919_v53  ;;  %v8922_v62 = vld [vmem:[#allocation8 + $0x1a8] sm:$0xff]  }
 0x3cb   : > { %v4795_v59 = vsel %vm2084_vm3, %v4792_v31, %v13297_v52  ;;  %v5016_v9 = vpack.c.bf16 %v4643_v32, %v4642_v12  ;;  %v4608_v17 = vmul.f32 %v11975_v43, %v13756_v1  ;;  %v4735_v63 = vrot.slane %v12001_v19, 1  ;;  %8274 = vmatpush3.bf16.msra.mxu0 %v8918_v39  ;;  %v8923_v18 = vld [vmem:[#allocation8 + $0x148] sm:$0xff]   ;;  %v8924_v31 = vld [vmem:[#allocation8 + $0x1e0] sm:$0xff]  }
 0x3cc   : > { %v5225_v15 = vsel %vm2422_vm2, %v12068_v34, %v12158_v3  ;;  %v12171_v51 = vor.u32 %v5197_v50, %v5194_v42  ;;  %v5008_v53 = vpack.c.bf16 %v4795_v59, %v4793_v4  ;;  %v13302_v55 = vrot.slane %v12013_v48, 1  ;;  %8275 = vmatprep.subr.bf16.mxu0 %v8921_v38  ;;  %v8925_v50 = vld [vmem:[#allocation8 + $0x108] sm:$0xff]  }
 0x3cd   : > { %6213 = vmatmul.mubr.bf16.gmra.mxu1 %v5225_v15  ;;  %v5301_v12 = vshrl.u32 %v5016_v9, 16  ;;  %v5304_v32 = vshll.u32 %v5016_v9, 16  ;;  %v5014_v52 = vpack.c.bf16 %v4608_v17, %v4607_v21  ;;  %v4736_v39 = vsel %vm1675_vm0, %v13757_v20, %v4735_v63  ;;  %v8926_v20 = vld [vmem:[#allocation8 + $0x1a0] sm:$0xff]  }
 0x3ce   : > { %v12180_v34 = vsel %vm2422_vm2, %v12141_v5, %v12171_v51  ;;  %v5228_v42 = vshrl.u32 %v5008_v53, 16  ;;  %v5231_v4 = vshll.u32 %v5008_v53, 16  ;;  %v4738_v38 = vsel %vm1675_vm0, %v4735_v63, %v13302_v55  ;;  %8218 = vmatpush3.bf16.msra.mxu1 %v8920_v47  ;;  %v8929_v15 = vld [vmem:[#allocation8 + $0x140] sm:$0xff]   ;;  %v8927_v63 = vld [vmem:[#allocation8 + $0x1d8] sm:$0xff]  }
 0x3cf   : > { %13758 = vst [vmem:[#allocation81_spill] sm:$0xff] %v12180_v34  ;;  %6220 = vmatprep.mubr.bf16.mxu1 %v12180_v34  ;;  %v5303_v21 = vrot.slane %v5301_v12, 3  ;;  %v5306_v59 = vrot.slane %v5304_v32, 4  ;;  %v5283_v9 = vshrl.u32 %v5014_v52, 16  ;;  %v5286_v17 = vshll.u32 %v5014_v52, 16  ;;  %8276 = vmatpush3.bf16.msra.mxu0 %v8922_v62  ;;  %v13760_v12 = vld [vmem:[#allocation100_spill] sm:$0xff] }
 0x3d0   : > { %v5230_v41 = vrot.slane %v5228_v42, 3  ;;  %v5233_v11 = vrot.slane %v5231_v4, 4  ;;  %v5012_v1 = vpack.c.bf16 %v4738_v38, %v4736_v39  ;;  %v4625_v53 = vmul.f32 %v11975_v43, %v13759_v44  ;;  %8219 = vmatprep.subr.bf16.mxu1 %v8923_v18  ;;  %8277 = vmatprep.subr.bf16.mxu0 %v8924_v31  ;;  %v13761_v38 = vld [vmem:[#allocation43_spill] sm:$0xff] }
 0x3d1   : > { %v12188_v47 = vor.u32 %v5306_v59, %v5303_v21  ;;  %v5285_v55 = vrot.slane %v5283_v9, 3  ;;  %v5288_v34 = vrot.slane %v5286_v17, 4  ;;  %v12192_v32 = vmul.f32 %v11987_v37, %v13760_v12  ;;  %v8928_v59 = vld [vmem:[#allocation8 + $0x198] sm:$0xff]  }
 0x3d2   : > { %v12194_v52 = vor.u32 %v5233_v11, %v5230_v41  ;;  %v5265_v62 = vshrl.u32 %v5012_v1, 16  ;;  %v5268_v42 = vshll.u32 %v5012_v1, 16  ;;  %v4796_v4 = vrot.slane %v4625_v53, 2  ;;  %8220 = vmatpush3.bf16.msra.mxu1 %v8925_v50  ;;  %v8931_v11 = vld [vmem:[#allocation8 + $0x100] sm:$0xff]  }
 0x3d3   : > { %v5308_v18 = vsel %vm2422_vm2, %v12128_v28, %v12188_v47  ;;  %v12199_v31 = vor.u32 %v5288_v34, %v5285_v55  ;;  %v4798_v39 = vrot.slane %v12192_v32, 2  ;;  %v4644_v21 = vmul.f32 %v12013_v48, %v13761_v38  ;;  %8278 = vmatpush3.bf16.msra.mxu0 %v8926_v20  ;;  %8221 = vmatprep.subr.bf16.mxu1 %v8929_v15  ;;  %v8930_v55 = vld [vmem:[#allocation8 + $0x1d0] sm:$0xff]   ;;  %v12210_v34 = vld [vmem:[#allocation8 + $0x238] sm:$0xff]  }
 0x3d4   : > { %v5235_v41 = vsel %vm2422_vm2, %v12125_v25, %v12194_v52  ;;  %v5267_v1 = vrot.slane %v5265_v62, 3  ;;  %v5270_v50 = vrot.slane %v5268_v42, 4  ;;  %v13762_v9 = vrot.slane %v12145_v49, 2  ;;  %8279 = vmatprep.subr.bf16.mxu0 %v8927_v63  ;;  %13763 = vst [vmem:[#allocation117_spill] sm:$0xff] %v12210_v34  ;;  %v13764_v15 = vld [vmem:[#allocation44_spill] sm:$0xff] }
 0x3d5   : > { %6310 = vmatmul.mubr.bf16.gmra.mxu0 %v5235_v41  ;;  %v5290_v17 = vsel %vm2422_vm2, %v12158_v3, %v12199_v31  ;;  %v4799_v20 = vsel %vm2084_vm3, %v4796_v4, %v4798_v39  ;;  %v4645_v25 = vmul.f32 %v11996_v35, %v13764_v15  ;;  %v4609_v53 = vmul.f32 %v11987_v37, %v13761_v38 }
 0x3d6   : > { %v4797_v28 = vsel %vm2084_vm3, %v13762_v9, %v4796_v4  ;;  %6317 = vmatprep.mubr.bf16.mxu0 %v5308_v18  ;;  %6221 = vmatmul.mubr.bf16.gmra.mxu1 %v5290_v17  ;;  %v12220_v49 = vor.u32 %v5270_v50, %v5267_v1  ;;  %v4610_v32 = vmul.f32 %v12001_v19, %v13764_v15  ;;  %v4739_v62 = vrot.slane %v11996_v35, 1  ;;  %v13765_v4 = vld [vmem:[#allocation102_spill] sm:$0xff]  ;;  %v8932_v18 = vld [vmem:[#allocation8 + $0x190] sm:$0xff]  }
 0x3d7   : > { %v5015_v63 = vpack.c.bf16 %v4799_v20, %v4797_v28  ;;  %v5023_v42 = vpack.c.bf16 %v4645_v25, %v4644_v21  ;;  %v4741_v3 = vrot.slane %v12007_v33, 1  ;;  %v4627_v41 = vmul.f32 %v12001_v19, %v13765_v4  ;;  %v13766_v9 = vld [vmem:[#allocation106_spill] sm:$0xff]  ;;  %8280 = vmatpush3.bf16.msra.mxu0 %v8928_v59  ;;  %8222 = vmatpush3.bf16.msra.mxu1 %v8931_v11 }
 0x3d8   : > { %v12230_v2 = vmul.f32 %v12013_v48, %v13766_v9  ;;  %v12235_v1 = vsel %vm2422_vm2, %v12171_v51, %v12220_v49  ;;  %v5021_v21 = vpack.c.bf16 %v4610_v32, %v4609_v53  ;;  %8281 = vmatprep.subr.bf16.mxu0 %v8930_v55  ;;  %v8933_v17 = vld [vmem:[#allocation8 + $0x1c8] sm:$0xff]   ;;  %8477 = vmatprep.subr.bf16.mxu1 %v12210_v34  ;;  %v13768_v59 = vrot.slane %v12013_v48, 1 }
 0x3d9   : > { %13767 = vst [vmem:[#allocation80_spill] sm:$0xff] %v12235_v1  ;;  %v5292_v50 = vshrl.u32 %v5015_v63, 16  ;;  %v5295_v28 = vshll.u32 %v5015_v63, 16  ;;  %6228 = vmatprep.mubr.bf16.mxu1 %v12235_v1  ;;  %v5364_v20 = vshrl.u32 %v5023_v42, 16  ;;  %v5367_v25 = vshll.u32 %v5023_v42, 16 }
 0x3da   : > { %v4740_v11 = vsel %vm1675_vm0, %v13768_v59, %v4739_v62  ;;  %v4742_v15 = vsel %vm1675_vm0, %v4739_v62, %v4741_v3  ;;  %v5346_v63 = vshrl.u32 %v5021_v21, 16  ;;  %v5349_v53 = vshll.u32 %v5021_v21, 16 }
 0x3db   : > { %v5294_v38 = vrot.slane %v5292_v50, 3  ;;  %v5297_v9 = vrot.slane %v5295_v28, 4  ;;  %v5366_v55 = vrot.slane %v5364_v20, 3  ;;  %v5369_v32 = vrot.slane %v5367_v25, 4  ;;  %8282 = vmatpush3.bf16.msra.mxu0 %v8932_v18  ;;  %v8934_v50 = vld [vmem:[#allocation8 + $0x188] sm:$0xff]  }
 0x3dc   : > { %v5019_v4 = vpack.c.bf16 %v4742_v15, %v4740_v11  ;;  %v4800_v34 = vrot.slane %v4627_v41, 2  ;;  %v5348_v61 = vrot.slane %v5346_v63, 3  ;;  %v5351_v42 = vrot.slane %v5349_v53, 4  ;;  %8283 = vmatprep.subr.bf16.mxu0 %v8933_v17  ;;  %v13769_v41 = vld [vmem:[#allocation46_spill] sm:$0xff] }
 0x3dd   : > { %v5298_v1 = vor.u32 %v5297_v9, %v5294_v38  ;;  %v4802_v12 = vrot.slane %v12230_v2, 2  ;;  %v12246_v59 = vor.u32 %v5369_v32, %v5366_v55  ;;  %v4646_v38 = vmul.f32 %v12007_v33, %v13769_v41  ;;  %v8935_v9 = vld [vmem:[#allocation8 + $0x1c0] sm:$0xff]  }
 0x3de   : > { %v5328_v19 = vshrl.u32 %v5019_v4, 16  ;;  %v5331_v44 = vshll.u32 %v5019_v4, 16  ;;  %v4801_v62 = vsel %vm2084_vm3, %v4798_v39, %v4800_v34  ;;  %v5352_v21 = vor.u32 %v5351_v42, %v5348_v61  ;;  %v8937_v11 = vld [vmem:[#allocation8 + $0x180] sm:$0xff]  }
 0x3df   : > { %v5299_v28 = vsel %vm2422_vm2, %v12194_v52, %v5298_v1  ;;  %v4803_v15 = vsel %vm2084_vm3, %v4800_v34, %v4802_v12  ;;  %v5371_v2 = vsel %vm2422_vm2, %v12188_v47, %v12246_v59  ;;  %v13770_v52 = vld [vmem:[#allocation47_spill] sm:$0xff]  ;;  %v4611_v34 = vmul.f32 %v12013_v48, %v13769_v41  ;;  %8284 = vmatpush3.bf16.msra.mxu0 %v8934_v50  ;;  %v13771_v55 = vld [vmem:[#allocation61_spill] sm:$0xff]  ;;  %v13775_v41 = vld [vmem:[#allocation52_spill] sm:$0xff] }
 0x3e0   : > { %6318 = vmatmul.mubr.bf16.gmra.mxu0 %v5299_v28  ;;  %v5330_v18 = vrot.slane %v5328_v19, 3  ;;  %v5333_v4 = vrot.slane %v5331_v44, 4  ;;  %v5022_v17 = vpack.c.bf16 %v4803_v15, %v4801_v62  ;;  %v5353_v39 = vsel %vm2422_vm2, %v12199_v31, %v5352_v21  ;;  %8285 = vmatprep.subr.bf16.mxu0 %v8935_v9 }
 0x3e1   : > { %6325 = vmatprep.mubr.bf16.mxu0 %v5371_v2  ;;  %v4647_v61 = vmul.f32 %v12034_v40, %v13770_v52  ;;  %v4612_v20 = vmul.f32 %v11996_v35, %v13770_v52  ;;  %6229 = vmatmul.mubr.bf16.gmra.mxu1 %v5353_v39  ;;  %v4743_v44 = vrot.slane %v12034_v40, 1  ;;  %v4745_v53 = vrot.slane %v12062_v6, 1 }
 0x3e2   : > { %v12265_v25 = vor.u32 %v5333_v4, %v5330_v18  ;;  %v5355_v47 = vshrl.u32 %v5022_v17, 16  ;;  %v5358_v19 = vshll.u32 %v5022_v17, 16  ;;  %v4629_v32 = vmul.f32 %v11996_v35, %v13771_v55  ;;  %v13773_v17 = vld [vmem:[#allocation111_spill] sm:$0xff] }
 0x3e3   : > { %v5030_v63 = vpack.c.bf16 %v4647_v61, %v4646_v38  ;;  %v5028_v31 = vpack.c.bf16 %v4612_v20, %v4611_v34  ;;  %v4744_v50 = vsel %vm1675_vm0, %v4741_v3, %v4743_v44  ;;  %v4746_v9 = vsel %vm1675_vm0, %v4743_v44, %v4745_v53  ;;  %8286 = vmatpush3.bf16.msra.mxu0 %v8937_v11 }
 0x3e4   : > { %v12274_v42 = vsel %vm2422_vm2, %v12220_v49, %v12265_v25  ;;  %v5357_v62 = vrot.slane %v5355_v47, 3  ;;  %v5360_v28 = vrot.slane %v5358_v19, 4  ;;  %v12283_v39 = vmul.f32 %v12007_v33, %v13773_v17 }
 0x3e5   : > { %13772 = vst [vmem:[#allocation101_spill] sm:$0xff] %v12274_v42  ;;  %6236 = vmatprep.mubr.bf16.mxu1 %v12274_v42  ;;  %v5427_v15 = vshrl.u32 %v5030_v63, 16  ;;  %v5430_v38 = vshll.u32 %v5030_v63, 16  ;;  %v5409_v2 = vshrl.u32 %v5028_v31, 16  ;;  %v5412_v18 = vshll.u32 %v5028_v31, 16 }
 0x3e6   : > { %v5361_v4 = vor.u32 %v5360_v28, %v5357_v62  ;;  %v4804_v49 = vrot.slane %v4629_v32, 2  ;;  %v5026_v19 = vpack.c.bf16 %v4746_v9, %v4744_v50  ;;  %v4806_v31 = vrot.slane %v12283_v39, 2  ;;  %v13774_v28 = vld [vmem:[#allocation50_spill] sm:$0xff] }
 0x3e7   : > { %v5429_v61 = vrot.slane %v5427_v15, 3  ;;  %v5432_v34 = vrot.slane %v5430_v38, 4  ;;  %v5411_v20 = vrot.slane %v5409_v2, 3  ;;  %v5414_v47 = vrot.slane %v5412_v18, 4 }
 0x3e8   : > { %v5362_v3 = vsel %vm2422_vm2, %v5298_v1, %v5361_v4  ;;  %v4805_v63 = vsel %vm2084_vm3, %v4802_v12, %v4804_v49  ;;  %v4648_v52 = vmul.f32 %v12062_v6, %v13774_v28  ;;  %v4649_v11 = vmul.f32 %v12021_v46, %v13775_v41 }
 0x3e9   : > { %6326 = vmatmul.mubr.bf16.gmra.mxu0 %v5362_v3  ;;  %v5433_v62 = vor.u32 %v5432_v34, %v5429_v61  ;;  %v5415_v44 = vor.u32 %v5414_v47, %v5411_v20  ;;  %v5391_v32 = vshrl.u32 %v5026_v19, 16  ;;  %v5394_v15 = vshll.u32 %v5026_v19, 16 }
 0x3ea   : > { %v4807_v38 = vsel %vm2084_vm3, %v4804_v49, %v4806_v31  ;;  %v4613_v1 = vmul.f32 %v12007_v33, %v13774_v28  ;;  %v5037_v18 = vpack.c.bf16 %v4649_v11, %v4648_v52  ;;  %v4614_v61 = vmul.f32 %v12034_v40, %v13775_v41 }
 0x3eb   : > { %v5434_v12 = vsel %vm2422_vm2, %v12246_v59, %v5433_v62  ;;  %v5416_v50 = vsel %vm2422_vm2, %v5352_v21, %v5415_v44  ;;  %v5029_v2 = vpack.c.bf16 %v4807_v38, %v4805_v63  ;;  %v5393_v9 = vrot.slane %v5391_v32, 3 }
 0x3ec   : > { %6333 = vmatprep.mubr.bf16.mxu0 %v5434_v12  ;;  %6237 = vmatmul.mubr.bf16.gmra.mxu1 %v5416_v50  ;;  %v5396_v39 = vrot.slane %v5394_v15, 4  ;;  %v4747_v34 = vrot.slane %v12021_v46, 1  ;;  %v5490_v47 = vshrl.u32 %v5037_v18, 16  ;;  %v5493_v3 = vshll.u32 %v5037_v18, 16  ;;  %v13778_v18 = vld [vmem:[#allocation64_spill] sm:$0xff] }
 0x3ed   : > { %v5418_v49 = vshrl.u32 %v5029_v2, 16  ;;  %v5421_v20 = vshll.u32 %v5029_v2, 16  ;;  %v5035_v28 = vpack.c.bf16 %v4614_v61, %v4613_v1  ;;  %v12303_v21 = vrot.slane %v12045_v29, 1 }
 0x3ee   : > { %v5397_v19 = vor.u32 %v5396_v39, %v5393_v9  ;;  %v4748_v59 = vsel %vm1675_vm0, %v4745_v53, %v4747_v34  ;;  %v5492_v11 = vrot.slane %v5490_v47, 3  ;;  %v5495_v32 = vrot.slane %v5493_v3, 4 }
 0x3ef   : > { %13776 = vst [vmem:[#allocation120_spill] sm:$0xff] %v12303_v21  ;;  %v5420_v52 = vrot.slane %v5418_v49, 3  ;;  %v5423_v63 = vrot.slane %v5421_v20, 4  ;;  %v5472_v38 = vshrl.u32 %v5035_v28, 16  ;;  %v5475_v12 = vshll.u32 %v5035_v28, 16  ;;  %v13779_v49 = vld [vmem:[#allocation114_spill] sm:$0xff] }
 0x3f0   : > { %v12307_v15 = vsel %vm2422_vm2, %v12265_v25, %v5397_v19  ;;  %v4750_v50 = vsel %vm1675_vm0, %v4747_v34, %v12303_v21  ;;  %v5496_v53 = vor.u32 %v5495_v32, %v5492_v11  ;;  %v4631_v9 = vmul.f32 %v12034_v40, %v13778_v18  ;;  %v13780_v25 = vld [vmem:[#allocation53_spill] sm:$0xff]  ;;  %v13781_v11 = vld [vmem:[#allocation70_spill] sm:$0xff] }
 0x3f1   : > { %13777 = vst [vmem:[#allocation103_spill] sm:$0xff] %v12307_v15  ;;  %6244 = vmatprep.mubr.bf16.mxu1 %v12307_v15  ;;  %v5424_v1 = vor.u32 %v5423_v63, %v5420_v52  ;;  %v5033_v2 = vpack.c.bf16 %v4750_v50, %v4748_v59  ;;  %v5474_v39 = vrot.slane %v5472_v38, 3  ;;  %v5477_v61 = vrot.slane %v5475_v12, 4  ;;  %v13783_v15 = vld [vmem:[#allocation119_spill] sm:$0xff] }
 0x3f2   : > { %v4632_v20 = vmul.f32 %v12062_v6, %v13779_v49  ;;  %v4650_v47 = vmul.f32 %v12045_v29, %v13780_v25  ;;  %v5497_v34 = vsel %vm2422_vm2, %v5433_v62, %v5496_v53  ;;  %v4808_v59 = vrot.slane %v4631_v9, 2 }
 0x3f3   : > { %v5425_v28 = vsel %vm2422_vm2, %v5361_v4, %v5424_v1  ;;  %v5454_v3 = vshrl.u32 %v5033_v2, 16  ;;  %v5457_v41 = vshll.u32 %v5033_v2, 16  ;;  %v5478_v52 = vor.u32 %v5477_v61, %v5474_v39 }
 0x3f4   : > { %6334 = vmatmul.mubr.bf16.gmra.mxu0 %v5425_v28  ;;  %v4810_v63 = vrot.slane %v4632_v20, 2  ;;  %v4651_v32 = vmul.f32 %v12078_v14, %v13781_v11  ;;  %v4615_v50 = vmul.f32 %v12062_v6, %v13780_v25  ;;  %v4616_v4 = vmul.f32 %v12021_v46, %v13781_v11  ;;  %v13782_v25 = vld [vmem:[#allocation68_spill] sm:$0xff] }
 0x3f5   : > { %6341 = vmatprep.mubr.bf16.mxu0 %v5497_v34  ;;  %v5456_v38 = vrot.slane %v5454_v3, 3  ;;  %v5459_v12 = vrot.slane %v5457_v41, 4  ;;  %v5479_v62 = vsel %vm2422_vm2, %v5415_v44, %v5478_v52  ;;  %v4809_v2 = vsel %vm2084_vm3, %v4806_v31, %v4808_v59 }
 0x3f6   : > { %v4811_v39 = vsel %vm2084_vm3, %v4808_v59, %v4810_v63  ;;  %v5044_v9 = vpack.c.bf16 %v4651_v32, %v4650_v47  ;;  %6245 = vmatmul.mubr.bf16.gmra.mxu1 %v5479_v62  ;;  %v5042_v28 = vpack.c.bf16 %v4616_v4, %v4615_v50  ;;  %v5050_v41 = vpack.c.bf16 %v12303_v21, %v12303_v21 }
 0x3f7   : > { %v12329_v61 = vor.u32 %v5459_v12, %v5456_v38  ;;  %v5036_v20 = vpack.c.bf16 %v4811_v39, %v4809_v2  ;;  %v4633_v11 = vmul.f32 %v12021_v46, %v13782_v25  ;;  %v12337_v44 = vmul.f32 %v12045_v29, %v13783_v15 }
 0x3f8   : > { %v5553_v34 = vshrl.u32 %v5044_v9, 16  ;;  %v5556_v3 = vshll.u32 %v5044_v9, 16  ;;  %v5535_v32 = vshrl.u32 %v5042_v28, 16  ;;  %v5538_v50 = vshll.u32 %v5042_v28, 16 }
 0x3f9   : > { %v12341_v31 = vsel %vm2422_vm2, %v5397_v19, %v12329_v61  ;;  %v5481_v47 = vshrl.u32 %v5036_v20, 16  ;;  %v5484_v59 = vshll.u32 %v5036_v20, 16  ;;  %v5607_v4 = vshrl.u32 %v5050_v41, 16  ;;  %v13784_v20 = vld [vmem:[#allocation65_spill] sm:$0xff] }
 0x3fa   : > { %6252 = vmatprep.mubr.bf16.mxu1 %v12341_v31  ;;  %v5555_v38 = vrot.slane %v5553_v34, 3  ;;  %v5558_v12 = vrot.slane %v5556_v3, 4  ;;  %v5537_v39 = vrot.slane %v5535_v32, 3  ;;  %v5610_v9 = vshll.u32 %v5050_v41, 16 }
 0x3fb   : > { %v5483_v62 = vrot.slane %v5481_v47, 3  ;;  %v5486_v2 = vrot.slane %v5484_v59, 4  ;;  %v5540_v15 = vrot.slane %v5538_v50, 4  ;;  %v5609_v21 = vrot.slane %v5607_v4, 3 }
 0x3fc   : > { %v5559_v25 = vor.u32 %v5558_v12, %v5555_v38  ;;  %v4812_v49 = vrot.slane %v4633_v11, 2  ;;  %v5612_v19 = vrot.slane %v5610_v9, 4  ;;  %v4814_v46 = vrot.slane %v12337_v44, 2 }
 0x3fd   : > { %v5487_v42 = vor.u32 %v5486_v2, %v5483_v62  ;;  %v4652_v18 = vmul.f32 %v12115_v10, %v13784_v20  ;;  %v5541_v3 = vor.u32 %v5540_v15, %v5537_v39  ;;  %v4617_v47 = vmul.f32 %v12045_v29, %v13784_v20 }
 0x3fe   : > { %v5560_v34 = vsel %vm2422_vm2, %v5496_v53, %v5559_v25  ;;  %v4813_v28 = vsel %vm2084_vm3, %v4810_v63, %v4812_v49  ;;  %v5613_v59 = vor.u32 %v5612_v19, %v5609_v21  ;;  %v4815_v11 = vsel %vm2084_vm3, %v4812_v49, %v4814_v46 }
 0x3ff   : > { %v5488_v41 = vsel %vm2422_vm2, %v5424_v1, %v5487_v42  ;;  %v5052_v32 = vpack.c.bf16 %v4652_v18, %v4652_v18  ;;  %v5542_v38 = vsel %vm2422_vm2, %v5478_v52, %v5541_v3  ;;  %v5043_v12 = vpack.c.bf16 %v4815_v11, %v4813_v28 }
 0x400   : > { %6342 = vmatmul.mubr.bf16.gmra.mxu0 %v5488_v41  ;;  %v5049_v50 = vpack.c.bf16 %v4617_v47, %v4617_v47  ;;  %v4653_v15 = vmul.f32 %v11952_v56, %v13741_v7  ;;  %6253 = vmatmul.mubr.bf16.gmra.mxu1 %v5542_v38  ;;  %v5614_v53 = vsel %vm2422_vm2, %v12329_v61, %v5613_v59 }
 0x401   : > { %6349 = vmatprep.mubr.bf16.mxu0 %v5560_v34  ;;  %v5625_v1 = vshrl.u32 %v5052_v32, 16  ;;  %v5628_v21 = vshll.u32 %v5052_v32, 16  ;;  %v4654_v63 = vmul.f32 %v11963_v16, %v13742_v23  ;;  %6260 = vmatprep.mubr.bf16.mxu1 %v5614_v53  ;;  %v5544_v18 = vshrl.u32 %v5043_v12, 16 }
 0x402   : > { %v5547_v49 = vshll.u32 %v5043_v12, 16  ;;  %v5598_v4 = vshrl.u32 %v5049_v50, 16  ;;  %v5601_v52 = vshll.u32 %v5049_v50, 16  ;;  %v4655_v56 = vmul.f32 %v11978_v8, %v13745_v24 }
 0x403   : > { %v5627_v62 = vrot.slane %v5625_v1, 3  ;;  %v5630_v2 = vrot.slane %v5628_v21, 4  ;;  %v4656_v39 = vmul.f32 %v11993_v27, %v13746_v60  ;;  %v5546_v9 = vrot.slane %v5544_v18, 3 }
 0x404   : > { %v5549_v19 = vrot.slane %v5547_v49, 4  ;;  %v5600_v34 = vrot.slane %v5598_v4, 3  ;;  %v5603_v28 = vrot.slane %v5601_v52, 4  ;;  %v4862_v41 = vrot.slane %v4653_v15, 2 }
 0x405   : > { %v5631_v47 = vor.u32 %v5630_v2, %v5627_v62  ;;  %v4863_v59 = vrot.slane %v4654_v63, 2  ;;  %v4865_v11 = vrot.slane %v4655_v56, 2  ;;  %v4867_v12 = vrot.slane %v4656_v39, 2 }
 0x406   : > { %v12366_v32 = vor.u32 %v5549_v19, %v5546_v9  ;;  %v5604_v38 = vor.u32 %v5603_v28, %v5600_v34  ;;  %v4635_v50 = vmul.f32 %v12078_v14, %v13714_v54  ;;  %v4996_v18 = vpack.c.bf16 %v12119_v36, %v12105_v0 }
 0x407   : > { %v5632_v53 = vsel %vm2422_vm2, %v5559_v25, %v5631_v47  ;;  %v4864_v1 = vsel %vm2084_vm3, %v4862_v41, %v4863_v59  ;;  %v4866_v21 = vsel %vm2084_vm3, %v4863_v59, %v4865_v11  ;;  %v4868_v49 = vsel %vm2084_vm3, %v4865_v11, %v4867_v12 }
 0x408   : > { %v5551_v15 = vsel %vm2422_vm2, %v5487_v42, %v12366_v32  ;;  %v5605_v63 = vsel %vm2422_vm2, %v5541_v3, %v5604_v38  ;;  %v4994_v4 = vpack.c.bf16 %v4864_v1, %v4862_v41  ;;  %v5003_v52 = vpack.c.bf16 %v4868_v49, %v4866_v21 }
 0x409   : > { %6350 = vmatmul.mubr.bf16.gmra.mxu0 %v5551_v15  ;;  %6261 = vmatmul.mubr.bf16.gmra.mxu1 %v5605_v63  ;;  %v4816_v62 = vrot.slane %v4635_v50, 2  ;;  %v5184_v25 = vshrl.u32 %v4996_v18, 16  ;;  %v5187_v2 = vshll.u32 %v4996_v18, 16  ;;  %v13785_v9 = vshrl.u32 %v12029_v22, 16 }
 0x40a   : > { %6357 = vmatprep.mubr.bf16.mxu0 %v5632_v53  ;;  %v5150_v56 = vshrl.u32 %v4994_v4, 16  ;;  %v5153_v39 = vshll.u32 %v4994_v4, 16  ;;  %v13786_v36 = vshll.u32 %v12029_v22, 16  ;;  %v5158_v19 = vshrl.u32 %v5003_v52, 16 }
 0x40b   : > { %v5135_v0 = vrot.slane %v13785_v9, 3  ;;  %v5161_v3 = vshll.u32 %v5003_v52, 16  ;;  %v4817_v34 = vsel %vm2084_vm3, %v4814_v46, %v4816_v62  ;;  %v5186_v28 = vrot.slane %v5184_v25, 3  ;;  %v8938_v9 = vld [vmem:[#allocation8 + $0x230] sm:$0xff]  }
 0x40c   : > { %v5138_v42 = vrot.slane %v13786_v36, 4  ;;  %v5152_v47 = vrot.slane %v5150_v56, 3  ;;  %v5155_v41 = vrot.slane %v5153_v39, 4  ;;  %v5051_v59 = vpack.c.bf16 %v4817_v34, %v4817_v34 }
 0x40d   : > { %v5189_v11 = vrot.slane %v5187_v2, 4  ;;  %v5160_v38 = vrot.slane %v5158_v19, 3  ;;  %v5163_v50 = vrot.slane %v5161_v3, 4  ;;  %v4657_v1 = vmul.f32 %v11975_v43, %v13752_v45  ;;  %v13789_v3 = vld [vmem:[#allocation100_spill] sm:$0xff] }
 0x40e   : > { %v5139_v53 = vor.u32 %v5138_v42, %v5135_v0  ;;  %v5156_v21 = vor.u32 %v5155_v41, %v5152_v47  ;;  %v5616_v22 = vshrl.u32 %v5051_v59, 16  ;;  %v5619_v18 = vshll.u32 %v5051_v59, 16  ;;  %v13787_v42 = vld [vmem:[#allocation98_spill] sm:$0xff] }
 0x40f   : > { %v5190_v15 = vor.u32 %v5189_v11, %v5186_v28  ;;  %v12388_v63 = vor.u32 %v5163_v50, %v5160_v38  ;;  %v4658_v44 = vmul.f32 %v11987_v37, %v13753_v30  ;;  %v4869_v49 = vrot.slane %v4657_v1, 2 }
 0x410   : > { %v5148_v46 = vsel %vm2422_vm2, %v5139_v53, %v12141_v5  ;;  %v5618_v4 = vrot.slane %v5616_v22, 3  ;;  %v5621_v52 = vrot.slane %v5619_v18, 4  ;;  %v4670_v25 = vmul.f32 %v11963_v16, %v13737_v58  ;;  %v13788_v16 = vld [vmem:[#allocation83_spill] sm:$0xff]  ;;  %v13792_v53 = vld [vmem:[#allocation34_spill] sm:$0xff] }
 0x411   : > { %v5199_v62 = vsel %vm2422_vm2, %v5190_v15, %v12171_v51  ;;  %v5165_v2 = vsel %vm2422_vm2, %v5156_v21, %v12388_v63  ;;  %v4870_v56 = vsel %vm2084_vm3, %v4867_v12, %v4869_v49  ;;  %v4871_v39 = vrot.slane %v4658_v44, 2  ;;  %v8939_v21 = vld [vmem:[#allocation8 + $0x228] sm:$0xff]  }
 0x412   : > { %v4671_v5 = vmul.f32 %v11978_v8, %v13731_v13  ;;  %6398 = vmatprep.mubr.bf16.mxu1 %v5165_v2  ;;  %v5622_v0 = vor.u32 %v5621_v52, %v5618_v4  ;;  %v4672_v36 = vmul.f32 %v11993_v27, %v13733_v57  ;;  %v4673_v51 = vmul.f32 %v11975_v43, %v13734_v26  ;;  %v13790_v13 = vld [vmem:[#allocation67_spill] sm:$0xff]  ;;  %v13791_v57 = vld [vmem:[#allocation117_spill] sm:$0xff] }
 0x413   : > { %v4659_v58 = vmul.f32 %v13788_v16, %v13787_v42  ;;  %6399 = vmatmul.mubr.bf16.vlgmr.msra.gmra.mxu1 %v5148_v46  ;;  %v4872_v19 = vsel %vm2084_vm3, %v4869_v49, %v4871_v39  ;;  %v4660_v34 = vmul.f32 %v12013_v48, %v13789_v3  ;;  %v4674_v28 = vmul.f32 %v11987_v37, %v13790_v13 }
 0x414   : > { %v4995_v12 = vpack.c.bf16 %v4671_v5, %v4670_v25  ;;  %v5623_v47 = vsel %vm2422_vm2, %v12366_v32, %v5622_v0  ;;  %8478 = vmatpush3.bf16.msra.mxu1 %v13791_v57  ;;  %v5010_v41 = vpack.c.bf16 %v4872_v19, %v4870_v56  ;;  %v5004_v26 = vpack.c.bf16 %v4673_v51, %v4672_v36 }
 0x415   : > { %v4873_v59 = vrot.slane %v4659_v58, 2  ;;  %6358 = vmatmul.mubr.bf16.gmra.mxu0 %v5623_v47  ;;  %8479 = vmatprep.subr.bf16.mxu1 %v8938_v9  ;;  %v4875_v50 = vrot.slane %v4660_v34, 2  ;;  %v4675_v1 = vmul.f32 %v13788_v16, %v13792_v53 }
 0x416   : > { %v5167_v11 = vshrl.u32 %v4995_v12, 16  ;;  %v5170_v38 = vshll.u32 %v4995_v12, 16  ;;  %6495 = vmatprep.mubr.bf16.mxu0 %v5199_v62  ;;  %v5247_v22 = vshrl.u32 %v5010_v41, 16  ;;  %v5250_v18 = vshll.u32 %v5010_v41, 16  ;;  %v13793_v62 = vld [vmem:[#allocation102_spill] sm:$0xff] }
 0x417   : > { %v5175_v15 = vshrl.u32 %v5004_v26, 16  ;;  %v5178_v46 = vshll.u32 %v5004_v26, 16  ;;  %v4874_v49 = vsel %vm2084_vm3, %v4871_v39, %v4873_v59  ;;  %v4876_v4 = vsel %vm2084_vm3, %v4873_v59, %v4875_v50  ;;  %v13794_v12 = vld [vmem:[#allocation106_spill] sm:$0xff]  ;;  %v13795_v39 = vld [vmem:[#allocation36_spill] sm:$0xff] }
 0x418   : > { %v5169_v32 = vrot.slane %v5167_v11, 3  ;;  %v5172_v44 = vrot.slane %v5170_v38, 4  ;;  %v5249_v52 = vrot.slane %v5247_v22, 3  ;;  %v5252_v25 = vrot.slane %v5250_v18, 4  ;;  %8480 = vmatpush3.bf16.msra.mxu1 %v8938_v9  ;;  %v8940_v9 = vld [vmem:[#allocation8 + $0x220] sm:$0xff]  }
 0x419   : > { %v5177_v2 = vrot.slane %v5175_v15, 3  ;;  %v5180_v56 = vrot.slane %v5178_v46, 4  ;;  %v5017_v0 = vpack.c.bf16 %v4876_v4, %v4874_v49  ;;  %v5011_v36 = vpack.c.bf16 %v4675_v1, %v4674_v28  ;;  %8481 = vmatprep.subr.bf16.mxu1 %v8939_v21  ;;  %v8941_v15 = vld [vmem:[#allocation8 + $0x218] sm:$0xff]   ;;  %v13798_v49 = vld [vmem:[#allocation38_spill] sm:$0xff] }
 0x41a   : > { %v5173_v5 = vor.u32 %v5172_v44, %v5169_v32  ;;  %v4661_v51 = vmul.f32 %v11996_v35, %v13793_v62  ;;  %v5253_v58 = vor.u32 %v5252_v25, %v5249_v52  ;;  %v4662_v34 = vmul.f32 %v12007_v33, %v13794_v12  ;;  %v13796_v46 = vld [vmem:[#allocation80_spill] sm:$0xff]  ;;  %v13797_v32 = vld [vmem:[#allocation81_spill] sm:$0xff] }
 0x41b   : > { %v5181_v19 = vor.u32 %v5180_v56, %v5177_v2  ;;  %v4676_v13 = vmul.f32 %v12013_v48, %v13795_v39  ;;  %v5310_v47 = vshrl.u32 %v5017_v0, 16  ;;  %v5313_v57 = vshll.u32 %v5017_v0, 16 }
 0x41c   : > { %v5256_v41 = vshrl.u32 %v5011_v36, 16  ;;  %v5259_v26 = vshll.u32 %v5011_v36, 16  ;;  %v5254_v28 = vsel %vm2422_vm2, %v12388_v63, %v5253_v58  ;;  %8482 = vmatpush3.bf16.msra.mxu1 %v8939_v21  ;;  %v4877_v11 = vrot.slane %v4661_v51, 2  ;;  %v13800_v51 = vld [vmem:[#allocation44_spill] sm:$0xff] }
 0x41d   : > { %v5182_v59 = vsel %vm2422_vm2, %v5173_v5, %v5181_v19  ;;  %v4879_v38 = vrot.slane %v4662_v34, 2  ;;  %6406 = vmatprep.mubr.bf16.mxu1 %v5254_v28  ;;  %v5312_v53 = vrot.slane %v5310_v47, 3  ;;  %v5315_v1 = vrot.slane %v5313_v57, 4  ;;  %8483 = vmatprep.subr.bf16.mxu1 %v8940_v9 }
 0x41e   : > { %6496 = vmatmul.mubr.bf16.vlgmr.msra.gmra.mxu0 %v5182_v59  ;;  %v5258_v22 = vrot.slane %v5256_v41, 3  ;;  %v5261_v18 = vrot.slane %v5259_v26, 4  ;;  %6407 = vmatmul.mubr.bf16.gmra.mxu1 %v13797_v32  ;;  %v4878_v44 = vsel %vm2084_vm3, %v4875_v50, %v4877_v11  ;;  %v4677_v21 = vmul.f32 %v11996_v35, %v13798_v49  ;;  %v13799_v50 = vld [vmem:[#allocation43_spill] sm:$0xff] }
 0x41f   : > { %6503 = vmatprep.mubr.bf16.mxu0 %v13796_v46  ;;  %v4880_v63 = vsel %vm2084_vm3, %v4877_v11, %v4879_v38  ;;  %v4837_v4 = vrot.slane %v12078_v14, 1  ;;  %v5316_v52 = vor.u32 %v5315_v1, %v5312_v53  ;;  %v4663_v56 = vmul.f32 %v12034_v40, %v13771_v55  ;;  %v8942_v26 = vld [vmem:[#allocation8 + $0x210] sm:$0xff]  }
 0x420   : > { %v5262_v25 = vor.u32 %v5261_v18, %v5258_v22  ;;  %v5024_v2 = vpack.c.bf16 %v4880_v63, %v4878_v44  ;;  %v5018_v5 = vpack.c.bf16 %v4677_v21, %v4676_v13  ;;  %8484 = vmatpush3.bf16.msra.mxu1 %v8940_v9  ;;  %v4664_v0 = vmul.f32 %v12062_v6, %v13773_v17  ;;  %v13801_v22 = vld [vmem:[#allocation64_spill] sm:$0xff]  ;;  %v13802_v18 = vld [vmem:[#allocation90_spill] sm:$0xff] }
 0x421   : > { %v4678_v36 = vmul.f32 %v12007_v33, %v13799_v50  ;;  %v4679_v34 = vmul.f32 %v12034_v40, %v13800_v51  ;;  %v5317_v39 = vsel %vm2422_vm2, %v5253_v58, %v5316_v52  ;;  %8485 = vmatprep.subr.bf16.mxu1 %v8941_v15  ;;  %v4881_v28 = vrot.slane %v4663_v56, 2  ;;  %v8943_v56 = vld [vmem:[#allocation8 + $0x208] sm:$0xff]  }
 0x422   : > { %v5263_v47 = vsel %vm2422_vm2, %v5181_v19, %v5262_v25  ;;  %v5373_v57 = vshrl.u32 %v5024_v2, 16  ;;  %v5376_v41 = vshll.u32 %v5024_v2, 16  ;;  %6414 = vmatprep.mubr.bf16.mxu1 %v5317_v39  ;;  %v5319_v13 = vshrl.u32 %v5018_v5, 16 }
 0x423   : > { %v5322_v9 = vshll.u32 %v5018_v5, 16  ;;  %v4883_v59 = vrot.slane %v4664_v0, 2  ;;  %v5025_v1 = vpack.c.bf16 %v4679_v34, %v4678_v36  ;;  %v4665_v32 = vmul.f32 %v13802_v18, %v13801_v22  ;;  %v13803_v0 = vld [vmem:[#allocation101_spill] sm:$0xff]  ;;  %v13804_v36 = vld [vmem:[#allocation114_spill] sm:$0xff] }
 0x424   : > { %v5375_v11 = vrot.slane %v5373_v57, 3  ;;  %v5378_v53 = vrot.slane %v5376_v41, 4  ;;  %v5321_v44 = vrot.slane %v5319_v13, 3  ;;  %v4882_v58 = vsel %vm2084_vm3, %v4879_v38, %v4881_v28  ;;  %8486 = vmatpush3.bf16.msra.mxu1 %v8941_v15  ;;  %v13805_v38 = vld [vmem:[#allocation46_spill] sm:$0xff] }
 0x425   : > { %v5324_v63 = vrot.slane %v5322_v9, 4  ;;  %v4884_v19 = vsel %vm2084_vm3, %v4881_v28, %v4883_v59  ;;  %v5382_v2 = vshrl.u32 %v5025_v1, 16  ;;  %v5385_v5 = vshll.u32 %v5025_v1, 16  ;;  %8487 = vmatprep.subr.bf16.mxu1 %v8942_v26  ;;  %v13806_v1 = vld [vmem:[#allocation47_spill] sm:$0xff] }
 0x426   : > { %6504 = vmatmul.mubr.bf16.gmra.mxu0 %v5263_v47  ;;  %v5379_v49 = vor.u32 %v5378_v53, %v5375_v11  ;;  %v5031_v21 = vpack.c.bf16 %v4884_v19, %v4882_v58  ;;  %6415 = vmatmul.mubr.bf16.gmra.mxu1 %v13796_v46  ;;  %v4666_v51 = vmul.f32 %v12045_v29, %v13804_v36  ;;  %v4885_v34 = vrot.slane %v4665_v32, 2 }
 0x427   : > { %6511 = vmatprep.mubr.bf16.mxu0 %v13803_v0  ;;  %v5325_v50 = vor.u32 %v5324_v63, %v5321_v44  ;;  %v4680_v39 = vmul.f32 %v12062_v6, %v13805_v38  ;;  %v5384_v41 = vrot.slane %v5382_v2, 3  ;;  %v5387_v9 = vrot.slane %v5385_v5, 4  ;;  %v13807_v44 = vld [vmem:[#allocation120_spill] sm:$0xff]  ;;  %v8944_v63 = vld [vmem:[#allocation8 + $0x200] sm:$0xff]  }
 0x428   : > { %v5380_v15 = vsel %vm2422_vm2, %v5316_v52, %v5379_v49  ;;  %v5436_v47 = vshrl.u32 %v5031_v21, 16  ;;  %v5439_v57 = vshll.u32 %v5031_v21, 16  ;;  %v4886_v28 = vsel %vm2084_vm3, %v4883_v59, %v4885_v34  ;;  %8488 = vmatpush3.bf16.msra.mxu1 %v8942_v26  ;;  %v13808_v59 = vld [vmem:[#allocation68_spill] sm:$0xff] }
 0x429   : > { %6422 = vmatprep.mubr.bf16.mxu1 %v5380_v15  ;;  %v5326_v13 = vsel %vm2422_vm2, %v5262_v25, %v5325_v50  ;;  %v4887_v46 = vrot.slane %v4666_v51, 2  ;;  %v4681_v32 = vmul.f32 %v13802_v18, %v13806_v1  ;;  %v4838_v52 = vsel %vm1675_vm0, %v13807_v44, %v4837_v4  ;;  %8489 = vmatprep.subr.bf16.mxu1 %v8943_v56  ;;  %v13809_v51 = vld [vmem:[#allocation119_spill] sm:$0xff] }
 0x42a   : > { %v5438_v11 = vrot.slane %v5436_v47, 3  ;;  %v5441_v53 = vrot.slane %v5439_v57, 4  ;;  %v5388_v58 = vor.u32 %v5387_v9, %v5384_v41  ;;  %v12468_v19 = vrot.slane %v12115_v10, 1  ;;  %v13810_v57 = vld [vmem:[#allocation50_spill] sm:$0xff] }
 0x42b   : > { %v4888_v25 = vsel %vm2084_vm3, %v4885_v34, %v4887_v46  ;;  %v4667_v26 = vmul.f32 %v12078_v14, %v13808_v59  ;;  %v5032_v5 = vpack.c.bf16 %v4681_v32, %v4680_v39  ;;  %v12474_v38 = vmul.f32 %v12115_v10, %v13809_v51 }
 0x42c   : > { %v5442_v21 = vor.u32 %v5441_v53, %v5438_v11  ;;  %v5038_v2 = vpack.c.bf16 %v4888_v25, %v4886_v28  ;;  %v5389_v15 = vsel %vm2422_vm2, %v5325_v50, %v5388_v58  ;;  %v4840_v34 = vsel %vm1675_vm0, %v4837_v4, %v12468_v19  ;;  %8490 = vmatpush3.bf16.msra.mxu1 %v8943_v56  ;;  %v13811_v53 = vld [vmem:[#allocation103_spill] sm:$0xff]  ;;  %v13812_v25 = vld [vmem:[#allocation52_spill] sm:$0xff] }
 0x42d   : > { %v4889_v47 = vrot.slane %v4667_v26, 2  ;;  %v4682_v41 = vmul.f32 %v12045_v29, %v13810_v57  ;;  %v5445_v11 = vshrl.u32 %v5032_v5, 16  ;;  %8491 = vmatprep.subr.bf16.mxu1 %v8944_v63  ;;  %v5448_v50 = vshll.u32 %v5032_v5, 16 }
 0x42e   : > { %6512 = vmatmul.mubr.bf16.gmra.mxu0 %v5326_v13  ;;  %v5443_v9 = vsel %vm2422_vm2, %v5379_v49, %v5442_v21  ;;  %v5499_v39 = vshrl.u32 %v5038_v2, 16  ;;  %v5502_v28 = vshll.u32 %v5038_v2, 16  ;;  %6423 = vmatmul.mubr.bf16.gmra.mxu1 %v13803_v0  ;;  %v5040_v1 = vpack.c.bf16 %v4840_v34, %v4838_v52  ;;  %v13813_v34 = vld [vmem:[#allocation93_spill] sm:$0xff] }
 0x42f   : > { %6519 = vmatprep.mubr.bf16.mxu0 %v13811_v53  ;;  %v4890_v4 = vsel %vm2084_vm3, %v4887_v46, %v4889_v47  ;;  %v4891_v32 = vrot.slane %v12474_v38, 2  ;;  %6430 = vmatprep.mubr.bf16.mxu1 %v5443_v9  ;;  %v5447_v13 = vrot.slane %v5445_v11, 3  ;;  %v4683_v49 = vmul.f32 %v12078_v14, %v13812_v25 }
 0x430   : > { %v5501_v44 = vrot.slane %v5499_v39, 3  ;;  %v5504_v56 = vrot.slane %v5502_v28, 4  ;;  %v5450_v26 = vrot.slane %v5448_v50, 4  ;;  %v5517_v2 = vshrl.u32 %v5040_v1, 16  ;;  %8492 = vmatpush3.bf16.msra.mxu1 %v8944_v63  ;;  %v13814_v39 = vld [vmem:[#allocation79_spill] sm:$0xff] }
 0x431   : > { %v5520_v57 = vshll.u32 %v5040_v1, 16  ;;  %v4892_v51 = vsel %vm2084_vm3, %v4889_v47, %v4891_v32  ;;  %v5039_v52 = vpack.c.bf16 %v4683_v49, %v4682_v41  ;;  %v4914_v46 = vrot.slane %v13813_v34, 1 }
 0x432   : > { %v5505_v0 = vor.u32 %v5504_v56, %v5501_v44  ;;  %v5045_v5 = vpack.c.bf16 %v4892_v51, %v4890_v4  ;;  %v5451_v59 = vor.u32 %v5450_v26, %v5447_v13  ;;  %v5519_v38 = vrot.slane %v5517_v2, 3  ;;  %v13816_v26 = vld [vmem:[#allocation70_spill] sm:$0xff] }
 0x433   : > { %v5522_v9 = vrot.slane %v5520_v57, 4  ;;  %v4916_v28 = vrot.slane %v13814_v39, 1  ;;  %v5508_v50 = vshrl.u32 %v5039_v52, 16  ;;  %v5511_v63 = vshll.u32 %v5039_v52, 16 }
 0x434   : > { %v5506_v11 = vsel %vm2422_vm2, %v5442_v21, %v5505_v0  ;;  %v5562_v36 = vshrl.u32 %v5045_v5, 16  ;;  %v5565_v25 = vshll.u32 %v5045_v5, 16  ;;  %v5452_v1 = vsel %vm2422_vm2, %v5388_v58, %v5451_v59 }
 0x435   : > { %v12495_v14 = vor.u32 %v5522_v9, %v5519_v38  ;;  %v4915_v51 = vsel %vm1675_vm0, %v12468_v19, %v4914_v46  ;;  %v5510_v4 = vrot.slane %v5508_v50, 3  ;;  %v4917_v44 = vsel %vm1675_vm0, %v4914_v46, %v4916_v28 }
 0x436   : > { %6520 = vmatmul.mubr.bf16.gmra.mxu0 %v5389_v15  ;;  %v5564_v47 = vrot.slane %v5562_v36, 3  ;;  %v5567_v41 = vrot.slane %v5565_v25, 4  ;;  %6431 = vmatmul.mubr.bf16.gmra.mxu1 %v13811_v53  ;;  %v5513_v21 = vrot.slane %v5511_v63, 4  ;;  %v5047_v56 = vpack.c.bf16 %v4917_v44, %v4915_v51  ;;  %v13815_v15 = vld [vmem:[#allocation53_spill] sm:$0xff] }
 0x437   : > { %6527 = vmatprep.mubr.bf16.mxu0 %v12341_v31  ;;  %v12505_v58 = vsel %vm2422_vm2, %v12329_v61, %v12495_v14  ;;  %v4669_v13 = vmul.f32 %v13813_v34, %v13714_v54  ;;  %6438 = vmatprep.mubr.bf16.mxu1 %v5506_v11  ;;  %v4684_v49 = vmul.f32 %v12115_v10, %v13815_v15 }
 0x438   : > { %v5568_v36 = vor.u32 %v5567_v41, %v5564_v47  ;;  %v4685_v2 = vmul.f32 %v13813_v34, %v13816_v26  ;;  %v5056_v57 = vpack.c.bf16 %v4916_v28, %v4916_v28  ;;  %v5514_v53 = vor.u32 %v5513_v21, %v5510_v4 }
 0x439   : > { %v5580_v5 = vshrl.u32 %v5047_v56, 16  ;;  %v5583_v52 = vshll.u32 %v5047_v56, 16  ;;  %v4893_v46 = vrot.slane %v4669_v13, 2  ;;  %v5053_v21 = vpack.c.bf16 %v12468_v19, %v12468_v19 }
 0x43a   : > { %v5569_v61 = vsel %vm2422_vm2, %v5505_v0, %v5568_v36  ;;  %v5046_v38 = vpack.c.bf16 %v4685_v2, %v4684_v49  ;;  %v5661_v9 = vshrl.u32 %v5056_v57, 16  ;;  %v5664_v25 = vshll.u32 %v5056_v57, 16 }
 0x43b   : > { %v5515_v54 = vsel %vm2422_vm2, %v5451_v59, %v5514_v53  ;;  %v5582_v11 = vrot.slane %v5580_v5, 3  ;;  %v5585_v50 = vrot.slane %v5583_v52, 4  ;;  %v4894_v63 = vsel %vm2084_vm3, %v4891_v32, %v4893_v46 }
 0x43c   : > { %v5054_v51 = vpack.c.bf16 %v4894_v63, %v4894_v63  ;;  %v5571_v47 = vshrl.u32 %v5046_v38, 16  ;;  %v5574_v41 = vshll.u32 %v5046_v38, 16  ;;  %v5663_v44 = vrot.slane %v5661_v9, 3 }
 0x43d   : > { %v5586_v28 = vor.u32 %v5585_v50, %v5582_v11  ;;  %v5666_v4 = vrot.slane %v5664_v25, 4  ;;  %v4687_v0 = vmul.f32 %v11978_v8, %v13741_v7  ;;  %v5634_v26 = vshrl.u32 %v5053_v21, 16 }
 0x43e   : > { %6528 = vmatmul.mubr.bf16.gmra.mxu0 %v5452_v1  ;;  %v5643_v56 = vshrl.u32 %v5054_v51, 16  ;;  %v5646_v13 = vshll.u32 %v5054_v51, 16  ;;  %v5573_v59 = vrot.slane %v5571_v47, 3  ;;  %v5576_v15 = vrot.slane %v5574_v41, 4  ;;  %6439 = vmatmul.mubr.bf16.gmra.mxu1 %v12341_v31 }
 0x43f   : > { %6535 = vmatprep.mubr.bf16.mxu0 %v12505_v58  ;;  %v5587_v32 = vsel %vm2422_vm2, %v12495_v14, %v5586_v28  ;;  %v5667_v49 = vor.u32 %v5666_v4, %v5663_v44  ;;  %v5637_v2 = vshll.u32 %v5053_v21, 16  ;;  %6446 = vmatprep.mubr.bf16.mxu1 %v5569_v61  ;;  %v4688_v8 = vmul.f32 %v11993_v27, %v13742_v23 }
 0x440   : > { %v5645_v19 = vrot.slane %v5643_v56, 3  ;;  %v5648_v57 = vrot.slane %v5646_v13, 4  ;;  %v5577_v5 = vor.u32 %v5576_v15, %v5573_v59  ;;  %v5636_v1 = vrot.slane %v5634_v26, 3 }
 0x441   : > { %v5668_v7 = vsel %vm2422_vm2, %v5586_v28, %v5667_v49  ;;  %v5639_v52 = vrot.slane %v5637_v2, 4  ;;  %v4689_v31 = vmul.f32 %v11975_v43, %v13745_v24  ;;  %v4690_v9 = vmul.f32 %v11987_v37, %v13746_v60 }
 0x442   : > { %v5649_v46 = vor.u32 %v5648_v57, %v5645_v19  ;;  %v5578_v38 = vsel %vm2422_vm2, %v5514_v53, %v5577_v5  ;;  %v4939_v61 = vrot.slane %v4687_v0, 2  ;;  %v4940_v11 = vrot.slane %v4688_v8, 2 }
 0x443   : > { %v5640_v25 = vor.u32 %v5639_v52, %v5636_v1  ;;  %v4942_v50 = vrot.slane %v4689_v31, 2  ;;  %v4686_v27 = vmul.f32 %v13814_v39, %v13784_v20  ;;  %v4944_v63 = vrot.slane %v4690_v9, 2 }
 0x444   : > { %v5650_v23 = vsel %vm2422_vm2, %v5568_v36, %v5649_v46  ;;  %v4691_v51 = vmul.f32 %v13788_v16, %v13752_v45  ;;  %v4692_v43 = vmul.f32 %v12013_v48, %v13753_v30  ;;  %v4941_v37 = vsel %vm2084_vm3, %v4939_v61, %v4940_v11 }
 0x445   : > { %v5641_v24 = vsel %vm2422_vm2, %v12495_v14, %v5640_v25  ;;  %v4943_v60 = vsel %vm2084_vm3, %v4940_v11, %v4942_v50  ;;  %v5055_v53 = vpack.c.bf16 %v4686_v27, %v4686_v27  ;;  %v4945_v20 = vsel %vm2084_vm3, %v4942_v50, %v4944_v63 }
 0x446   : > { %6536 = vmatmul.mubr.bf16.gmra.mxu0 %v5515_v54  ;;  %v4997_v47 = vpack.c.bf16 %v4941_v37, %v4939_v61  ;;  %v4946_v36 = vrot.slane %v4691_v51, 2  ;;  %v4948_v41 = vrot.slane %v4692_v43, 2  ;;  %6447 = vmatmul.mubr.bf16.gmra.mxu1 %v12505_v58  ;;  %v5006_v45 = vpack.c.bf16 %v4945_v20, %v4943_v60  ;;  %v13819_v20 = vld [vmem:[#allocation68_spill] sm:$0xff] }
 0x447   : > { %6543 = vmatprep.mubr.bf16.mxu0 %v5587_v32  ;;  %v5652_v16 = vshrl.u32 %v5055_v53, 16  ;;  %v5655_v48 = vshll.u32 %v5055_v53, 16  ;;  %v4693_v14 = vmul.f32 %v11996_v35, %v13787_v42  ;;  %6454 = vmatprep.mubr.bf16.mxu1 %v5650_v23  ;;  %v4694_v15 = vmul.f32 %v12007_v33, %v13789_v3 }
 0x448   : > { %v5201_v30 = vshrl.u32 %v4997_v47, 16  ;;  %v5204_v44 = vshll.u32 %v4997_v47, 16  ;;  %v4947_v28 = vsel %vm2084_vm3, %v4944_v63, %v4946_v36  ;;  %v4949_v54 = vsel %vm2084_vm3, %v4946_v36, %v4948_v41 }
 0x449   : > { %v5209_v4 = vshrl.u32 %v5006_v45, 16  ;;  %v5212_v21 = vshll.u32 %v5006_v45, 16  ;;  %v5654_v0 = vrot.slane %v5652_v16, 3  ;;  %v5657_v56 = vrot.slane %v5655_v48, 4 }
 0x44a   : > { %v5203_v13 = vrot.slane %v5201_v30, 3  ;;  %v5206_v59 = vrot.slane %v5204_v44, 4  ;;  %v5013_v58 = vpack.c.bf16 %v4949_v54, %v4947_v28  ;;  %v4950_v42 = vrot.slane %v4693_v14, 2  ;;  %v13820_v14 = vld [vmem:[#allocation119_spill] sm:$0xff] }
 0x44b   : > { %v5211_v32 = vrot.slane %v5209_v4, 3  ;;  %v5214_v49 = vrot.slane %v5212_v21, 4  ;;  %v5658_v35 = vor.u32 %v5657_v56, %v5654_v0  ;;  %v4952_v57 = vrot.slane %v4694_v15, 2 }
 0x44c   : > { %v5207_v26 = vor.u32 %v5206_v59, %v5203_v13  ;;  %v5274_v2 = vshrl.u32 %v5013_v58, 16  ;;  %v5277_v19 = vshll.u32 %v5013_v58, 16  ;;  %v4951_v52 = vsel %vm2084_vm3, %v4948_v41, %v4950_v42  ;;  %v13821_v59 = vld [vmem:[#allocation84_spill] sm:$0xff] }
 0x44d   : > { %v5215_v8 = vor.u32 %v5214_v49, %v5211_v32  ;;  %v5659_v1 = vsel %vm2422_vm2, %v5577_v5, %v5658_v35  ;;  %v4695_v31 = vmul.f32 %v12034_v40, %v13793_v62  ;;  %v4953_v33 = vsel %vm2084_vm3, %v4950_v42, %v4952_v57 }
 0x44e   : > { %6544 = vmatmul.mubr.bf16.gmra.mxu0 %v5578_v38  ;;  %v5276_v46 = vrot.slane %v5274_v2, 3  ;;  %v5279_v9 = vrot.slane %v5277_v19, 4  ;;  %v4696_v3 = vmul.f32 %v12062_v6, %v13794_v12  ;;  %6455 = vmatmul.mubr.bf16.gmra.mxu1 %v5641_v24  ;;  %v5020_v25 = vpack.c.bf16 %v4953_v33, %v4951_v52  ;;  %v13817_v38 = vld [vmem:[#allocation99_spill] sm:$0xff] }
 0x44f   : > { %6551 = vmatprep.mubr.bf16.mxu0 %v5668_v7  ;;  %v5216_v61 = vsel %vm2422_vm2, %v5207_v26, %v5215_v8  ;;  %v4954_v11 = vrot.slane %v4695_v31, 2  ;;  %v4697_v5 = vmul.f32 %v13802_v18, %v13771_v55  ;;  %v4698_v62 = vmul.f32 %v12045_v29, %v13773_v17  ;;  %v13818_v55 = vld [vmem:[#allocation114_spill] sm:$0xff] }
 0x450   : > { %8493 = vmatprep.mubr.bf16.mxu1 %v5216_v61  ;;  %v5280_v50 = vor.u32 %v5279_v9, %v5276_v46  ;;  %v4956_v40 = vrot.slane %v4696_v3, 2  ;;  %v4699_v27 = vmul.f32 %v13817_v38, %v13801_v22  ;;  %v5337_v23 = vshrl.u32 %v5020_v25, 16 }
 0x451   : > { %v5340_v6 = vshll.u32 %v5020_v25, 16  ;;  %v4955_v12 = vsel %vm2084_vm3, %v4952_v57, %v4954_v11  ;;  %v4958_v7 = vrot.slane %v4697_v5, 2  ;;  %v4960_v43 = vrot.slane %v4698_v62, 2 }
 0x452   : > { %v5281_v63 = vsel %vm2422_vm2, %v5215_v8, %v5280_v50  ;;  %v4957_v51 = vsel %vm2084_vm3, %v4954_v11, %v4956_v40  ;;  %v4700_v18 = vmul.f32 %v12115_v10, %v13818_v55  ;;  %v5339_v24 = vrot.slane %v5337_v23, 3  ;;  %v8945_v55 = vld [vmem:[#allocation9 + $0x38] sm:$0xff]  }
 0x453   : > { %v5342_v37 = vrot.slane %v5340_v6, 4  ;;  %v5027_v60 = vpack.c.bf16 %v4957_v51, %v4955_v12  ;;  %v4959_v29 = vsel %vm2084_vm3, %v4956_v40, %v4958_v7  ;;  %v4961_v17 = vsel %vm2084_vm3, %v4958_v7, %v4960_v43  ;;  %8509 = vmatprep.subr.bf16.mxu0 %v8945_v55 }
 0x454   : > { %v4962_v22 = vrot.slane %v4699_v27, 2  ;;  %v4964_v53 = vrot.slane %v4700_v18, 2  ;;  %v4701_v47 = vmul.f32 %v13813_v34, %v13819_v20  ;;  %v5034_v16 = vpack.c.bf16 %v4961_v17, %v4959_v29  ;;  %v12591_v18 = vld [vmem:[%s13822_s8] ss:$0 sm:$0xff]  ;;  %8510 = vmatpush3.bf16.msra.mxu0 %v8945_v55  ;;  %v8946_v20 = vld [vmem:[#allocation9 + $0x30] sm:$0xff]  }
 0x455   : > { %v5343_v36 = vor.u32 %v5342_v37, %v5339_v24  ;;  %v5400_v41 = vshrl.u32 %v5027_v60, 16  ;;  %v5403_v45 = vshll.u32 %v5027_v60, 16  ;;  %v4702_v30 = vmul.f32 %v13814_v39, %v13820_v14  ;;  %8511 = vmatprep.subr.bf16.mxu0 %v8946_v20 }
 0x456   : > { %6552 = vmatmul.mubr.bf16.gmra.mxu0 %v5659_v1  ;;  %v4963_v48 = vsel %vm2084_vm3, %v4960_v43, %v4962_v22  ;;  %v4965_v10 = vsel %vm2084_vm3, %v4962_v22, %v4964_v53  ;;  %v4966_v44 = vrot.slane %v4701_v47, 2  ;;  %8494 = vmatmul.mubr.bf16.vlgmr.msra.gmra.mxu1 %v5281_v63  ;;  %v5463_v21 = vshrl.u32 %v5034_v16, 16 }
 0x457   : > { %v5344_v28 = vsel %vm2422_vm2, %v5280_v50, %v5343_v36  ;;  %v5402_v54 = vrot.slane %v5400_v41, 3  ;;  %v5405_v4 = vrot.slane %v5403_v45, 4  ;;  %v5466_v34 = vshll.u32 %v5034_v16, 16 }
 0x458   : > { %8497 = vmatprep.mubr.bf16.mxu1 %v5344_v28  ;;  %v5041_v0 = vpack.c.bf16 %v4965_v10, %v4963_v48  ;;  %v4967_v56 = vsel %vm2084_vm3, %v4964_v53, %v4966_v44  ;;  %v4968_v13 = vrot.slane %v4702_v30, 2  ;;  %v4970_v58 = vrot.slane %v13821_v59, 2  ;;  %8512 = vmatpush3.bf16.msra.mxu0 %v8946_v20  ;;  %v8947_v30 = vld [vmem:[#allocation9 + $0x28] sm:$0xff]  }
 0x459   : > { %v5406_v15 = vor.u32 %v5405_v4, %v5402_v54  ;;  %v5465_v32 = vrot.slane %v5463_v21, 3  ;;  %v5468_v49 = vrot.slane %v5466_v34, 4  ;;  %8513 = vmatprep.subr.bf16.mxu0 %v8947_v30 }
 0x45a   : > { %v5526_v35 = vshrl.u32 %v5041_v0, 16  ;;  %v5529_v39 = vshll.u32 %v5041_v0, 16  ;;  %v4969_v42 = vsel %vm2084_vm3, %v4966_v44, %v4968_v13  ;;  %v4971_v2 = vsel %vm2084_vm3, %v4968_v13, %v4970_v58 }
 0x45b   : > { %v5048_v26 = vpack.c.bf16 %v4969_v42, %v4967_v56  ;;  %v5469_v19 = vor.u32 %v5468_v49, %v5465_v32  ;;  %v5057_v57 = vpack.c.bf16 %v4971_v2, %v4971_v2  ;;  %v5407_v8 = vsel %vm2422_vm2, %v5343_v36, %v5406_v15 }
 0x45c   : > { %v5528_v31 = vrot.slane %v5526_v35, 3  ;;  %v5531_v46 = vrot.slane %v5529_v39, 4  ;;  %8514 = vmatpush3.bf16.msra.mxu0 %v8947_v30 }
 0x45d   : > { %v5589_v1 = vshrl.u32 %v5048_v26, 16  ;;  %v5592_v52 = vshll.u32 %v5048_v26, 16  ;;  %v5670_v9 = vshrl.u32 %v5057_v57, 16  ;;  %v5673_v33 = vshll.u32 %v5057_v57, 16 }
 0x45e   : > { %8498 = vmatmul.mubr.bf16.gmra.mxu1 %v5407_v8  ;;  %v5470_v3 = vsel %vm2422_vm2, %v5406_v15, %v5469_v19  ;;  %v5532_v40 = vor.u32 %v5531_v46, %v5528_v31 }
 0x45f   : > { %v5591_v61 = vrot.slane %v5589_v1, 3  ;;  %v5594_v25 = vrot.slane %v5592_v52, 4  ;;  %8501 = vmatprep.mubr.bf16.mxu1 %v5470_v3  ;;  %v5672_v11 = vrot.slane %v5670_v9, 3  ;;  %v5675_v5 = vrot.slane %v5673_v33, 4 }
 0x460   : > { %v5533_v27 = vsel %vm2422_vm2, %v5469_v19, %v5532_v40 }
 0x461   : > { %v5595_v50 = vor.u32 %v5594_v25, %v5591_v61  ;;  %v5676_v62 = vor.u32 %v5675_v5, %v5672_v11 }
 0x463   : > { %v5677_v38 = vsel %vm2422_vm2, %v5595_v50, %v5676_v62  ;;  %v5596_v23 = vsel %vm2422_vm2, %v5532_v40, %v5595_v50 }
 0x466   : > { %8502 = vmatmul.mubr.bf16.gmra.mxu1 %v5533_v27 }
 0x467   : > { %8505 = vmatprep.mubr.bf16.mxu1 %v5596_v23 }
 0x46e   : > { %8506 = vmatmul.mubr.bf16.gmra.mxu1 %v5677_v38 }
 0x478   : > { %v8095_v6 = vpop.f32.mrf.mxu1 }
 0x47a   : > { %v8096_v12 = vpop.f32.mrf.mxu1 }
 0x47b   : > { %v8097_v7 = vadd.f32 %v8096_v12, %v8095_v6 }
 0x47c   : > { %v8098_v63 = vpop.f32.mrf.mxu1 }
 0x47d   : > { %v6207_v37 = vadd.f32 %v8097_v7, %v12591_v18 }
 0x47e   : > { %v8099_v51 = vpop.f32.mrf.mxu1 }
 0x47f   : > { %v8100_v43 = vadd.f32 %v8099_v51, %v8098_v63 }
 0x481   : > { %v6210_v53 = vadd.f32 %v8100_v43, %v12591_v18 }
 0x486   : > { %v8159_v24 = vpop.f32.mrf.mxu0 }
 0x488   : > { %v8160_v60 = vpop.f32.mrf.mxu0 }
 0x489   : > { %v8161_v29 = vadd.f32 %v8160_v60, %v8159_v24 }
 0x48a   : > { %v8162_v17 = vpop.f32.mrf.mxu0 }
 0x48b   : > { %v12594_v22 = vadd.f32 %v8161_v29, %v6207_v37 }
 0x48c   : > { %v8163_v47 = vpop.f32.mrf.mxu0 }
 0x48d   : > { %v8101_v36 = vpop.f32.mrf.mxu1  ;;  %v8164_v41 = vadd.f32 %v8163_v47, %v8162_v17 }
 0x48f   : > { %v12597_v45 = vadd.f32 %v8164_v41, %v6210_v53  ;;  %v8102_v16 = vpop.f32.mrf.mxu1  ;;  %v8948_v53 = vld [vmem:[#allocation9 + $0x20] sm:$0xff]  }
 0x490   : > { %v8103_v48 = vadd.f32 %v8102_v16, %v8101_v36  ;;  %8515 = vmatprep.subr.bf16.mxu0 %v8948_v53 }
 0x491   : > { %v8104_v10 = vpop.f32.mrf.mxu1  ;;  %8516 = vmatpush3.bf16.msra.mxu0 %v8948_v53 }
 0x492   : > { %v6215_v54 = vadd.f32 %v8103_v48, %v12591_v18 }
 0x493   : > { %v8105_v14 = vpop.f32.mrf.mxu1 }
 0x494   : > { %v8106_v44 = vadd.f32 %v8105_v14, %v8104_v10 }
 0x495   : > { %v8165_v28 = vpop.f32.mrf.mxu0 }
 0x496   : > { %v8107_v4 = vpop.f32.mrf.mxu1  ;;  %v6218_v58 = vadd.f32 %v8106_v44, %v12591_v18 }
 0x497   : > { %v8166_v21 = vpop.f32.mrf.mxu0 }
 0x498   : > { %v8167_v34 = vadd.f32 %v8166_v21, %v8165_v28  ;;  %v8108_v0 = vpop.f32.mrf.mxu1 }
 0x499   : > { %v8168_v56 = vpop.f32.mrf.mxu0  ;;  %v8109_v13 = vadd.f32 %v8108_v0, %v8107_v4  ;;  %v8950_v4 = vld [vmem:[#allocation9 + $0x10] sm:$0xff]  }
 0x49a   : > { %v12600_v59 = vadd.f32 %v8167_v34, %v6215_v54  ;;  %v8110_v15 = vpop.f32.mrf.mxu1  ;;  %v8949_v54 = vld [vmem:[#allocation9 + $0x18] sm:$0xff]  }
 0x49b   : > { %v8169_v32 = vpop.f32.mrf.mxu0  ;;  %v6223_v2 = vadd.f32 %v8109_v13, %v12591_v18  ;;  %8517 = vmatprep.subr.bf16.mxu0 %v8949_v54 }
 0x49c   : > { %v8170_v49 = vadd.f32 %v8169_v32, %v8168_v56  ;;  %v8111_v35 = vpop.f32.mrf.mxu1  ;;  %8518 = vmatpush3.bf16.msra.mxu0 %v8949_v54  ;;  %v8951_v56 = vld [vmem:[#allocation9 + $0x8] sm:$0xff]  }
 0x49d   : > { %v8112_v39 = vadd.f32 %v8111_v35, %v8110_v15  ;;  %8519 = vmatprep.subr.bf16.mxu0 %v8950_v4 }
 0x49e   : > { %v12603_v42 = vadd.f32 %v8170_v49, %v6218_v58 }
 0x49f   : > { %v6226_v46 = vadd.f32 %v8112_v39, %v12591_v18  ;;  %v8952_v39 = vld [vmem:[#allocation9] sm:$0xff]  }
 0x4a0   : > { %13823 = vst [vmem:[#allocation121_spill] sm:$0xff] %v12603_v42  ;;  %v8171_v26 = vpop.f32.mrf.mxu0  ;;  %8520 = vmatpush3.bf16.msra.mxu0 %v8950_v4 }
 0x4a1   : > { %v8113_v57 = vpop.f32.mrf.mxu1  ;;  %8521 = vmatprep.subr.bf16.mxu0 %v8951_v56 }
 0x4a2   : > { %v8172_v19 = vpop.f32.mrf.mxu0 }
 0x4a3   : > { %v8173_v8 = vadd.f32 %v8172_v19, %v8171_v26  ;;  %v8114_v52 = vpop.f32.mrf.mxu1 }
 0x4a4   : > { %v8174_v1 = vpop.f32.mrf.mxu0  ;;  %v8115_v9 = vadd.f32 %v8114_v52, %v8113_v57  ;;  %8522 = vmatpush3.bf16.msra.mxu0 %v8951_v56 }
 0x4a5   : > { %v12606_v31 = vadd.f32 %v8173_v8, %v6223_v2  ;;  %v8116_v3 = vpop.f32.mrf.mxu1  ;;  %8523 = vmatprep.subr.bf16.mxu0 %v8952_v39 }
 0x4a6   : > { %v8175_v33 = vpop.f32.mrf.mxu0  ;;  %v6231_v40 = vadd.f32 %v8115_v9, %v12591_v18 }
 0x4a7   : > { %13824 = vst [vmem:[#allocation115_spill] sm:$0xff] %v12606_v31  ;;  %v8176_v61 = vadd.f32 %v8175_v33, %v8174_v1  ;;  %v8117_v25 = vpop.f32.mrf.mxu1 }
 0x4a8   : > { %v8118_v50 = vadd.f32 %v8117_v25, %v8116_v3  ;;  %8524 = vmatpush3.bf16.msra.mxu0 %v8952_v39 }
 0x4a9   : > { %v12609_v11 = vadd.f32 %v8176_v61, %v6226_v46  ;;  %v8177_v5 = vpop.f32.mrf.mxu0 }
 0x4aa   : > { %v6234_v12 = vadd.f32 %v8118_v50, %v12591_v18 }
 0x4ab   : > { %13825 = vst [vmem:[#allocation82_spill] sm:$0xff] %v12609_v11  ;;  %v8178_v62 = vpop.f32.mrf.mxu0 }
 0x4ac   : > { %v8179_v38 = vadd.f32 %v8178_v62, %v8177_v5  ;;  %v8119_v27 = vpop.f32.mrf.mxu1 }
 0x4ad   : > { %v8180_v23 = vpop.f32.mrf.mxu0 }
 0x4ae   : > { %v12612_v6 = vadd.f32 %v8179_v38, %v6231_v40  ;;  %v8120_v7 = vpop.f32.mrf.mxu1 }
 0x4af   : > { %v8181_v63 = vpop.f32.mrf.mxu0  ;;  %v8121_v51 = vadd.f32 %v8120_v7, %v8119_v27 }
 0x4b0   : > { %13826 = vst [vmem:[#allocation88_spill] sm:$0xff] %v12612_v6  ;;  %v8182_v43 = vadd.f32 %v8181_v63, %v8180_v23  ;;  %v8122_v55 = vpop.f32.mrf.mxu1 }
 0x4b1   : > { %v6239_v17 = vadd.f32 %v8121_v51, %v12591_v18 }
 0x4b2   : > { %v12615_v24 = vadd.f32 %v8182_v43, %v6234_v12  ;;  %v8123_v37 = vpop.f32.mrf.mxu1 }
 0x4b3   : > { %v8124_v60 = vadd.f32 %v8123_v37, %v8122_v55 }
 0x4b4   : > { %13827 = vst [vmem:[#allocation105_spill] sm:$0xff] %v12615_v24  ;;  %v8183_v29 = vpop.f32.mrf.mxu0 }
 0x4b5   : > { %v6242_v48 = vadd.f32 %v8124_v60, %v12591_v18 }
 0x4b6   : > { %v8184_v20 = vpop.f32.mrf.mxu0  ;;  %v8125_v36 = vpop.f32.mrf.mxu1 }
 0x4b7   : > { %v8185_v47 = vadd.f32 %v8184_v20, %v8183_v29 }
 0x4b8   : > { %v8186_v41 = vpop.f32.mrf.mxu0  ;;  %v8126_v10 = vpop.f32.mrf.mxu1 }
 0x4b9   : > { %v12618_v16 = vadd.f32 %v8185_v47, %v6239_v17  ;;  %v8127_v30 = vadd.f32 %v8126_v10, %v8125_v36 }
 0x4ba   : > { %v8187_v14 = vpop.f32.mrf.mxu0  ;;  %v8128_v28 = vpop.f32.mrf.mxu1 }
 0x4bb   : > { %13828 = vst [vmem:[#allocation108_spill] sm:$0xff] %v12618_v16  ;;  %v8188_v44 = vadd.f32 %v8187_v14, %v8186_v41  ;;  %v6247_v58 = vadd.f32 %v8127_v30, %v12591_v18 }
 0x4bc   : > { %v8129_v34 = vpop.f32.mrf.mxu1 }
 0x4bd   : > { %v12621_v21 = vadd.f32 %v8188_v44, %v6242_v48  ;;  %v8130_v0 = vadd.f32 %v8129_v34, %v8128_v28 }
 0x4bf   : > { %13829 = vst [vmem:[#allocation122_spill] sm:$0xff] %v12621_v21  ;;  %v6250_v57 = vadd.f32 %v8130_v0, %v12591_v18 }
 0x4c0   : > { %v8189_v13 = vpop.f32.mrf.mxu0  ;;  %v8131_v15 = vpop.f32.mrf.mxu1 }
 0x4c2   : > { %v8190_v32 = vpop.f32.mrf.mxu0  ;;  %v8132_v35 = vpop.f32.mrf.mxu1 }
 0x4c3   : > { %v8191_v49 = vadd.f32 %v8190_v32, %v8189_v13  ;;  %v8133_v2 = vadd.f32 %v8132_v35, %v8131_v15 }
 0x4c4   : > { %v8192_v26 = vpop.f32.mrf.mxu0  ;;  %v8134_v8 = vpop.f32.mrf.mxu1 }
 0x4c5   : > { %v12624_v19 = vadd.f32 %v8191_v49, %v6247_v58  ;;  %v6255_v25 = vadd.f32 %v8133_v2, %v12591_v18 }
 0x4c6   : > { %v8193_v1 = vpop.f32.mrf.mxu0  ;;  %v8135_v46 = vpop.f32.mrf.mxu1 }
 0x4c7   : > { %13830 = vst [vmem:[#allocation110_spill] sm:$0xff] %v12624_v19  ;;  %v8194_v52 = vadd.f32 %v8193_v1, %v8192_v26  ;;  %v8136_v9 = vadd.f32 %v8135_v46, %v8134_v8 }
 0x4c9   : > { %v12627_v33 = vadd.f32 %v8194_v52, %v6250_v57  ;;  %v8195_v3 = vpop.f32.mrf.mxu0  ;;  %v8137_v61 = vpop.f32.mrf.mxu1  ;;  %v6258_v12 = vadd.f32 %v8136_v9, %v12591_v18 }
 0x4cb   : > { %13831 = vst [vmem:[#allocation112_spill] sm:$0xff] %v12627_v33  ;;  %v8196_v5 = vpop.f32.mrf.mxu0  ;;  %v8138_v50 = vpop.f32.mrf.mxu1 }
 0x4cc   : > { %v8197_v40 = vadd.f32 %v8196_v5, %v8195_v3  ;;  %v8139_v62 = vadd.f32 %v8138_v50, %v8137_v61 }
 0x4cd   : > { %v8198_v38 = vpop.f32.mrf.mxu0  ;;  %v8140_v27 = vpop.f32.mrf.mxu1 }
 0x4ce   : > { %v12630_v23 = vadd.f32 %v8197_v40, %v6255_v25  ;;  %v6263_v17 = vadd.f32 %v8139_v62, %v12591_v18 }
 0x4cf   : > { %v8199_v7 = vpop.f32.mrf.mxu0  ;;  %v8141_v63 = vpop.f32.mrf.mxu1 }
 0x4d0   : > { %13832 = vst [vmem:[#allocation124_spill] sm:$0xff] %v12630_v23  ;;  %v8200_v51 = vadd.f32 %v8199_v7, %v8198_v38  ;;  %v8142_v43 = vadd.f32 %v8141_v63, %v8140_v27 }
 0x4d2   : > { %v12633_v55 = vadd.f32 %v8200_v51, %v6258_v12  ;;  %v6266_v19 = vadd.f32 %v8142_v43, %v12591_v18 }
 0x4d3   : > { %v8223_v37 = vpop.f32.mrf.mxu1 }
 0x4d4   : > { %13833 = vst [vmem:[#allocation118_spill] sm:$0xff] %v12633_v55 }
 0x4d5   : > { %v8201_v60 = vpop.f32.mrf.mxu0  ;;  %v8224_v29 = vpop.f32.mrf.mxu1 }
 0x4d6   : > { %v8225_v53 = vadd.f32 %v8224_v29, %v8223_v37 }
 0x4d7   : > { %v8202_v20 = vpop.f32.mrf.mxu0  ;;  %v8226_v47 = vpop.f32.mrf.mxu1 }
 0x4d8   : > { %v8203_v36 = vadd.f32 %v8202_v20, %v8201_v60  ;;  %v12637_v41 = vadd.f32 %v8225_v53, %v12594_v22 }
 0x4d9   : > { %v8204_v48 = vpop.f32.mrf.mxu0  ;;  %v8227_v14 = vpop.f32.mrf.mxu1 }
 0x4da   : > { %13834 = vst [vmem:[#allocation123_spill] sm:$0xff] %v12637_v41  ;;  %v12639_v10 = vadd.f32 %v8203_v36, %v6263_v17  ;;  %v8228_v41 = vadd.f32 %v8227_v14, %v8226_v47 }
 0x4db   : > { %v8205_v30 = vpop.f32.mrf.mxu0 }
 0x4dc   : > { %13835 = vst [vmem:[#allocation113_spill] sm:$0xff] %v12639_v10  ;;  %v8206_v21 = vadd.f32 %v8205_v30, %v8204_v48 }
 0x4de   : > { %v12641_v44 = vpop.f32.mrf.mxu0  ;;  %v8229_v28 = vpop.f32.mrf.mxu1  ;;  %v12662_v42 = vadd.f32 %v8206_v21, %v6266_v19 }
 0x4e0   : > { %v8288_v54 = vpop.f32.mrf.mxu0  ;;  %v8230_v4 = vpop.f32.mrf.mxu1 }
 0x4e1   : > { %v8231_v16 = vadd.f32 %v8230_v4, %v8229_v28  ;;  %v8289_v18 = vadd.f32 %v8288_v54, %v12641_v44  ;;  %v13844_v4 = vld [vmem:[#allocation121_spill] sm:$0xff] }
 0x4e2   : > { %v12643_v34 = vpop.f32.mrf.mxu0  ;;  %v8232_v0 = vpop.f32.mrf.mxu1  ;;  %v13848_v54 = vld [vmem:[#allocation105_spill] sm:$0xff] }
 0x4e3   : > { %13836 = vst [vmem:[#allocation104_spill] sm:$0xff] %v12643_v34  ;;  %v6409_v43 = vadd.f32 %v8231_v16, %v12600_v59 }
 0x4e4   : > { %v8291_v56 = vpop.f32.mrf.mxu0  ;;  %v8233_v13 = vpop.f32.mrf.mxu1 }
 0x4e6   : > { %v8293_v58 = vpop.f32.mrf.mxu0  ;;  %v8235_v15 = vpop.f32.mrf.mxu1 }
 0x4e8   : > { %v8294_v32 = vpop.f32.mrf.mxu0  ;;  %v8236_v22 = vpop.f32.mrf.mxu1 }
 0x4e9   : > { %v8237_v6 = vadd.f32 %v8236_v22, %v8235_v15  ;;  %v8295_v47 = vadd.f32 %v8294_v32, %v8293_v58  ;;  %v13845_v15 = vld [vmem:[#allocation115_spill] sm:$0xff] }
 0x4ea   : > { %v8296_v49 = vpop.f32.mrf.mxu0  ;;  %v8238_v35 = vpop.f32.mrf.mxu1  ;;  %v13843_v30 = vld [vmem:[#allocation104_spill] sm:$0xff] }
 0x4eb   : > { %v8292_v28 = vadd.f32 %v8291_v56, %v13843_v30  ;;  %v6417_v22 = vadd.f32 %v8237_v6, %v13845_v15  ;;  %v13849_v56 = vld [vmem:[#allocation108_spill] sm:$0xff] }
 0x4ec   : > { %v8297_v39 = vpop.f32.mrf.mxu0  ;;  %v8239_v26 = vpop.f32.mrf.mxu1 }
 0x4ed   : > { %v8240_v11 = vadd.f32 %v8239_v26, %v8238_v35  ;;  %v13846_v35 = vld [vmem:[#allocation82_spill] sm:$0xff]  ;;  %v13847_v26 = vld [vmem:[#allocation88_spill] sm:$0xff] }
 0x4ee   : > { %v8299_v2 = vpop.f32.mrf.mxu0  ;;  %v8241_v57 = vpop.f32.mrf.mxu1 }
 0x4f0   : > { %v8300_v8 = vpop.f32.mrf.mxu0  ;;  %v8242_v1 = vpop.f32.mrf.mxu1 }
 0x4f1   : > { %v8301_v19 = vadd.f32 %v8300_v8, %v8299_v2 }
 0x4f2   : > { %v8302_v52 = vpop.f32.mrf.mxu0  ;;  %v8244_v46 = vpop.f32.mrf.mxu1 }
 0x4f4   : > { %v8303_v9 = vpop.f32.mrf.mxu0  ;;  %v8245_v3 = vpop.f32.mrf.mxu1 }
 0x4f6   : > { %v8305_v61 = vpop.f32.mrf.mxu0  ;;  %v8247_v25 = vpop.f32.mrf.mxu1 }
 0x4f8   : > { %v8306_v5 = vpop.f32.mrf.mxu0  ;;  %v8248_v50 = vpop.f32.mrf.mxu1 }
 0x4f9   : > { %v8249_v48 = vadd.f32 %v8248_v50, %v8247_v25  ;;  %v8307_v44 = vadd.f32 %v8306_v5, %v8305_v61  ;;  %v6514_v61 = vadd.f32 %v8301_v19, %v6417_v22 }
 0x4fa   : > { %v8308_v40 = vpop.f32.mrf.mxu0  ;;  %v8250_v62 = vpop.f32.mrf.mxu1 }
 0x4fc   : > { %v8309_v38 = vpop.f32.mrf.mxu0  ;;  %v8251_v27 = vpop.f32.mrf.mxu1 }
 0x4fd   : > { %v8310_v16 = vadd.f32 %v8309_v38, %v8308_v40  ;;  %v8252_v58 = vadd.f32 %v8251_v27, %v8250_v62 }
 0x4fe   : > { %v8311_v12 = vpop.f32.mrf.mxu0  ;;  %v8253_v7 = vpop.f32.mrf.mxu1 }
 0x500   : > { %v8312_v63 = vpop.f32.mrf.mxu0  ;;  %v8254_v51 = vpop.f32.mrf.mxu1 }
 0x501   : > { %v8255_v25 = vadd.f32 %v8254_v51, %v8253_v7 }
 0x502   : > { %v12645_v37 = vpop.f32.mrf.mxu0  ;;  %v8256_v60 = vpop.f32.mrf.mxu1 }
 0x503   : > { %13837 = vst [vmem:[#allocation59_spill] sm:$0xff] %v12645_v37 }
 0x504   : > { %v12647_v29 = vpop.f32.mrf.mxu0  ;;  %v8257_v17 = vpop.f32.mrf.mxu1 }
 0x505   : > { %13838 = vst [vmem:[#allocation94_spill] sm:$0xff] %v12647_v29  ;;  %v8234_v29 = vadd.f32 %v8233_v13, %v8232_v0  ;;  %v8298_v13 = vadd.f32 %v8297_v39, %v8296_v49  ;;  %v6506_v49 = vadd.f32 %v8295_v47, %v6409_v43  ;;  %v13850_v39 = vld [vmem:[#allocation123_spill] sm:$0xff]  ;;  %v8258_v2 = vadd.f32 %v8257_v17, %v8256_v60  ;;  %v13857_v47 = vld [vmem:[#allocation112_spill] sm:$0xff] }
 0x506   : > { %v12649_v53 = vpop.f32.mrf.mxu0  ;;  %v8259_v20 = vpop.f32.mrf.mxu1  ;;  %v6498_v6 = vadd.f32 %v8289_v18, %v13850_v39 }
 0x507   : > { %13839 = vst [vmem:[#allocation126_spill] sm:$0xff] %v12649_v53  ;;  %v6412_v0 = vadd.f32 %v8234_v29, %v13844_v4  ;;  %v13860_v4 = vld [vmem:[#allocation124_spill] sm:$0xff] }
 0x508   : > { %v12651_v36 = vpop.f32.mrf.mxu0  ;;  %v8260_v10 = vpop.f32.mrf.mxu1 }
 0x509   : > { %13840 = vst [vmem:[#allocation72_spill] sm:$0xff] %v12651_v36  ;;  %v8243_v36 = vadd.f32 %v8242_v1, %v8241_v57 }
 0x50a   : > { %v12653_v55 = vpop.f32.mrf.mxu0  ;;  %v8262_v23 = vpop.f32.mrf.mxu1 }
 0x50b   : > { %13841 = vst [vmem:[#allocation107_spill] sm:$0xff] %v12653_v55  ;;  %v6404_v55 = vadd.f32 %v8228_v41, %v12597_v45  ;;  %v6420_v45 = vadd.f32 %v8240_v11, %v13846_v35  ;;  %v8304_v41 = vadd.f32 %v8303_v9, %v8302_v52  ;;  %v6425_v57 = vadd.f32 %v8243_v36, %v13847_v26  ;;  %v13861_v35 = vld [vmem:[#allocation118_spill] sm:$0xff] }
 0x50c   : > { %v12655_v33 = vpop.f32.mrf.mxu0  ;;  %v8263_v37 = vpop.f32.mrf.mxu1  ;;  %v6509_v11 = vadd.f32 %v8298_v13, %v6412_v0  ;;  %v8261_v9 = vadd.f32 %v8260_v10, %v8259_v20  ;;  %v13853_v36 = vld [vmem:[#allocation94_spill] sm:$0xff] }
 0x50d   : > { %13842 = vst [vmem:[#allocation76_spill] sm:$0xff] %v12655_v33  ;;  %v8246_v33 = vadd.f32 %v8245_v3, %v8244_v46  ;;  %v6433_v46 = vadd.f32 %v8249_v48, %v13849_v56  ;;  %v8313_v3 = vadd.f32 %v8312_v63, %v8311_v12  ;;  %v6501_v52 = vadd.f32 %v8292_v28, %v6404_v55  ;;  %v13852_v63 = vld [vmem:[#allocation59_spill] sm:$0xff]  ;;  %v13854_v55 = vld [vmem:[#allocation110_spill] sm:$0xff] }
 0x50e   : > { %v12658_v24 = vpop.f32.mrf.mxu0  ;;  %v12660_v53 = vpop.f32.mrf.mxu1  ;;  %v12675_v5 = vadd.f32 %v8304_v41, %v6420_v45  ;;  %v8264_v62 = vadd.f32 %v8263_v37, %v8262_v23  ;;  %v6522_v29 = vadd.f32 %v8307_v44, %v6425_v57  ;;  %v8316_v18 = vadd.f32 %v13853_v36, %v13852_v63  ;;  %v13855_v17 = vld [vmem:[#allocation126_spill] sm:$0xff] }
 0x50f   : > { %v6428_v59 = vadd.f32 %v8246_v33, %v13848_v54  ;;  %v13851_v33 = vld [vmem:[#allocation122_spill] sm:$0xff]  ;;  %v12682_v60 = vadd.f32 %v8313_v3, %v6433_v46  ;;  %v6441_v10 = vadd.f32 %v8255_v25, %v13854_v55  ;;  %v6444_v48 = vadd.f32 %v8258_v2, %v13857_v47 }
 0x510   : > { %v8324_v31 = vpop.f32.mrf.mxu0  ;;  %v8266_v34 = vpop.f32.mrf.mxu1  ;;  %v6436_v40 = vadd.f32 %v8252_v58, %v13851_v33  ;;  %v13856_v20 = vld [vmem:[#allocation72_spill] sm:$0xff]  ;;  %v6449_v0 = vadd.f32 %v8261_v9, %v13860_v4  ;;  %v6452_v45 = vadd.f32 %v8264_v62, %v13861_v35 }
 0x511   : > { %v6525_v12 = vadd.f32 %v8310_v16, %v6428_v59  ;;  %v8319_v43 = vadd.f32 %v13856_v20, %v13855_v17  ;;  %v8325_v19 = vadd.f32 %v8324_v31, %v12658_v24  ;;  %v8267_v26 = vadd.f32 %v8266_v34, %v12660_v53 }
 0x512   : > { %v8326_v14 = vpop.f32.mrf.mxu0  ;;  %v8268_v21 = vpop.f32.mrf.mxu1  ;;  %v13858_v23 = vld [vmem:[#allocation107_spill] sm:$0xff]  ;;  %v12701_v58 = vadd.f32 %v8316_v18, %v6436_v40 }
 0x513   : > { %v6538_v31 = vadd.f32 %v8319_v43, %v6441_v10 }
 0x514   : > { %v8327_v32 = vpop.f32.mrf.mxu0  ;;  %v8269_v1 = vpop.f32.mrf.mxu1  ;;  %v13859_v37 = vld [vmem:[#allocation76_spill] sm:$0xff] }
 0x515   : > { %v8322_v30 = vadd.f32 %v13859_v37, %v13858_v23  ;;  %v8328_v41 = vadd.f32 %v8327_v32, %v8326_v14  ;;  %v8270_v56 = vadd.f32 %v8269_v1, %v8268_v21  ;;  %v13862_v32 = vld [vmem:[#allocation113_spill] sm:$0xff] }
 0x516   : > { %v8495_v8 = vpop.f32.mrf.mxu1  ;;  %v8329_v38 = vpop.f32.mrf.mxu0  ;;  %v6457_v39 = vadd.f32 %v8267_v26, %v13862_v32 }
 0x517   : > { %v6603_v50 = vadd.f32 %v8495_v8, %v6506_v49  ;;  %v6541_v24 = vadd.f32 %v8322_v30, %v6444_v48  ;;  %v12711_v8 = vadd.f32 %v8325_v19, %v6449_v0  ;;  %v12713_v21 = vadd.f32 %v8328_v41, %v6452_v45 }
 0x518   : > { %v6594_v27 = vpop.f32.mrf.mxu1  ;;  %v8330_v57 = vpop.f32.mrf.mxu0  ;;  %v6460_v33 = vadd.f32 %v8270_v56, %v12662_v42 }
 0x519   : > { %v6675_v7 = vmul.f32 %v6603_v50, %v6603_v50  ;;  %v12680_v51 = vadd.f32 %v6594_v27, %v6498_v6  ;;  %v8331_v1 = vadd.f32 %v8330_v57, %v8329_v38  ;;  %v12725_v38 = vmul.f32 0.5, %v6603_v50 }
 0x51a   : > { %v8496_v28 = vpop.f32.mrf.mxu1  ;;  %v8332_v6 = vpop.f32.mrf.mxu0 }
 0x51b   : > { %v6691_v13 = vmul.f32 %v6675_v7, %v6603_v50  ;;  %v6673_v15 = vmul.f32 %v12680_v51, %v12680_v51  ;;  %v12693_v22 = vadd.f32 %v8496_v28, %v6509_v11  ;;  %v6554_v43 = vadd.f32 %v8331_v1, %v6457_v39 }
 0x51c   : > { %v6597_v44 = vpop.f32.mrf.mxu1  ;;  %v8333_v7 = vpop.f32.mrf.mxu0  ;;  %v12749_v41 = vmul.f32 0.5, %v12680_v51 }
 0x51d   : > { %v6707_v54 = vmul.f32 0.044715, %v6691_v13  ;;  %v6689_v59 = vmul.f32 %v6673_v15, %v12680_v51  ;;  %v6676_v16 = vmul.f32 %v12693_v22, %v12693_v22  ;;  %v12703_v46 = vadd.f32 %v6597_v44, %v6501_v52 }
 0x51e   : > { %v8499_v3 = vpop.f32.mrf.mxu1  ;;  %v8334_v37 = vadd.f32 %v8333_v7, %v8332_v6 }
 0x51f   : > { %v6723_v49 = vadd.f32 %v6707_v54, %v6603_v50  ;;  %v6705_v14 = vmul.f32 0.044715, %v6689_v59  ;;  %v6692_v34 = vmul.f32 %v6676_v16, %v12693_v22  ;;  %v12706_v53 = vadd.f32 %v8499_v3, %v6522_v29 }
 0x520   : > { %v6674_v25 = vmul.f32 %v12703_v46, %v12703_v46  ;;  %v6610_v2 = vpop.f32.mrf.mxu1 }
 0x521   : > { %v6739_v11 = vmul.f32 0.7978846, %v6723_v49  ;;  %v6721_v52 = vadd.f32 %v6705_v14, %v12680_v51  ;;  %v6708_v9 = vmul.f32 0.044715, %v6692_v34  ;;  %v6679_v62 = vmul.f32 %v12706_v53, %v12706_v53 }
 0x522   : > { %v6690_v40 = vmul.f32 %v6674_v25, %v12703_v46  ;;  %v12720_v27 = vadd.f32 %v6610_v2, %v6514_v61  ;;  %v8500_v29 = vpop.f32.mrf.mxu1  ;;  %v6557_v14 = vadd.f32 %v8334_v37, %v6460_v33 }
 0x523   : > { %9089 = vtanh.f32 %v6739_v11  ;;  %v6737_v63 = vmul.f32 0.7978846, %v6721_v52  ;;  %v6724_v36 = vadd.f32 %v6708_v9, %v12693_v22  ;;  %v12723_v18 = vadd.f32 %v8500_v29, %v6525_v12 }
 0x524   : > { %v6706_v55 = vmul.f32 0.044715, %v6690_v40  ;;  %v6695_v42 = vmul.f32 %v6679_v62, %v12706_v53  ;;  %v6677_v10 = vmul.f32 %v12720_v27, %v12720_v27  ;;  %v6613_v17 = vpop.f32.mrf.mxu1  ;;  %v6658_v29 = vmul.f32 0.5, %v12703_v46 }
 0x525   : > { %9091 = vtanh.f32 %v6737_v63  ;;  %v6740_v61 = vmul.f32 0.7978846, %v6724_v36  ;;  %v6680_v20 = vmul.f32 %v12723_v18, %v12723_v18  ;;  %v12735_v48 = vadd.f32 %v6613_v17, %v12675_v5 }
 0x526   : > { %v6722_v47 = vadd.f32 %v6706_v55, %v12703_v46  ;;  %v6711_v12 = vmul.f32 0.044715, %v6695_v42  ;;  %v6693_v50 = vmul.f32 %v6677_v10, %v12720_v27  ;;  %v8503_v23 = vpop.f32.mrf.mxu1 }
 0x527   : > { %9093 = vtanh.f32 %v6740_v61  ;;  %v6696_v30 = vmul.f32 %v6680_v20, %v12723_v18  ;;  %v12738_v28 = vadd.f32 %v8503_v23, %v6538_v31  ;;  %v6678_v15 = vmul.f32 %v12735_v48, %v12735_v48 }
 0x528   : > { %v6738_v4 = vmul.f32 0.7978846, %v6722_v47  ;;  %v6727_v0 = vadd.f32 %v6711_v12, %v12706_v53  ;;  %v6709_v13 = vmul.f32 0.044715, %v6693_v50  ;;  %v6626_v19 = vpop.f32.mrf.mxu1 }
 0x529   : > { %v6712_v35 = vmul.f32 0.044715, %v6696_v30  ;;  %v6683_v5 = vmul.f32 %v12738_v28, %v12738_v28  ;;  %v12746_v45 = vadd.f32 %v6626_v19, %v12682_v60  ;;  %v6694_v44 = vmul.f32 %v6678_v15, %v12735_v48 }
 0x52a   : > { %9095 = vtanh.f32 %v6738_v4  ;;  %v6743_v26 = vmul.f32 0.7978846, %v6727_v0  ;;  %v6725_v57 = vadd.f32 %v6709_v13, %v12720_v27  ;;  %v8504_v54 = vpop.f32.mrf.mxu1  ;;  %v6660_v60 = vmul.f32 0.5, %v12693_v22 }
 0x52b   : > { %v6728_v59 = vadd.f32 %v6712_v35, %v12723_v18  ;;  %v6699_v16 = vmul.f32 %v6683_v5, %v12738_v28  ;;  %v6681_v56 = vmul.f32 %v12746_v45, %v12746_v45  ;;  %v12757_v3 = vadd.f32 %v8504_v54, %v6541_v24 }
 0x52c   : > { %v6741_v51 = vmul.f32 0.7978846, %v6725_v57  ;;  %v6710_v31 = vmul.f32 0.044715, %v6694_v44  ;;  %v6629_v49 = vpop.f32.mrf.mxu1  ;;  %9097 = vtanh.f32 %v6743_v26 }
 0x52d   : > { %v6744_v34 = vmul.f32 0.7978846, %v6728_v59  ;;  %v6715_v32 = vmul.f32 0.044715, %v6699_v16  ;;  %v6697_v39 = vmul.f32 %v6681_v56, %v12746_v45  ;;  %v6684_v25 = vmul.f32 %v12757_v3, %v12757_v3 }
 0x52e   : > { %9099 = vtanh.f32 %v6741_v51  ;;  %v6726_v6 = vadd.f32 %v6710_v31, %v12735_v48  ;;  %v12765_v24 = vadd.f32 %v6629_v49, %v12701_v58  ;;  %v8507_v2 = vpop.f32.mrf.mxu1  ;;  %v12775_v58 = vmul.f32 0.5, %v12706_v53 }
 0x52f   : > { %9101 = vtanh.f32 %v6744_v34  ;;  %v6731_v22 = vadd.f32 %v6715_v32, %v12738_v28  ;;  %v6713_v1 = vmul.f32 0.044715, %v6697_v39  ;;  %v12768_v11 = vadd.f32 %v8507_v2, %v6554_v43 }
 0x530   : > { %v9090_v52 = vpop.eup %9089  ;;  %v6742_v9 = vmul.f32 0.7978846, %v6726_v6  ;;  %v6700_v33 = vmul.f32 %v6684_v25, %v12757_v3  ;;  %v6682_v40 = vmul.f32 %v12765_v24, %v12765_v24  ;;  %v6642_v62 = vpop.f32.mrf.mxu1  ;;  %v6664_v2 = vmul.f32 0.5, %v12723_v18 }
 0x531   : > { %v6771_v63 = vadd.f32 1.0, %v9090_v52  ;;  %v6747_v36 = vmul.f32 0.7978846, %v6731_v22  ;;  %v6729_v7 = vadd.f32 %v6713_v1, %v12746_v45  ;;  %v6687_v17 = vmul.f32 %v12768_v11, %v12768_v11 }
 0x532   : > { %v9092_v55 = vpop.eup %9091  ;;  %9103 = vtanh.f32 %v6742_v9  ;;  %v6716_v42 = vmul.f32 0.044715, %v6700_v33  ;;  %v6698_v10 = vmul.f32 %v6682_v40, %v12765_v24  ;;  %v8508_v61 = vpop.f32.mrf.mxu1  ;;  %v12783_v43 = vadd.f32 %v6642_v62, %v12711_v8 }
 0x533   : > { %v6787_v20 = vmul.f32 %v6771_v63, %v12725_v38  ;;  %9105 = vtanh.f32 %v6747_v36  ;;  %v6745_v46 = vmul.f32 0.7978846, %v6729_v7  ;;  %v6703_v50 = vmul.f32 %v6687_v17, %v12768_v11 }
 0x534   : > { %v9094_v53 = vpop.eup %9093  ;;  %v6732_v47 = vadd.f32 %v6716_v42, %v12757_v3  ;;  %v6714_v12 = vmul.f32 0.044715, %v6698_v10  ;;  %v12787_v23 = vadd.f32 %v8508_v61, %v6557_v14  ;;  %v6645_v37 = vpop.f32.mrf.mxu1  ;;  %v6685_v4 = vmul.f32 %v12783_v43, %v12783_v43 }
 0x535   : > { %v6772_v30 = vadd.f32 1.0, %v9094_v53  ;;  %9107 = vtanh.f32 %v6745_v46  ;;  %v6661_v38 = vmul.f32 0.5, %v12720_v27  ;;  %v6803_v0 = vmul.f32 1.7015043, %v6787_v20 }
 0x536   : > { %v6748_v13 = vmul.f32 0.7978846, %v6732_v47  ;;  %v6730_v8 = vadd.f32 %v6714_v12, %v12765_v24  ;;  %v6719_v15 = vmul.f32 0.044715, %v6703_v50  ;;  %v6701_v5 = vmul.f32 %v6685_v4, %v12783_v43 }
 0x537   : > { %v9096_v19 = vpop.eup %9095  ;;  %v6788_v35 = vmul.f32 %v6772_v30, %v6660_v60  ;;  %v6688_v26 = vmul.f32 %v12787_v23, %v12787_v23  ;;  %v12797_v57 = vadd.f32 %v6645_v37, %v12713_v21  ;;  %v6769_v27 = vadd.f32 1.0, %v9092_v55 }
 0x538   : > { %9109 = vtanh.f32 %v6748_v13  ;;  %v6746_v44 = vmul.f32 0.7978846, %v6730_v8  ;;  %v6735_v54 = vadd.f32 %v6719_v15, %v12768_v11  ;;  %v6717_v16 = vmul.f32 0.044715, %v6701_v5 }
 0x539   : > { %v6804_v59 = vmul.f32 1.7015043, %v6788_v35  ;;  %v6704_v56 = vmul.f32 %v6688_v26, %v12787_v23  ;;  %v6686_v60 = vmul.f32 %v12797_v57, %v12797_v57  ;;  %v9098_v51 = vpop.eup %9097  ;;  %v6770_v49 = vadd.f32 1.0, %v9096_v19 }
 0x53a   : > { %9111 = vtanh.f32 %v6746_v44  ;;  %v6751_v31 = vmul.f32 0.7978846, %v6735_v54  ;;  %v6785_v14 = vmul.f32 %v6769_v27, %v12749_v41  ;;  %v6733_v32 = vadd.f32 %v6717_v16, %v12783_v43 }
 0x53b   : > { %v9100_v21 = vpop.eup %9099  ;;  %v6818_v34 = vpack.c.bf16 %v6804_v59, %v6803_v0  ;;  %v6720_v39 = vmul.f32 0.044715, %v6704_v56  ;;  %v6702_v6 = vmul.f32 %v6686_v60, %v12797_v57  ;;  %v6786_v22 = vmul.f32 %v6770_v49, %v6658_v29 }
 0x53c   : > { %v9102_v25 = vpop.eup %9101  ;;  %9113 = vtanh.f32 %v6751_v31  ;;  %v6773_v1 = vadd.f32 1.0, %v9100_v21  ;;  %v6749_v52 = vmul.f32 0.7978846, %v6733_v32  ;;  %v6775_v40 = vadd.f32 1.0, %v9098_v51 }
 0x53d   : > { %v6736_v9 = vadd.f32 %v6720_v39, %v12787_v23  ;;  %v6718_v33 = vmul.f32 0.044715, %v6702_v6  ;;  %v6801_v62 = vmul.f32 1.7015043, %v6785_v14  ;;  %v6802_v41 = vmul.f32 1.7015043, %v6786_v22 }
 0x53e   : > { %v6662_v63 = vmul.f32 0.5, %v12735_v48  ;;  %v6776_v36 = vadd.f32 1.0, %v9102_v25  ;;  %9115 = vtanh.f32 %v6749_v52  ;;  %v6791_v18 = vmul.f32 %v6775_v40, %v12775_v58 }
 0x53f   : > { %v9104_v7 = vpop.eup %9103  ;;  %v6752_v55 = vmul.f32 0.7978846, %v6736_v9  ;;  %v6734_v42 = vadd.f32 %v6718_v33, %v12797_v57  ;;  %v6817_v29 = vpack.c.bf16 %v6802_v41, %v6801_v62  ;;  %v6789_v61 = vmul.f32 %v6773_v1, %v6661_v38 }
 0x540   : > { %v9106_v10 = vpop.eup %9105  ;;  %v6774_v17 = vadd.f32 1.0, %v9104_v7  ;;  %v6792_v20 = vmul.f32 %v6776_v36, %v6664_v2  ;;  %v6807_v12 = vmul.f32 1.7015043, %v6791_v18  ;;  %v6667_v37 = vmul.f32 0.5, %v12738_v28 }
 0x541   : > { %9117 = vtanh.f32 %v6752_v55  ;;  %v6750_v46 = vmul.f32 0.7978846, %v6734_v42  ;;  %8525 = vmatprep.mubr.bf16.mxu0 %v6817_v29  ;;  %v6779_v50 = vadd.f32 1.0, %v9106_v10  ;;  %v6805_v30 = vmul.f32 1.7015043, %v6789_v61 }
 0x542   : > { %v9108_v53 = vpop.eup %9107  ;;  %v6790_v47 = vmul.f32 %v6774_v17, %v6662_v63  ;;  %v6808_v48 = vmul.f32 1.7015043, %v6792_v20  ;;  %8526 = vmatmul.mubr.bf16.vlgmr.msra.gmra.mxu0 %v6818_v34  ;;  %v6668_v38 = vmul.f32 0.5, %v12757_v3  ;;  %v6665_v15 = vmul.f32 0.5, %v12746_v45 }
 0x543   : > { %9119 = vtanh.f32 %v6750_v46  ;;  %v6777_v0 = vadd.f32 1.0, %v9108_v53  ;;  %v6795_v35 = vmul.f32 %v6779_v50, %v6667_v37  ;;  %v6666_v26 = vmul.f32 0.5, %v12765_v24 }
 0x544   : > { %v6806_v4 = vmul.f32 1.7015043, %v6790_v47  ;;  %v6820_v58 = vpack.c.bf16 %v6808_v48, %v6807_v12  ;;  %v6671_v45 = vmul.f32 0.5, %v12768_v11  ;;  %v6672_v24 = vmul.f32 0.5, %v12787_v23 }
 0x545   : > { %v9110_v13 = vpop.eup %9109  ;;  %v6793_v28 = vmul.f32 %v6777_v0, %v6665_v15  ;;  %v6811_v16 = vmul.f32 1.7015043, %v6795_v35  ;;  %v6669_v32 = vmul.f32 0.5, %v12783_v43  ;;  %v6670_v2 = vmul.f32 0.5, %v12797_v57  ;;  %v7640_v57 = vld [vmem:[%s13864_s9] ss:$0 sm:$0xff] }
 0x546   : > { %v6819_v8 = vpack.c.bf16 %v6806_v4, %v6805_v30  ;;  %v6780_v19 = vadd.f32 1.0, %v9110_v13 }
 0x547   : > { %v9112_v5 = vpop.eup %9111  ;;  %v6809_v3 = vmul.f32 1.7015043, %v6793_v28 }
 0x548   : > { %8529 = vmatprep.mubr.bf16.mxu0 %v6819_v8  ;;  %v6778_v44 = vadd.f32 1.0, %v9112_v5  ;;  %v6796_v54 = vmul.f32 %v6780_v19, %v6668_v38 }
 0x549   : > { %v9114_v27 = vpop.eup %9113 }
 0x54a   : > { %v6794_v59 = vmul.f32 %v6778_v44, %v6666_v26  ;;  %v6812_v56 = vmul.f32 1.7015043, %v6796_v54  ;;  %8530 = vmatmul.mubr.bf16.gmra.mxu0 %v6820_v58  ;;  %v6783_v60 = vadd.f32 1.0, %v9114_v27 }
 0x54b   : > { %v9116_v51 = vpop.eup %9115 }
 0x54c   : > { %v6810_v31 = vmul.f32 1.7015043, %v6794_v59  ;;  %v6822_v49 = vpack.c.bf16 %v6812_v56, %v6811_v16  ;;  %v6781_v14 = vadd.f32 1.0, %v9116_v51  ;;  %v6799_v6 = vmul.f32 %v6783_v60, %v6671_v45 }
 0x54e   : > { %v9118_v21 = vpop.eup %9117  ;;  %v6821_v34 = vpack.c.bf16 %v6810_v31, %v6809_v3  ;;  %v6797_v1 = vmul.f32 %v6781_v14, %v6669_v32  ;;  %v6815_v9 = vmul.f32 1.7015043, %v6799_v6 }
 0x54f   : > { %v6784_v39 = vadd.f32 1.0, %v9118_v21 }
 0x550   : > { %v9120_v25 = vpop.eup %9119  ;;  %8533 = vmatprep.mubr.bf16.mxu0 %v6821_v34  ;;  %v6813_v40 = vmul.f32 1.7015043, %v6797_v1 }
 0x551   : > { %v6782_v22 = vadd.f32 1.0, %v9120_v25  ;;  %v6800_v52 = vmul.f32 %v6784_v39, %v6672_v24 }
 0x552   : > { %8534 = vmatmul.mubr.bf16.gmra.mxu0 %v6822_v49 }
 0x553   : > { %v6798_v11 = vmul.f32 %v6782_v22, %v6670_v2  ;;  %v6816_v33 = vmul.f32 1.7015043, %v6800_v52 }
 0x555   : > { %v6814_v62 = vmul.f32 1.7015043, %v6798_v11  ;;  %v6824_v23 = vpack.c.bf16 %v6816_v33, %v6815_v9 }
 0x557   : > { %v6823_v41 = vpack.c.bf16 %v6814_v62, %v6813_v40 }
 0x559   : > { %8537 = vmatprep.mubr.bf16.mxu0 %v6823_v41 }
 0x55a   : > { %8538 = vmatmul.mubr.bf16.gmra.mxu0 %v6824_v23 }
 0x602   : > { %v8527_v43 = vpop.f32.mrf.mxu0 }
 0x603   : > { %v6939_v7 = vadd.f32 %v8527_v43, %v7640_v57 }
 0x604   : > { %v6930_v63 = vpop.f32.mrf.mxu0 }
 0x605   : > { %v6931_v18 = vadd.f32 %v7640_v57, %v6930_v63 }
 0x606   : > { %v8528_v36 = vpop.f32.mrf.mxu0 }
 0x607   : > { %v6942_v55 = vadd.f32 %v8528_v36, %v7640_v57 }
 0x608   : > { %v6933_v42 = vpop.f32.mrf.mxu0 }
 0x609   : > { %v7698_v10 = vpack.c.bf16 %v6942_v55, %v6939_v7  ;;  %v6934_v29 = vadd.f32 %v7640_v57, %v6933_v42 }
 0x60a   : > { %v8531_v17 = vpop.f32.mrf.mxu0 }
 0x60b   : > { %7730 = vst [vmem:[%s12825_s7 + $0x8] sm:$0xff] %v7698_v10   ;;  %v7693_v61 = vpack.c.bf16 %v6934_v29, %v6931_v18  ;;  %v6955_v53 = vadd.f32 %v8531_v17, %v7640_v57 }
 0x60c   : > { %v6946_v20 = vpop.f32.mrf.mxu0 }
 0x60d   : > { %7694 = vst [vmem:[%s12825_s7] sm:$0xff] %v7693_v61   ;;  %v6947_v48 = vadd.f32 %v7640_v57, %v6946_v20 }
 0x60e   : > { %v8532_v46 = vpop.f32.mrf.mxu0 }
 0x60f   : > { %v6958_v47 = vadd.f32 %v8532_v46, %v7640_v57 }
 0x610   : > { %v6949_v12 = vpop.f32.mrf.mxu0 }
 0x611   : > { %v7708_v50 = vpack.c.bf16 %v6958_v47, %v6955_v53  ;;  %v6950_v37 = vadd.f32 %v7640_v57, %v6949_v12 }
 0x612   : > { %v8535_v30 = vpop.f32.mrf.mxu0 }
 0x613   : > { %7732 = vst [vmem:[%s12825_s7 + $0x18] sm:$0xff] %v7708_v50   ;;  %v7703_v4 = vpack.c.bf16 %v6950_v37, %v6947_v48  ;;  %v6971_v13 = vadd.f32 %v8535_v30, %v7640_v57 }
 0x614   : > { %v6962_v58 = vpop.f32.mrf.mxu0 }
 0x615   : > { %7731 = vst [vmem:[%s12825_s7 + $0x10] sm:$0xff] %v7703_v4   ;;  %v6963_v15 = vadd.f32 %v7640_v57, %v6962_v58 }
 0x616   : > { %v8536_v0 = vpop.f32.mrf.mxu0 }
 0x617   : > { %v6974_v38 = vadd.f32 %v8536_v0, %v7640_v57 }
 0x618   : > { %v6965_v8 = vpop.f32.mrf.mxu0 }
 0x619   : > { %v7718_v19 = vpack.c.bf16 %v6974_v38, %v6971_v13  ;;  %v6966_v35 = vadd.f32 %v7640_v57, %v6965_v8 }
 0x61a   : > { %v8539_v5 = vpop.f32.mrf.mxu0 }
 0x61b   : > { %7734 = vst [vmem:[%s12825_s7 + $0x28] sm:$0xff] %v7718_v19   ;;  %v7713_v26 = vpack.c.bf16 %v6966_v35, %v6963_v15  ;;  %v6987_v54 = vadd.f32 %v8539_v5, %v7640_v57 }
 0x61c   : > { %v6978_v44 = vpop.f32.mrf.mxu0 }
 0x61d   : > { %7733 = vst [vmem:[%s12825_s7 + $0x20] sm:$0xff] %v7713_v26   ;;  %v6979_v16 = vadd.f32 %v7640_v57, %v6978_v44 }
 0x61e   : > { %v8540_v28 = vpop.f32.mrf.mxu0 }
 0x61f   : > { %v6990_v27 = vadd.f32 %v8540_v28, %v7640_v57 }
 0x620   : > { %v6981_v59 = vpop.f32.mrf.mxu0 }
 0x621   : > { %v7728_v56 = vpack.c.bf16 %v6990_v27, %v6987_v54  ;;  %v6982_v60 = vadd.f32 %v7640_v57, %v6981_v59  ;;  %7076 = sbr.rel (%p7665_p1) target bundleno = 1576 (0x628), region = 96 }
 0x623   : > { %7736 = vst [vmem:[%s12825_s7 + $0x38] sm:$0xff] %v7728_v56   ;;  %v7723_v51 = vpack.c.bf16 %v6982_v60, %v6979_v16 }
 0x625   : > { %7735 = vst [vmem:[%s12825_s7 + $0x30] sm:$0xff] %v7723_v51  }
 0x626   : > { %v9407_v3 = vmov 0.0  }
 0x627   : > { %7077 = vst [vmem:[#allocation2] sm:$0x1] %v9407_v3 }
 0x628 PF: > { %v7079_v31 = vadd.f32 %v6934_v29, %v6931_v18  ;;  %p7666_p3 = scmp.ne.s32.totalorder %s9378_s24, 1 }
 0x629   : > { %s13865_s19 = sld [smem:[#allocation141_spill]] (!%p7666_p3) }
 0x62a   : > { %v7080_v49 = vadd.f32 %v7079_v31, %v6939_v7  ;;  %s13867_s9 = sld [smem:[#allocation143_spill]] (!%p7666_p3) }
 0x62b   : > { %s13868_s8 = sld [smem:[#allocation142_spill]] (!%p7666_p3) }
 0x62c   : > { %v7081_v45 = vadd.f32 %v7080_v49, %v6942_v55  ;;  %s13869_s30 = sld [smem:[#allocation144_spill]] (!%p7666_p3) }
 0x62e   : > { %v7082_v14 = vadd.f32 %v7081_v45, %v6947_v48  ;;  %v7078_v23 = vld [vmem:[#allocation2] sm:$0x1] }
 0x62f   : > { %s13866_s14 = smov (!%p7666_p3), %s13865_s19 }
 0x630   : > { %v7083_v21 = vadd.f32 %v7082_v14, %v6950_v37 }
 0x632   : > { %v7084_v34 = vadd.f32 %v7083_v21, %v6955_v53 }
 0x634   : > { %v7085_v24 = vadd.f32 %v7084_v34, %v6958_v47 }
 0x636   : > { %v7086_v32 = vadd.f32 %v7085_v24, %v6963_v15 }
 0x638   : > { %v7087_v39 = vadd.f32 %v7086_v32, %v6966_v35 }
 0x63a   : > { %v7088_v6 = vadd.f32 %v7087_v39, %v6971_v13 }
 0x63c   : > { %v7089_v25 = vadd.f32 %v7088_v6, %v6974_v38 }
 0x63e   : > { %v7090_v2 = vadd.f32 %v7089_v25, %v6979_v16 }
 0x640   : > { %v7091_v22 = vadd.f32 %v7090_v2, %v6982_v60 }
 0x642   : > { %v7092_v1 = vadd.f32 %v7091_v22, %v6987_v54 }
 0x644   : > { %v7093_v52 = vadd.f32 %v7092_v1, %v6990_v27 }
 0x646   : > { %v7094_v11 = vrot.slane %v7093_v52, 4 }
 0x648   : > { %v7095_v9 = vadd.f32 %v7094_v11, %v7093_v52 }
 0x64a   : > { %v7096_v33 = vrot.slane %v7095_v9, 2 }
 0x64c   : > { %v7097_v40 = vadd.f32 %v7096_v33, %v7095_v9 }
 0x64e   : > { %v7098_v62 = vrot.slane %v7097_v40, 1 }
 0x650   : > { %v7099_v41 = vadd.f32 %v7098_v62, %v7097_v40  ;;  %7105 = sbr.rel (%p7666_p3) target bundleno = 2081 (0x821), region = 100 }
 0x652   : > { %v7100_v43 = vadd.f32 %v7099_v41, %v7078_v23 }
 0x654   : > { %7101 = vst [vmem:[#allocation2] sm:$0x1] %v7100_v43 }
 0x655   : > { %v7123_v57 = vld [vmem:[%s13865_s19 + $0x78] sm:$0xff]  ;;  %v9408_v63 = vmov 0.0   ;;  %v7122_v36 = vld [vmem:[%s13866_s14 + $0x70] sm:$0xff]  ;;  %vm9409_vm4 = vmmov 0   ;;  %v7121_v7 = vld [vmem:[%s13866_s14 + $0x68] sm:$0xff] }
 0x656   : > { %8541 = vmatprep.subr.mxu0 %v9408_v63  ;;  %8573 = vmatprep.mubr.msk.f32.mxu0 %vm9409_vm4, %v9408_v63  ;;  %v7120_v55 = vld [vmem:[%s13866_s14 + $0x60] sm:$0xff]  ;;  %v7211_v42 = vld [vmem:[%s13867_s9 + $0x78] sm:$0xff]  ;;  %v7210_v18 = vld [vmem:[%s13867_s9 + $0x70] sm:$0xff] }
 0x657   : > { %8542 = vmatpush3.msra.mxu0 %v7123_v57  ;;  %8576 = vmatprep.subr.mxu1 %v9408_v63  ;;  %v7119_v10 = vld [vmem:[%s13866_s14 + $0x58] sm:$0xff]  ;;  %v7209_v29 = vld [vmem:[%s13867_s9 + $0x68] sm:$0xff]  ;;  %v7118_v17 = vld [vmem:[%s13866_s14 + $0x50] sm:$0xff] }
 0x658   : > { %8543 = vmatprep.subr.mxu0 %v9408_v63  ;;  %8608 = vmatprep.mubr.msk.f32.mxu1 %vm9409_vm4, %v9408_v63  ;;  %v7208_v61 = vld [vmem:[%s13867_s9 + $0x60] sm:$0xff]  ;;  %v7117_v20 = vld [vmem:[%s13866_s14 + $0x48] sm:$0xff]  ;;  %v7207_v46 = vld [vmem:[%s13867_s9 + $0x58] sm:$0xff] }
 0x659   : > { %8544 = vmatpush3.msra.mxu0 %v7122_v36  ;;  %8577 = vmatpush3.msra.mxu1 %v7211_v42  ;;  %v7116_v53 = vld [vmem:[%s13866_s14 + $0x40] sm:$0xff]  ;;  %v7206_v47 = vld [vmem:[%s13867_s9 + $0x50] sm:$0xff]  ;;  %v7115_v12 = vld [vmem:[%s13866_s14 + $0x38] sm:$0xff] }
 0x65a   : > { %8545 = vmatprep.subr.mxu0 %v9408_v63  ;;  %8578 = vmatprep.subr.mxu1 %v9408_v63  ;;  %v7205_v48 = vld [vmem:[%s13867_s9 + $0x48] sm:$0xff]  ;;  %v7114_v50 = vld [vmem:[%s13866_s14 + $0x30] sm:$0xff]  ;;  %v7204_v37 = vld [vmem:[%s13867_s9 + $0x40] sm:$0xff] }
 0x65b   : > { %8546 = vmatpush3.msra.mxu0 %v7121_v7  ;;  %8579 = vmatpush3.msra.mxu1 %v7210_v18  ;;  %v7113_v30 = vld [vmem:[%s13866_s14 + $0x28] sm:$0xff]  ;;  %v7203_v4 = vld [vmem:[%s13867_s9 + $0x38] sm:$0xff]  ;;  %v7112_v58 = vld [vmem:[%s13866_s14 + $0x20] sm:$0xff] }
 0x65c   : > { %8547 = vmatprep.subr.mxu0 %v9408_v63  ;;  %8580 = vmatprep.subr.mxu1 %v9408_v63  ;;  %v7202_v0 = vld [vmem:[%s13867_s9 + $0x30] sm:$0xff]  ;;  %v7111_v13 = vld [vmem:[%s13866_s14 + $0x18] sm:$0xff]  ;;  %v7201_v38 = vld [vmem:[%s13867_s9 + $0x28] sm:$0xff] }
 0x65d   : > { %8548 = vmatpush3.msra.mxu0 %v7120_v55  ;;  %8581 = vmatpush3.msra.mxu1 %v7209_v29  ;;  %v7110_v8 = vld [vmem:[%s13866_s14 + $0x10] sm:$0xff]  ;;  %v7200_v15 = vld [vmem:[%s13867_s9 + $0x20] sm:$0xff]  ;;  %v7109_v35 = vld [vmem:[%s13866_s14 + $0x8] sm:$0xff] }
 0x65e   : > { %8549 = vmatprep.subr.mxu0 %v9408_v63  ;;  %8582 = vmatprep.subr.mxu1 %v9408_v63  ;;  %v7106_v19 = vld [vmem:[#allocation2] sm:$0x1]  ;;  %v7199_v5 = vld [vmem:[%s13867_s9 + $0x18] sm:$0xff]  ;;  %v7198_v28 = vld [vmem:[%s13867_s9 + $0x10] sm:$0xff] }
 0x65f   : > { %8550 = vmatpush3.msra.mxu0 %v7119_v10  ;;  %8583 = vmatpush3.msra.mxu1 %v7208_v61  ;;  %v7108_v26 = vld [vmem:[%s13866_s14] sm:$0xff]  ;;  %v7107_v44 = vmul.f32 0.00390625, %v7106_v19  ;;  %v7197_v54 = vld [vmem:[%s13867_s9 + $0x8] sm:$0xff] }
 0x660   : > { %8551 = vmatprep.subr.mxu0 %v9408_v63  ;;  %8584 = vmatprep.subr.mxu1 %v9408_v63  ;;  %v7196_v27 = vld [vmem:[%s13867_s9] sm:$0xff] }
 0x661   : > { %8552 = vmatpush3.msra.mxu0 %v7118_v17  ;;  %8585 = vmatpush3.msra.mxu1 %v7207_v46  ;;  %v7124_v59 = vld [vmem:[%s13868_s8] sm:$0x1] }
 0x662   : > { %8553 = vmatprep.subr.mxu0 %v9408_v63  ;;  %8586 = vmatprep.subr.mxu1 %v9408_v63  ;;  %v7212_v3 = vld [vmem:[%s13869_s30] sm:$0x1] }
 0x663   : > { %8554 = vmatpush3.msra.mxu0 %v7117_v20  ;;  %8587 = vmatpush3.msra.mxu1 %v7206_v47 }
 0x664   : > { %8555 = vmatprep.subr.mxu0 %v9408_v63  ;;  %8588 = vmatprep.subr.mxu1 %v9408_v63 }
 0x665   : > { %8556 = vmatpush3.msra.mxu0 %v7116_v53  ;;  %8589 = vmatpush3.msra.mxu1 %v7205_v48 }
 0x666   : > { %8557 = vmatprep.subr.mxu0 %v9408_v63  ;;  %8590 = vmatprep.subr.mxu1 %v9408_v63 }
 0x667   : > { %8558 = vmatpush3.msra.mxu0 %v7115_v12  ;;  %8591 = vmatpush3.msra.mxu1 %v7204_v37 }
 0x668   : > { %8559 = vmatprep.subr.mxu0 %v9408_v63  ;;  %8592 = vmatprep.subr.mxu1 %v9408_v63 }
 0x669   : > { %8560 = vmatpush3.msra.mxu0 %v7114_v50  ;;  %8593 = vmatpush3.msra.mxu1 %v7203_v4 }
 0x66a   : > { %8561 = vmatprep.subr.mxu0 %v9408_v63  ;;  %8594 = vmatprep.subr.mxu1 %v9408_v63 }
 0x66b   : > { %8562 = vmatpush3.msra.mxu0 %v7113_v30  ;;  %8595 = vmatpush3.msra.mxu1 %v7202_v0 }
 0x66c   : > { %8563 = vmatprep.subr.mxu0 %v9408_v63  ;;  %8596 = vmatprep.subr.mxu1 %v9408_v63 }
 0x66d   : > { %8564 = vmatpush3.msra.mxu0 %v7112_v58  ;;  %8597 = vmatpush3.msra.mxu1 %v7201_v38 }
 0x66e   : > { %8565 = vmatprep.subr.mxu0 %v9408_v63  ;;  %8598 = vmatprep.subr.mxu1 %v9408_v63 }
 0x66f   : > { %8566 = vmatpush3.msra.mxu0 %v7111_v13  ;;  %8599 = vmatpush3.msra.mxu1 %v7200_v15 }
 0x670   : > { %8567 = vmatprep.subr.mxu0 %v9408_v63  ;;  %8600 = vmatprep.subr.mxu1 %v9408_v63 }
 0x671   : > { %8568 = vmatpush3.msra.mxu0 %v7110_v8  ;;  %8601 = vmatpush3.msra.mxu1 %v7199_v5 }
 0x672   : > { %8569 = vmatprep.subr.mxu0 %v9408_v63  ;;  %8602 = vmatprep.subr.mxu1 %v9408_v63 }
 0x673   : > { %8570 = vmatpush3.msra.mxu0 %v7109_v35  ;;  %8603 = vmatpush3.msra.mxu1 %v7198_v28 }
 0x674   : > { %8571 = vmatprep.subr.mxu0 %v9408_v63  ;;  %8604 = vmatprep.subr.mxu1 %v9408_v63 }
 0x675   : > { %8572 = vmatpush3.msra.mxu0 %v7108_v26  ;;  %8605 = vmatpush3.msra.mxu1 %v7197_v54 }
 0x676   : > { %8574 = vmatmul.mubr.f32.vlgmr.msra.gmra.mxu0 %v7107_v44  ;;  %8606 = vmatprep.subr.mxu1 %v9408_v63 }
 0x677   : > { %8607 = vmatpush3.msra.mxu1 %v7196_v27 }
 0x736   : > { %v7191_v16 = vpop.f32.mrf.mxu0 }
 0x737   : > { %v7192_v56 = vadd.f32 %v7191_v16, %v7124_v59 }
 0x738   : > { %v8575_v60 = vpop.f32.mrf.mxu0 }
 0x739   : > { %v7195_v51 = vmax.f32 %v7192_v56, 0.0 }
 0x73b   : > { %8609 = vmatmul.mubr.f32.vlgmr.msra.gmra.mxu1 %v7195_v51 }
 0x7fb   : > { %v7279_v31 = vpop.f32.mrf.mxu1 }
 0x7fc   : > { %v7280_v49 = vadd.f32 %v7279_v31, %v7212_v3 }
 0x7fd   : > { %v8610_v45 = vpop.f32.mrf.mxu1 }
 0x7fe   : > { %v7283_v14 = vsub.f32 0.0, %v7280_v49 }
 0x800   : > { %v7284_v21 = vmul.f32 1.442695, %v7283_v14 }
 0x802   : > { %9126 = vpow2.f32 %v7284_v21 }
 0x80f   : > { %v9127_v34 = vpop.eup %9126 }
 0x810   : > { %v7286_v24 = vadd.f32 1.0, %v9127_v34 }
 0x812   : > { %9128 = vrcp.f32 %v7286_v24 }
 0x81f   : > { %v9129_v32 = vpop.eup %9128 }
 0x820   : > { %7289 = vst [vmem:[%s13327_s15] sm:$0x1] %v9129_v32 }
 0x821 PF: > { %s13870_s12 = sld [smem:[#allocation22_spill]]  ;;  %s7668_s19 = sshll.u32 %s9378_s24, 4 }
 0x822   : > { %s13872_s29 = sld [smem:[#allocation24_spill]]  ;;  %s7310_s16 = sshll.u32 %s12825_s7, 4  ;;  %s12979_s16 = int_to_ptr.vmem [resolvable:$true] %s7310_s16 }
 0x823   : > { %s13873_s17 = sld [smem:[#allocation145_spill]]  ;;  %s12988_s15 = scalar_lea.sflag [#allocation5], %s572_s25 }
 0x824   : > { %s9236_s0 = scalar_lea.vmem %s12979_s16, 1024  ;;  %s9410_s24 = smov [#allocation11]  }
 0x825   : > { %p9237_p12 = scmp.ne.s32.totalorder %s12979_s16, %s9236_s0  ;;  %s9240_s7 = sshll.u32 %s9410_s24, 4  ;;  %s9241_s7 = int_to_ptr.vmem [resolvable:$false] %s9240_s7 }
 0x826   : > { %p9243_p4 = scmp.lt.s32.totalorder %s12979_s16, %s9241_s7 }
 0x827   : > { %s7669_s11 = sshll.u32 %s13870_s12, 5 }
 0x828   : > { %s7307_s21 = sadd.s32 %s7669_s11, %s7668_s19  ;;  %p13874_p5 = scmp.ne.s32.totalorder %s13872_s29, 0 }
 0x829   : > { %s7670_s10 = sshll.u32 %s7307_s21, 6  ;;  %s9242_s19 = scalar_lea.vmem %s9241_s7, 2048 }
 0x82a   : > { %s12984_s30 = scalar_lea.hbm %s13873_s17, %s7670_s10  ;;  %p9238_p6 = pnand %p9237_p12, %p13874_p5 }
 0x82b   : > { %p9244_p8 = scmp.lt.s32.totalorder %s9242_s19, %s9236_s0 }
 0x82c   : > { %p9239_p11 = pneg %p9238_p6 }
 0x82d   : > { %p9245_p7 = por %p9244_p8, %p9243_p4 }
 0x82f   : > { %p9246_p0 = pnand %p9245_p7, %p9239_p11 }
 0x831   : > { %9249 = shalt.err (!%p9246_p0)
}
 0x832   : > { %s9250_s25 = scalar_lea.hbm %s12984_s30, 1024  ;;  %s9254_s21 = scalar_lea.hbm %s13873_s17, 4096 }
 0x833   : > { %p9251_p13 = scmp.ne.s32.totalorder %s12984_s30, %s9250_s25  ;;  %p9255_p10 = scmp.lt.s32.totalorder %s12984_s30, %s13873_s17 }
 0x834   : > { %p9256_p1 = scmp.lt.s32.totalorder %s9254_s21, %s9250_s25 }
 0x835   : > { %p9252_p2 = pnand %p9251_p13, %p13874_p5 }
 0x836   : > { %p9257_p3 = por %p9256_p1, %p9255_p10 }
 0x837   : > { %p9253_p9 = pneg %p9252_p2 }
 0x839   : > { %p9258_p12 = pnand %p9257_p3, %p9253_p9 }
 0x83b   : > { %9261 = shalt.err (!%p9258_p12)
}
 0x83c   : > { %s9411_s0 = smov 64   ;;  %s13875_s18 = sld [smem:[#allocation28_spill]] }
 0x83d   : > { %s9412_s24 = smov 4   ;;  %s7671_s7 = sshll.u32 %s13870_s12, 4 }
 0x83e   : > { %8628 = dma.vmem_to_hbm [thread:$0]  (%p13874_p5), %s12979_s16, 1024, %s12984_s30, %s12988_s15, %s9411_s0, %s9411_s0, %s9412_s24  }
 0x83f   : > { %s13876_s11 = sld [smem:[#allocation146_spill]]  ;;  %s13877_s21 = scalar_lea.vmem [#allocation12], %s9694_s13 }
 0x840   : > { %s7326_s10 = sshll.u32 %s13877_s21, 4  ;;  %s7296_s8 = scalar_lea.sflag [#allocation13], %s9694_s13  ;;  %s7327_s10 = int_to_ptr.vmem [resolvable:$true] %s7326_s10 }
 0x841   : > { %s9262_s1 = scalar_lea.vmem %s7327_s10, 16  ;;  %s9413_s2 = smov [#allocation12]  }
 0x842   : > { %p9263_p6 = scmp.ne.s32.totalorder %s7327_s10, %s9262_s1  ;;  %p13878_p11 = scmp.ne.s32.totalorder %s13875_s18, 0 }
 0x843   : > { %s9266_s3 = sshll.u32 %s9413_s2, 4  ;;  %s9267_s3 = int_to_ptr.vmem [resolvable:$false] %s9266_s3 }
 0x844   : > { %p9264_p4 = pnand %p9263_p6, %p13878_p11  ;;  %s9268_s5 = scalar_lea.vmem %s9267_s3, 32 }
 0x845   : > { %s7324_s25 = scalar_lea.hbm %s13876_s11, %s7671_s7  ;;  %p9269_p7 = scmp.lt.s32.totalorder %s7327_s10, %s9267_s3 }
 0x846   : > { %p9265_p8 = pneg %p9264_p4  ;;  %p9270_p5 = scmp.lt.s32.totalorder %s9268_s5, %s9262_s1 }
 0x848   : > { %p9271_p0 = por %p9270_p5, %p9269_p7 }
 0x84a   : > { %p9272_p13 = pnand %p9271_p0, %p9265_p8 }
 0x84c   : > { %9275 = shalt.err (!%p9272_p13)
}
 0x84d   : > { %s9276_s15 = scalar_lea.hbm %s7324_s25, 16  ;;  %s9280_s29 = scalar_lea.hbm %s13876_s11, 32 }
 0x84e   : > { %p9277_p2 = scmp.ne.s32.totalorder %s7324_s25, %s9276_s15  ;;  %p9281_p1 = scmp.lt.s32.totalorder %s7324_s25, %s13876_s11 }
 0x84f   : > { %p9282_p3 = scmp.lt.s32.totalorder %s9280_s29, %s9276_s15 }
 0x850   : > { %p9278_p9 = pnand %p9277_p2, %p13878_p11 }
 0x851   : > { %p9283_p12 = por %p9282_p3, %p9281_p1 }
 0x852   : > { %p9279_p10 = pneg %p9278_p9 }
 0x854   : > { %p9284_p6 = pnand %p9283_p12, %p9279_p10 }
 0x856   : > { %9287 = shalt.err (!%p9284_p6)
}
 0x857   : > { %8629 = dma.vmem_to_hbm [thread:$0]  (%p13878_p11), %s7327_s10, 16, %s7324_s25, %s7296_s8  }
 0x858 PF: > { %s13879_s1 = sld [smem:[#allocation19_spill]]  ;;  %p8660_p4 = scmp.ge.s32.totalorder %s9394_s28, 2 }
 0x859   : > { %s13880_s2 = sld [smem:[#allocation25_spill]] }
 0x85e   : > { %s7338_s3 = sand.u32 1, %s13879_s1  }
 0x85f   : > { %p13881_p8 = scmp.ne.s32.totalorder %s13880_s2, 0  ;;  %s7339_s5 = scalar_lea.sflag [#allocation5], %s7338_s3 }
 0x861   : > { %p8647_p7 = pnand %p8660_p4, %p13881_p8 }
 0x863   : > { %p8648_p5 = pneg %p8647_p7 }
 0x865   : > { %9345 = dma.done.wait (%p8648_p5), %s7339_s5, 1024  }
 0x866   : > { %9347 = vsyncadd (%p8648_p5), %s7339_s5, 4294966272  ;;  %s13882_s0 = sld [smem:[#allocation21_spill]] }
 0x867   : > { %s13883_s24 = sld [smem:[#allocation26_spill]] }
 0x86c   : > { %s7347_s7 = sand.u32 1, %s13882_s0  }
 0x86d   : > { %p13884_p0 = scmp.ne.s32.totalorder %s13883_s24, 0  ;;  %s7348_s18 = scalar_lea.sflag [#allocation13], %s7347_s7 }
 0x86f   : > { %p8650_p13 = pnand %p8660_p4, %p13884_p0 }
 0x871   : > { %p8651_p2 = pneg %p8650_p13 }
 0x873   : > { %9349 = dma.done.wait (%p8651_p2), %s7348_s18, 16  }
 0x874   : > { %9351 = vsyncadd (%p8651_p2), %s7348_s18, 4294967280  ;;  %s37_s28 = sadd.s32 1, %s9394_s28   ;;  %s13885_s18 = sld [smem:[#allocation20_spill]] }
 0x875   : > { %p34_p11 = scmp.ge.s32.totalorder %s37_s28, 6   ;;  %s13886_s24 = sld [smem:[#allocation23_spill]] }
 0x876   : > { %s13887_s26 = sld [smem:[#allocation27_spill]]  ;;  %s13889_s19 = smov %s9362_s20 }
 0x877   : > { %s13888_s10 = sld [smem:[#allocation29_spill]]  ;;  %s13890_s20 = smov %s9674_s6 }
 0x878   : > { %s13891_s21 = smov %s9370_s22  ;;  %s13892_s22 = smov %s9374_s23 }
 0x879   : > { %s13893_s23 = smov %s9669_s4  ;;  %s13894_s25 = smov %s9390_s27 }
 0x87a   :  { %36 = sbr.rel (!%p34_p11) target bundleno = 30 (0x1e), region = 160 }
 0x87d   : > { %s13895_s27 = smov %s13888_s10 }
 0x87f   :  { %7352 = vsyncpa [#allocation4], 1 }
 0x880   :  { %7354 = vsyncpa [#allocation4 + $0x1], 1 }
 0x881   :  { %7355 = vsyncpa [#allocation7], 1 }
 0x882   :  { %7356 = vsyncpa [#allocation10], 1 }
 0x883   :  { %7357 = vsyncpa [#allocation5], 1 }
 0x884   :  { %7359 = vsyncpa [#allocation5 + $0x1], 1 }
 0x885   :  { %7360 = vsyncpa [#allocation13], 1 }
 0x886   :  { %7362 = vsyncpa [#allocation13 + $0x1], 1 }

</bundles_post_ra>
